<compile_context>
chip_gen: v6e
topology: v6e:2x2x1
jax: 0.10.0
libtpu: 0.0.40
codegen_flags: <defaults>
</compile_context>

<pallas_src>
import functools

import numpy as np
import jax
import jax.numpy as jnp
from jax import lax
from jax.experimental import pallas as pl
from jax.experimental.pallas import tpu as pltpu


def _round_up(x, m):
    return (x + m - 1) // m * m


# ---------------------------------------------------------------------------
# Fused kernel: conv1+pool1+conv2+pool2+fc1+fc2+fc3 for TILE_B images / step.
# ---------------------------------------------------------------------------

def lenet5_kernel(x_ref, w1_ref, b1_ref, w2_ref, b2_ref,
                  fw1_ref, fb1_ref, fw2_ref, fb2_ref, fw3_ref, fb3_ref,
                  o_ref):
    T = x_ref.shape[0]
    x = x_ref[...]                                               # (T, 32, 32)

    # conv1 + ReLU: one MXU matmul, K = 5*32 = 160, N = 28*8 (lanes = ow*8+ci).
    xcat = jnp.concatenate([x[:, k:k + 28, :] for k in range(5)], axis=-1)
    xcat = xcat.reshape(T * 28, 160)
    y1 = jnp.dot(xcat, w1_ref[...], preferred_element_type=jnp.float32)
    y1 = jnp.maximum(y1 + b1_ref[...], 0.0)                      # (T*28, 224)

    # pool1 (2x2 / stride 2): pairwise row max, then max with an 8-lane shift.
    y1 = y1.reshape(T, 14, 2, 224)
    y1 = jnp.maximum(y1[:, :, 0, :], y1[:, :, 1, :])             # (T, 14, 224)
    sh1 = jnp.concatenate([y1[:, :, 8:],
                           jnp.zeros((T, 14, 8), jnp.float32)], axis=-1)
    u1 = jnp.maximum(y1, sh1)        # valid at lanes 16*j + ci (gaps unused)

    # conv2 + ReLU: one big-K MXU matmul, K = 5*224 = 1120, N = 10*16.
    ucat = jnp.concatenate([u1[:, k:k + 10, :] for k in range(5)], axis=-1)
    ucat = ucat.reshape(T * 10, 1120)
    y2 = jnp.dot(ucat, w2_ref[...], preferred_element_type=jnp.float32)
    y2 = jnp.maximum(y2 + b2_ref[...], 0.0)                      # (T*10, 160)

    # pool2 (2x2 / stride 2).
    y2 = y2.reshape(T, 5, 2, 160)
    y2 = jnp.maximum(y2[:, :, 0, :], y2[:, :, 1, :])             # (T, 5, 160)
    sh2 = jnp.concatenate([y2[:, :, 16:],
                           jnp.zeros((T, 5, 16), jnp.float32)], axis=-1)
    u2 = jnp.maximum(y2, sh2)        # valid at lanes 32*j + co (gaps unused)

    # fc1 / fc2 / fc3 as three M=T matmuls (all outputs padded to 128 lanes).
    flat = u2.reshape(T, 800)
    h = jnp.maximum(
        jnp.dot(flat, fw1_ref[...], preferred_element_type=jnp.float32)
        + fb1_ref[...], 0.0)
    h = jnp.maximum(
        jnp.dot(h, fw2_ref[...], preferred_element_type=jnp.float32)
        + fb2_ref[...], 0.0)
    out = jnp.dot(h, fw3_ref[...], preferred_element_type=jnp.float32) \
        + fb3_ref[...]
    o_ref[...] = out.astype(o_ref.dtype)                         # (T, 128)


# ---------------------------------------------------------------------------
# Wrapper: weight repacking (row-lowered conv weights) + pallas_call
# ---------------------------------------------------------------------------

def _pack_params(params):
    f32 = jnp.float32

    # conv1 -> banded row-lowered weight (5*32, 28*8); col = ow*8 + co.
    E1 = np.zeros((5, 32, 28), np.float32)          # E1[kj, w_in, ow]
    for kj in range(5):
        for ow in range(28):
            E1[kj, ow + kj, ow] = 1.0
    a1 = params["conv1_w"].astype(f32)[:, 0]                    # (co, ki, kj)
    w1 = jnp.einsum("jwo,ckj->kwoc", jnp.asarray(E1), a1)       # (5,32,28,6)
    w1 = jnp.pad(w1, ((0, 0), (0, 0), (0, 0), (0, 2))).reshape(160, 224)
    b1 = jnp.tile(jnp.pad(params["conv1_b"].astype(f32), (0, 2)),
                  28).reshape(1, 224)

    # conv2 -> banded row-lowered weight (5*224, 10*16) reading the
    # uncompacted pool1 lane layout (row = ki*224 + 16*j + ci; ci>=6 and the
    # pool "gap" lanes get zero rows, so garbage lanes never contribute).
    E2 = np.zeros((5, 14, 10), np.float32)          # E2[kj, j_in, ow]
    for kj in range(5):
        for ow in range(10):
            E2[kj, ow + kj, ow] = 1.0
    a2 = params["conv2_w"].astype(f32).transpose(2, 3, 1, 0)    # (ki,kj,ci,co)
    w2 = jnp.einsum("qjo,kqic->kjioc", jnp.asarray(E2), a2)     # (5,14,6,10,16)
    w2 = jnp.pad(w2, ((0, 0), (0, 0), (0, 10), (0, 0), (0, 0)))
    w2 = w2.reshape(1120, 160)
    b2 = jnp.tile(params["conv2_b"].astype(f32), 10).reshape(1, 160)

    # fc1 reads the uncompacted pool2 layout (flat index h*160 + 32*j + co);
    # torch's (c,h,w) flatten order is folded into the weight at pack time.
    fw1 = params["fc1_w"].astype(f32).reshape(120, 16, 5, 5)
    fw1 = fw1.transpose(2, 3, 1, 0)                              # (h, w, c, n)
    fw1 = jnp.pad(fw1, ((0, 0), (0, 0), (0, 16), (0, 8))).reshape(800, 128)
    fb1 = jnp.pad(params["fc1_b"].astype(f32), (0, 8)).reshape(1, 128)

    fw2 = jnp.pad(params["fc2_w"].astype(f32).T, ((0, 8), (0, 44)))
    fb2 = jnp.pad(params["fc2_b"].astype(f32), (0, 44)).reshape(1, 128)
    fw3 = jnp.pad(params["fc3_w"].astype(f32).T, ((0, 44), (0, 118)))
    fb3 = jnp.pad(params["fc3_b"].astype(f32), (0, 118)).reshape(1, 128)
    return (w1, b1, w2, b2, fw1, fb1, fw2, fb2, fw3, fb3)


@functools.partial(jax.jit, static_argnames=("tile_b",))
def lenet5_forward(params, x, tile_b=32):
    B = x.shape[0]
    # Per-step batch tile (>= 8 sublanes).  ~ a few MiB of VMEM per step at
    # tile_b=32, safe on v7x's 64 MiB VMEM; raise tile_b on v5e/v6e (128 MiB)
    # for large batches — grid stays >= 2 so both cores get work.
    T = min(tile_b, _round_up(B, 8))
    Bp = _round_up(B, T)
    packed = _pack_params(params)

    # conv1's padding=2 applied up front; dense (B, 32, 32) layout.
    xp = jnp.pad(x[:, 0].astype(jnp.float32),
                 ((0, Bp - B), (2, 2), (2, 2)))                  # (Bp, 32, 32)

    def wspec(a):
        return pl.BlockSpec(a.shape, lambda b: (0, 0))

    out = pl.pallas_call(
        lenet5_kernel,
        out_shape=jax.ShapeDtypeStruct((Bp, 128), jnp.float32),
        grid=(Bp // T,),
        in_specs=[pl.BlockSpec((T, 32, 32), lambda b: (b, 0, 0))]
                 + [wspec(a) for a in packed],
        out_specs=pl.BlockSpec((T, 128), lambda b: (b, 0)),
        compiler_params=pltpu.CompilerParams(
            dimension_semantics=("parallel",),
            vmem_limit_bytes=32 * 1024 * 1024),
    )(xp, *packed)
    return out[:B, :10]


# ---------------------------------------------------------------------------
# Parameter init (PyTorch-style) and a pure-JAX reference for validation
# ---------------------------------------------------------------------------

def init_params(key):
    ks = jax.random.split(key, 10)

    def w(k, shape, fan_in):
        bound = 1.0 / (fan_in ** 0.5)
        return jax.random.uniform(k, shape, jnp.float32, -bound, bound)

    return {
        "conv1_w": w(ks[0], (6, 1, 5, 5), 1 * 5 * 5),
        "conv1_b": w(ks[1], (6,), 1 * 5 * 5),
        "conv2_w": w(ks[2], (16, 6, 5, 5), 6 * 5 * 5),
        "conv2_b": w(ks[3], (16,), 6 * 5 * 5),
        "fc1_w": w(ks[4], (120, 400), 400),
        "fc1_b": w(ks[5], (120,), 400),
        "fc2_w": w(ks[6], (84, 120), 120),
        "fc2_b": w(ks[7], (84,), 120),
        "fc3_w": w(ks[8], (10, 84), 84),
        "fc3_b": w(ks[9], (10,), 84),
    }


def lenet5_reference(params, x):
    hp = lax.Precision.HIGHEST

    def conv(x, w, b, pad):
        out = lax.conv_general_dilated(
            x, w, window_strides=(1, 1), padding=[(pad, pad), (pad, pad)],
            dimension_numbers=("NCHW", "OIHW", "NCHW"), precision=hp)
        return out + b.reshape(1, -1, 1, 1)

    def pool(x):
        return lax.reduce_window(x, -jnp.inf, lax.max,
                                 (1, 1, 2, 2), (1, 1, 2, 2), "VALID")

    x = pool(jax.nn.relu(conv(x, params["conv1_w"], params["conv1_b"], 2)))
    x = pool(jax.nn.relu(conv(x, params["conv2_w"], params["conv2_b"], 0)))
    x = x.reshape(x.shape[0], -1)
    x = jax.nn.relu(jnp.dot(x, params["fc1_w"].T, precision=hp) + params["fc1_b"])
    x = jax.nn.relu(jnp.dot(x, params["fc2_w"].T, precision=hp) + params["fc2_b"])
    return jnp.dot(x, params["fc3_w"].T, precision=hp) + params["fc3_b"]


if __name__ == "__main__":
    key = jax.random.PRNGKey(0)
    pkey, xkey = jax.random.split(key)
    params = init_params(pkey)
    # LeNet5's fc1 (16*5*5 inputs) implies 28x28 single-channel images.
    x = jax.random.normal(xkey, (2, 1, 28, 28), jnp.float32)

    logits = lenet5_forward(params, x)
    jax.block_until_ready(logits)
    assert logits.shape == (2, 10)
    assert bool(jnp.all(jnp.isfinite(logits)))

    ref = lenet5_reference(params, x)
    assert bool(jnp.allclose(logits, ref, atol=1e-2, rtol=1e-2)), (
        "max abs diff vs reference: "
        + str(float(jnp.max(jnp.abs(logits - ref)))))
    print("KERNEL_OK")
</pallas_src>

<mosaic_0001>
module attributes {stable_mosaic.version = 11 : i64} {
  func.func @lenet5_kernel(%arg0: i32, %arg1: memref<8x32x32xf32, #tpu.memory_space<vmem>>, %arg2: memref<160x224xf32, #tpu.memory_space<vmem>>, %arg3: memref<1x224xf32, #tpu.memory_space<vmem>>, %arg4: memref<1120x160xf32, #tpu.memory_space<vmem>>, %arg5: memref<1x160xf32, #tpu.memory_space<vmem>>, %arg6: memref<800x128xf32, #tpu.memory_space<vmem>>, %arg7: memref<1x128xf32, #tpu.memory_space<vmem>>, %arg8: memref<128x128xf32, #tpu.memory_space<vmem>>, %arg9: memref<1x128xf32, #tpu.memory_space<vmem>>, %arg10: memref<128x128xf32, #tpu.memory_space<vmem>>, %arg11: memref<1x128xf32, #tpu.memory_space<vmem>>, %arg12: memref<8x128xf32, #tpu.memory_space<vmem>>) attributes {dimension_semantics = [#tpu.dimension_semantics<parallel>], iteration_bounds = array<i64: 1>, scalar_prefetch = 0 : i64, scratch_operands = 0 : i64, tpu.core_type = #tpu.core_type<tc>, window_params = [{transform_indices = @transform_0, window_bounds = array<i64: 8, 32, 32>}, {pipeline_mode = #tpu.pipeline_mode<synchronous>, transform_indices = @transform_1, window_bounds = array<i64: 160, 224>}, {pipeline_mode = #tpu.pipeline_mode<synchronous>, transform_indices = @transform_2, window_bounds = array<i64: 1, 224>}, {pipeline_mode = #tpu.pipeline_mode<synchronous>, transform_indices = @transform_3, window_bounds = array<i64: 1120, 160>}, {pipeline_mode = #tpu.pipeline_mode<synchronous>, transform_indices = @transform_4, window_bounds = array<i64: 1, 160>}, {pipeline_mode = #tpu.pipeline_mode<synchronous>, transform_indices = @transform_5, window_bounds = array<i64: 800, 128>}, {pipeline_mode = #tpu.pipeline_mode<synchronous>, transform_indices = @transform_6, window_bounds = array<i64: 1, 128>}, {pipeline_mode = #tpu.pipeline_mode<synchronous>, transform_indices = @transform_7, window_bounds = array<i64: 128, 128>}, {pipeline_mode = #tpu.pipeline_mode<synchronous>, transform_indices = @transform_8, window_bounds = array<i64: 1, 128>}, {pipeline_mode = #tpu.pipeline_mode<synchronous>, transform_indices = @transform_9, window_bounds = array<i64: 128, 128>}, {pipeline_mode = #tpu.pipeline_mode<synchronous>, transform_indices = @transform_10, window_bounds = array<i64: 1, 128>}, {transform_indices = @transform_11, window_bounds = array<i64: 8, 128>}]} {
    %c0 = arith.constant 0 : index
    %c0_0 = arith.constant 0 : index
    %c0_1 = arith.constant 0 : index
    %0 = vector.load %arg1[%c0, %c0_0, %c0_1] : memref<8x32x32xf32, #tpu.memory_space<vmem>>, vector<8x32x32xf32>
    %1 = vector.extract_strided_slice %0 {offsets = [0, 0, 0], sizes = [8, 28, 32], strides = [1, 1, 1]} : vector<8x32x32xf32> to vector<8x28x32xf32>
    %2 = vector.extract_strided_slice %0 {offsets = [0, 1, 0], sizes = [8, 28, 32], strides = [1, 1, 1]} : vector<8x32x32xf32> to vector<8x28x32xf32>
    %3 = vector.extract_strided_slice %0 {offsets = [0, 2, 0], sizes = [8, 28, 32], strides = [1, 1, 1]} : vector<8x32x32xf32> to vector<8x28x32xf32>
    %4 = vector.extract_strided_slice %0 {offsets = [0, 3, 0], sizes = [8, 28, 32], strides = [1, 1, 1]} : vector<8x32x32xf32> to vector<8x28x32xf32>
    %5 = vector.extract_strided_slice %0 {offsets = [0, 4, 0], sizes = [8, 28, 32], strides = [1, 1, 1]} : vector<8x32x32xf32> to vector<8x28x32xf32>
    %6 = tpu.concatenate %1, %2, %3, %4, %5 in 2 : vector<8x28x32xf32>, vector<8x28x32xf32>, vector<8x28x32xf32>, vector<8x28x32xf32>, vector<8x28x32xf32> -> vector<8x28x160xf32>
    %7 = vector.shape_cast %6 : vector<8x28x160xf32> to vector<224x160xf32>
    %c0_2 = arith.constant 0 : index
    %c0_3 = arith.constant 0 : index
    %8 = vector.load %arg2[%c0_2, %c0_3] : memref<160x224xf32, #tpu.memory_space<vmem>>, vector<160x224xf32>
    %cst = arith.constant dense<0.000000e+00> : vector<224x224xf32>
    %9 = tpu.matmul %7, %8, %cst {dimension_numbers = #tpu.dot_dimension_numbers<[1], [0], [0], [1], [0, 0, 1, 1], [], []>} : vector<224x160xf32>, vector<160x224xf32>, vector<224x224xf32> -> vector<224x224xf32>
    %c0_4 = arith.constant 0 : index
    %c0_5 = arith.constant 0 : index
    %10 = vector.load %arg3[%c0_4, %c0_5] : memref<1x224xf32, #tpu.memory_space<vmem>>, vector<1x224xf32>
    %11 = vector.broadcast %10 : vector<1x224xf32> to vector<224x224xf32>
    %12 = arith.addf %9, %11 : vector<224x224xf32>
    %cst_6 = arith.constant 0.000000e+00 : f32
    %13 = vector.broadcast %cst_6 : f32 to vector<224x224xf32>
    %14 = arith.maximumf %12, %13 : vector<224x224xf32>
    %15 = vector.shape_cast %14 : vector<224x224xf32> to vector<8x14x2x224xf32>
    %16 = vector.extract_strided_slice %15 {offsets = [0, 0, 0, 0], sizes = [8, 14, 1, 224], strides = [1, 1, 1, 1]} : vector<8x14x2x224xf32> to vector<8x14x1x224xf32>
    %17 = vector.shape_cast %16 : vector<8x14x1x224xf32> to vector<8x14x224xf32>
    %18 = vector.extract_strided_slice %15 {offsets = [0, 0, 1, 0], sizes = [8, 14, 1, 224], strides = [1, 1, 1, 1]} : vector<8x14x2x224xf32> to vector<8x14x1x224xf32>
    %19 = vector.shape_cast %18 : vector<8x14x1x224xf32> to vector<8x14x224xf32>
    %20 = arith.maximumf %17, %19 : vector<8x14x224xf32>
    %21 = vector.extract_strided_slice %20 {offsets = [0, 0, 8], sizes = [8, 14, 216], strides = [1, 1, 1]} : vector<8x14x224xf32> to vector<8x14x216xf32>
    %cst_7 = arith.constant 0.000000e+00 : f32
    %22 = vector.broadcast %cst_7 : f32 to vector<8x14x8xf32>
    %23 = tpu.concatenate %21, %22 in 2 : vector<8x14x216xf32>, vector<8x14x8xf32> -> vector<8x14x224xf32>
    %24 = arith.maximumf %20, %23 : vector<8x14x224xf32>
    %25 = vector.extract_strided_slice %24 {offsets = [0, 0, 0], sizes = [8, 10, 224], strides = [1, 1, 1]} : vector<8x14x224xf32> to vector<8x10x224xf32>
    %26 = vector.extract_strided_slice %24 {offsets = [0, 1, 0], sizes = [8, 10, 224], strides = [1, 1, 1]} : vector<8x14x224xf32> to vector<8x10x224xf32>
    %27 = vector.extract_strided_slice %24 {offsets = [0, 2, 0], sizes = [8, 10, 224], strides = [1, 1, 1]} : vector<8x14x224xf32> to vector<8x10x224xf32>
    %28 = vector.extract_strided_slice %24 {offsets = [0, 3, 0], sizes = [8, 10, 224], strides = [1, 1, 1]} : vector<8x14x224xf32> to vector<8x10x224xf32>
    %29 = vector.extract_strided_slice %24 {offsets = [0, 4, 0], sizes = [8, 10, 224], strides = [1, 1, 1]} : vector<8x14x224xf32> to vector<8x10x224xf32>
    %30 = tpu.concatenate %25, %26, %27, %28, %29 in 2 : vector<8x10x224xf32>, vector<8x10x224xf32>, vector<8x10x224xf32>, vector<8x10x224xf32>, vector<8x10x224xf32> -> vector<8x10x1120xf32>
    %31 = vector.shape_cast %30 : vector<8x10x1120xf32> to vector<80x1120xf32>
    %c0_8 = arith.constant 0 : index
    %c0_9 = arith.constant 0 : index
    %32 = vector.load %arg4[%c0_8, %c0_9] : memref<1120x160xf32, #tpu.memory_space<vmem>>, vector<1120x160xf32>
    %cst_10 = arith.constant dense<0.000000e+00> : vector<80x160xf32>
    %33 = tpu.matmul %31, %32, %cst_10 {dimension_numbers = #tpu.dot_dimension_numbers<[1], [0], [0], [1], [0, 0, 1, 1], [], []>} : vector<80x1120xf32>, vector<1120x160xf32>, vector<80x160xf32> -> vector<80x160xf32>
    %c0_11 = arith.constant 0 : index
    %c0_12 = arith.constant 0 : index
    %34 = vector.load %arg5[%c0_11, %c0_12] : memref<1x160xf32, #tpu.memory_space<vmem>>, vector<1x160xf32>
    %35 = vector.broadcast %34 : vector<1x160xf32> to vector<80x160xf32>
    %36 = arith.addf %33, %35 : vector<80x160xf32>
    %cst_13 = arith.constant 0.000000e+00 : f32
    %37 = vector.broadcast %cst_13 : f32 to vector<80x160xf32>
    %38 = arith.maximumf %36, %37 : vector<80x160xf32>
    %39 = vector.shape_cast %38 : vector<80x160xf32> to vector<8x5x2x160xf32>
    %40 = vector.extract_strided_slice %39 {offsets = [0, 0, 0, 0], sizes = [8, 5, 1, 160], strides = [1, 1, 1, 1]} : vector<8x5x2x160xf32> to vector<8x5x1x160xf32>
    %41 = vector.shape_cast %40 : vector<8x5x1x160xf32> to vector<8x5x160xf32>
    %42 = vector.extract_strided_slice %39 {offsets = [0, 0, 1, 0], sizes = [8, 5, 1, 160], strides = [1, 1, 1, 1]} : vector<8x5x2x160xf32> to vector<8x5x1x160xf32>
    %43 = vector.shape_cast %42 : vector<8x5x1x160xf32> to vector<8x5x160xf32>
    %44 = arith.maximumf %41, %43 : vector<8x5x160xf32>
    %45 = vector.extract_strided_slice %44 {offsets = [0, 0, 16], sizes = [8, 5, 144], strides = [1, 1, 1]} : vector<8x5x160xf32> to vector<8x5x144xf32>
    %cst_14 = arith.constant 0.000000e+00 : f32
    %46 = vector.broadcast %cst_14 : f32 to vector<8x5x16xf32>
    %47 = tpu.concatenate %45, %46 in 2 : vector<8x5x144xf32>, vector<8x5x16xf32> -> vector<8x5x160xf32>
    %48 = arith.maximumf %44, %47 : vector<8x5x160xf32>
    %49 = vector.shape_cast %48 : vector<8x5x160xf32> to vector<8x800xf32>
    %c0_15 = arith.constant 0 : index
    %c0_16 = arith.constant 0 : index
    %50 = vector.load %arg6[%c0_15, %c0_16] : memref<800x128xf32, #tpu.memory_space<vmem>>, vector<800x128xf32>
    %cst_17 = arith.constant dense<0.000000e+00> : vector<8x128xf32>
    %51 = tpu.matmul %49, %50, %cst_17 {dimension_numbers = #tpu.dot_dimension_numbers<[1], [0], [0], [1], [0, 0, 1, 1], [], []>} : vector<8x800xf32>, vector<800x128xf32>, vector<8x128xf32> -> vector<8x128xf32>
    %c0_18 = arith.constant 0 : index
    %c0_19 = arith.constant 0 : index
    %52 = vector.load %arg7[%c0_18, %c0_19] : memref<1x128xf32, #tpu.memory_space<vmem>>, vector<1x128xf32>
    %53 = vector.broadcast %52 : vector<1x128xf32> to vector<8x128xf32>
    %54 = arith.addf %51, %53 : vector<8x128xf32>
    %cst_20 = arith.constant 0.000000e+00 : f32
    %55 = vector.broadcast %cst_20 : f32 to vector<8x128xf32>
    %56 = arith.maximumf %54, %55 : vector<8x128xf32>
    %c0_21 = arith.constant 0 : index
    %c0_22 = arith.constant 0 : index
    %57 = vector.load %arg8[%c0_21, %c0_22] : memref<128x128xf32, #tpu.memory_space<vmem>>, vector<128x128xf32>
    %cst_23 = arith.constant dense<0.000000e+00> : vector<8x128xf32>
    %58 = tpu.matmul %56, %57, %cst_23 {dimension_numbers = #tpu.dot_dimension_numbers<[1], [0], [0], [1], [0, 0, 1, 1], [], []>} : vector<8x128xf32>, vector<128x128xf32>, vector<8x128xf32> -> vector<8x128xf32>
    %c0_24 = arith.constant 0 : index
    %c0_25 = arith.constant 0 : index
    %59 = vector.load %arg9[%c0_24, %c0_25] : memref<1x128xf32, #tpu.memory_space<vmem>>, vector<1x128xf32>
    %60 = vector.broadcast %59 : vector<1x128xf32> to vector<8x128xf32>
    %61 = arith.addf %58, %60 : vector<8x128xf32>
    %cst_26 = arith.constant 0.000000e+00 : f32
    %62 = vector.broadcast %cst_26 : f32 to vector<8x128xf32>
    %63 = arith.maximumf %61, %62 : vector<8x128xf32>
    %c0_27 = arith.constant 0 : index
    %c0_28 = arith.constant 0 : index
    %64 = vector.load %arg10[%c0_27, %c0_28] : memref<128x128xf32, #tpu.memory_space<vmem>>, vector<128x128xf32>
    %cst_29 = arith.constant dense<0.000000e+00> : vector<8x128xf32>
    %65 = tpu.matmul %63, %64, %cst_29 {dimension_numbers = #tpu.dot_dimension_numbers<[1], [0], [0], [1], [0, 0, 1, 1], [], []>} : vector<8x128xf32>, vector<128x128xf32>, vector<8x128xf32> -> vector<8x128xf32>
    %c0_30 = arith.constant 0 : index
    %c0_31 = arith.constant 0 : index
    %66 = vector.load %arg11[%c0_30, %c0_31] : memref<1x128xf32, #tpu.memory_space<vmem>>, vector<1x128xf32>
    %67 = vector.broadcast %66 : vector<1x128xf32> to vector<8x128xf32>
    %68 = arith.addf %65, %67 : vector<8x128xf32>
    %c0_32 = arith.constant 0 : index
    %c0_33 = arith.constant 0 : index
    %69 = vector.load %arg12[%c0_32, %c0_33] : memref<8x128xf32, #tpu.memory_space<vmem>>, vector<8x128xf32>
    tpu.vector_store %arg12[%c0_32, %c0_33], %68 {strides = array<i32>} : memref<8x128xf32, #tpu.memory_space<vmem>>, vector<8x128xf32>,
    return
  }
  func.func @transform_0(%arg0: i32) -> (i32, i32, i32) {
    %c0_i32 = arith.constant 0 : i32
    %c0_i32_0 = arith.constant 0 : i32
    %c0_i32_1 = arith.constant 0 : i32
    return %arg0, %c0_i32, %c0_i32_0 : i32, i32, i32
  }
  func.func @transform_1(%arg0: i32) -> (i32, i32) {
    %c0_i32 = arith.constant 0 : i32
    %c0_i32_0 = arith.constant 0 : i32
    %c0_i32_1 = arith.constant 0 : i32
    return %c0_i32, %c0_i32_0 : i32, i32
  }
  func.func @transform_2(%arg0: i32) -> (i32, i32) {
    %c0_i32 = arith.constant 0 : i32
    %c0_i32_0 = arith.constant 0 : i32
    %c0_i32_1 = arith.constant 0 : i32
    return %c0_i32, %c0_i32_0 : i32, i32
  }
  func.func @transform_3(%arg0: i32) -> (i32, i32) {
    %c0_i32 = arith.constant 0 : i32
    %c0_i32_0 = arith.constant 0 : i32
    %c0_i32_1 = arith.constant 0 : i32
    return %c0_i32, %c0_i32_0 : i32, i32
  }
  func.func @transform_4(%arg0: i32) -> (i32, i32) {
    %c0_i32 = arith.constant 0 : i32
    %c0_i32_0 = arith.constant 0 : i32
    %c0_i32_1 = arith.constant 0 : i32
    return %c0_i32, %c0_i32_0 : i32, i32
  }
  func.func @transform_5(%arg0: i32) -> (i32, i32) {
    %c0_i32 = arith.constant 0 : i32
    %c0_i32_0 = arith.constant 0 : i32
    %c0_i32_1 = arith.constant 0 : i32
    return %c0_i32, %c0_i32_0 : i32, i32
  }
  func.func @transform_6(%arg0: i32) -> (i32, i32) {
    %c0_i32 = arith.constant 0 : i32
    %c0_i32_0 = arith.constant 0 : i32
    %c0_i32_1 = arith.constant 0 : i32
    return %c0_i32, %c0_i32_0 : i32, i32
  }
  func.func @transform_7(%arg0: i32) -> (i32, i32) {
    %c0_i32 = arith.constant 0 : i32
    %c0_i32_0 = arith.constant 0 : i32
    %c0_i32_1 = arith.constant 0 : i32
    return %c0_i32, %c0_i32_0 : i32, i32
  }
  func.func @transform_8(%arg0: i32) -> (i32, i32) {
    %c0_i32 = arith.constant 0 : i32
    %c0_i32_0 = arith.constant 0 : i32
    %c0_i32_1 = arith.constant 0 : i32
    return %c0_i32, %c0_i32_0 : i32, i32
  }
  func.func @transform_9(%arg0: i32) -> (i32, i32) {
    %c0_i32 = arith.constant 0 : i32
    %c0_i32_0 = arith.constant 0 : i32
    %c0_i32_1 = arith.constant 0 : i32
    return %c0_i32, %c0_i32_0 : i32, i32
  }
  func.func @transform_10(%arg0: i32) -> (i32, i32) {
    %c0_i32 = arith.constant 0 : i32
    %c0_i32_0 = arith.constant 0 : i32
    %c0_i32_1 = arith.constant 0 : i32
    return %c0_i32, %c0_i32_0 : i32, i32
  }
  func.func @transform_11(%arg0: i32) -> (i32, i32) {
    %c0_i32 = arith.constant 0 : i32
    %c0_i32_0 = arith.constant 0 : i32
    return %arg0, %c0_i32 : i32, i32
  }
}

</mosaic_0001>

<bundles_post_ra>
// kernel: tile.13
= control target key start
LH: loop header
LB: loop body
LE: loop exit
PB: predicated region body
PF: predicated region fallthrough
CT: control target
= control target key end

     0   :  { %s40_s0 = inlined_call_operand.vmem [shape: f32[8], index: 0, kind: input, shape index: {}]   ;;  %s41_s1 = inlined_call_operand.vmem [shape: f32[28,8], index: 1, kind: output, shape index: {}]  }
   0x1   :  { %v4_v0 = vld [vmem:[%s40_s0] ss:$0 sm:$0xff] }
   0x2   :  { %5 = vst [vmem:[%s41_s1] sm:$0xff] %v4_v0  ;;  %12 = vst [vmem:[%s41_s1 + $0x8] sm:$0xff] %v4_v0 }
   0x3   :  { %13 = vst [vmem:[%s41_s1 + $0x10] sm:$0xff] %v4_v0  ;;  %14 = vst [vmem:[%s41_s1 + $0x18] sm:$0xff] %v4_v0 }

// kernel: tile.14
= control target key start
LH: loop header
LB: loop body
LE: loop exit
PB: predicated region body
PF: predicated region fallthrough
CT: control target
= control target key end

     0   :  { %s152_s10 = smov 120   ;;  %s153_s11 = smov 104   ;;  %vm4_vm0 = vcmask 64512   ;;  %vm10_vm1 = vcmask 1048512   ;;  %vm16_vm2 = vcmask 982912   ;;  %vm22_vm3 = vcmask 917312   ;;  %s231_s0 = inlined_call_operand.vmem [shape: f32[28,8], index: 0, kind: input, shape index: {}]   ;;  %s232_s1 = inlined_call_operand.vmem [shape: f32[1,224], index: 1, kind: output, shape index: {}]  }
   0x1   :  { %v121_v0 = vld [vmem:[%s231_s0 + $0xf] sm:$0x1]   ;;  %v123_v1 = vld [vmem:[%s231_s0 + $0xd] sm:$0x1]   ;;  %v122_v2 = vld [vmem:[%s231_s0 + $0xe] sm:$0x1]  }
   0x2   :  { %8 = vrot.lane.b32.xlu0 %v121_v0, %s152_s10  ;;  %20 = vrot.lane.b32.xlu1 %v123_v1, %s153_s11  ;;  %v124_v3 = vld [vmem:[%s231_s0 + $0xc] sm:$0x1]   ;;  %s31_s16 = smov 3  ;;  %s38_s17 = smov 3  ;;  %vm28_vm4 = vcmask 851712   ;;  %vm35_vm5 = vcmask 786112  }
   0x3   :  { %s154_s18 = smov 112   ;;  %s155_s19 = smov 96   ;;  %v125_v4 = vld [vmem:[%s231_s0 + $0xb] ss:$16 sm:%s31_s16]   ;;  %v126_v5 = vld [vmem:[%s231_s0 + $0xa] ss:$16 sm:%s38_s17]  }
   0x4   :  { %s45_s24 = smov 3  ;;  %s52_s25 = smov 3  ;;  %vm42_vm6 = vcmask 720512   ;;  %vm49_vm7 = vcmask 654912   ;;  %vm56_vm8 = vcmask 589312   ;;  %vm63_vm9 = vcmask 523712  }
   0x5   :  { %s156_s26 = smov 88   ;;  %s157_s27 = smov 80   ;;  %v127_v6 = vld [vmem:[%s231_s0 + $0x9] ss:$16 sm:%s45_s24]   ;;  %v128_v7 = vld [vmem:[%s231_s0 + $0x8] ss:$16 sm:%s52_s25]  }
   0x6   :  { %14 = vrot.lane.b32.xlu0 %v122_v2, %s154_s18  ;;  %26 = vrot.lane.b32.xlu1 %v124_v3, %s155_s19  ;;  %s59_s3 = smov 3  ;;  %s66_s4 = smov 3  ;;  %vm70_vm10 = vcmask 458112   ;;  %vm77_vm11 = vcmask 392512   ;;  %vm84_vm12 = vcmask 326912   ;;  %vm91_vm13 = vcmask 261312  }
   0x7   :  { %s158_s5 = smov 72   ;;  %s159_s6 = smov 64   ;;  %v129_v8 = vld [vmem:[%s231_s0 + $0x7] ss:$16 sm:%s59_s3]   ;;  %v130_v9 = vld [vmem:[%s231_s0 + $0x6] ss:$16 sm:%s66_s4]  }
   0x8   :  { %s2_s9 = smov 3  ;;  %s73_s14 = smov 3  ;;  %vm98_vm14 = vcmask 195712   ;;  %vm105_vm15 = vcmask 130112  }
   0x9   :  { %v3_v10 = vld [vmem:[%s231_s0] ss:$16 sm:%s2_s9]   ;;  %s80_s15 = smov 3  ;;  %s160_s16 = smov 56   ;;  %v131_v11 = vld [vmem:[%s231_s0 + $0x5] ss:$16 sm:%s73_s14]  }
   0xa   :  { %33 = vrot.lane.b32.xlu0 %v125_v4, %s156_s26  ;;  %40 = vrot.lane.b32.xlu1 %v126_v5, %s157_s27  ;;  %5 = vst.msk [vmem:[#allocation0] ss:$8 sm:$0x3] %vm4_vm0, %v3_v10   ;;  %s161_s17 = smov 48   ;;  %v132_v12 = vld [vmem:[%s231_s0 + $0x4] ss:$16 sm:%s80_s15]  }
   0xb   :  { %s87_s22 = smov 3  ;;  %s94_s23 = smov 3 }
   0xc   :  { %s162_s24 = smov 40   ;;  %s163_s25 = smov 32   ;;  %v133_v13 = vld [vmem:[%s231_s0 + $0x3] ss:$16 sm:%s87_s22]   ;;  %v134_v14 = vld [vmem:[%s231_s0 + $0x2] ss:$16 sm:%s94_s23]  }
   0xd   :  { %s101_s30 = smov 3  ;;  %s164_s2 = smov 24  }
   0xe   :  { %47 = vrot.lane.b32.xlu0 %v127_v6, %s158_s5  ;;  %54 = vrot.lane.b32.xlu1 %v128_v7, %s159_s6  ;;  %s165_s3 = smov 16   ;;  %v135_v15 = vld [vmem:[%s231_s0 + $0x1] ss:$16 sm:%s101_s30]   ;;  %s166_s0 = smov 8  }
  0x12   :  { %61 = vrot.lane.b32.xlu0 %v129_v8, %s160_s16  ;;  %68 = vrot.lane.b32.xlu1 %v130_v9, %s161_s17 }
  0x16   :  { %75 = vrot.lane.b32.xlu0 %v131_v11, %s162_s24  ;;  %82 = vrot.lane.b32.xlu1 %v132_v12, %s163_s25 }
  0x1a   :  { %89 = vrot.lane.b32.xlu0 %v133_v13, %s164_s2  ;;  %96 = vrot.lane.b32.xlu1 %v134_v14, %s165_s3 }
  0x1e   :  { %103 = vrot.lane.b32.xlu0 %v135_v15, %s166_s0 }
  0x74   :  { %v9_v16 = vpop.permute.xlu0 %8   ;;  %v21_v17 = vpop.permute.xlu1 %20  }
  0x75   :  { %11 = vst.msk [vmem:[#allocation0] sm:$0x1] %vm10_vm1, %v9_v16  }
  0x78   :  { %v15_v18 = vpop.permute.xlu0 %14   ;;  %v27_v19 = vpop.permute.xlu1 %26  }
  0x79   :  { %17 = vst.msk [vmem:[#allocation0] sm:$0x1] %vm16_vm2, %v15_v18  }
  0x7a   :  { %23 = vst.msk [vmem:[#allocation0] sm:$0x1] %vm22_vm3, %v21_v17  }
  0x7b   :  { %29 = vst.msk [vmem:[#allocation0] sm:$0x1] %vm28_vm4, %v27_v19  }
  0x7c   :  { %v34_v20 = vpop.permute.xlu0 %33   ;;  %v41_v21 = vpop.permute.xlu1 %40  }
  0x7d   :  { %36 = vst.msk [vmem:[#allocation0] ss:$8 sm:$0x3] %vm35_vm5, %v34_v20  }
  0x7e   :  { %43 = vst.msk [vmem:[#allocation0] ss:$8 sm:$0x3] %vm42_vm6, %v41_v21  }
  0x80   :  { %v48_v22 = vpop.permute.xlu0 %47   ;;  %v55_v23 = vpop.permute.xlu1 %54  }
  0x81   :  { %50 = vst.msk [vmem:[#allocation0] ss:$8 sm:$0x3] %vm49_vm7, %v48_v22  }
  0x82   :  { %57 = vst.msk [vmem:[#allocation0] ss:$8 sm:$0x3] %vm56_vm8, %v55_v23  }
  0x84   :  { %v62_v24 = vpop.permute.xlu0 %61   ;;  %v69_v25 = vpop.permute.xlu1 %68  }
  0x85   :  { %64 = vst.msk [vmem:[#allocation0] ss:$8 sm:$0x3] %vm63_vm9, %v62_v24  }
  0x86   :  { %71 = vst.msk [vmem:[#allocation0] ss:$8 sm:$0x3] %vm70_vm10, %v69_v25  }
  0x88   :  { %v76_v26 = vpop.permute.xlu0 %75   ;;  %v83_v27 = vpop.permute.xlu1 %82  }
  0x89   :  { %78 = vst.msk [vmem:[#allocation0] ss:$8 sm:$0x3] %vm77_vm11, %v76_v26  }
  0x8a   :  { %85 = vst.msk [vmem:[#allocation0] ss:$8 sm:$0x3] %vm84_vm12, %v83_v27  }
  0x8c   :  { %v90_v28 = vpop.permute.xlu0 %89   ;;  %v97_v29 = vpop.permute.xlu1 %96  }
  0x8d   :  { %92 = vst.msk [vmem:[#allocation0] ss:$8 sm:$0x3] %vm91_vm13, %v90_v28  }
  0x8e   :  { %99 = vst.msk [vmem:[#allocation0] ss:$8 sm:$0x3] %vm98_vm14, %v97_v29  }
  0x90   :  { %v104_v30 = vpop.permute.xlu0 %103  }
  0x91   :  { %106 = vst.msk [vmem:[#allocation0] ss:$8 sm:$0x3] %vm105_vm15, %v104_v30  }
  0x98   :  { %v111_v31 = vld [vmem:[#allocation0] sm:$0x1]  ;;  %v116_v32 = vld [vmem:[#allocation0 + $0x8] sm:$0x1] }
  0x99   :  { %114 = vst [vmem:[%s232_s1] sm:$0x1] %v111_v31  ;;  %136 = vst [vmem:[%s232_s1 + $0x1] sm:$0x1] %v116_v32 }

// kernel: tile.18
= control target key start
LH: loop header
LB: loop body
LE: loop exit
PB: predicated region body
PF: predicated region fallthrough
CT: control target
= control target key end

     0   :  { %s28_s0 = inlined_call_operand.vmem [shape: f32[16], index: 0, kind: input, shape index: {}]   ;;  %s29_s1 = inlined_call_operand.vmem [shape: f32[10,16], index: 1, kind: output, shape index: {}]  }
   0x1   :  { %v4_v0 = vld [vmem:[%s28_s0] ss:$0 sm:$0xff] }
   0x2   :  { %5 = vst [vmem:[%s29_s1] sm:$0xff] %v4_v0  ;;  %8 = vst [vmem:[%s29_s1 + $0x8] sm:$0xff] %v4_v0 }

// kernel: tile.19
= control target key start
LH: loop header
LB: loop body
LE: loop exit
PB: predicated region body
PF: predicated region fallthrough
CT: control target
= control target key end

     0   :  { %s78_s10 = smov 112   ;;  %s79_s11 = smov 80   ;;  %vm4_vm0 = vcmask 130048   ;;  %vm10_vm1 = vcmask 1048448   ;;  %vm16_vm2 = vcmask 917248   ;;  %vm22_vm3 = vcmask 786048   ;;  %s125_s0 = inlined_call_operand.vmem [shape: f32[10,16], index: 0, kind: input, shape index: {}]   ;;  %s126_s1 = inlined_call_operand.vmem [shape: f32[1,160], index: 1, kind: output, shape index: {}]  }
   0x1   :  { %v63_v0 = vld [vmem:[%s125_s0 + $0x7] sm:$0x1]   ;;  %v65_v1 = vld [vmem:[%s125_s0 + $0x5] sm:$0x1]   ;;  %v64_v2 = vld [vmem:[%s125_s0 + $0x6] sm:$0x1]  }
   0x2   :  { %8 = vrot.lane.b32.xlu0 %v63_v0, %s78_s10  ;;  %20 = vrot.lane.b32.xlu1 %v65_v1, %s79_s11  ;;  %v66_v3 = vld [vmem:[%s125_s0 + $0x4] sm:$0x1]   ;;  %s2_s16 = smov 3  ;;  %s80_s17 = smov 96   ;;  %v67_v5 = vld [vmem:[%s125_s0 + $0x3] sm:$0x1]  }
   0x3   :  { %s81_s18 = smov 64   ;;  %v3_v4 = vld [vmem:[%s125_s0] ss:$8 sm:%s2_s16]   ;;  %v68_v6 = vld [vmem:[%s125_s0 + $0x2] sm:$0x1]   ;;  %s43_s25 = smov 3 }
   0x4   :  { %5 = vst.msk [vmem:[#allocation0] ss:$8 sm:$0x3] %vm4_vm0, %v3_v4   ;;  %s82_s26 = smov 48   ;;  %s83_s27 = smov 32   ;;  %vm28_vm4 = vcmask 654848  }
   0x5   :  { %v69_v7 = vld [vmem:[%s125_s0 + $0x1] ss:$8 sm:%s43_s25]   ;;  %s84_s0 = smov 16   ;;  %vm34_vm5 = vcmask 523648   ;;  %vm40_vm6 = vcmask 392448   ;;  %vm47_vm7 = vcmask 261248  }
   0x6   :  { %14 = vrot.lane.b32.xlu0 %v64_v2, %s80_s17  ;;  %26 = vrot.lane.b32.xlu1 %v66_v3, %s81_s18 }
   0xa   :  { %32 = vrot.lane.b32.xlu0 %v67_v5, %s82_s26  ;;  %38 = vrot.lane.b32.xlu1 %v68_v6, %s83_s27 }
   0xe   :  { %45 = vrot.lane.b32.xlu0 %v69_v7, %s84_s0 }
  0x74   :  { %v9_v8 = vpop.permute.xlu0 %8   ;;  %v21_v9 = vpop.permute.xlu1 %20  }
  0x75   :  { %11 = vst.msk [vmem:[#allocation0] sm:$0x1] %vm10_vm1, %v9_v8  }
  0x78   :  { %v15_v10 = vpop.permute.xlu0 %14   ;;  %v27_v11 = vpop.permute.xlu1 %26  }
  0x79   :  { %17 = vst.msk [vmem:[#allocation0] sm:$0x1] %vm16_vm2, %v15_v10  }
  0x7a   :  { %23 = vst.msk [vmem:[#allocation0] sm:$0x1] %vm22_vm3, %v21_v9  }
  0x7b   :  { %29 = vst.msk [vmem:[#allocation0] sm:$0x1] %vm28_vm4, %v27_v11  }
  0x7c   :  { %v33_v12 = vpop.permute.xlu0 %32   ;;  %v39_v13 = vpop.permute.xlu1 %38  }
  0x7d   :  { %35 = vst.msk [vmem:[#allocation0] sm:$0x1] %vm34_vm5, %v33_v12  }
  0x7e   :  { %41 = vst.msk [vmem:[#allocation0] sm:$0x1] %vm40_vm6, %v39_v13  }
  0x80   :  { %v46_v14 = vpop.permute.xlu0 %45  }
  0x81   :  { %48 = vst.msk [vmem:[#allocation0] ss:$8 sm:$0x3] %vm47_vm7, %v46_v14  }
  0x88   :  { %v53_v15 = vld [vmem:[#allocation0] sm:$0x1]  ;;  %v58_v16 = vld [vmem:[#allocation0 + $0x8] sm:$0x1] }
  0x89   :  { %56 = vst [vmem:[%s126_s1] sm:$0x1] %v53_v15  ;;  %70 = vst [vmem:[%s126_s1 + $0x1] sm:$0x1] %v58_v16 }

// kernel: lenet5_forward.1
= control target key start
LH: loop header
LB: loop body
LE: loop exit
PB: predicated region body
PF: predicated region fallthrough
CT: control target
= control target key end

     0   :  { %vm408_vm0 = vcmask 1044480   ;;  %vm102_vm1 = vcmask 1046528   ;;  %vm255_vm2 = vcmask 1045504   ;;  %s12094_s29 = smov 96   ;;  %s12095_s30 = smov 32   ;;  %vm561_vm3 = vcmask 1043456   ;;  %s20260_s0 = inlined_call_operand.vmem [shape: f32[8,32,32], index: 0, kind: input, shape index: {}]   ;;  %s20261_s1 = inlined_call_operand.vmem [shape: f32[160,224], index: 1, kind: input, shape index: {}]   ;;  %s20262_s2 = inlined_call_operand.vmem [shape: f32[1,224], index: 2, kind: input, shape index: {}]   ;;  %s20263_s3 = inlined_call_operand.vmem [shape: f32[1120,160], index: 3, kind: input, shape index: {}]   ;;  %s20264_s4 = inlined_call_operand.vmem [shape: f32[1,160], index: 4, kind: input, shape index: {}]   ;;  %s20265_s5 = inlined_call_operand.vmem [shape: f32[800,128], index: 5, kind: input, shape index: {}]   ;;  %s20266_s7 = inlined_call_operand.vmem [shape: f32[128,128], index: 7, kind: input, shape index: {}]   ;;  %s20267_s9 = inlined_call_operand.vmem [shape: f32[128,128], index: 9, kind: input, shape index: {}]   ;;  %s20268_s6 = inlined_call_operand.vmem [shape: f32[1,128], index: 6, kind: input, shape index: {}]   ;;  %s20269_s8 = inlined_call_operand.vmem [shape: f32[1,128], index: 8, kind: input, shape index: {}]   ;;  %s20270_s10 = inlined_call_operand.vmem [shape: f32[1,128], index: 10, kind: input, shape index: {}]   ;;  %s20271_s11 = inlined_call_operand.vmem [shape: f32[8,128], index: 11, kind: output, shape index: {}]  }
   0x1   :  { %v12166_v0 = vld [vmem:[%s20260_s0] sm:$0xff]  ;;  %v12171_v1 = vld [vmem:[%s20260_s0 + $0x8] sm:$0xff]  ;;  %v12176_v2 = vld [vmem:[%s20260_s0 + $0x10] sm:$0xff]  ;;  %s12096_s28 = smov 64   ;;  %vm618_vm4 = vcmask 261120   ;;  %vm651_vm5 = vcmask 523264  }
   0x2   :  { %v409_v3 = vrot.slane %v12166_v0, 3  ;;  %v410_v4 = vrot.slane %v12171_v1, 3  ;;  %v412_v5 = vrot.slane %v12176_v2, 3  ;;  %v103_v6 = vrot.slane %v12166_v0, 1  ;;  %v12185_v7 = vld [vmem:[%s20260_s0 + $0x18] sm:$0xff]  ;;  %v12190_v8 = vld [vmem:[%s20260_s0 + $0x40] sm:$0xff] }
   0x3   :  { %v104_v9 = vrot.slane %v12171_v1, 1  ;;  %v106_v10 = vrot.slane %v12176_v2, 1  ;;  %v12197_v11 = vld [vmem:[%s20260_s0 + $0x48] sm:$0xff]  ;;  %v108_v12 = vrot.slane %v12185_v7, 1  ;;  %v117_v13 = vrot.slane %v12190_v8, 1  ;;  %v836_v34 = vld [vmem:[%s20261_s1 + $0xf8] sm:$0xff] }
   0x4   :  { %v411_v14 = vsel %vm408_vm0, %v409_v3, %v410_v4  ;;  %v413_v15 = vsel %vm408_vm0, %v410_v4, %v412_v5  ;;  %v118_v16 = vrot.slane %v12197_v11, 1  ;;  %v256_v17 = vrot.slane %v12166_v0, 2  ;;  %v835_v35 = vld [vmem:[%s20261_s1 + $0xf0] sm:$0xff]  ;;  %v12238_v40 = vld [vmem:[%s20260_s0 + $0x20] sm:$0xff]  ;;  %997 = vmatprep.subr.mxu0 %v836_v34  ;;  %v834_v41 = vld [vmem:[%s20261_s1 + $0xe8] sm:$0xff] }
   0x5   :  { %v12009_v18 = vpack.i.bf16 %v413_v15, %v411_v14  ;;  %v105_v19 = vsel %vm102_vm1, %v103_v6, %v104_v9  ;;  %v107_v20 = vsel %vm102_vm1, %v104_v9, %v106_v10  ;;  %v109_v21 = vsel %vm102_vm1, %v106_v10, %v108_v12  ;;  %v12246_v42 = vld [vmem:[%s20260_s0 + $0x28] sm:$0xff]  ;;  %998 = vmatpush1.msra.mxu0 %v835_v35  ;;  %v833_v43 = vld [vmem:[%s20261_s1 + $0xe0] sm:$0xff]  ;;  %v832_v44 = vld [vmem:[%s20261_s1 + $0xd8] sm:$0xff] }
   0x6   :  { %v11999_v22 = vpack.i.bf16 %v107_v20, %v105_v19  ;;  %v119_v23 = vsel %vm102_vm1, %v117_v13, %v118_v16  ;;  %v257_v24 = vrot.slane %v12171_v1, 2  ;;  %v259_v25 = vrot.slane %v12176_v2, 2  ;;  %999 = vmatprep.subr.mxu0 %v834_v41  ;;  %v831_v45 = vld [vmem:[%s20261_s1 + $0xd0] sm:$0xff]  ;;  %v830_v49 = vld [vmem:[%s20261_s1 + $0xc8] sm:$0xff]  ;;  %v829_v52 = vld [vmem:[%s20261_s1 + $0xc0] sm:$0xff] }
   0x7   :  { %12010 = vrot.lane.b32.xlu1 %v12009_v18, %s12094_s29  ;;  %v12014_v26 = vpack.i.bf16 %v119_v23, %v109_v21  ;;  %v261_v27 = vrot.slane %v12185_v7, 2  ;;  %v270_v28 = vrot.slane %v12190_v8, 2  ;;  %v271_v29 = vrot.slane %v12197_v11, 2  ;;  %1000 = vmatpush1.msra.mxu0 %v833_v43  ;;  %v12276_v53 = vld [vmem:[%s20260_s0 + $0x30] sm:$0xff]  ;;  %v828_v54 = vld [vmem:[%s20261_s1 + $0xb8] sm:$0xff]  ;;  %v826_v57 = vld [vmem:[%s20261_s1 + $0xa8] sm:$0xff] }
   0x8   :  { %12000 = vrot.lane.b32.xlu0 %v11999_v22, %s12095_s30  ;;  %v258_v30 = vsel %vm255_vm2, %v256_v17, %v257_v24  ;;  %v260_v31 = vsel %vm255_vm2, %v257_v24, %v259_v25  ;;  %v414_v32 = vrot.slane %v12185_v7, 3  ;;  %v423_v33 = vrot.slane %v12190_v8, 3  ;;  %1001 = vmatprep.subr.mxu0 %v832_v44  ;;  %v827_v56 = vld [vmem:[%s20261_s1 + $0xb0] sm:$0xff]  ;;  %v825_v60 = vld [vmem:[%s20261_s1 + $0xa0] sm:$0xff]  ;;  %v824_v61 = vld [vmem:[%s20261_s1 + $0x98] sm:$0xff] }
   0x9   :  { %v12004_v36 = vpack.i.bf16 %v260_v31, %v258_v30  ;;  %v262_v37 = vsel %vm255_vm2, %v259_v25, %v261_v27  ;;  %v272_v38 = vsel %vm255_vm2, %v270_v28, %v271_v29  ;;  %v424_v39 = vrot.slane %v12197_v11, 3  ;;  %1002 = vmatpush1.msra.mxu0 %v831_v45  ;;  %v823_v62 = vld [vmem:[%s20261_s1 + $0x90] sm:$0xff]  ;;  %v822_v4 = vld [vmem:[%s20261_s1 + $0x88] sm:$0xff]  ;;  %v821_v9 = vld [vmem:[%s20261_s1 + $0x80] sm:$0xff] }
   0xa   :  { %v12019_v46 = vpack.i.bf16 %v272_v38, %v262_v37  ;;  %v415_v47 = vsel %vm408_vm0, %v412_v5, %v414_v32  ;;  %v110_v50 = vrot.slane %v12238_v40, 1  ;;  %v111_v51 = vrot.slane %v12246_v42, 1  ;;  %1003 = vmatprep.subr.mxu0 %v830_v49  ;;  %v820_v10 = vld [vmem:[%s20261_s1 + $0x78] sm:$0xff]  ;;  %v818_v17 = vld [vmem:[%s20261_s1 + $0x68] sm:$0xff]  ;;  %v817_v20 = vld [vmem:[%s20261_s1 + $0x60] sm:$0xff] }
   0xb   :  { %12015 = vrot.lane.b32.xlu1 %v12014_v26, %s12095_s30  ;;  %v425_v48 = vsel %vm408_vm0, %v423_v33, %v424_v39  ;;  %1004 = vmatpush1.msra.mxu0 %v829_v52  ;;  %v113_v59 = vrot.slane %v12276_v53, 1  ;;  %v264_v63 = vrot.slane %v12246_v42, 2  ;;  %v266_v3 = vrot.slane %v12276_v53, 2  ;;  %v12334_v19 = vld [vmem:[%s20260_s0 + $0x38] sm:$0xff]  ;;  %v815_v22 = vld [vmem:[%s20261_s1 + $0x50] sm:$0xff]  ;;  %v814_v25 = vld [vmem:[%s20261_s1 + $0x48] sm:$0xff] }
   0xc   :  { %12005 = vrot.lane.b32.xlu0 %v12004_v36, %s12096_s28  ;;  %v12024_v55 = vpack.i.bf16 %v425_v48, %v415_v47  ;;  %v112_v58 = vsel %vm102_vm1, %v110_v50, %v111_v51  ;;  %1005 = vmatprep.subr.mxu0 %v828_v54  ;;  %v263_v6 = vrot.slane %v12238_v40, 2  ;;  %v416_v14 = vrot.slane %v12238_v40, 3  ;;  %v816_v21 = vld [vmem:[%s20261_s1 + $0x58] sm:$0xff]  ;;  %v811_v30 = vld [vmem:[%s20261_s1 + $0x30] sm:$0xff]  ;;  %v810_v35 = vld [vmem:[%s20261_s1 + $0x28] sm:$0xff] }
   0xd   :  { %1006 = vmatpush1.msra.mxu0 %v827_v56  ;;  %v114_v5 = vsel %vm102_vm1, %v111_v51, %v113_v59  ;;  %v267_v13 = vsel %vm255_vm2, %v264_v63, %v266_v3  ;;  %v417_v15 = vrot.slane %v12246_v42, 3  ;;  %v115_v24 = vrot.slane %v12334_v19, 1  ;;  %v812_v28 = vld [vmem:[%s20261_s1 + $0x38] sm:$0xff]  ;;  %v12371_v34 = vld [vmem:[%s20260_s0 + $0x50] sm:$0xff]  ;;  %v809_v38 = vld [vmem:[%s20261_s1 + $0x20] sm:$0xff] }
   0xe   :  { %1007 = vmatprep.subr.mxu0 %v826_v57  ;;  %v265_v18 = vsel %vm255_vm2, %v263_v6, %v264_v63  ;;  %v419_v26 = vrot.slane %v12276_v53, 3  ;;  %v421_v33 = vrot.slane %v12334_v19, 3  ;;  %v268_v37 = vrot.slane %v12334_v19, 2  ;;  %v808_v41 = vld [vmem:[%s20261_s1 + $0x18] sm:$0xff]  ;;  %v807_v44 = vld [vmem:[%s20261_s1 + $0x10] sm:$0xff]  ;;  %v806_v47 = vld [vmem:[%s20261_s1 + $0x8] sm:$0xff] }
   0xf   :  { %165 = vrot.lane.b32.xlu1 %v108_v12, %s12095_s30  ;;  %1008 = vmatpush1.msra.mxu0 %v825_v60  ;;  %v819_v12 = vld [vmem:[%s20261_s1 + $0x70] sm:$0xff]  ;;  %v418_v23 = vsel %vm408_vm0, %v416_v14, %v417_v15  ;;  %v116_v31 = vsel %vm102_vm1, %v113_v59, %v115_v24  ;;  %v120_v43 = vrot.slane %v12371_v34, 1  ;;  %v805_v49 = vld [vmem:[%s20261_s1] sm:$0xff]  ;;  %v844_v50 = vld [vmem:[%s20261_s1 + $0x138] sm:$0xff]  ;;  %v426_v52 = vrot.slane %v12371_v34, 3 }
  0x10   :  { %12020 = vrot.lane.b32.xlu0 %v12019_v46, %s12096_s28  ;;  %1009 = vmatprep.subr.mxu0 %v824_v61  ;;  %v420_v36 = vsel %vm408_vm0, %v417_v15, %v419_v26  ;;  %v422_v45 = vsel %vm408_vm0, %v419_v26, %v421_v33  ;;  %v269_v48 = vsel %vm255_vm2, %v266_v3, %v268_v37  ;;  %v843_v54 = vld [vmem:[%s20261_s1 + $0x130] sm:$0xff]  ;;  %v842_v57 = vld [vmem:[%s20261_s1 + $0x128] sm:$0xff]  ;;  %v273_v59 = vrot.slane %v12371_v34, 2  ;;  %v841_v61 = vld [vmem:[%s20261_s1 + $0x120] sm:$0xff] }
  0x11   :  { %1010 = vmatpush1.msra.mxu0 %v823_v62  ;;  %v121_v51 = vsel %vm102_vm1, %v118_v16, %v120_v43  ;;  %v562_v16 = vrot.slane %v12166_v0, 4  ;;  %v840_v62 = vld [vmem:[%s20261_s1 + $0x118] sm:$0xff]  ;;  %v837_v14 = vld [vmem:[%s20261_s1 + $0x100] sm:$0xff]  ;;  %vm684_vm6 = vcmask 785408   ;;  %vm3414_vm7 = vcmask 1041409  }
  0x12   :  { %1011 = vmatprep.subr.mxu0 %v822_v4  ;;  %v839_v4 = vld [vmem:[%s20261_s1 + $0x110] sm:$0xff]  ;;  %vm3416_vm8 = vcmask 1042434   ;;  %vm3418_vm9 = vcmask 1043459   ;;  %vm3420_vm10 = vcmask 1044484   ;;  %vm3422_vm11 = vcmask 1045509  }
  0x13   :  { %12025 = vrot.lane.b32.xlu1 %v12024_v55, %s12094_s29  ;;  %1012 = vmatpush1.msra.mxu0 %v821_v9  ;;  %v838_v9 = vld [vmem:[%s20261_s1 + $0x108] sm:$0xff]  ;;  %vm3424_vm12 = vcmask 1046534   ;;  %vm3426_vm13 = vcmask 1047559   ;;  %vm3710_vm14 = vcmask 719872   ;;  %vm3677_vm15 = vcmask 982016  }
  0x14   :  { %167 = vrot.lane.b32.xlu0 %v112_v58, %s12095_s30  ;;  %1013 = vmatprep.subr.mxu0 %v820_v10  ;;  %v563_v58 = vrot.slane %v12171_v1, 4  ;;  %v274_v10 = vsel %vm255_vm2, %v271_v29, %v273_v59 }
  0x15   :  { %1014 = vmatpush1.msra.mxu0 %v819_v12 }
  0x16   :  { %1015 = vmatprep.subr.mxu0 %v818_v17  ;;  %v564_v63 = vsel %vm561_vm3, %v562_v16, %v563_v58 }
  0x17   :  { %318 = vrot.lane.b32.xlu1 %v261_v27, %s12096_s28  ;;  %1016 = vmatpush1.msra.mxu0 %v817_v20  ;;  %v813_v27 = vld [vmem:[%s20261_s1 + $0x40] sm:$0xff]  ;;  %v12477_v20 = vld [vmem:[%s20260_s0 + $0x70] sm:$0xff] }
  0x18   :  { %169 = vrot.lane.b32.xlu0 %v114_v5, %s12095_s30  ;;  %1017 = vmatprep.subr.mxu0 %v816_v21  ;;  %v427_v5 = vsel %vm408_vm0, %v424_v39, %v426_v52  ;;  %v12462_v39 = vld [vmem:[%s20260_s0 + $0x68] sm:$0xff] }
  0x19   :  { %1018 = vmatpush1.msra.mxu0 %v815_v22  ;;  %11519 = vmatprep.mubr.msk.f32.mxu0 %vm618_vm4, %v564_v63  ;;  %v127_v22 = vrot.slane %v12477_v20, 1  ;;  %v12551_v63 = vld [vmem:[%s20260_s0 + $0xc0] sm:$0xff] }
  0x1a   :  { %1019 = vmatprep.subr.mxu0 %v814_v25 }
  0x1b   :  { %322 = vrot.lane.b32.xlu1 %v267_v13, %s12096_s28  ;;  %1020 = vmatpush1.msra.mxu0 %v813_v27  ;;  %v12457_v13 = vld [vmem:[%s20260_s0 + $0x60] sm:$0xff] }
  0x1c   :  { %320 = vrot.lane.b32.xlu0 %v265_v18, %s12096_s28  ;;  %1021 = vmatprep.subr.mxu0 %v812_v28  ;;  %v124_v17 = vrot.slane %v12457_v13, 1  ;;  %v125_v18 = vrot.slane %v12462_v39, 1  ;;  %v277_v26 = vrot.slane %v12457_v13, 2  ;;  %v430_v28 = vrot.slane %v12457_v13, 3 }
  0x1d   :  { %1022 = vmatpush1.msra.mxu0 %v811_v30  ;;  %v431_v30 = vrot.slane %v12462_v39, 3 }
  0x1e   :  { %1023 = vmatprep.subr.mxu0 %v810_v35  ;;  %v126_v21 = vsel %vm102_vm1, %v124_v17, %v125_v18  ;;  %v128_v25 = vsel %vm102_vm1, %v125_v18, %v127_v22  ;;  %v145_v17 = vrot.slane %v12551_v63, 1 }
  0x1f   :  { %473 = vrot.lane.b32.xlu1 %v418_v23, %s12094_s29  ;;  %1024 = vmatpush1.msra.mxu0 %v809_v38  ;;  %v278_v23 = vrot.slane %v12462_v39, 2  ;;  %v432_v35 = vsel %vm408_vm0, %v430_v28, %v431_v30  ;;  %v12588_v28 = vld [vmem:[%s20260_s0 + $0xa8] sm:$0xff] }
  0x20   :  { %471 = vrot.lane.b32.xlu0 %v414_v32, %s12094_s29  ;;  %v12381_v32 = vld [vmem:[%s20260_s0 + $0x58] sm:$0xff]  ;;  %1025 = vmatprep.subr.mxu0 %v808_v41 }
  0x21   :  { %v122_v46 = vrot.slane %v12381_v32, 1  ;;  %1026 = vmatpush1.msra.mxu0 %v807_v44  ;;  %v428_v56 = vrot.slane %v12381_v32, 3  ;;  %v275_v60 = vrot.slane %v12381_v32, 2 }
  0x22   :  { %1027 = vmatprep.subr.mxu0 %v806_v47  ;;  %v12524_v47 = vld [vmem:[%s20260_s0 + $0x90] sm:$0xff] }
  0x23   :  { %171 = vrot.lane.b32.xlu1 %v116_v31, %s12095_s30  ;;  %v123_v55 = vsel %vm102_vm1, %v120_v43, %v122_v46  ;;  %1028 = vmatpush1.msra.mxu0 %v805_v49  ;;  %v429_v6 = vsel %vm408_vm0, %v426_v52, %v428_v56  ;;  %v276_v12 = vsel %vm255_vm2, %v273_v59, %v275_v60 }
  0x24   :  { %475 = vrot.lane.b32.xlu0 %v420_v36, %s12094_s29  ;;  %1053 = vmatprep.subr.mxu0 %v844_v50  ;;  %v12029_v3 = vpack.i.bf16 %v123_v55, %v121_v51  ;;  %v12039_v29 = vpack.i.bf16 %v429_v6, %v427_v5  ;;  %v12034_v15 = vpack.i.bf16 %v276_v12, %v274_v10  ;;  %v134_v51 = vrot.slane %v12524_v47, 1 }
  0x25   :  { %1054 = vmatpush2.msra.mxu0 %v843_v54  ;;  %v279_v31 = vsel %vm255_vm2, %v277_v26, %v278_v23  ;;  %v298_v12 = vrot.slane %v12551_v63, 2 }
  0x26   :  { %1055 = vmatprep.subr.mxu0 %v842_v57 }
  0x27   :  { %477 = vrot.lane.b32.xlu1 %v422_v45, %s12094_s29  ;;  %1056 = vmatpush2.msra.mxu0 %v841_v61  ;;  %v12514_v45 = vld [vmem:[%s20260_s0 + $0x80] sm:$0xff]  ;;  %v287_v61 = vrot.slane %v12524_v47, 2 }
  0x28   :  { %324 = vrot.lane.b32.xlu0 %v269_v48, %s12096_s28  ;;  %1057 = vmatprep.subr.mxu0 %v840_v62  ;;  %v131_v49 = vrot.slane %v12514_v45, 1  ;;  %v437_v54 = vrot.slane %v12514_v45, 3  ;;  %v284_v59 = vrot.slane %v12514_v45, 2  ;;  %v12546_v62 = vld [vmem:[%s20260_s0 + $0x98] sm:$0xff] }
  0x29   :  { %1058 = vmatpush2.msra.mxu0 %v839_v4  ;;  %v289_v10 = vrot.slane %v12546_v62, 2 }
  0x2a   :  { %1059 = vmatprep.subr.mxu0 %v838_v9 }
  0x2b   :  { %326 = vrot.lane.b32.xlu1 %v268_v37, %s12096_s28  ;;  %1060 = vmatpush2.msra.mxu0 %v837_v14  ;;  %v433_v37 = vrot.slane %v12477_v20, 3 }
  0x2c   :  { %173 = vrot.lane.b32.xlu0 %v115_v24, %s12095_s30  ;;  %v280_v24 = vrot.slane %v12477_v20, 2 }
  0x2d   :  { %v434_v43 = vsel %vm408_vm0, %v431_v30, %v433_v37 }
  0x2e   :  { %v281_v27 = vsel %vm255_vm2, %v278_v23, %v280_v24  ;;  %v290_v23 = vsel %vm255_vm2, %v287_v61, %v289_v10 }
  0x2f   :  { %12030 = vrot.lane.b32.xlu1 %v12029_v3, %s12095_s30  ;;  %v12556_v3 = vld [vmem:[%s20260_s0 + $0xc8] sm:$0xff] }
  0x30   :  { %479 = vrot.lane.b32.xlu0 %v421_v33, %s12094_s29  ;;  %v12498_v33 = vld [vmem:[%s20260_s0 + $0x78] sm:$0xff]  ;;  %v299_v14 = vrot.slane %v12556_v3, 2  ;;  %v146_v18 = vrot.slane %v12556_v3, 1 }
  0x31   :  { %v129_v36 = vrot.slane %v12498_v33, 1  ;;  %v435_v41 = vrot.slane %v12498_v33, 3  ;;  %v282_v44 = vrot.slane %v12498_v33, 2 }
  0x32   :  { %v147_v26 = vsel %vm102_vm1, %v145_v17, %v146_v18  ;;  %v12644_v17 = vld [vmem:[%s20260_s0 + $0xd0] sm:$0xff] }
  0x33   :  { %12040 = vrot.lane.b32.xlu1 %v12039_v29, %s12094_s29  ;;  %v130_v38 = vsel %vm102_vm1, %v127_v22, %v129_v36  ;;  %v436_v48 = vsel %vm408_vm0, %v433_v37, %v435_v41  ;;  %v283_v52 = vsel %vm255_vm2, %v280_v24, %v282_v44  ;;  %v300_v24 = vsel %vm255_vm2, %v298_v12, %v299_v14  ;;  %v12597_v37 = vld [vmem:[%s20260_s0 + $0xb0] sm:$0xff] }
  0x34   :  { %12035 = vrot.lane.b32.xlu0 %v12034_v15, %s12096_s28  ;;  %v136_v15 = vrot.slane %v12546_v62, 1  ;;  %v12064_v30 = vpack.i.bf16 %v300_v24, %v290_v23 }
  0x37   :  { %183 = vrot.lane.b32.xlu1 %v126_v21, %s12095_s30 }
  0x38   :  { %181 = vrot.lane.b32.xlu0 %v122_v46, %s12095_s30  ;;  %v12519_v46 = vld [vmem:[%s20260_s0 + $0x88] sm:$0xff] }
  0x39   :  { %v132_v50 = vrot.slane %v12519_v46, 1  ;;  %v438_v55 = vrot.slane %v12519_v46, 3 }
  0x3b   :  { %334 = vrot.lane.b32.xlu1 %v275_v60, %s12096_s28  ;;  %v133_v57 = vsel %vm102_vm1, %v131_v49, %v132_v50  ;;  %v135_v16 = vsel %vm102_vm1, %v132_v50, %v134_v51  ;;  %v285_v60 = vrot.slane %v12519_v46, 2  ;;  %v439_v5 = vsel %vm408_vm0, %v437_v54, %v438_v55 }
  0x3c   :  { %185 = vrot.lane.b32.xlu0 %v128_v25, %s12095_s30  ;;  %v12044_v4 = vpack.i.bf16 %v135_v16, %v133_v57  ;;  %v137_v25 = vsel %vm102_vm1, %v134_v51, %v136_v15  ;;  %v294_v57 = vrot.slane %v12597_v37, 2  ;;  %v445_v16 = vrot.slane %v12588_v28, 3 }
  0x3d   :  { %v286_v9 = vsel %vm255_vm2, %v284_v59, %v285_v60  ;;  %v288_v29 = vsel %vm255_vm2, %v285_v60, %v287_v61  ;;  %v447_v59 = vrot.slane %v12597_v37, 3 }
  0x3e   :  { %v12049_v22 = vpack.i.bf16 %v288_v29, %v286_v9 }
  0x3f   :  { %338 = vrot.lane.b32.xlu1 %v281_v27, %s12096_s28  ;;  %v12583_v27 = vld [vmem:[%s20260_s0 + $0xa0] sm:$0xff] }
  0x40   :  { %336 = vrot.lane.b32.xlu0 %v279_v31, %s12096_s28  ;;  %v12059_v31 = vpack.i.bf16 %v147_v26, %v137_v25  ;;  %v291_v54 = vrot.slane %v12583_v27, 2  ;;  %v444_v61 = vrot.slane %v12583_v27, 3  ;;  %v148_v25 = vrot.slane %v12644_v17, 1 }
  0x42   :  { %v446_v9 = vsel %vm408_vm0, %v444_v61, %v445_v16 }
  0x43   :  { %489 = vrot.lane.b32.xlu1 %v432_v35, %s12094_s29  ;;  %v138_v35 = vrot.slane %v12583_v27, 1 }
  0x44   :  { %487 = vrot.lane.b32.xlu0 %v428_v56, %s12094_s29  ;;  %v440_v56 = vrot.slane %v12524_v47, 3 }
  0x46   :  { %v441_v6 = vsel %vm408_vm0, %v438_v55, %v440_v56  ;;  %v292_v55 = vrot.slane %v12588_v28, 2 }
  0x47   :  { %187 = vrot.lane.b32.xlu1 %v130_v38, %s12095_s30  ;;  %v12054_v21 = vpack.i.bf16 %v441_v6, %v439_v5  ;;  %v442_v38 = vrot.slane %v12546_v62, 3  ;;  %v448_v5 = vsel %vm408_vm0, %v445_v16, %v447_v59 }
  0x48   :  { %491 = vrot.lane.b32.xlu0 %v434_v43, %s12094_s29  ;;  %v452_v43 = vrot.slane %v12556_v3, 3  ;;  %v295_v60 = vsel %vm255_vm2, %v292_v55, %v294_v57 }
  0x49   :  { %v443_v49 = vsel %vm408_vm0, %v440_v56, %v442_v38  ;;  %v293_v56 = vsel %vm255_vm2, %v291_v54, %v292_v55 }
  0x4b   :  { %493 = vrot.lane.b32.xlu1 %v436_v48, %s12094_s29  ;;  %v141_v48 = vrot.slane %v12597_v37, 1 }
  0x4c   :  { %340 = vrot.lane.b32.xlu0 %v283_v52, %s12096_s28 }
  0x4f   :  { %342 = vrot.lane.b32.xlu1 %v282_v44, %s12096_s28 }
  0x50   :  { %189 = vrot.lane.b32.xlu0 %v129_v36, %s12095_s30  ;;  %v139_v36 = vrot.slane %v12588_v28, 1 }
  0x52   :  { %v140_v44 = vsel %vm102_vm1, %v138_v35, %v139_v36  ;;  %v142_v51 = vsel %vm102_vm1, %v139_v36, %v141_v48  ;;  %v149_v36 = vsel %vm102_vm1, %v146_v18, %v148_v25  ;;  %v12682_v18 = vld [vmem:[%s20260_s0 + $0xf0] sm:$0xff] }
  0x53   :  { %12045 = vrot.lane.b32.xlu1 %v12044_v4, %s12095_s30  ;;  %v12628_v4 = vld [vmem:[%s20260_s0 + $0xb8] sm:$0xff] }
  0x54   :  { %495 = vrot.lane.b32.xlu0 %v435_v41, %s12094_s29  ;;  %v451_v41 = vrot.slane %v12551_v63, 3  ;;  %v296_v6 = vrot.slane %v12628_v4, 2 }
  0x56   :  { %v453_v50 = vsel %vm408_vm0, %v451_v41, %v452_v43  ;;  %v297_v12 = vsel %vm255_vm2, %v294_v57, %v296_v6  ;;  %v454_v41 = vrot.slane %v12644_v17, 3  ;;  %v565_v57 = vrot.slane %v12176_v2, 4 }
  0x57   :  { %12055 = vrot.lane.b32.xlu1 %v12054_v21, %s12094_s29  ;;  %v12069_v52 = vpack.i.bf16 %v453_v50, %v443_v49  ;;  %v12649_v21 = vld [vmem:[%s20260_s0 + $0xd8] sm:$0xff] }
  0x58   :  { %12050 = vrot.lane.b32.xlu0 %v12049_v22, %s12096_s28  ;;  %v301_v22 = vrot.slane %v12644_v17, 2  ;;  %v303_v23 = vrot.slane %v12649_v21, 2  ;;  %v150_v26 = vrot.slane %v12649_v21, 1  ;;  %v455_v55 = vsel %vm408_vm0, %v452_v43, %v454_v41 }
  0x5b   :  { %12065 = vrot.lane.b32.xlu1 %v12064_v30, %s12096_s28  ;;  %v302_v30 = vsel %vm255_vm2, %v299_v14, %v301_v22  ;;  %v12676_v14 = vld [vmem:[%s20260_s0 + $0xe8] sm:$0xff] }
  0x5c   :  { %12060 = vrot.lane.b32.xlu0 %v12059_v31, %s12095_s30  ;;  %v304_v31 = vsel %vm255_vm2, %v301_v22, %v303_v23 }
  0x5d   :  { %v12079_v49 = vpack.i.bf16 %v304_v31, %v302_v30  ;;  %v570_v30 = vrot.slane %v12246_v42, 4 }
  0x5f   :  { %199 = vrot.lane.b32.xlu1 %v140_v44, %s12095_s30  ;;  %v456_v44 = vrot.slane %v12649_v21, 3 }
  0x60   :  { %197 = vrot.lane.b32.xlu0 %v136_v15, %s12095_s30  ;;  %v449_v15 = vrot.slane %v12628_v4, 3 }
  0x62   :  { %v450_v24 = vsel %vm408_vm0, %v447_v59, %v449_v15 }
  0x63   :  { %201 = vrot.lane.b32.xlu1 %v142_v51, %s12095_s30 }
  0x64   :  { %12070 = vrot.lane.b32.xlu0 %v12069_v52, %s12094_s29  ;;  %v12687_v52 = vld [vmem:[%s20260_s0 + $0xe0] sm:$0xff] }
  0x65   :  { %v152_v43 = vrot.slane %v12687_v52, 1 }
  0x67   :  { %352 = vrot.lane.b32.xlu1 %v293_v56, %s12096_s28  ;;  %v457_v56 = vsel %vm408_vm0, %v454_v41, %v456_v44 }
  0x68   :  { %350 = vrot.lane.b32.xlu0 %v289_v10, %s12096_s28  ;;  %v143_v10 = vrot.slane %v12628_v4, 1 }
  0x6a   :  { %v144_v29 = vsel %vm102_vm1, %v141_v48, %v143_v10 }
  0x6b   :  { %503 = vrot.lane.b32.xlu1 %v442_v38, %s12094_s29  ;;  %v151_v38 = vsel %vm102_vm1, %v148_v25, %v150_v26  ;;  %v569_v25 = vrot.slane %v12238_v40, 4 }
  0x6c   :  { %354 = vrot.lane.b32.xlu0 %v295_v60, %s12096_s28  ;;  %v12074_v51 = vpack.i.bf16 %v151_v38, %v149_v36  ;;  %v153_v60 = vrot.slane %v12676_v14, 1 }
  0x6f   :  { %507 = vrot.lane.b32.xlu1 %v448_v5, %s12094_s29 }
  0x70   :  { %505 = vrot.lane.b32.xlu0 %v446_v9, %s12094_s29 }
  0x73   :  { %356 = vrot.lane.b32.xlu1 %v297_v12, %s12096_s28  ;;  %v12084_v12 = vpack.i.bf16 %v457_v56, %v455_v55  ;;  %v154_v55 = vsel %vm102_vm1, %v152_v43, %v153_v60 }
  0x74   :  { %203 = vrot.lane.b32.xlu0 %v144_v29, %s12095_s30  ;;  %v567_v29 = vrot.slane %v12185_v7, 4 }
  0x77   :  { %205 = vrot.lane.b32.xlu1 %v143_v10, %s12095_s30 }
  0x78   :  { %509 = vrot.lane.b32.xlu0 %v450_v24, %s12094_s29  ;;  %v566_v24 = vsel %vm561_vm3, %v563_v58, %v565_v57 }
  0x79   :  { %v12011_v35 = vpop.permute.xlu1 %12010 }
  0x7a   :  { %v12001_v48 = vpop.permute.xlu0 %12000  ;;  %v12012_v9 = vunpack.i.l.bf16 %v12011_v35 }
  0x7b   :  { %511 = vrot.lane.b32.xlu1 %v449_v15, %s12094_s29  ;;  %v12002_v50 = vunpack.i.l.bf16 %v12001_v48  ;;  %v12003_v16 = vunpack.i.h.bf16 %v12001_v48  ;;  %v12013_v48 = vunpack.i.h.bf16 %v12011_v35  ;;  %v12735_v35 = vsel %vm561_vm3, %v569_v25, %v570_v30 }
  0x7c   :  { %358 = vrot.lane.b32.xlu0 %v296_v6, %s12096_s28  ;;  %v155_v6 = vrot.slane %v12682_v18, 1  ;;  %v11488_v43 = vcombine.low %v567_v29, %v12735_v35  ;;  %v458_v25 = vrot.slane %v12687_v52, 3 }
  0x7d   :  { %v12689_v54 = vpop.permute.xlu1 %12015  ;;  %v619_v10 = vsel %vm618_vm4, %v12166_v0, %v12002_v50  ;;  %v620_v38 = vsel %vm618_vm4, %v12171_v1, %v12003_v16  ;;  %v305_v50 = vrot.slane %v12687_v52, 2  ;;  %v306_v1 = vrot.slane %v12676_v14, 2 }
  0x7e   :  { %v12006_v59 = vpop.permute.xlu0 %12005  ;;  %v12017_v31 = vunpack.i.l.bf16 %v12689_v54 }
  0x7f   :  { %v12008_v61 = vunpack.i.h.bf16 %v12006_v59  ;;  %v12007_v5 = vunpack.i.l.bf16 %v12006_v59  ;;  %12080 = vrot.lane.b32.xlu1 %v12079_v49, %s12096_s28  ;;  %v156_v49 = vsel %vm102_vm1, %v153_v60, %v155_v6 }
  0x80   :  { %12075 = vrot.lane.b32.xlu0 %v12074_v51, %s12095_s30 }
  0x81   :  { %v166_v15 = vpop.permute.xlu1 %165  ;;  %v652_v22 = vsel %vm651_vm5, %v619_v10, %v12007_v5  ;;  %v653_v58 = vsel %vm651_vm5, %v620_v38, %v12008_v61  ;;  %v621_v61 = vsel %vm618_vm4, %v12176_v2, %v12017_v31  ;;  %v307_v5 = vsel %vm255_vm2, %v305_v50, %v306_v1  ;;  %v12761_v31 = vld [vmem:[%s20260_s0 + $0xf8] sm:$0xff] }
  0x82   :  { %v12713_v36 = vpop.permute.xlu0 %12020  ;;  %v685_v0 = vsel %vm684_vm6, %v652_v22, %v12012_v9  ;;  %v686_v59 = vsel %vm684_vm6, %v653_v58, %v12013_v48  ;;  %v308_v10 = vrot.slane %v12682_v18, 2  ;;  %v459_v2 = vrot.slane %v12676_v14, 3 }
  0x83   :  { %v12022_v41 = vunpack.i.l.bf16 %v12713_v36  ;;  %1062 = vmatmul.mubr.f32.vlgmr.msra.gmra.mxu0 %v685_v0  ;;  %213 = vrot.lane.b32.xlu1 %v150_v26, %s12095_s30  ;;  %v568_v26 = vsel %vm561_vm3, %v565_v57, %v567_v29  ;;  %v461_v22 = vrot.slane %v12682_v18, 3  ;;  %v310_v58 = vrot.slane %v12761_v31, 2 }
  0x84   :  { %12085 = vrot.lane.b32.xlu0 %v12084_v12, %s12094_s29  ;;  %11520 = vmatprep.mubr.msk.f32.mxu0 %vm618_vm4, %v566_v24  ;;  %v309_v29 = vsel %vm255_vm2, %v306_v1, %v308_v10  ;;  %v622_v48 = vsel %vm618_vm4, %v12185_v7, %v166_v15  ;;  %v460_v1 = vsel %vm408_vm0, %v458_v25, %v459_v2 }
  0x85   :  { %v12728_v51 = vpop.permute.xlu1 %12025  ;;  %v654_v60 = vsel %vm651_vm5, %v621_v61, %v12022_v41  ;;  %v462_v38 = vsel %vm408_vm0, %v459_v2, %v461_v22  ;;  %v572_v41 = vrot.slane %v12276_v53, 4  ;;  %v311_v7 = vsel %vm255_vm2, %v308_v10, %v310_v58 }
  0x86   :  { %v12027_v56 = vunpack.i.l.bf16 %v12728_v51  ;;  %v168_v16 = vpop.permute.xlu0 %167  ;;  %vm12102_vm2 = vmmov 0  }
  0x87   :  { %1068 = vmatmul.mubr.f32.gmra.mxu0 %v686_v59  ;;  %217 = vrot.lane.b32.xlu1 %v156_v49, %s12095_s30  ;;  %v573_v61 = vsel %vm561_vm3, %v570_v30, %v572_v41 }
  0x88   :  { %215 = vrot.lane.b32.xlu0 %v154_v55, %s12095_s30  ;;  %11521 = vmatprep.mubr.msk.f32.mxu0 %vm618_vm4, %v568_v26  ;;  %v687_v57 = vsel %vm684_vm6, %v654_v60, %v12027_v56 }
  0x89   :  { %v319_v9 = vpop.permute.xlu1 %318 }
  0x8a   :  { %v170_v12 = vpop.permute.xlu0 %169 }
  0x8b   :  { %1074 = vmatmul.mubr.f32.gmra.mxu0 %v687_v57  ;;  %368 = vrot.lane.b32.xlu1 %v307_v5, %s12096_s28  ;;  %v624_v15 = vsel %vm618_vm4, %v12246_v42, %v170_v12  ;;  %v463_v57 = vrot.slane %v12761_v31, 3 }
  0x8c   :  { %366 = vrot.lane.b32.xlu0 %v303_v23, %s12096_s28  ;;  %11522 = vmatprep.mubr.msk.f32.mxu0 %vm618_vm4, %v11488_v43  ;;  %v623_v23 = vsel %vm618_vm4, %v12238_v40, %v168_v16  ;;  %v655_v40 = vsel %vm651_vm5, %v622_v48, %v319_v9  ;;  %v574_v9 = vrot.slane %v12334_v19, 4 }
  0x8d   :  { %v323_v24 = vpop.permute.xlu1 %322 }
  0x8e   :  { %v321_v0 = vpop.permute.xlu0 %320  ;;  %v657_v5 = vsel %vm651_vm5, %v624_v15, %v323_v24  ;;  %v12018_v15 = vunpack.i.h.bf16 %v12689_v54 }
  0x8f   :  { %519 = vrot.lane.b32.xlu1 %v456_v44, %s12094_s29  ;;  %v656_v49 = vsel %vm651_vm5, %v623_v23, %v321_v0  ;;  %v157_v44 = vrot.slane %v12761_v31, 1 }
  0x90   :  { %370 = vrot.lane.b32.xlu0 %v309_v29, %s12096_s28  ;;  %v575_v29 = vsel %vm561_vm3, %v572_v41, %v574_v9  ;;  %v627_v54 = vsel %vm618_vm4, %v12190_v8, %v12018_v15 }
  0x91   :  { %v474_v50 = vpop.permute.xlu1 %473  ;;  %v158_v60 = vsel %vm102_vm1, %v155_v6, %v157_v44  ;;  %v464_v6 = vsel %vm408_vm0, %v461_v22, %v463_v57  ;;  %vm10223_vm0 = vcmask 130048   ;;  %vm10206_vm1 = vcmask 916480  }
  0x92   :  { %v689_v55 = vsel %vm684_vm6, %v656_v49, %v474_v50  ;;  %v472_v26 = vpop.permute.xlu0 %471 }
  0x93   :  { %v688_v56 = vsel %vm684_vm6, %v655_v40, %v472_v26  ;;  %523 = vrot.lane.b32.xlu1 %v462_v38, %s12094_s29  ;;  %v757_v42 = vcombine.high %v689_v55, %v12735_v35  ;;  %v576_v26 = vrot.slane %v12190_v8, 4 }
  0x94   :  { %v11487_v16 = vcombine.low %v688_v56, %v689_v55  ;;  %521 = vrot.lane.b32.xlu0 %v460_v1, %s12094_s29  ;;  %v577_v56 = vrot.slane %v12197_v11, 4 }
  0x95   :  { %v172_v59 = vpop.permute.xlu1 %171 }
  0x96   :  { %v476_v43 = vpop.permute.xlu0 %475  ;;  %1080 = vmatmul.mubr.f32.gmra.mxu0 %v11487_v16  ;;  %v625_v2 = vsel %vm618_vm4, %v12276_v53, %v172_v59 }
  0x97   :  { %v690_v10 = vsel %vm684_vm6, %v657_v5, %v476_v43  ;;  %372 = vrot.lane.b32.xlu1 %v311_v7, %s12096_s28  ;;  %v579_v5 = vrot.slane %v12371_v34, 4  ;;  %v12028_v43 = vunpack.i.h.bf16 %v12728_v51  ;;  %v583_v51 = vrot.slane %v12457_v13, 4 }
  0x98   :  { %v758_v12 = vcombine.low %v690_v10, %v573_v61  ;;  %219 = vrot.lane.b32.xlu0 %v158_v60, %s12095_s30  ;;  %v11489_v23 = vcombine.low %v757_v42, %v690_v10  ;;  %v759_v53 = vcombine.high %v690_v10, %v573_v61 }
  0x99   :  { %v478_v30 = vpop.permute.xlu1 %477 }
  0x9a   :  { %v11490_v24 = vcombine.high %v12735_v35, %v758_v12  ;;  %v325_v25 = vpop.permute.xlu0 %324 }
  0x9b   :  { %v658_v0 = vsel %vm651_vm5, %v625_v2, %v325_v25  ;;  %221 = vrot.lane.b32.xlu1 %v157_v44, %s12095_s30  ;;  %v584_v2 = vrot.slane %v12462_v39, 4 }
  0x9c   :  { %v691_v38 = vsel %vm684_vm6, %v658_v0, %v478_v30  ;;  %525 = vrot.lane.b32.xlu0 %v464_v6, %s12094_s29  ;;  %11523 = vmatprep.mubr.msk.f32.mxu0 %vm618_vm4, %v11490_v24  ;;  %v580_v6 = vsel %vm561_vm3, %v577_v56, %v579_v5 }
  0x9d   :  { %v760_v22 = vcombine.low %v691_v38, %v575_v29  ;;  %1086 = vmatmul.mubr.f32.gmra.mxu0 %v11489_v23  ;;  %v327_v48 = vpop.permute.xlu1 %326  ;;  %v11491_v50 = vcombine.low %v759_v53, %v691_v38  ;;  %v761_v16 = vcombine.high %v691_v38, %v575_v29  ;;  %v585_v53 = vsel %vm561_vm3, %v583_v51, %v584_v2 }
  0x9e   :  { %v174_v49 = vpop.permute.xlu0 %173 }
  0x9f   :  { %v626_v35 = vsel %vm618_vm4, %v12334_v19, %v174_v49  ;;  %527 = vrot.lane.b32.xlu1 %v463_v57, %s12094_s29  ;;  %v11492_v41 = vcombine.high %v573_v61, %v760_v22  ;;  %v12023_v61 = vunpack.i.h.bf16 %v12713_v36  ;;  %v578_v57 = vsel %vm561_vm3, %v576_v26, %v577_v56 }
  0xa0   :  { %374 = vrot.lane.b32.xlu0 %v310_v58, %s12096_s28  ;;  %v659_v44 = vsel %vm651_vm5, %v626_v35, %v327_v48  ;;  %v581_v36 = vrot.slane %v12381_v32, 4 }
  0xa1   :  { %11524 = vmatprep.mubr.msk.f32.mxu0 %vm618_vm4, %v11492_v41  ;;  %v12031_v1 = vpop.permute.xlu1 %12030  ;;  %v660_v30 = vsel %vm651_vm5, %v627_v54, %v12023_v61 }
  0xa2   :  { %v480_v40 = vpop.permute.xlu0 %479  ;;  %1092 = vmatmul.mubr.f32.gmra.mxu0 %v11491_v50  ;;  %v12032_v10 = vunpack.i.l.bf16 %v12031_v1  ;;  %v12033_v24 = vunpack.i.h.bf16 %v12031_v1  ;;  %v693_v25 = vsel %vm684_vm6, %v660_v30, %v12028_v43  ;;  %v582_v48 = vsel %vm561_vm3, %v579_v5, %v581_v36 }
  0xa3   :  { %v692_v55 = vsel %vm684_vm6, %v659_v44, %v480_v40  ;;  %v11496_v44 = vcombine.low %v581_v36, %v585_v53  ;;  %v588_v5 = vrot.slane %v12498_v33, 4 }
  0xa4   :  { %v762_v19 = vcombine.low %v692_v55, %v574_v9  ;;  %v11493_v60 = vcombine.low %v761_v16, %v692_v55  ;;  %v628_v0 = vsel %vm618_vm4, %v12197_v11, %v12032_v10  ;;  %v629_v41 = vsel %vm618_vm4, %v12371_v34, %v12033_v24 }
  0xa5   :  { %v12041_v7 = vpop.permute.xlu1 %12040 }
  0xa6   :  { %v11494_v58 = vcombine.high %v575_v29, %v762_v19  ;;  %v12036_v59 = vpop.permute.xlu0 %12035  ;;  %v12042_v29 = vunpack.i.l.bf16 %v12041_v7  ;;  %v12043_v49 = vunpack.i.h.bf16 %v12041_v7  ;;  %v586_v19 = vrot.slane %v12477_v20, 4 }
  0xa7   :  { %v12037_v12 = vunpack.i.l.bf16 %v12036_v59  ;;  %v12038_v23 = vunpack.i.h.bf16 %v12036_v59 }
  0xa8   :  { %11525 = vmatprep.mubr.msk.f32.mxu0 %vm618_vm4, %v11494_v58  ;;  %v587_v61 = vsel %vm561_vm3, %v584_v2, %v586_v19 }
  0xa9   :  { %1098 = vmatmul.mubr.f32.gmra.mxu0 %v11493_v60  ;;  %v184_v9 = vpop.permute.xlu1 %183  ;;  %v661_v38 = vsel %vm651_vm5, %v628_v0, %v12037_v12  ;;  %v662_v50 = vsel %vm651_vm5, %v629_v41, %v12038_v23 }
  0xaa   :  { %v182_v42 = vpop.permute.xlu0 %181  ;;  %11526 = vmatprep.mubr.msk.f32.mxu0 %vm618_vm4, %v578_v57  ;;  %v694_v35 = vsel %vm684_vm6, %v661_v38, %v12042_v29  ;;  %v631_v40 = vsel %vm618_vm4, %v12457_v13, %v184_v9  ;;  %v695_v55 = vsel %vm684_vm6, %v662_v50, %v12043_v49  ;;  %v591_v49 = vrot.slane %v12519_v46, 4 }
  0xab   :  { %v630_v26 = vsel %vm618_vm4, %v12381_v32, %v182_v42 }
  0xad   :  { %1104 = vmatmul.mubr.f32.gmra.mxu0 %v693_v25  ;;  %v335_v8 = vpop.permute.xlu1 %334 }
  0xae   :  { %v186_v22 = vpop.permute.xlu0 %185  ;;  %11527 = vmatprep.mubr.msk.f32.mxu0 %vm618_vm4, %v580_v6  ;;  %v663_v16 = vsel %vm651_vm5, %v630_v26, %v335_v8  ;;  %v593_v26 = vrot.slane %v12524_v47, 4 }
  0xaf   :  { %v632_v59 = vsel %vm618_vm4, %v12462_v39, %v186_v22  ;;  %v589_v39 = vsel %vm561_vm3, %v586_v19, %v588_v5 }
  0xb1   :  { %1110 = vmatmul.mubr.f32.gmra.mxu0 %v694_v35  ;;  %v339_v11 = vpop.permute.xlu1 %338 }
  0xb2   :  { %v337_v1 = vpop.permute.xlu0 %336  ;;  %11528 = vmatprep.mubr.msk.f32.mxu0 %vm618_vm4, %v582_v48  ;;  %v665_v60 = vsel %vm651_vm5, %v632_v59, %v339_v11  ;;  %v595_v59 = vrot.slane %v12546_v62, 4 }
  0xb3   :  { %v664_v56 = vsel %vm651_vm5, %v631_v40, %v337_v1 }
  0xb5   :  { %1116 = vmatmul.mubr.f32.gmra.mxu0 %v695_v55  ;;  %v490_v34 = vpop.permute.xlu1 %489 }
  0xb6   :  { %v697_v7 = vsel %vm684_vm6, %v664_v56, %v490_v34  ;;  %v488_v15 = vpop.permute.xlu0 %487  ;;  %11529 = vmatprep.mubr.msk.f32.mxu0 %vm618_vm4, %v11496_v44 }
  0xb7   :  { %v696_v13 = vsel %vm684_vm6, %v663_v16, %v488_v15  ;;  %v771_v12 = vcombine.high %v697_v7, %v585_v53 }
  0xb8   :  { %v11495_v58 = vcombine.low %v696_v13, %v697_v7 }
  0xb9   :  { %v188_v32 = vpop.permute.xlu1 %187 }
  0xba   :  { %v492_v57 = vpop.permute.xlu0 %491  ;;  %1122 = vmatmul.mubr.f32.gmra.mxu0 %v11495_v58  ;;  %v633_v42 = vsel %vm618_vm4, %v12477_v20, %v188_v32  ;;  %v594_v58 = vsel %vm561_vm3, %v591_v49, %v593_v26  ;;  %v598_v32 = vrot.slane %v12588_v28, 4 }
  0xbb   :  { %v698_v43 = vsel %vm684_vm6, %v665_v60, %v492_v57  ;;  %v597_v57 = vrot.slane %v12583_v27, 4 }
  0xbc   :  { %v772_v10 = vcombine.low %v698_v43, %v587_v61  ;;  %v11497_v6 = vcombine.low %v771_v12, %v698_v43  ;;  %v773_v29 = vcombine.high %v698_v43, %v587_v61 }
  0xbd   :  { %v494_v9 = vpop.permute.xlu1 %493 }
  0xbe   :  { %v11498_v54 = vcombine.high %v585_v53, %v772_v10  ;;  %v341_v36 = vpop.permute.xlu0 %340  ;;  %v590_v53 = vrot.slane %v12514_v45, 4 }
  0xbf   :  { %v666_v30 = vsel %vm651_vm5, %v633_v42, %v341_v36 }
  0xc0   :  { %v699_v51 = vsel %vm684_vm6, %v666_v30, %v494_v9  ;;  %11530 = vmatprep.mubr.msk.f32.mxu0 %vm618_vm4, %v11498_v54  ;;  %v592_v55 = vsel %vm561_vm3, %v590_v53, %v591_v49  ;;  %v596_v9 = vsel %vm561_vm3, %v593_v26, %v595_v59 }
  0xc1   :  { %v774_v2 = vcombine.low %v699_v51, %v589_v39  ;;  %1128 = vmatmul.mubr.f32.gmra.mxu0 %v11497_v6  ;;  %v343_v24 = vpop.permute.xlu1 %342  ;;  %v11499_v23 = vcombine.low %v773_v29, %v699_v51  ;;  %v775_v11 = vcombine.high %v699_v51, %v589_v39 }
  0xc2   :  { %v190_v25 = vpop.permute.xlu0 %189 }
  0xc3   :  { %v634_v0 = vsel %vm618_vm4, %v12498_v33, %v190_v25  ;;  %v11500_v20 = vcombine.high %v587_v61, %v774_v2 }
  0xc4   :  { %v667_v38 = vsel %vm651_vm5, %v634_v0, %v343_v24  ;;  %v600_v0 = vrot.slane %v12597_v37, 4 }
  0xc5   :  { %11531 = vmatprep.mubr.msk.f32.mxu0 %vm618_vm4, %v11500_v20  ;;  %v12046_v8 = vpop.permute.xlu1 %12045 }
  0xc6   :  { %v496_v22 = vpop.permute.xlu0 %495  ;;  %1134 = vmatmul.mubr.f32.gmra.mxu0 %v11499_v23  ;;  %v12047_v35 = vunpack.i.l.bf16 %v12046_v8  ;;  %v12048_v56 = vunpack.i.h.bf16 %v12046_v8  ;;  %v601_v8 = vsel %vm561_vm3, %v598_v32, %v600_v0 }
  0xc7   :  { %v700_v48 = vsel %vm684_vm6, %v667_v38, %v496_v22 }
  0xc8   :  { %v776_v41 = vcombine.low %v700_v48, %v588_v5  ;;  %v11501_v44 = vcombine.low %v775_v11, %v700_v48  ;;  %v635_v19 = vsel %vm618_vm4, %v12514_v45, %v12047_v35  ;;  %v636_v45 = vsel %vm618_vm4, %v12519_v46, %v12048_v56 }
  0xc9   :  { %v12056_v50 = vpop.permute.xlu1 %12055 }
  0xca   :  { %v11502_v33 = vcombine.high %v589_v39, %v776_v41  ;;  %v12051_v1 = vpop.permute.xlu0 %12050  ;;  %v12057_v34 = vunpack.i.l.bf16 %v12056_v50  ;;  %v12058_v61 = vunpack.i.h.bf16 %v12056_v50  ;;  %v599_v39 = vsel %vm561_vm3, %v597_v57, %v598_v32 }
  0xcb   :  { %v12052_v40 = vunpack.i.l.bf16 %v12051_v1  ;;  %v12053_v16 = vunpack.i.h.bf16 %v12051_v1  ;;  %v11504_v51 = vcombine.low %v595_v59, %v599_v39 }
  0xcc   :  { %11532 = vmatprep.mubr.msk.f32.mxu0 %vm618_vm4, %v11502_v33 }
  0xcd   :  { %1140 = vmatmul.mubr.f32.gmra.mxu0 %v11501_v44  ;;  %v12878_v7 = vpop.permute.xlu1 %12065  ;;  %v668_v15 = vsel %vm651_vm5, %v635_v19, %v12052_v40  ;;  %v669_v10 = vsel %vm651_vm5, %v636_v45, %v12053_v16 }
  0xce   :  { %v12881_v13 = vpop.permute.xlu0 %12060  ;;  %11533 = vmatprep.mubr.msk.f32.mxu0 %vm618_vm4, %v592_v55  ;;  %v701_v60 = vsel %vm684_vm6, %v668_v15, %v12057_v34  ;;  %v12067_v42 = vunpack.i.l.bf16 %v12878_v7  ;;  %v702_v54 = vsel %vm684_vm6, %v669_v10, %v12058_v61  ;;  %v604_v10 = vrot.slane %v12551_v63, 4 }
  0xcf   :  { %v12062_v5 = vunpack.i.l.bf16 %v12881_v13 }
  0xd1   :  { %1146 = vmatmul.mubr.f32.gmra.mxu0 %v701_v60  ;;  %v200_v43 = vpop.permute.xlu1 %199  ;;  %v637_v36 = vsel %vm618_vm4, %v12524_v47, %v12062_v5 }
  0xd2   :  { %v198_v12 = vpop.permute.xlu0 %197  ;;  %11534 = vmatprep.mubr.msk.f32.mxu0 %vm618_vm4, %v594_v58  ;;  %v670_v2 = vsel %vm651_vm5, %v637_v36, %v12067_v42  ;;  %v639_v38 = vsel %vm618_vm4, %v12583_v27, %v200_v43  ;;  %v607_v36 = vrot.slane %v12644_v17, 4 }
  0xd3   :  { %v638_v22 = vsel %vm618_vm4, %v12546_v62, %v198_v12  ;;  %v602_v62 = vrot.slane %v12628_v4, 4  ;;  %v605_v12 = vrot.slane %v12556_v3, 4 }
  0xd5   :  { %1152 = vmatmul.mubr.f32.gmra.mxu0 %v702_v54  ;;  %v202_v46 = vpop.permute.xlu1 %201  ;;  %v603_v19 = vsel %vm561_vm3, %v600_v0, %v602_v62 }
  0xd6   :  { %v12900_v30 = vpop.permute.xlu0 %12070  ;;  %11535 = vmatprep.mubr.msk.f32.mxu0 %vm618_vm4, %v596_v9  ;;  %v640_v23 = vsel %vm618_vm4, %v12588_v28, %v202_v46  ;;  %v12063_v9 = vunpack.i.h.bf16 %v12881_v13 }
  0xd7   :  { %v12072_v6 = vunpack.i.l.bf16 %v12900_v30 }
  0xd8   :  { %v643_v13 = vsel %vm618_vm4, %v12551_v63, %v12063_v9 }
  0xd9   :  { %v353_v24 = vpop.permute.xlu1 %352  ;;  %v703_v29 = vsel %vm684_vm6, %v670_v2, %v12072_v6  ;;  %v12068_v6 = vunpack.i.h.bf16 %v12878_v7  ;;  %v606_v2 = vsel %vm561_vm3, %v604_v10, %v605_v12  ;;  %v609_v7 = vrot.slane %v12649_v21, 4 }
  0xda   :  { %v351_v25 = vpop.permute.xlu0 %350  ;;  %1158 = vmatmul.mubr.f32.gmra.mxu0 %v703_v29  ;;  %v672_v49 = vsel %vm651_vm5, %v639_v38, %v353_v24  ;;  %v12073_v24 = vunpack.i.h.bf16 %v12900_v30  ;;  %v612_v30 = vrot.slane %v12676_v14, 4 }
  0xdb   :  { %11536 = vmatprep.mubr.msk.f32.mxu0 %vm618_vm4, %v11504_v51  ;;  %v671_v35 = vsel %vm651_vm5, %v638_v22, %v351_v25 }
  0xdd   :  { %v504_v20 = vpop.permute.xlu1 %503 }
  0xde   :  { %v355_v47 = vpop.permute.xlu0 %354  ;;  %v704_v28 = vsel %vm684_vm6, %v671_v35, %v504_v20  ;;  %v608_v20 = vsel %vm561_vm3, %v605_v12, %v607_v36 }
  0xdf   :  { %v673_v48 = vsel %vm651_vm5, %v640_v23, %v355_v47  ;;  %v676_v23 = vsel %vm651_vm5, %v643_v13, %v12068_v6 }
  0xe0   :  { %v709_v63 = vsel %vm684_vm6, %v676_v23, %v12073_v24  ;;  %v847_v23 = vlaneseq }
  0xe1   :  { %v508_v53 = vpop.permute.xlu1 %507 }
  0xe2   :  { %v706_v41 = vsel %vm684_vm6, %v673_v48, %v508_v53  ;;  %v506_v11 = vpop.permute.xlu0 %505 }
  0xe3   :  { %v786_v50 = vcombine.low %v706_v41, %v601_v8  ;;  %v705_v33 = vsel %vm684_vm6, %v672_v49, %v506_v11  ;;  %v787_v32 = vcombine.high %v706_v41, %v601_v8  ;;  %v610_v11 = vsel %vm561_vm3, %v607_v36, %v609_v7 }
  0xe4   :  { %v785_v1 = vcombine.high %v705_v33, %v599_v39  ;;  %v11503_v27 = vcombine.low %v704_v28, %v705_v33 }
  0xe5   :  { %v11506_v44 = vcombine.high %v599_v39, %v786_v50  ;;  %v357_v40 = vpop.permute.xlu1 %356 }
  0xe6   :  { %v204_v55 = vpop.permute.xlu0 %203  ;;  %1164 = vmatmul.mubr.f32.gmra.mxu0 %v11503_v27  ;;  %v11505_v56 = vcombine.low %v785_v1, %v706_v41 }
  0xe7   :  { %v641_v26 = vsel %vm618_vm4, %v12597_v37, %v204_v55  ;;  %11537 = vmatprep.mubr.msk.f32.mxu0 %vm618_vm4, %v11506_v44 }
  0xe8   :  { %v674_v16 = vsel %vm651_vm5, %v641_v26, %v357_v40 }
  0xe9   :  { %v206_v34 = vpop.permute.xlu1 %205 }
  0xea   :  { %v510_v15 = vpop.permute.xlu0 %509  ;;  %1170 = vmatmul.mubr.f32.gmra.mxu0 %v11505_v56  ;;  %v642_v60 = vsel %vm618_vm4, %v12628_v4, %v206_v34 }
  0xeb   :  { %v707_v58 = vsel %vm684_vm6, %v674_v16, %v510_v15 }
  0xec   :  { %v788_v59 = vcombine.low %v707_v58, %v603_v19  ;;  %v11507_v5 = vcombine.low %v787_v32, %v707_v58  ;;  %v789_v39 = vcombine.high %v707_v58, %v603_v19 }
  0xed   :  { %v512_v61 = vpop.permute.xlu1 %511 }
  0xee   :  { %v11508_v45 = vcombine.high %v601_v8, %v788_v59  ;;  %v359_v37 = vpop.permute.xlu0 %358  ;;  %v611_v8 = vrot.slane %v12687_v52, 4 }
  0xef   :  { %v675_v57 = vsel %vm651_vm5, %v642_v60, %v359_v37 }
  0xf0   :  { %v708_v43 = vsel %vm684_vm6, %v675_v57, %v512_v61  ;;  %11538 = vmatprep.mubr.msk.f32.mxu0 %vm618_vm4, %v11508_v45  ;;  %v613_v28 = vsel %vm561_vm3, %v611_v8, %v612_v30  ;;  %v845_v8 = vld [vmem:[%s20262_s2] sm:$0x3]  ;;  %s12098_s2 = smov 120  }
  0xf1   :  { %v790_v42 = vcombine.low %v708_v43, %v602_v62  ;;  %1176 = vmatmul.mubr.f32.gmra.mxu0 %v11507_v5  ;;  %v12081_v54 = vpop.permute.xlu1 %12080  ;;  %v11509_v51 = vcombine.low %v789_v39, %v708_v43  ;;  %v614_v62 = vrot.slane %v12682_v18, 4 }
  0xf2   :  { %v12076_v4 = vpop.permute.xlu0 %12075  ;;  %v12082_v47 = vunpack.i.l.bf16 %v12081_v54  ;;  %v12083_v35 = vunpack.i.h.bf16 %v12081_v54 }
  0xf3   :  { %v11510_v46 = vcombine.high %v603_v19, %v790_v42  ;;  %v12077_v29 = vunpack.i.l.bf16 %v12076_v4  ;;  %v12078_v38 = vunpack.i.h.bf16 %v12076_v4 }
  0xf5   :  { %11539 = vmatprep.mubr.msk.f32.mxu0 %vm618_vm4, %v11510_v46  ;;  %v214_v25 = vpop.permute.xlu1 %213  ;;  %v644_v53 = vsel %vm618_vm4, %v12556_v3, %v12077_v29  ;;  %v645_v27 = vsel %vm618_vm4, %v12644_v17, %v12078_v38  ;;  %v11512_v3 = vcombine.low %v609_v7, %v613_v28  ;;  %v615_v17 = vsel %vm561_vm3, %v612_v30, %v614_v62 }
  0xf6   :  { %v12086_v0 = vpop.permute.xlu0 %12085  ;;  %1182 = vmatmul.mubr.f32.gmra.mxu0 %v11509_v51  ;;  %v677_v41 = vsel %vm651_vm5, %v644_v53, %v12082_v47  ;;  %v678_v40 = vsel %vm651_vm5, %v645_v27, %v12083_v35  ;;  %v646_v19 = vsel %vm618_vm4, %v12649_v21, %v214_v25  ;;  %v12990_v30 = vshrl.u32 %v847_v23, 7 }
  0xf7   :  { %11540 = vmatprep.mubr.msk.f32.mxu0 %vm618_vm4, %v606_v2  ;;  %v12087_v22 = vunpack.i.l.bf16 %v12086_v0  ;;  %v12088_v50 = vunpack.i.h.bf16 %v12086_v0 }
  0xf8   :  { %20748 = vst [vmem:[#allocation2_spill] sm:$0xff] %v12990_v30  ;;  %v20272_v38 = vsub.s32 1, %v12990_v30 }
  0xf9   :  { %v218_v48 = vpop.permute.xlu1 %217  ;;  %v710_v1 = vsel %vm684_vm6, %v677_v41, %v12087_v22  ;;  %v711_v26 = vsel %vm684_vm6, %v678_v40, %v12088_v50 }
  0xfa   :  { %v216_v49 = vpop.permute.xlu0 %215  ;;  %1188 = vmatmul.mubr.f32.gmra.mxu0 %v709_v63  ;;  %v648_v34 = vsel %vm618_vm4, %v12676_v14, %v218_v48  ;;  %v12097_v48 = vmov 1983009808   ;;  %v13004_v53 = vrot.slane %v845_v8, %v20272_v38 }
  0xfb   :  { %11541 = vmatprep.mubr.msk.f32.mxu0 %vm618_vm4, %v608_v20  ;;  %v647_v16 = vsel %vm618_vm4, %v12687_v52, %v216_v49  ;;  %v616_v52 = vrot.slane %v12761_v31, 4  ;;  %v1345_v63 = vunpack.c.l.s4 %v12097_v48 }
  0xfd   :  { %v369_v33 = vpop.permute.xlu1 %368  ;;  %v617_v42 = vsel %vm561_vm3, %v614_v62, %v616_v52  ;;  %v1346_v41 = vunpack.c.0.s8 %v1345_v63 }
  0xfe   :  { %v367_v44 = vpop.permute.xlu0 %366  ;;  %1194 = vmatmul.mubr.f32.gmra.mxu0 %v710_v1  ;;  %v680_v59 = vsel %vm651_vm5, %v647_v16, %v369_v33 }
  0xff   :  { %11542 = vmatprep.mubr.msk.f32.mxu0 %vm618_vm4, %v610_v11  ;;  %v679_v32 = vsel %vm651_vm5, %v646_v19, %v367_v44  ;;  %v13009_v27 = vsub.s32 %v1346_v41, %v12990_v30 }
 0x101   :  { %v520_v55 = vpop.permute.xlu1 %519  ;;  %20750 = vst [vmem:[#allocation4_spill] sm:$0xff] %v13009_v27 }
 0x102   :  { %v371_v56 = vpop.permute.xlu0 %370  ;;  %1200 = vmatmul.mubr.f32.gmra.mxu0 %v711_v26  ;;  %v712_v14 = vsel %vm684_vm6, %v679_v32, %v520_v55 }
 0x103   :  { %11543 = vmatprep.mubr.msk.f32.mxu0 %vm618_vm4, %v11512_v3  ;;  %v681_v15 = vsel %vm651_vm5, %v648_v34, %v371_v56 }
 0x105   :  { %v524_v58 = vpop.permute.xlu1 %523 }
 0x106   :  { %v714_v61 = vsel %vm684_vm6, %v681_v15, %v524_v58  ;;  %v522_v60 = vpop.permute.xlu0 %521 }
 0x107   :  { %v800_v45 = vcombine.low %v714_v61, %v615_v17  ;;  %v713_v37 = vsel %vm684_vm6, %v680_v59, %v522_v60  ;;  %v801_v6 = vcombine.high %v714_v61, %v615_v17 }
 0x108   :  { %v799_v57 = vcombine.high %v713_v37, %v613_v28  ;;  %v11511_v21 = vcombine.low %v712_v14, %v713_v37 }
 0x109   :  { %v11514_v5 = vcombine.high %v613_v28, %v800_v45  ;;  %v373_v43 = vpop.permute.xlu1 %372 }
 0x10a   :  { %v220_v10 = vpop.permute.xlu0 %219  ;;  %1206 = vmatmul.mubr.f32.gmra.mxu0 %v11511_v21  ;;  %v11513_v9 = vcombine.low %v799_v57, %v714_v61  ;;  %v13020_v21 = vsub.s32 2, %v12990_v30 }
 0x10b   :  { %v649_v12 = vsel %vm618_vm4, %v12682_v18, %v220_v10  ;;  %11544 = vmatprep.mubr.msk.f32.mxu0 %vm618_vm4, %v11514_v5 }
 0x10c   :  { %v682_v39 = vsel %vm651_vm5, %v649_v12, %v373_v43  ;;  %20751 = vst [vmem:[#allocation5_spill] sm:$0xff] %v13020_v21 }
 0x10d   :  { %v222_v54 = vpop.permute.xlu1 %221 }
 0x10e   :  { %v526_v4 = vpop.permute.xlu0 %525  ;;  %1212 = vmatmul.mubr.f32.gmra.mxu0 %v11513_v9  ;;  %v650_v24 = vsel %vm618_vm4, %v12761_v31, %v222_v54  ;;  %v12993_v31 = vsub.s32 0, %v12990_v30 }
 0x10f   :  { %v715_v46 = vsel %vm684_vm6, %v682_v39, %v526_v4 }
 0x110   :  { %v802_v36 = vcombine.low %v715_v46, %v617_v42  ;;  %v11515_v25 = vcombine.low %v801_v6, %v715_v46  ;;  %v803_v20 = vcombine.high %v715_v46, %v617_v42  ;;  %20749 = vst [vmem:[#allocation3_spill] sm:$0xff] %v12993_v31  ;;  %v13000_v22 = vrot.slane %v845_v8, %v12993_v31 }
 0x111   :  { %v528_v51 = vpop.permute.xlu1 %527 }
 0x112   :  { %v11516_v2 = vcombine.high %v615_v17, %v802_v36  ;;  %v375_v18 = vpop.permute.xlu0 %374 }
 0x113   :  { %v683_v29 = vsel %vm651_vm5, %v650_v24, %v375_v18 }
 0x114   :  { %v716_v13 = vsel %vm684_vm6, %v683_v29, %v528_v51  ;;  %11545 = vmatprep.mubr.msk.f32.mxu0 %vm618_vm4, %v11516_v2 }
 0x115   :  { %v804_v0 = vcombine.low %v716_v13, %v616_v52  ;;  %1218 = vmatmul.mubr.f32.gmra.mxu0 %v11515_v25  ;;  %v11517_v47 = vcombine.low %v803_v20, %v716_v13 }
 0x117   :  { %v11518_v7 = vcombine.high %v617_v42, %v804_v0 }
 0x119   :  { %11546 = vmatprep.mubr.msk.f32.mxu0 %vm618_vm4, %v11518_v7 }
 0x11a   :  { %1224 = vmatmul.mubr.f32.gmra.mxu0 %v11517_v47 }
 0x143   :  { %v1063_v49 = vpop.f32.mrf.mxu0 }
 0x144   :  { %v1064_v35 = vadd.f32 %v1063_v49, %v13000_v22 }
 0x145   :  { %v1065_v11 = vpop.f32.mrf.mxu0 }
 0x146   :  { %v1066_v28 = vadd.f32 %v1065_v11, %v13004_v53  ;;  %v1230_v33 = vmax.f32 %v1064_v35, 0.0 }
 0x147   :  { %v1069_v50 = vpop.f32.mrf.mxu0 }
 0x148   :  { %v1231_v1 = vmax.f32 %v1066_v28, 0.0  ;;  %v1070_v44 = vadd.f32 %v1069_v50, %v13000_v22 }
 0x149   :  { %v1071_v3 = vpop.f32.mrf.mxu0 }
 0x14a   :  { %v1342_v40 = vcombine.low %v1230_v33, %v1231_v1  ;;  %v1343_v62 = vcombine.high %v1230_v33, %v1231_v1  ;;  %v1072_v55 = vadd.f32 %v1071_v3, %v13004_v53  ;;  %v1232_v19 = vmax.f32 %v1070_v44, 0.0 }
 0x14b   :  { %v1075_v26 = vpop.f32.mrf.mxu0 }
 0x14c   :  { %v1350_v56 = vrot.slane %v1342_v40, %v13009_v27  ;;  %v1357_v34 = vrot.slane %v1343_v62, %v13009_v27  ;;  %v1233_v17 = vmax.f32 %v1072_v55, 0.0  ;;  %v1076_v32 = vadd.f32 %v1075_v26, %v13000_v22 }
 0x14d   :  { %v1077_v16 = vpop.f32.mrf.mxu0 }
 0x14e   :  { %v1358_v15 = vcombine.high %v1350_v56, %v1350_v56  ;;  %v1359_v58 = vcombine.high %v1357_v34, %v1357_v34  ;;  %v11547_v59 = vrot.slane %v1350_v56, 9  ;;  %v11549_v61 = vrot.slane %v1357_v34, 9 }
 0x14f   :  { %v1360_v60 = vcombine.low %v1232_v19, %v1233_v17  ;;  %v1361_v14 = vcombine.high %v1232_v19, %v1233_v17  ;;  %v1078_v45 = vadd.f32 %v1077_v16, %v13004_v53  ;;  %v1234_v39 = vmax.f32 %v1076_v32, 0.0 }
 0x150   :  { %v11548_v37 = vrot.slane %v1358_v15, 9  ;;  %v13017_v57 = vmax.f32 %v1350_v56, %v11547_v59  ;;  %v11550_v10 = vrot.slane %v1359_v58, 9  ;;  %v13026_v9 = vmax.f32 %v1357_v34, %v11549_v61 }
 0x151   :  { %v1368_v5 = vrot.slane %v1360_v60, %v13009_v27  ;;  %v1375_v43 = vrot.slane %v1361_v14, %v13009_v27  ;;  %v1235_v52 = vmax.f32 %v1078_v45, 0.0 }
 0x152   :  { %v13024_v12 = vmax.f32 %v1358_v15, %v11548_v37  ;;  %v2525_v4 = vrot.slane %v13017_v57, %v13020_v21  ;;  %v13032_v29 = vmax.f32 %v1359_v58, %v11550_v10  ;;  %v2541_v20 = vrot.slane %v13026_v9, %v13020_v21 }
 0x153   :  { %v1376_v42 = vcombine.high %v1368_v5, %v1368_v5  ;;  %v1377_v54 = vcombine.high %v1375_v43, %v1375_v43  ;;  %v11551_v36 = vrot.slane %v1368_v5, 9  ;;  %v11553_v6 = vrot.slane %v1375_v43, 9 }
 0x154   :  { %v2533_v46 = vrot.slane %v13024_v12, %v13020_v21  ;;  %v1378_v24 = vcombine.low %v1234_v39, %v1235_v52  ;;  %v1379_v18 = vcombine.high %v1234_v39, %v1235_v52  ;;  %v2549_v1 = vrot.slane %v13032_v29, %v13020_v21 }
 0x155   :  { %v11552_v51 = vrot.slane %v1376_v42, 9  ;;  %v11554_v2 = vrot.slane %v1377_v54, 9  ;;  %v13034_v25 = vmax.f32 %v1368_v5, %v11551_v36  ;;  %v13043_v8 = vmax.f32 %v1375_v43, %v11553_v6 }
 0x156   :  { %v1081_v13 = vpop.f32.mrf.mxu0  ;;  %v3428_v0 = vsel %vm3414_vm7, %v2533_v46, %v2525_v4  ;;  %v1386_v47 = vrot.slane %v1378_v24, %v13009_v27  ;;  %v1393_v23 = vrot.slane %v1379_v18, %v13009_v27  ;;  %v2521_v3 = vrot.slane %v13017_v57, %v12993_v31 }
 0x157   :  { %v13039_v7 = vmax.f32 %v1376_v42, %v11552_v51  ;;  %v1082_v48 = vadd.f32 %v1081_v13, %v13000_v22  ;;  %v13046_v49 = vmax.f32 %v1377_v54, %v11554_v2  ;;  %v3429_v28 = vsel %vm3416_vm8, %v2541_v20, %v3428_v0 }
 0x158   :  { %v1083_v63 = vpop.f32.mrf.mxu0  ;;  %v1394_v35 = vcombine.high %v1386_v47, %v1386_v47  ;;  %v1395_v41 = vcombine.high %v1393_v23, %v1393_v23  ;;  %v11555_v11 = vrot.slane %v1386_v47, 9  ;;  %v11557_v50 = vrot.slane %v1393_v23, 9 }
 0x159   :  { %v1084_v33 = vadd.f32 %v1083_v63, %v13004_v53  ;;  %v2557_v44 = vrot.slane %v13034_v25, %v13020_v21  ;;  %v2529_v40 = vrot.slane %v13024_v12, %v12993_v31  ;;  %v2537_v62 = vrot.slane %v13026_v9, %v12993_v31 }
 0x15a   :  { %v2565_v55 = vrot.slane %v13039_v7, %v13020_v21  ;;  %v11556_v26 = vrot.slane %v1394_v35, 9  ;;  %v1236_v56 = vmax.f32 %v1082_v48, 0.0  ;;  %v3430_v17 = vsel %vm3418_vm9, %v2549_v1, %v3429_v28 }
 0x15b   :  { %v1237_v34 = vmax.f32 %v1084_v33, 0.0  ;;  %v11558_v19 = vrot.slane %v1395_v41, 9  ;;  %v13063_v16 = vmax.f32 %v1386_v47, %v11555_v11  ;;  %v2573_v58 = vrot.slane %v13043_v8, %v13020_v21 }
 0x15c   :  { %v2581_v59 = vrot.slane %v13046_v49, %v13020_v21  ;;  %v13069_v32 = vmax.f32 %v1393_v23, %v11557_v50  ;;  %v3431_v14 = vsel %vm3420_vm10, %v2557_v44, %v3430_v17  ;;  %v2545_v5 = vrot.slane %v13032_v29, %v12993_v31 }
 0x15d   :  { %v1087_v15 = vpop.f32.mrf.mxu0  ;;  %v1396_v61 = vcombine.low %v1236_v56, %v1237_v34  ;;  %v1397_v60 = vcombine.high %v1236_v56, %v1237_v34  ;;  %v3432_v37 = vsel %vm3422_vm11, %v2565_v55, %v3431_v14  ;;  %v2553_v43 = vrot.slane %v13034_v25, %v12993_v31 }
 0x15e   :  { %v1088_v45 = vadd.f32 %v1087_v15, %v13000_v22  ;;  %v13078_v10 = vmax.f32 %v1394_v35, %v11556_v26  ;;  %v3433_v39 = vsel %vm3424_vm12, %v2573_v58, %v3432_v37  ;;  %v13083_v4 = vmax.f32 %v1395_v41, %v11558_v19 }
 0x15f   :  { %v1089_v52 = vpop.f32.mrf.mxu0  ;;  %v1404_v42 = vrot.slane %v1396_v61, %v13009_v27  ;;  %v1411_v54 = vrot.slane %v1397_v60, %v13009_v27  ;;  %v3434_v46 = vsel %vm3426_vm13, %v2581_v59, %v3433_v39  ;;  %v3415_v36 = vsel %vm3414_vm7, %v2529_v40, %v2521_v3 }
 0x160   :  { %20752 = vst [vmem:[#allocation6_spill] sm:$0xff] %v13083_v4  ;;  %v1090_v6 = vadd.f32 %v1089_v52, %v13004_v53  ;;  %v2585_v51 = vrot.slane %v13063_v16, %v12993_v31  ;;  %v2589_v2 = vrot.slane %v13063_v16, %v13020_v21  ;;  %3615 = vrot.lane.b32.xlu1 %v3434_v46, %s12098_s2  ;;  %v1238_v0 = vmax.f32 %v1088_v45, 0.0 }
 0x161   :  { %v1413_v24 = vcombine.high %v1411_v54, %v1411_v54  ;;  %v11561_v18 = vrot.slane %v1411_v54, 9  ;;  %v2561_v20 = vrot.slane %v13039_v7, %v12993_v31  ;;  %v3417_v47 = vsel %vm3416_vm8, %v2537_v62, %v3415_v36 }
 0x162   :  { %v1093_v13 = vpop.f32.mrf.mxu0  ;;  %v1239_v23 = vmax.f32 %v1090_v6, 0.0  ;;  %v1412_v48 = vcombine.high %v1404_v42, %v1404_v42  ;;  %v2569_v35 = vrot.slane %v13043_v8, %v12993_v31  ;;  %v2577_v41 = vrot.slane %v13046_v49, %v12993_v31 }
 0x163   :  { %v11562_v63 = vrot.slane %v1413_v24, 9  ;;  %v3419_v28 = vsel %vm3418_vm9, %v2545_v5, %v3417_v47  ;;  %v2597_v1 = vrot.slane %v13078_v10, %v13020_v21  ;;  %v11559_v44 = vrot.slane %v1404_v42, 9 }
 0x164   :  { %v1095_v11 = vpop.f32.mrf.mxu0  ;;  %v1414_v50 = vcombine.low %v1238_v0, %v1239_v23  ;;  %v1415_v33 = vcombine.high %v1238_v0, %v1239_v23  ;;  %v13103_v3 = vmax.f32 %v1411_v54, %v11561_v18  ;;  %v3421_v40 = vsel %vm3420_vm10, %v2553_v43, %v3419_v28 }
 0x165   :  { %v1094_v62 = vadd.f32 %v1093_v13, %v13000_v22  ;;  %v3423_v55 = vsel %vm3422_vm11, %v2561_v20, %v3421_v40  ;;  %v1096_v34 = vadd.f32 %v1095_v11, %v13004_v53  ;;  %v11560_v17 = vrot.slane %v1412_v48, 9 }
 0x166   :  { %v1422_v26 = vrot.slane %v1414_v50, %v13009_v27  ;;  %v1429_v56 = vrot.slane %v1415_v33, %v13009_v27  ;;  %v13111_v19 = vmax.f32 %v1413_v24, %v11562_v63  ;;  %v3425_v15 = vsel %vm3424_vm12, %v2569_v35, %v3423_v55 }
 0x167   :  { %v2605_v58 = vrot.slane %v13069_v32, %v13020_v21  ;;  %v3427_v59 = vsel %vm3426_vm13, %v2577_v41, %v3425_v15  ;;  %v13117_v37 = vmax.f32 %v1404_v42, %v11559_v44  ;;  %v1240_v43 = vmax.f32 %v1094_v62, 0.0 }
 0x168   :  { %v1430_v61 = vcombine.high %v1422_v26, %v1422_v26  ;;  %v1431_v60 = vcombine.high %v1429_v56, %v1429_v56  ;;  %v11563_v14 = vrot.slane %v1422_v26, 9  ;;  %3613 = vrot.lane.b32.xlu0 %v3427_v59, %s12098_s2  ;;  %v11565_v5 = vrot.slane %v1429_v56, 9 }
 0x169   :  { %v1099_v45 = vpop.f32.mrf.mxu0  ;;  %v1241_v52 = vmax.f32 %v1096_v34, 0.0  ;;  %v13125_v42 = vmax.f32 %v1412_v48, %v11560_v17  ;;  %v2613_v23 = vrot.slane %v13083_v4, %v13020_v21  ;;  %v2621_v48 = vrot.slane %v13117_v37, %v13020_v21 }
 0x16a   :  { %v11564_v46 = vrot.slane %v1430_v61, 9  ;;  %v1100_v36 = vadd.f32 %v1099_v45, %v13000_v22  ;;  %v11566_v24 = vrot.slane %v1431_v60, 9  ;;  %v13131_v47 = vmax.f32 %v1422_v26, %v11563_v14 }
 0x16b   :  { %v1101_v6 = vpop.f32.mrf.mxu0  ;;  %v1432_v18 = vcombine.low %v1240_v43, %v1241_v52  ;;  %v1433_v13 = vcombine.high %v1240_v43, %v1241_v52  ;;  %v13135_v35 = vmax.f32 %v1429_v56, %v11565_v5  ;;  %v3440_v11 = vsel %vm3414_vm7, %v2597_v1, %v2589_v2 }
 0x16c   :  { %20753 = vst [vmem:[#allocation7_spill] sm:$0xff] %v13131_v47  ;;  %v13141_v28 = vmax.f32 %v1430_v61, %v11564_v46  ;;  %v1242_v50 = vmax.f32 %v1100_v36, 0.0  ;;  %v3441_v33 = vsel %vm3416_vm8, %v2605_v58, %v3440_v11  ;;  %v2593_v44 = vrot.slane %v13078_v10, %v12993_v31 }
 0x16d   :  { %v1105_v63 = vpop.f32.mrf.mxu0  ;;  %20754 = vst [vmem:[#allocation8_spill] sm:$0xff] %v13135_v35  ;;  %v1447_v41 = vrot.slane %v1433_v13, %v13009_v27  ;;  %v13146_v62 = vmax.f32 %v1431_v60, %v11566_v24  ;;  %v1440_v55 = vrot.slane %v1432_v18, %v13009_v27  ;;  %v2629_v56 = vrot.slane %v13125_v42, %v13020_v21 }
 0x16e   :  { %20755 = vst [vmem:[#allocation9_spill] sm:$0xff] %v13141_v28  ;;  %v2601_v34 = vrot.slane %v13069_v32, %v12993_v31  ;;  %v3435_v17 = vsel %vm3414_vm7, %v2593_v44, %v2585_v51  ;;  %v3442_v58 = vsel %vm3418_vm9, %v2613_v23, %v3441_v33  ;;  %v2609_v59 = vrot.slane %v13083_v4, %v12993_v31 }
 0x16f   :  { %v1107_v40 = vpop.f32.mrf.mxu0  ;;  %20756 = vst [vmem:[#allocation10_spill] sm:$0xff] %v13146_v62  ;;  %v1449_v26 = vcombine.high %v1447_v41, %v1447_v41  ;;  %v11569_v1 = vrot.slane %v1447_v41, 9  ;;  %v2617_v61 = vrot.slane %v13117_v37, %v12993_v31  ;;  %v2625_v60 = vrot.slane %v13125_v42, %v12993_v31 }
 0x170   :  { %v3443_v14 = vsel %vm3420_vm10, %v2621_v48, %v3442_v58  ;;  %v3436_v45 = vsel %vm3416_vm8, %v2601_v34, %v3435_v17  ;;  %v1102_v5 = vadd.f32 %v1101_v6, %v13004_v53  ;;  %v1106_v51 = vadd.f32 %v1105_v63, %v13000_v22 }
 0x171   :  { %v1111_v15 = vpop.f32.mrf.mxu0  ;;  %v1448_v52 = vcombine.high %v1440_v55, %v1440_v55  ;;  %v11567_v46 = vrot.slane %v1440_v55, 9  ;;  %v11570_v36 = vrot.slane %v1449_v26, 9  ;;  %v3444_v24 = vsel %vm3422_vm11, %v2629_v56, %v3443_v14 }
 0x172   :  { %v13171_v18 = vmax.f32 %v1447_v41, %v11569_v1  ;;  %3619 = vrot.lane.b32.xlu1 %v3444_v24, %s12098_s2  ;;  %v3437_v13 = vsel %vm3418_vm9, %v2609_v59, %v3436_v45  ;;  %v1243_v23 = vmax.f32 %v1102_v5, 0.0  ;;  %v1108_v48 = vadd.f32 %v1107_v40, %v13004_v53 }
 0x173   :  { %v1113_v43 = vpop.f32.mrf.mxu0  ;;  %v3438_v11 = vsel %vm3420_vm10, %v2617_v61, %v3437_v13  ;;  %v1244_v6 = vmax.f32 %v1106_v51, 0.0  ;;  %v1112_v63 = vadd.f32 %v1111_v15, %v13000_v22  ;;  %v11568_v17 = vrot.slane %v1448_v52, 9 }
 0x174   :  { %20757 = vst [vmem:[#allocation11_spill] sm:$0xff] %v13171_v18  ;;  %v1114_v33 = vadd.f32 %v1113_v43, %v13004_v53  ;;  %v3439_v44 = vsel %vm3422_vm11, %v2625_v60, %v3438_v11  ;;  %v1450_v34 = vcombine.low %v1242_v50, %v1243_v23  ;;  %v1451_v56 = vcombine.high %v1242_v50, %v1243_v23 }
 0x175   :  { %v1245_v41 = vmax.f32 %v1108_v48, 0.0  ;;  %3617 = vrot.lane.b32.xlu0 %v3439_v44, %s12098_s2  ;;  %v1246_v58 = vmax.f32 %v1112_v63, 0.0  ;;  %v1117_v59 = vpop.f32.mrf.mxu0  ;;  %v13185_v5 = vmax.f32 %v1440_v55, %v11567_v46  ;;  %v13187_v60 = vmax.f32 %v1449_v26, %v11570_v36 }
 0x176   :  { %v1247_v40 = vmax.f32 %v1114_v33, 0.0  ;;  %v1458_v61 = vrot.slane %v1450_v34, %v13009_v27  ;;  %v1465_v15 = vrot.slane %v1451_v56, %v13009_v27  ;;  %v13194_v23 = vadd.f32 %v1117_v59, %v13000_v22 }
 0x177   :  { %v1468_v14 = vcombine.low %v1244_v6, %v1245_v41  ;;  %v1469_v45 = vcombine.high %v1244_v6, %v1245_v41  ;;  %20758 = vst [vmem:[#allocation12_spill] sm:$0xff] %v13185_v5  ;;  %v1119_v33 = vpop.f32.mrf.mxu0  ;;  %v13214_v24 = vmax.f32 %v1448_v52, %v11568_v17  ;;  %v2661_v2 = vrot.slane %v13141_v28, %v13020_v21 }
 0x178   :  { %v1486_v50 = vcombine.low %v1246_v58, %v1247_v40  ;;  %v1487_v51 = vcombine.high %v1246_v58, %v1247_v40  ;;  %v1466_v13 = vcombine.high %v1458_v61, %v1458_v61  ;;  %v13202_v46 = vcombine.high %v1465_v15, %v1465_v15 }
 0x179   :  { %v1476_v48 = vrot.slane %v1468_v14, %v13009_v27  ;;  %v1483_v11 = vrot.slane %v1469_v45, %v13009_v27  ;;  %v11571_v36 = vrot.slane %v1458_v61, 9  ;;  %v11573_v63 = vrot.slane %v1465_v15, 9  ;;  %20761 = vst [vmem:[#allocation15_spill] sm:$0xff] %v13214_v24 }
 0x17a   :  { %v1494_v55 = vrot.slane %v1486_v50, %v13009_v27  ;;  %v13200_v26 = vrot.slane %v1487_v51, %v13009_v27  ;;  %v11572_v6 = vrot.slane %v1466_v13, 9  ;;  %v1248_v14 = vmax.f32 %v13194_v23, 0.0  ;;  %v1123_v54 = vpop.f32.mrf.mxu0 }
 0x17b   :  { %v1484_v44 = vcombine.high %v1476_v48, %v1476_v48  ;;  %v1485_v34 = vcombine.high %v1483_v11, %v1483_v11  ;;  %v11575_v56 = vrot.slane %v1476_v48, 9  ;;  %v11577_v41 = vrot.slane %v1483_v11, 9 }
 0x17c   :  { %v1502_v58 = vcombine.high %v1494_v55, %v1494_v55  ;;  %v13206_v40 = vcombine.high %v13200_v26, %v13200_v26  ;;  %v11579_v59 = vrot.slane %v1494_v55, 9  ;;  %v11574_v43 = vrot.slane %v13202_v46, 9 }
 0x17d   :  { %v11576_v45 = vrot.slane %v1484_v44, 9  ;;  %v11578_v50 = vrot.slane %v1485_v34, 9  ;;  %v13209_v51 = vmax.f32 %v1476_v48, %v11575_v56  ;;  %v13211_v38 = vmax.f32 %v1483_v11, %v11577_v41 }
 0x17e   :  { %v2669_v0 = vrot.slane %v13135_v35, %v13020_v21  ;;  %v13220_v1 = vmax.f32 %v1458_v61, %v11571_v36  ;;  %v13222_v23 = vmax.f32 %v1466_v13, %v11572_v6  ;;  %v13224_v20 = vmax.f32 %v1465_v15, %v11573_v63 }
 0x17f   :  { %20759 = vst [vmem:[#allocation13_spill] sm:$0xff] %v13209_v51  ;;  %20760 = vst [vmem:[#allocation14_spill] sm:$0xff] %v13211_v38  ;;  %v11580_v48 = vrot.slane %v1502_v58, 9  ;;  %v13226_v11 = vmax.f32 %v1484_v44, %v11576_v45  ;;  %v11581_v56 = vrot.slane %v13200_v26, 9  ;;  %v13230_v17 = vmax.f32 %v1494_v55, %v11579_v59 }
 0x180   :  { %20762 = vst [vmem:[#allocation16_spill] sm:$0xff] %v13220_v1  ;;  %20763 = vst [vmem:[#allocation17_spill] sm:$0xff] %v13222_v23  ;;  %v13232_v41 = vmax.f32 %v1485_v34, %v11578_v50  ;;  %v2677_v13 = vrot.slane %v13146_v62, %v13020_v21  ;;  %v2685_v36 = vrot.slane %v13185_v5, %v13020_v21  ;;  %v1125_v34 = vpop.f32.mrf.mxu0 }
 0x181   :  { %20764 = vst [vmem:[#allocation18_spill] sm:$0xff] %v13224_v20  ;;  %20765 = vst [vmem:[#allocation19_spill] sm:$0xff] %v13226_v11  ;;  %v20768_v55 = vrot.slane %v13103_v3, %v13020_v21  ;;  %v20769_v6 = vrot.slane %v13111_v19, %v13020_v21  ;;  %v2657_v44 = vrot.slane %v13141_v28, %v12993_v31 }
 0x182   :  { %20766 = vst [vmem:[#allocation20_spill] sm:$0xff] %v13230_v17  ;;  %20767 = vst [vmem:[#allocation21_spill] sm:$0xff] %v13232_v41  ;;  %v2693_v59 = vrot.slane %v13214_v24, %v13020_v21  ;;  %v20770_v45 = vrot.slane %v13131_v47, %v13020_v21  ;;  %v2665_v15 = vrot.slane %v13135_v35, %v12993_v31  ;;  %v1129_v35 = vpop.f32.mrf.mxu0 }
 0x183   :  { %v3452_v63 = vsel %vm3414_vm7, %v20769_v6, %v20768_v55  ;;  %v2673_v39 = vrot.slane %v13146_v62, %v12993_v31  ;;  %v20771_v6 = vrot.slane %v13103_v3, %v12993_v31  ;;  %v20772_v61 = vrot.slane %v13111_v19, %v12993_v31 }
 0x184   :  { %v3453_v50 = vsel %vm3416_vm8, %v20770_v45, %v3452_v63  ;;  %v1120_v30 = vadd.f32 %v1119_v33, %v13004_v53  ;;  %v1124_v63 = vadd.f32 %v1123_v54, %v13000_v22  ;;  %v2681_v4 = vrot.slane %v13185_v5, %v12993_v31 }
 0x185   :  { %v3454_v55 = vsel %vm3418_vm9, %v2661_v2, %v3453_v50  ;;  %v3445_v52 = vsel %vm3414_vm7, %v20772_v61, %v20771_v6  ;;  %v20773_v2 = vrot.slane %v13131_v47, %v12993_v31  ;;  %v1126_v62 = vadd.f32 %v1125_v34, %v13004_v53 }
 0x186   :  { %v3455_v45 = vsel %vm3420_vm10, %v2669_v0, %v3454_v55  ;;  %v2689_v61 = vrot.slane %v13214_v24, %v12993_v31  ;;  %v1249_v54 = vmax.f32 %v1120_v30, 0.0  ;;  %v1250_v6 = vmax.f32 %v1124_v63, 0.0 }
 0x187   :  { %v3446_v50 = vsel %vm3416_vm8, %v20773_v2, %v3445_v52  ;;  %v3456_v28 = vsel %vm3422_vm11, %v2677_v13, %v3455_v45  ;;  %v1251_v5 = vmax.f32 %v1126_v62, 0.0  ;;  %v2721_v24 = vrot.slane %v13222_v23, %v12993_v31 }
 0x188   :  { %v3447_v33 = vsel %vm3418_vm9, %v2657_v44, %v3446_v50  ;;  %v3457_v0 = vsel %vm3424_vm12, %v2685_v36, %v3456_v28  ;;  %v1504_v34 = vcombine.low %v1248_v14, %v1249_v54  ;;  %v1505_v2 = vcombine.high %v1248_v14, %v1249_v54 }
 0x189   :  { %v3448_v55 = vsel %vm3420_vm10, %v2665_v15, %v3447_v33  ;;  %v3458_v47 = vsel %vm3426_vm13, %v2693_v59, %v3457_v0  ;;  %v1522_v44 = vcombine.low %v1250_v6, %v1251_v5  ;;  %v1523_v28 = vcombine.high %v1250_v6, %v1251_v5  ;;  %v1131_v5 = vpop.f32.mrf.mxu0 }
 0x18a   :  { %v3449_v52 = vsel %vm3422_vm11, %v2673_v39, %v3448_v55  ;;  %3623 = vrot.lane.b32.xlu1 %v3458_v47, %s12098_s2  ;;  %v13293_v36 = vmax.f32 %v1502_v58, %v11580_v48  ;;  %v1512_v15 = vrot.slane %v1504_v34, %v13009_v27  ;;  %v1519_v59 = vrot.slane %v1505_v2, %v13009_v27 }
 0x18b   :  { %v3450_v30 = vsel %vm3424_vm12, %v2681_v4, %v3449_v52  ;;  %v1530_v39 = vrot.slane %v1522_v44, %v13009_v27  ;;  %v1537_v14 = vrot.slane %v1523_v28, %v13009_v27  ;;  %v13302_v47 = vmax.f32 %v13202_v46, %v11574_v43 }
 0x18c   :  { %20774 = vst [vmem:[#allocation22_spill] sm:$0xff] %v13293_v36  ;;  %v3451_v62 = vsel %vm3426_vm13, %v2689_v61, %v3450_v30  ;;  %v2709_v4 = vrot.slane %v13187_v60, %v13020_v21  ;;  %v1520_v58 = vcombine.high %v1512_v15, %v1512_v15  ;;  %v1521_v48 = vcombine.high %v1519_v59, %v1519_v59  ;;  %v1135_v30 = vpop.f32.mrf.mxu0 }
 0x18d   :  { %3621 = vrot.lane.b32.xlu0 %v3451_v62, %s12098_s2  ;;  %20775 = vst [vmem:[#allocation23_spill] sm:$0xff] %v13302_v47  ;;  %v11583_v63 = vrot.slane %v1512_v15, 9  ;;  %v11585_v45 = vrot.slane %v1519_v59, 9  ;;  %v13306_v50 = vcombine.high %v1530_v39, %v1530_v39  ;;  %v1539_v61 = vcombine.high %v1537_v14, %v1537_v14 }
 0x18e   :  { %v11587_v33 = vrot.slane %v1530_v39, 9  ;;  %v11589_v54 = vrot.slane %v1537_v14, 9  ;;  %v2757_v43 = vrot.slane %v13226_v11, %v13020_v21  ;;  %v13313_v46 = vmax.f32 %v13200_v26, %v11581_v56 }
 0x18f   :  { %v2717_v55 = vrot.slane %v13220_v1, %v13020_v21  ;;  %v11584_v6 = vrot.slane %v1520_v58, 9  ;;  %v11586_v52 = vrot.slane %v1521_v48, 9  ;;  %v13317_v34 = vmax.f32 %v1512_v15, %v11583_v63 }
 0x190   :  { %20776 = vst [vmem:[#allocation24_spill] sm:$0xff] %v13313_v46  ;;  %v2725_v2 = vrot.slane %v13222_v23, %v13020_v21  ;;  %v13321_v44 = vmax.f32 %v1519_v59, %v11585_v45  ;;  %v2733_v62 = vrot.slane %v13224_v20, %v13020_v21  ;;  %v2741_v26 = vrot.slane %v13302_v47, %v13020_v21 }
 0x191   :  { %20777 = vst [vmem:[#allocation25_spill] sm:$0xff] %v13317_v34  ;;  %v11590_v56 = vrot.slane %v1539_v61, 9  ;;  %v13328_v0 = vmax.f32 %v1530_v39, %v11587_v33  ;;  %v13330_v13 = vmax.f32 %v1537_v14, %v11589_v54  ;;  %v20781_v15 = vrot.slane %v13171_v18, %v13020_v21  ;;  %v1137_v54 = vpop.f32.mrf.mxu0 }
 0x192   :  { %20778 = vst [vmem:[#allocation26_spill] sm:$0xff] %v13321_v44  ;;  %v2705_v45 = vrot.slane %v13187_v60, %v12993_v31  ;;  %v2713_v28 = vrot.slane %v13220_v1, %v12993_v31  ;;  %v13343_v39 = vmax.f32 %v1520_v58, %v11584_v6  ;;  %v13345_v14 = vmax.f32 %v1521_v48, %v11586_v52 }
 0x193   :  { %20779 = vst [vmem:[#allocation27_spill] sm:$0xff] %v13328_v0  ;;  %20780 = vst [vmem:[#allocation28_spill] sm:$0xff] %v13330_v13  ;;  %v3464_v63 = vsel %vm3414_vm7, %v2709_v4, %v20781_v15  ;;  %v1130_v58 = vadd.f32 %v1129_v35, %v13000_v22  ;;  %v2729_v6 = vrot.slane %v13224_v20, %v12993_v31 }
 0x194   :  { %v3465_v59 = vsel %vm3416_vm8, %v2717_v55, %v3464_v63  ;;  %20782 = vst [vmem:[#allocation29_spill] sm:$0xff] %v13343_v39  ;;  %20783 = vst [vmem:[#allocation30_spill] sm:$0xff] %v13345_v14  ;;  %v20784_v63 = vrot.slane %v13171_v18, %v12993_v31  ;;  %v13363_v33 = vmax.f32 %v1539_v61, %v11590_v56  ;;  %v20786_v56 = vrot.slane %v13206_v40, 9 }
 0x195   :  { %v3466_v4 = vsel %vm3418_vm9, %v2725_v2, %v3465_v59  ;;  %v1132_v2 = vadd.f32 %v1131_v5, %v13004_v53  ;;  %v1141_v59 = vpop.f32.mrf.mxu0  ;;  %v1136_v35 = vadd.f32 %v1135_v30, %v13000_v22 }
 0x196   :  { %v3467_v15 = vsel %vm3420_vm10, %v2733_v62, %v3466_v4  ;;  %v3459_v23 = vsel %vm3414_vm7, %v2705_v45, %v20784_v63  ;;  %20785 = vst [vmem:[#allocation31_spill] sm:$0xff] %v13363_v33  ;;  %v2737_v62 = vrot.slane %v13302_v47, %v12993_v31 }
 0x197   :  { %v3468_v48 = vsel %vm3422_vm11, %v2741_v26, %v3467_v15  ;;  %v3460_v52 = vsel %vm3416_vm8, %v2713_v28, %v3459_v23  ;;  %v1252_v23 = vmax.f32 %v1130_v58, 0.0  ;;  %v1253_v28 = vmax.f32 %v1132_v2, 0.0 }
 0x198   :  { %3627 = vrot.lane.b32.xlu1 %v3468_v48, %s12098_s2  ;;  %v3461_v45 = vsel %vm3418_vm9, %v2721_v24, %v3460_v52  ;;  %v13379_v15 = vmax.f32 %v13206_v40, %v20786_v56  ;;  %v2781_v24 = vrot.slane %v13230_v17, %v13020_v21  ;;  %v2773_v58 = vrot.slane %v13232_v41, %v13020_v21  ;;  %v13390_v52 = vpop.f32.mrf.mxu0 }
 0x199   :  { %v3462_v4 = vsel %vm3420_vm10, %v2729_v6, %v3461_v45  ;;  %v1540_v30 = vcombine.low %v1252_v23, %v1253_v28  ;;  %v1541_v63 = vcombine.high %v1252_v23, %v1253_v28  ;;  %v20788_v48 = vrot.slane %v13209_v51, %v13020_v21 }
 0x19a   :  { %v3463_v61 = vsel %vm3422_vm11, %v2737_v62, %v3462_v4  ;;  %20787 = vst [vmem:[#allocation32_spill] sm:$0xff] %v13379_v15  ;;  %v1254_v2 = vmax.f32 %v1136_v35, 0.0  ;;  %v2789_v62 = vrot.slane %v13293_v36, %v13020_v21  ;;  %v20789_v45 = vrot.slane %v13211_v38, %v13020_v21 }
 0x19b   :  { %3625 = vrot.lane.b32.xlu0 %v3463_v61, %s12098_s2  ;;  %v3476_v6 = vsel %vm3414_vm7, %v2757_v43, %v20788_v48  ;;  %v1548_v23 = vrot.slane %v1540_v30, %v13009_v27  ;;  %v1555_v28 = vrot.slane %v1541_v63, %v13009_v27  ;;  %v2797_v43 = vrot.slane %v13313_v46, %v13020_v21 }
 0x19c   :  { %v3477_v4 = vsel %vm3416_vm8, %v20789_v45, %v3476_v6  ;;  %v2805_v35 = vrot.slane %v13379_v15, %v13020_v21  ;;  %v20790_v48 = vrot.slane %v13209_v51, %v12993_v31  ;;  %v20791_v6 = vrot.slane %v13226_v11, %v12993_v31 }
 0x19d   :  { %v3478_v61 = vsel %vm3418_vm9, %v2773_v58, %v3477_v4  ;;  %v1138_v63 = vadd.f32 %v1137_v54, %v13004_v53  ;;  %v1556_v45 = vcombine.high %v1548_v23, %v1548_v23  ;;  %v1557_v40 = vcombine.high %v1555_v28, %v1555_v28  ;;  %v1147_v4 = vpop.f32.mrf.mxu0 }
 0x19e   :  { %v3479_v56 = vsel %vm3420_vm10, %v2781_v24, %v3478_v61  ;;  %v3469_v30 = vsel %vm3414_vm7, %v20791_v6, %v20790_v48  ;;  %v11591_v26 = vrot.slane %v1548_v23, 9  ;;  %v2769_v58 = vrot.slane %v13232_v41, %v12993_v31 }
 0x19f   :  { %v3480_v5 = vsel %vm3422_vm11, %v2789_v62, %v3479_v56  ;;  %v2777_v24 = vrot.slane %v13230_v17, %v12993_v31  ;;  %v20792_v61 = vrot.slane %v13211_v38, %v12993_v31  ;;  %v1255_v48 = vmax.f32 %v1138_v63, 0.0 }
 0x1a0   :  { %v11592_v6 = vrot.slane %v1556_v45, 9  ;;  %v11593_v54 = vrot.slane %v1555_v28, 9  ;;  %v2785_v11 = vrot.slane %v13293_v36, %v12993_v31  ;;  %v13428_v51 = vadd.f32 %v1141_v59, %v13000_v22 }
 0x1a1   :  { %v3470_v55 = vsel %vm3416_vm8, %v20792_v61, %v3469_v30  ;;  %v3481_v41 = vsel %vm3424_vm12, %v2797_v43, %v3480_v5  ;;  %v1558_v56 = vcombine.low %v1254_v2, %v1255_v48  ;;  %v1559_v17 = vcombine.high %v1254_v2, %v1255_v48  ;;  %v1149_v61 = vpop.f32.mrf.mxu0 }
 0x1a2   :  { %v3471_v62 = vsel %vm3418_vm9, %v2769_v58, %v3470_v55  ;;  %v11594_v47 = vrot.slane %v1557_v40, 9  ;;  %v13434_v30 = vmax.f32 %v1548_v23, %v11591_v26  ;;  %v2793_v63 = vrot.slane %v13313_v46, %v12993_v31 }
 0x1a3   :  { %v3482_v36 = vsel %vm3426_vm13, %v2805_v35, %v3481_v41  ;;  %v3472_v59 = vsel %vm3420_vm10, %v2777_v24, %v3471_v62  ;;  %v1566_v5 = vrot.slane %v1558_v56, %v13009_v27  ;;  %v1573_v55 = vrot.slane %v1559_v17, %v13009_v27  ;;  %v1153_v62 = vpop.f32.mrf.mxu0 }
 0x1a4   :  { %20793 = vst [vmem:[#allocation33_spill] sm:$0xff] %v13434_v30  ;;  %3631 = vrot.lane.b32.xlu1 %v3482_v36, %s12098_s2  ;;  %v2801_v2 = vrot.slane %v13379_v15, %v12993_v31  ;;  %v3473_v26 = vsel %vm3422_vm11, %v2785_v11, %v3472_v59  ;;  %v20794_v23 = vrot.slane %v13306_v50, 9  ;;  %v2821_v41 = vrot.slane %v13343_v39, %v13020_v21 }
 0x1a5   :  { %v13453_v35 = vmax.f32 %v1556_v45, %v11592_v6  ;;  %v13455_v58 = vmax.f32 %v1555_v28, %v11593_v54  ;;  %v3474_v17 = vsel %vm3424_vm12, %v2793_v63, %v3473_v26  ;;  %v1256_v36 = vmax.f32 %v13428_v51, 0.0 }
 0x1a6   :  { %v13449_v43 = vmax.f32 %v13306_v50, %v20794_v23  ;;  %v13459_v24 = vmax.f32 %v1557_v40, %v11594_v47  ;;  %v3475_v48 = vsel %vm3426_vm13, %v2801_v2, %v3474_v17  ;;  %v13467_v45 = vcombine.high %v1566_v5, %v1566_v5 }
 0x1a7   :  { %20796 = vst [vmem:[#allocation35_spill] sm:$0xff] %v13453_v35  ;;  %20797 = vst [vmem:[#allocation36_spill] sm:$0xff] %v13455_v58  ;;  %3629 = vrot.lane.b32.xlu0 %v3475_v48, %s12098_s2  ;;  %v1575_v28 = vcombine.high %v1573_v55, %v1573_v55  ;;  %v2829_v6 = vrot.slane %v13321_v44, %v13020_v21  ;;  %v2845_v51 = vrot.slane %v13328_v0, %v13020_v21 }
 0x1a8   :  { %20795 = vst [vmem:[#allocation34_spill] sm:$0xff] %v13449_v43  ;;  %20798 = vst [vmem:[#allocation37_spill] sm:$0xff] %v13459_v24  ;;  %v2837_v47 = vrot.slane %v13345_v14, %v13020_v21  ;;  %v2853_v40 = vrot.slane %v13449_v43, %v13020_v21  ;;  %v20799_v54 = vrot.slane %v13317_v34, %v13020_v21  ;;  %v11595_v59 = vrot.slane %v1566_v5, 9 }
 0x1a9   :  { %v2817_v63 = vrot.slane %v13343_v39, %v12993_v31  ;;  %v11597_v2 = vrot.slane %v1573_v55, 9  ;;  %v2825_v23 = vrot.slane %v13321_v44, %v12993_v31  ;;  %v2833_v48 = vrot.slane %v13345_v14, %v12993_v31 }
 0x1aa   :  { %v3488_v56 = vsel %vm3414_vm7, %v2821_v41, %v20799_v54  ;;  %v2841_v11 = vrot.slane %v13328_v0, %v12993_v31  ;;  %v2849_v41 = vrot.slane %v13449_v43, %v12993_v31  ;;  %v1155_v54 = vpop.f32.mrf.mxu0  ;;  %v11598_v38 = vrot.slane %v1575_v28, 9 }
 0x1ab   :  { %v3489_v26 = vsel %vm3416_vm8, %v2829_v6, %v3488_v56  ;;  %v20800_v6 = vrot.slane %v13317_v34, %v12993_v31  ;;  %v1150_v43 = vadd.f32 %v1149_v61, %v13004_v53  ;;  %v1154_v0 = vadd.f32 %v1153_v62, %v13000_v22 }
 0x1ac   :  { %v3490_v17 = vsel %vm3418_vm9, %v2837_v47, %v3489_v26  ;;  %v1144_v47 = vadd.f32 %v13390_v52, %v13004_v53  ;;  %v1148_v26 = vadd.f32 %v1147_v4, %v13000_v22  ;;  %v2889_v34 = vrot.slane %v13455_v58, %v12993_v31 }
 0x1ad   :  { %v3491_v50 = vsel %vm3420_vm10, %v2845_v51, %v3490_v17  ;;  %v3483_v56 = vsel %vm3414_vm7, %v2817_v63, %v20800_v6  ;;  %v1156_v63 = vadd.f32 %v1155_v54, %v13004_v53  ;;  %v13508_v6 = vmax.f32 %v1573_v55, %v11597_v2 }
 0x1ae   :  { %v3492_v14 = vsel %vm3422_vm11, %v2853_v40, %v3491_v50  ;;  %v3484_v44 = vsel %vm3416_vm8, %v2825_v23, %v3483_v56  ;;  %v1257_v17 = vmax.f32 %v1144_v47, 0.0  ;;  %v1258_v4 = vmax.f32 %v1148_v26, 0.0  ;;  %v1159_v56 = vpop.f32.mrf.mxu0 }
 0x1af   :  { %3635 = vrot.lane.b32.xlu1 %v3492_v14, %s12098_s2  ;;  %v3485_v51 = vsel %vm3418_vm9, %v2833_v48, %v3484_v44  ;;  %20801 = vst [vmem:[#allocation38_spill] sm:$0xff] %v13508_v6  ;;  %v1259_v39 = vmax.f32 %v1150_v43, 0.0  ;;  %v1261_v61 = vmax.f32 %v1156_v63, 0.0  ;;  %v11596_v14 = vrot.slane %v13467_v45, 9 }
 0x1b0   :  { %v3486_v52 = vsel %vm3420_vm10, %v2841_v11, %v3485_v51  ;;  %v1576_v40 = vcombine.low %v1256_v36, %v1257_v17  ;;  %v1577_v23 = vcombine.high %v1256_v36, %v1257_v17  ;;  %v13513_v44 = vmax.f32 %v1566_v5, %v11595_v59 }
 0x1b1   :  { %v3487_v50 = vsel %vm3422_vm11, %v2849_v41, %v3486_v52  ;;  %v1594_v62 = vcombine.low %v1258_v4, %v1259_v39  ;;  %v1595_v48 = vcombine.high %v1258_v4, %v1259_v39  ;;  %v13516_v55 = vmax.f32 %v1575_v28, %v11598_v38 }
 0x1b2   :  { %20802 = vst [vmem:[#allocation39_spill] sm:$0xff] %v13513_v44  ;;  %3633 = vrot.lane.b32.xlu0 %v3487_v50, %s12098_s2  ;;  %v1584_v11 = vrot.slane %v1576_v40, %v13009_v27  ;;  %v1591_v43 = vrot.slane %v1577_v23, %v13009_v27  ;;  %v1260_v2 = vmax.f32 %v1154_v0, 0.0  ;;  %v13525_v5 = vadd.f32 %v1159_v56, %v13000_v22 }
 0x1b3   :  { %20803 = vst [vmem:[#allocation40_spill] sm:$0xff] %v13516_v55  ;;  %v1602_v41 = vrot.slane %v1594_v62, %v13009_v27  ;;  %v1609_v54 = vrot.slane %v1595_v48, %v13009_v27  ;;  %v20816_v46 = vrot.slane %v13363_v33, %v12993_v31 }
 0x1b4   :  { %v1592_v59 = vcombine.high %v1584_v11, %v1584_v11  ;;  %v13527_v47 = vcombine.high %v1591_v43, %v1591_v43  ;;  %v1612_v38 = vcombine.low %v1260_v2, %v1261_v61  ;;  %v1613_v39 = vcombine.high %v1260_v2, %v1261_v61 }
 0x1b5   :  { %v1610_v28 = vcombine.high %v1602_v41, %v1602_v41  ;;  %v1611_v26 = vcombine.high %v1609_v54, %v1609_v54  ;;  %v11603_v51 = vrot.slane %v1602_v41, 9  ;;  %v11605_v17 = vrot.slane %v1609_v54, 9 }
 0x1b6   :  { %v11599_v63 = vrot.slane %v1584_v11, 9  ;;  %v11600_v52 = vrot.slane %v1592_v59, 9  ;;  %v11601_v4 = vrot.slane %v1591_v43, 9  ;;  %v13536_v62 = vrot.slane %v1612_v38, %v13009_v27 }
 0x1b7   :  { %v11604_v50 = vrot.slane %v1610_v28, 9  ;;  %v11606_v40 = vrot.slane %v1611_v26, 9  ;;  %v13531_v23 = vmax.f32 %v1602_v41, %v11603_v51  ;;  %v13533_v56 = vmax.f32 %v1609_v54, %v11605_v17 }
 0x1b8   :  { %v13539_v61 = vrot.slane %v1613_v39, %v13009_v27  ;;  %v1262_v48 = vmax.f32 %v13525_v5, 0.0  ;;  %v13543_v2 = vmax.f32 %v13467_v45, %v11596_v14  ;;  %v11602_v36 = vrot.slane %v13527_v47, 9  ;;  %v1161_v14 = vpop.f32.mrf.mxu0 }
 0x1b9   :  { %20804 = vst [vmem:[#allocation41_spill] sm:$0xff] %v13531_v23  ;;  %20805 = vst [vmem:[#allocation42_spill] sm:$0xff] %v13533_v56  ;;  %v13546_v0 = vmax.f32 %v1610_v28, %v11604_v50  ;;  %v2885_v41 = vrot.slane %v13453_v35, %v13020_v21  ;;  %v2893_v54 = vrot.slane %v13455_v58, %v13020_v21 }
 0x1ba   :  { %20806 = vst [vmem:[#allocation43_spill] sm:$0xff] %v13543_v2  ;;  %v13552_v38 = vmax.f32 %v1584_v11, %v11599_v63  ;;  %v13554_v51 = vmax.f32 %v1592_v59, %v11600_v52  ;;  %v13556_v39 = vmax.f32 %v1591_v43, %v11601_v4  ;;  %v2901_v45 = vrot.slane %v13459_v24, %v13020_v21  ;;  %v1165_v52 = vpop.f32.mrf.mxu0 }
 0x1bb   :  { %20807 = vst [vmem:[#allocation44_spill] sm:$0xff] %v13546_v0  ;;  %v13560_v5 = vmax.f32 %v1611_v26, %v11606_v40  ;;  %v13574_v63 = vcombine.high %v13536_v62, %v13536_v62  ;;  %v13578_v26 = vcombine.high %v13539_v61, %v13539_v61  ;;  %v20812_v40 = vrot.slane %v13330_v13, %v13020_v21 }
 0x1bc   :  { %20808 = vst [vmem:[#allocation45_spill] sm:$0xff] %v13552_v38  ;;  %20809 = vst [vmem:[#allocation46_spill] sm:$0xff] %v13554_v51  ;;  %v20813_v11 = vrot.slane %v13363_v33, %v13020_v21  ;;  %v2881_v28 = vrot.slane %v13453_v35, %v12993_v31  ;;  %v2909_v43 = vrot.slane %v13513_v44, %v13020_v21 }
 0x1bd   :  { %20810 = vst [vmem:[#allocation47_spill] sm:$0xff] %v13556_v39  ;;  %20811 = vst [vmem:[#allocation48_spill] sm:$0xff] %v13560_v5  ;;  %v2917_v17 = vrot.slane %v13543_v2, %v13020_v21  ;;  %v20814_v4 = vrot.slane %v13434_v30, %v13020_v21  ;;  %v20815_v35 = vrot.slane %v13330_v13, %v12993_v31 }
 0x1be   :  { %v3500_v59 = vsel %vm3414_vm7, %v20813_v11, %v20812_v40  ;;  %v2897_v11 = vrot.slane %v13459_v24, %v12993_v31  ;;  %v2905_v40 = vrot.slane %v13513_v44, %v12993_v31  ;;  %v1162_v44 = vadd.f32 %v1161_v14, %v13004_v53  ;;  %v1167_v24 = vpop.f32.mrf.mxu0 }
 0x1bf   :  { %v3501_v50 = vsel %vm3416_vm8, %v20814_v4, %v3500_v59  ;;  %v3493_v20 = vsel %vm3414_vm7, %v20816_v46, %v20815_v35  ;;  %v2913_v4 = vrot.slane %v13543_v2, %v12993_v31  ;;  %v2933_v46 = vrot.slane %v13516_v55, %v13020_v21 }
 0x1c0   :  { %v3502_v15 = vsel %vm3418_vm9, %v2885_v41, %v3501_v50  ;;  %v20817_v41 = vrot.slane %v13434_v30, %v12993_v31  ;;  %v1263_v2 = vmax.f32 %v1162_v44, 0.0 }
 0x1c1   :  { %v3503_v59 = vsel %vm3420_vm10, %v2893_v54, %v3502_v15  ;;  %v2941_v15 = vrot.slane %v13552_v38, %v13020_v21 }
 0x1c2   :  { %v3494_v50 = vsel %vm3416_vm8, %v20817_v41, %v3493_v20  ;;  %v3504_v58 = vsel %vm3422_vm11, %v2901_v45, %v3503_v59  ;;  %v2949_v20 = vrot.slane %v13554_v51, %v13020_v21  ;;  %v2957_v59 = vrot.slane %v13556_v39, %v13020_v21 }
 0x1c3   :  { %v3495_v13 = vsel %vm3418_vm9, %v2881_v28, %v3494_v50  ;;  %v3505_v35 = vsel %vm3424_vm12, %v2909_v43, %v3504_v58  ;;  %v13635_v28 = vmax.f32 %v13527_v47, %v11602_v36  ;;  %v1630_v43 = vcombine.low %v1262_v48, %v1263_v2 }
 0x1c4   :  { %v3496_v54 = vsel %vm3420_vm10, %v2889_v34, %v3495_v13  ;;  %v3506_v14 = vsel %vm3426_vm13, %v2917_v17, %v3505_v35  ;;  %v1631_v13 = vcombine.high %v1262_v48, %v1263_v2  ;;  %v20819_v34 = vrot.slane %v13508_v6, %v13020_v21  ;;  %v1171_v17 = vpop.f32.mrf.mxu0 }
 0x1c5   :  { %v3497_v45 = vsel %vm3422_vm11, %v2897_v11, %v3496_v54  ;;  %20818 = vst [vmem:[#allocation49_spill] sm:$0xff] %v13635_v28  ;;  %3639 = vrot.lane.b32.xlu1 %v3506_v14, %s12098_s2  ;;  %v2929_v47 = vrot.slane %v13516_v55, %v12993_v31  ;;  %v2937_v41 = vrot.slane %v13552_v38, %v12993_v31 }
 0x1c6   :  { %v3498_v58 = vsel %vm3424_vm12, %v2905_v40, %v3497_v45  ;;  %v3512_v44 = vsel %vm3414_vm7, %v2933_v46, %v20819_v34  ;;  %v11609_v40 = vrot.slane %v13539_v61, 9  ;;  %v1638_v48 = vrot.slane %v1630_v43, %v13009_v27 }
 0x1c7   :  { %v3499_v11 = vsel %vm3426_vm13, %v2913_v4, %v3498_v58  ;;  %v3513_v36 = vsel %vm3416_vm8, %v2941_v15, %v3512_v44  ;;  %v1645_v2 = vrot.slane %v1631_v13, %v13009_v27  ;;  %v11608_v4 = vrot.slane %v13574_v63, 9  ;;  %v1173_v13 = vpop.f32.mrf.mxu0 }
 0x1c8   :  { %3637 = vrot.lane.b32.xlu0 %v3499_v11, %s12098_s2  ;;  %v3514_v50 = vsel %vm3418_vm9, %v2949_v20, %v3513_v36  ;;  %v2965_v46 = vrot.slane %v13635_v28, %v13020_v21  ;;  %v2945_v35 = vrot.slane %v13554_v51, %v12993_v31  ;;  %v1646_v54 = vcombine.high %v1638_v48, %v1638_v48 }
 0x1c9   :  { %v3515_v15 = vsel %vm3420_vm10, %v2957_v59, %v3514_v50  ;;  %v1647_v14 = vcombine.high %v1645_v2, %v1645_v2  ;;  %v11611_v45 = vrot.slane %v1638_v48, 9  ;;  %v20820_v58 = vrot.slane %v13508_v6, %v12993_v31  ;;  %v1177_v38 = vpop.f32.mrf.mxu0 }
 0x1ca   :  { %v3516_v20 = vsel %vm3422_vm11, %v2965_v46, %v3515_v15  ;;  %v1166_v44 = vadd.f32 %v1165_v52, %v13000_v22  ;;  %v1168_v59 = vadd.f32 %v1167_v24, %v13004_v53  ;;  %v11610_v11 = vrot.slane %v13578_v26, 9 }
 0x1cb   :  { %v3507_v43 = vsel %vm3414_vm7, %v2929_v47, %v20820_v58  ;;  %v11612_v36 = vrot.slane %v1646_v54, 9  ;;  %v11613_v50 = vrot.slane %v1645_v2, 9  ;;  %3643 = vrot.lane.b32.xlu1 %v3516_v20, %s12098_s2  ;;  %v2953_v51 = vrot.slane %v13556_v39, %v12993_v31 }
 0x1cc   :  { %v3508_v34 = vsel %vm3416_vm8, %v2937_v41, %v3507_v43  ;;  %v11614_v47 = vrot.slane %v1647_v14, 9  ;;  %v1264_v46 = vmax.f32 %v1166_v44, 0.0  ;;  %v1265_v15 = vmax.f32 %v1168_v59, 0.0 }
 0x1cd   :  { %v3509_v58 = vsel %vm3418_vm9, %v2945_v35, %v3508_v34  ;;  %v20821_v41 = vrot.slane %v13536_v62, 9  ;;  %v13680_v24 = vmax.f32 %v1638_v48, %v11611_v45  ;;  %v2961_v43 = vrot.slane %v13635_v28, %v12993_v31  ;;  %v1179_v45 = vpop.f32.mrf.mxu0 }
 0x1ce   :  { %v1172_v20 = vadd.f32 %v1171_v17, %v13000_v22  ;;  %v13686_v39 = vmax.f32 %v13574_v63, %v11608_v4  ;;  %v3510_v55 = vsel %vm3420_vm10, %v2953_v51, %v3509_v58  ;;  %v1648_v35 = vcombine.low %v1264_v46, %v1265_v15 }
 0x1cf   :  { %v13678_v52 = vmax.f32 %v13536_v62, %v20821_v41  ;;  %20823 = vst [vmem:[#allocation51_spill] sm:$0xff] %v13680_v24  ;;  %v1649_v34 = vcombine.high %v1264_v46, %v1265_v15  ;;  %v13690_v44 = vmax.f32 %v13539_v61, %v11609_v40  ;;  %v13692_v59 = vmax.f32 %v1645_v2, %v11613_v50 }
 0x1d0   :  { %20824 = vst [vmem:[#allocation52_spill] sm:$0xff] %v13686_v39  ;;  %v3511_v62 = vsel %vm3422_vm11, %v2961_v43, %v3510_v55  ;;  %v13696_v48 = vmax.f32 %v13578_v26, %v11610_v11  ;;  %v13698_v41 = vmax.f32 %v1646_v54, %v11612_v36  ;;  %v13700_v17 = vmax.f32 %v1647_v14, %v11614_v47  ;;  %v1183_v43 = vpop.f32.mrf.mxu0 }
 0x1d1   :  { %20822 = vst [vmem:[#allocation50_spill] sm:$0xff] %v13678_v52  ;;  %20825 = vst [vmem:[#allocation53_spill] sm:$0xff] %v13690_v44  ;;  %3641 = vrot.lane.b32.xlu0 %v3511_v62, %s12098_s2  ;;  %v13704_v51 = vrot.slane %v1648_v35, %v13009_v27  ;;  %v1663_v61 = vrot.slane %v1649_v34, %v13009_v27  ;;  %v1266_v26 = vmax.f32 %v1172_v20, 0.0 }
 0x1d2   :  { %20826 = vst [vmem:[#allocation54_spill] sm:$0xff] %v13692_v59  ;;  %20827 = vst [vmem:[#allocation55_spill] sm:$0xff] %v13696_v48  ;;  %v20830_v40 = vrot.slane %v13531_v23, %v13020_v21  ;;  %v20831_v2 = vrot.slane %v13546_v0, %v13020_v21  ;;  %v2997_v14 = vrot.slane %v13560_v5, %v13020_v21 }
 0x1d3   :  { %20828 = vst [vmem:[#allocation56_spill] sm:$0xff] %v13698_v41  ;;  %20829 = vst [vmem:[#allocation57_spill] sm:$0xff] %v13700_v17  ;;  %v1665_v54 = vcombine.high %v1663_v61, %v1663_v61  ;;  %v3005_v11 = vrot.slane %v13678_v52, %v13020_v21  ;;  %v3013_v36 = vrot.slane %v13686_v39, %v13020_v21  ;;  %v11617_v35 = vrot.slane %v1663_v61, 9 }
 0x1d4   :  { %v3524_v4 = vsel %vm3414_vm7, %v20831_v2, %v20830_v40  ;;  %v3021_v50 = vrot.slane %v13690_v44, %v13020_v21  ;;  %v3029_v47 = vrot.slane %v13696_v48, %v13020_v21  ;;  %v20832_v58 = vrot.slane %v13533_v56, %v13020_v21 }
 0x1d5   :  { %v2993_v15 = vrot.slane %v13560_v5, %v12993_v31  ;;  %v13736_v20 = vcombine.high %v13704_v51, %v13704_v51  ;;  %v11618_v34 = vrot.slane %v1665_v54, 9  ;;  %v3001_v62 = vrot.slane %v13678_v52, %v12993_v31 }
 0x1d6   :  { %v3525_v46 = vsel %vm3416_vm8, %v20832_v58, %v3524_v4  ;;  %v11615_v40 = vrot.slane %v13704_v51, 9  ;;  %v20833_v4 = vrot.slane %v13531_v23, %v12993_v31  ;;  %v20834_v58 = vrot.slane %v13546_v0, %v12993_v31 }
 0x1d7   :  { %v3526_v2 = vsel %vm3418_vm9, %v2997_v14, %v3525_v46  ;;  %v1174_v55 = vadd.f32 %v1173_v13, %v13004_v53  ;;  %v3009_v28 = vrot.slane %v13686_v39, %v12993_v31  ;;  %v3017_v52 = vrot.slane %v13690_v44, %v12993_v31 }
 0x1d8   :  { %v3517_v63 = vsel %vm3414_vm7, %v20834_v58, %v20833_v4  ;;  %v3527_v5 = vsel %vm3420_vm10, %v3005_v11, %v3526_v2  ;;  %v3025_v14 = vrot.slane %v13696_v48, %v12993_v31  ;;  %v20835_v0 = vrot.slane %v13533_v56, %v12993_v31  ;;  %v1185_v11 = vpop.f32.mrf.mxu0 }
 0x1d9   :  { %v3528_v46 = vsel %vm3422_vm11, %v3013_v36, %v3527_v5  ;;  %v1267_v58 = vmax.f32 %v1174_v55, 0.0  ;;  %v1178_v13 = vadd.f32 %v1177_v38, %v13000_v22  ;;  %v13763_v2 = vmax.f32 %v1663_v61, %v11617_v35 }
 0x1da   :  { %v3518_v4 = vsel %vm3416_vm8, %v20835_v0, %v3517_v63  ;;  %v13765_v39 = vmax.f32 %v1665_v54, %v11618_v34  ;;  %v3529_v44 = vsel %vm3424_vm12, %v3021_v50, %v3528_v46  ;;  %v1180_v38 = vadd.f32 %v1179_v45, %v13004_v53  ;;  %v1189_v46 = vpop.f32.mrf.mxu0 }
 0x1db   :  { %20836 = vst [vmem:[#allocation58_spill] sm:$0xff] %v13763_v2  ;;  %v3519_v23 = vsel %vm3418_vm9, %v2993_v15, %v3518_v4  ;;  %v3530_v48 = vsel %vm3426_vm13, %v3029_v47, %v3529_v44  ;;  %v1666_v36 = vcombine.low %v1266_v26, %v1267_v58  ;;  %v1667_v56 = vcombine.high %v1266_v26, %v1267_v58 }
 0x1dc   :  { %20837 = vst [vmem:[#allocation59_spill] sm:$0xff] %v13765_v39  ;;  %v3520_v5 = vsel %vm3420_vm10, %v3001_v62, %v3519_v23  ;;  %3647 = vrot.lane.b32.xlu1 %v3530_v48, %s12098_s2  ;;  %v1184_v61 = vadd.f32 %v1183_v43, %v13000_v22  ;;  %v1186_v63 = vadd.f32 %v1185_v11, %v13004_v53  ;;  %v1268_v50 = vmax.f32 %v1178_v13, 0.0 }
 0x1dd   :  { %v3521_v0 = vsel %vm3422_vm11, %v3009_v28, %v3520_v5  ;;  %v1674_v54 = vrot.slane %v1666_v36, %v13009_v27  ;;  %v1681_v44 = vrot.slane %v1667_v56, %v13009_v27  ;;  %v1269_v26 = vmax.f32 %v1180_v38, 0.0 }
 0x1de   :  { %v3522_v55 = vsel %vm3424_vm12, %v3017_v52, %v3521_v0  ;;  %v1270_v47 = vmax.f32 %v1184_v61, 0.0  ;;  %v1271_v48 = vmax.f32 %v1186_v63, 0.0  ;;  %v11616_v4 = vrot.slane %v13736_v20, 9 }
 0x1df   :  { %v3523_v23 = vsel %vm3426_vm13, %v3025_v14, %v3522_v55  ;;  %v1682_v28 = vcombine.high %v1674_v54, %v1674_v54  ;;  %v1683_v45 = vcombine.high %v1681_v44, %v1681_v44  ;;  %v11619_v15 = vrot.slane %v1674_v54, 9 }
 0x1e0   :  { %3645 = vrot.lane.b32.xlu0 %v3523_v23, %s12098_s2  ;;  %v11621_v43 = vrot.slane %v1681_v44, 9  ;;  %v1684_v35 = vcombine.low %v1268_v50, %v1269_v26  ;;  %v1685_v34 = vcombine.high %v1268_v50, %v1269_v26  ;;  %v1702_v62 = vcombine.low %v1270_v47, %v1271_v48  ;;  %v1191_v23 = vpop.f32.mrf.mxu0 }
 0x1e1   :  { %v1703_v52 = vcombine.high %v1270_v47, %v1271_v48  ;;  %v13783_v56 = vmax.f32 %v13704_v51, %v11615_v40  ;;  %v11620_v58 = vrot.slane %v1682_v28, 9  ;;  %v11622_v40 = vrot.slane %v1683_v45, 9 }
 0x1e2   :  { %v1692_v13 = vrot.slane %v1684_v35, %v13009_v27  ;;  %v1699_v11 = vrot.slane %v1685_v34, %v13009_v27  ;;  %v1710_v5 = vrot.slane %v1702_v62, %v13009_v27  ;;  %v13797_v61 = vmax.f32 %v1674_v54, %v11619_v15 }
 0x1e3   :  { %20838 = vst [vmem:[#allocation60_spill] sm:$0xff] %v13783_v56  ;;  %v1717_v36 = vrot.slane %v1703_v52, %v13009_v27  ;;  %v13799_v63 = vmax.f32 %v1681_v44, %v11621_v43  ;;  %v13801_v26 = vmax.f32 %v1682_v28, %v11620_v58  ;;  %v1190_v35 = vadd.f32 %v1189_v46, %v13000_v22  ;;  %v1195_v58 = vpop.f32.mrf.mxu0 }
 0x1e4   :  { %20839 = vst [vmem:[#allocation61_spill] sm:$0xff] %v13797_v61  ;;  %v1700_v55 = vcombine.high %v1692_v13, %v1692_v13  ;;  %v1701_v50 = vcombine.high %v1699_v11, %v1699_v11  ;;  %v11623_v47 = vrot.slane %v1692_v13, 9  ;;  %v11625_v48 = vrot.slane %v1699_v11, 9 }
 0x1e5   :  { %20840 = vst [vmem:[#allocation62_spill] sm:$0xff] %v13799_v63  ;;  %20841 = vst [vmem:[#allocation63_spill] sm:$0xff] %v13801_v26  ;;  %v1718_v52 = vcombine.high %v1710_v5, %v1710_v5  ;;  %v1719_v38 = vcombine.high %v1717_v36, %v1717_v36  ;;  %v13804_v14 = vmax.f32 %v1683_v45, %v11622_v40  ;;  %v11627_v54 = vrot.slane %v1710_v5, 9 }
 0x1e6   :  { %v11624_v34 = vrot.slane %v1700_v55, 9  ;;  %v11626_v62 = vrot.slane %v1701_v50, 9  ;;  %v13806_v51 = vmax.f32 %v1699_v11, %v11625_v48  ;;  %v11629_v44 = vrot.slane %v1717_v36, 9 }
 0x1e7   :  { %20842 = vst [vmem:[#allocation64_spill] sm:$0xff] %v13804_v14  ;;  %v13820_v40 = vmax.f32 %v1692_v13, %v11623_v47  ;;  %v11628_v43 = vrot.slane %v1718_v52, 9  ;;  %v11630_v0 = vrot.slane %v1719_v38, 9  ;;  %v13830_v6 = vmax.f32 %v1710_v5, %v11627_v54 }
 0x1e8   :  { %20843 = vst [vmem:[#allocation65_spill] sm:$0xff] %v13806_v51  ;;  %v13822_v48 = vmax.f32 %v1700_v55, %v11624_v34  ;;  %v13824_v15 = vmax.f32 %v1701_v50, %v11626_v62  ;;  %v13832_v45 = vmax.f32 %v1717_v36, %v11629_v44  ;;  %v13835_v11 = vmax.f32 %v13736_v20, %v11616_v4  ;;  %v1197_v34 = vpop.f32.mrf.mxu0 }
 0x1e9   :  { %20844 = vst [vmem:[#allocation66_spill] sm:$0xff] %v13820_v40  ;;  %20847 = vst [vmem:[#allocation69_spill] sm:$0xff] %v13830_v6  ;;  %v3045_v13 = vrot.slane %v13698_v41, %v13020_v21  ;;  %v3053_v55 = vrot.slane %v13692_v59, %v13020_v21  ;;  %v3061_v50 = vrot.slane %v13700_v17, %v13020_v21 }
 0x1ea   :  { %20845 = vst [vmem:[#allocation67_spill] sm:$0xff] %v13822_v48  ;;  %20846 = vst [vmem:[#allocation68_spill] sm:$0xff] %v13824_v15  ;;  %v3069_v47 = vrot.slane %v13783_v56, %v13020_v21  ;;  %v3077_v5 = vrot.slane %v13835_v11, %v13020_v21  ;;  %v3041_v20 = vrot.slane %v13698_v41, %v12993_v31  ;;  %v1201_v18 = vpop.f32.mrf.mxu0 }
 0x1eb   :  { %20848 = vst [vmem:[#allocation70_spill] sm:$0xff] %v13832_v45  ;;  %20849 = vst [vmem:[#allocation71_spill] sm:$0xff] %v13835_v11  ;;  %v3049_v4 = vrot.slane %v13692_v59, %v12993_v31  ;;  %v3057_v36 = vrot.slane %v13700_v17, %v12993_v31  ;;  %v20850_v62 = vrot.slane %v13680_v24, %v13020_v21 }
 0x1ec   :  { %v3065_v44 = vrot.slane %v13783_v56, %v12993_v31  ;;  %v3073_v28 = vrot.slane %v13835_v11, %v12993_v31  ;;  %v1192_v46 = vadd.f32 %v1191_v23, %v13004_v53  ;;  %v20851_v59 = vrot.slane %v13680_v24, %v12993_v31 }
 0x1ed   :  { %v3536_v54 = vsel %vm3414_vm7, %v3045_v13, %v20850_v62  ;;  %v1196_v30 = vadd.f32 %v1195_v58, %v13000_v22  ;;  %v1198_v33 = vadd.f32 %v1197_v34, %v13004_v53  ;;  %v1272_v13 = vmax.f32 %v1190_v35, 0.0 }
 0x1ee   :  { %v3537_v41 = vsel %vm3416_vm8, %v3053_v55, %v3536_v54  ;;  %v3531_v17 = vsel %vm3414_vm7, %v3041_v20, %v20851_v59  ;;  %v1273_v1 = vmax.f32 %v1192_v46, 0.0  ;;  %v20864_v35 = vrot.slane %v13797_v61, %v13020_v21 }
 0x1ef   :  { %v3538_v62 = vsel %vm3418_vm9, %v3061_v50, %v3537_v41  ;;  %v3532_v56 = vsel %vm3416_vm8, %v3049_v4, %v3531_v17  ;;  %v1274_v55 = vmax.f32 %v1196_v30, 0.0  ;;  %v1275_v54 = vmax.f32 %v1198_v33, 0.0 }
 0x1f0   :  { %v3539_v11 = vsel %vm3420_vm10, %v3069_v47, %v3538_v62  ;;  %v3533_v23 = vsel %vm3418_vm9, %v3057_v36, %v3532_v56  ;;  %v1720_v20 = vcombine.low %v1272_v13, %v1273_v1  ;;  %v1721_v58 = vcombine.high %v1272_v13, %v1273_v1 }
 0x1f1   :  { %v3540_v24 = vsel %vm3422_vm11, %v3077_v5, %v3539_v11  ;;  %v3534_v59 = vsel %vm3420_vm10, %v3065_v44, %v3533_v23  ;;  %v1738_v17 = vcombine.low %v1274_v55, %v1275_v54  ;;  %v1739_v46 = vcombine.high %v1274_v55, %v1275_v54 }
 0x1f2   :  { %3651 = vrot.lane.b32.xlu1 %v3540_v24, %s12098_s2  ;;  %v3535_v41 = vsel %vm3422_vm11, %v3073_v28, %v3534_v59  ;;  %v13881_v33 = vmax.f32 %v1718_v52, %v11628_v43  ;;  %v1728_v56 = vrot.slane %v1720_v20, %v13009_v27  ;;  %v1735_v1 = vrot.slane %v1721_v58, %v13009_v27  ;;  %v1203_v52 = vpop.f32.mrf.mxu0 }
 0x1f3   :  { %3649 = vrot.lane.b32.xlu0 %v3535_v41, %s12098_s2  ;;  %v13886_v11 = vmax.f32 %v1719_v38, %v11630_v0  ;;  %v1746_v50 = vrot.slane %v1738_v17, %v13009_v27  ;;  %v1753_v24 = vrot.slane %v1739_v46, %v13009_v27  ;;  %v1202_v28 = vadd.f32 %v1201_v18, %v13000_v22 }
 0x1f4   :  { %20852 = vst [vmem:[#allocation72_spill] sm:$0xff] %v13881_v33  ;;  %v1736_v47 = vcombine.high %v1728_v56, %v1728_v56  ;;  %v1737_v34 = vcombine.high %v1735_v1, %v1735_v1  ;;  %v11631_v5 = vrot.slane %v1728_v56, 9  ;;  %v11633_v4 = vrot.slane %v1735_v1, 9  ;;  %v1207_v20 = vpop.f32.mrf.mxu0 }
 0x1f5   :  { %20853 = vst [vmem:[#allocation73_spill] sm:$0xff] %v13886_v11  ;;  %v1754_v43 = vcombine.high %v1746_v50, %v1746_v50  ;;  %v1755_v36 = vcombine.high %v1753_v24, %v1753_v24  ;;  %v11635_v44 = vrot.slane %v1746_v50, 9  ;;  %v11637_v13 = vrot.slane %v1753_v24, 9 }
 0x1f6   :  { %v11632_v62 = vrot.slane %v1736_v47, 9  ;;  %v11634_v23 = vrot.slane %v1737_v34, 9  ;;  %v13891_v55 = vmax.f32 %v1728_v56, %v11631_v5  ;;  %v13893_v0 = vmax.f32 %v1735_v1, %v11633_v4 }
 0x1f7   :  { %v11636_v54 = vrot.slane %v1754_v43, 9  ;;  %v1204_v59 = vadd.f32 %v1203_v52, %v13004_v53  ;;  %v11638_v58 = vrot.slane %v1755_v36, 9  ;;  %v1276_v41 = vmax.f32 %v1202_v28, 0.0 }
 0x1f8   :  { %20854 = vst [vmem:[#allocation74_spill] sm:$0xff] %v13891_v55  ;;  %20855 = vst [vmem:[#allocation75_spill] sm:$0xff] %v13893_v0  ;;  %v3125_v17 = vrot.slane %v13804_v14, %v13020_v21  ;;  %v3133_v46 = vrot.slane %v13820_v40, %v13020_v21  ;;  %v13904_v56 = vmax.f32 %v1736_v47, %v11632_v62  ;;  %v1209_v62 = vpop.f32.mrf.mxu0 }
 0x1f9   :  { %v13906_v1 = vmax.f32 %v1746_v50, %v11635_v44  ;;  %v13908_v5 = vmax.f32 %v1753_v24, %v11637_v13  ;;  %v3141_v4 = vrot.slane %v13822_v48, %v13020_v21  ;;  %v13912_v38 = vmax.f32 %v1737_v34, %v11634_v23 }
 0x1fa   :  { %20856 = vst [vmem:[#allocation76_spill] sm:$0xff] %v13904_v56  ;;  %v13922_v47 = vmax.f32 %v1754_v43, %v11636_v54  ;;  %v1277_v24 = vmax.f32 %v1204_v59, 0.0  ;;  %v20861_v44 = vrot.slane %v13763_v2, %v13020_v21  ;;  %v20862_v34 = vrot.slane %v13765_v39, %v13020_v21 }
 0x1fb   :  { %20857 = vst [vmem:[#allocation77_spill] sm:$0xff] %v13906_v1  ;;  %20858 = vst [vmem:[#allocation78_spill] sm:$0xff] %v13908_v5  ;;  %v13931_v23 = vmax.f32 %v1755_v36, %v11638_v58  ;;  %v3121_v43 = vrot.slane %v13804_v14, %v12993_v31  ;;  %v3129_v54 = vrot.slane %v13820_v40, %v12993_v31 }
 0x1fc   :  { %20859 = vst [vmem:[#allocation79_spill] sm:$0xff] %v13912_v38  ;;  %20860 = vst [vmem:[#allocation80_spill] sm:$0xff] %v13922_v47  ;;  %v3548_v13 = vsel %vm3414_vm7, %v20862_v34, %v20861_v44  ;;  %v1756_v59 = vcombine.low %v1276_v41, %v1277_v24  ;;  %v1757_v50 = vcombine.high %v1276_v41, %v1277_v24 }
 0x1fd   :  { %20863 = vst [vmem:[#allocation81_spill] sm:$0xff] %v13931_v23  ;;  %v3549_v28 = vsel %vm3416_vm8, %v20864_v35, %v3548_v13  ;;  %v20865_v52 = vrot.slane %v13801_v26, %v13020_v21  ;;  %v20866_v36 = vrot.slane %v13763_v2, %v12993_v31  ;;  %v20867_v58 = vrot.slane %v13765_v39, %v12993_v31 }
 0x1fe   :  { %v20868_v34 = vrot.slane %v13799_v63, %v13020_v21  ;;  %v20869_v41 = vrot.slane %v13797_v61, %v12993_v31  ;;  %v1764_v18 = vrot.slane %v1756_v59, %v13009_v27  ;;  %v1771_v30 = vrot.slane %v1757_v50, %v13009_v27 }
 0x1ff   :  { %v3550_v44 = vsel %vm3418_vm9, %v20865_v52, %v3549_v28  ;;  %v3541_v35 = vsel %vm3414_vm7, %v20867_v58, %v20866_v36  ;;  %v1208_v28 = vadd.f32 %v1207_v20, %v13000_v22  ;;  %v1210_v52 = vadd.f32 %v1209_v62, %v13004_v53 }
 0x200   :  { %v3551_v13 = vsel %vm3420_vm10, %v20868_v34, %v3550_v44  ;;  %v3542_v24 = vsel %vm3416_vm8, %v20869_v41, %v3541_v35  ;;  %v20870_v58 = vrot.slane %v13801_v26, %v12993_v31  ;;  %v20871_v35 = vrot.slane %v13799_v63, %v12993_v31 }
 0x201   :  { %v3552_v36 = vsel %vm3422_vm11, %v3125_v17, %v3551_v13  ;;  %v1278_v41 = vmax.f32 %v1208_v28, 0.0  ;;  %v1279_v62 = vmax.f32 %v1210_v52, 0.0  ;;  %v1772_v40 = vcombine.high %v1764_v18, %v1764_v18 }
 0x202   :  { %v3543_v44 = vsel %vm3418_vm9, %v20870_v58, %v3542_v24  ;;  %v3553_v34 = vsel %vm3424_vm12, %v3133_v46, %v3552_v36  ;;  %v1773_v59 = vcombine.high %v1771_v30, %v1771_v30  ;;  %v11639_v14 = vrot.slane %v1764_v18, 9 }
 0x203   :  { %v3544_v20 = vsel %vm3420_vm10, %v20871_v35, %v3543_v44  ;;  %v11641_v50 = vrot.slane %v1771_v30, 9  ;;  %v3554_v17 = vsel %vm3426_vm13, %v3141_v4, %v3553_v34  ;;  %v3137_v13 = vrot.slane %v13822_v48, %v12993_v31 }
 0x204   :  { %v1774_v26 = vcombine.low %v1278_v41, %v1279_v62  ;;  %v1775_v24 = vcombine.high %v1278_v41, %v1279_v62  ;;  %v11640_v58 = vrot.slane %v1772_v40, 9  ;;  %v11642_v46 = vrot.slane %v1773_v59, 9  ;;  %3655 = vrot.lane.b32.xlu1 %v3554_v17, %s12098_s2 }
 0x205   :  { %v13977_v36 = vmax.f32 %v1764_v18, %v11639_v14  ;;  %v3545_v28 = vsel %vm3422_vm11, %v3121_v43, %v3544_v20  ;;  %v13981_v52 = vmax.f32 %v1771_v30, %v11641_v50  ;;  %v3205_v41 = vrot.slane %v13904_v56, %v13020_v21 }
 0x206   :  { %v3546_v44 = vsel %vm3424_vm12, %v3129_v54, %v3545_v28  ;;  %v1782_v35 = vrot.slane %v1774_v26, %v13009_v27  ;;  %v1789_v4 = vrot.slane %v1775_v24, %v13009_v27  ;;  %v13998_v43 = vmax.f32 %v1772_v40, %v11640_v58  ;;  %v1213_v24 = vpop.f32.mrf.mxu0 }
 0x207   :  { %20872 = vst [vmem:[#allocation82_spill] sm:$0xff] %v13977_v36  ;;  %20873 = vst [vmem:[#allocation83_spill] sm:$0xff] %v13981_v52  ;;  %v3547_v54 = vsel %vm3426_vm13, %v3137_v13, %v3546_v44  ;;  %v14001_v20 = vmax.f32 %v1773_v59, %v11642_v46  ;;  %v3173_v17 = vrot.slane %v13881_v33, %v13020_v21 }
 0x208   :  { %20874 = vst [vmem:[#allocation84_spill] sm:$0xff] %v13998_v43  ;;  %3653 = vrot.lane.b32.xlu0 %v3547_v54, %s12098_s2  ;;  %v1790_v62 = vcombine.high %v1782_v35, %v1782_v35  ;;  %v1791_v50 = vcombine.high %v1789_v4, %v1789_v4  ;;  %v11645_v13 = vrot.slane %v1789_v4, 9  ;;  %v20876_v46 = vrot.slane %v13806_v51, %v13020_v21  ;;  %v1215_v48 = vpop.f32.mrf.mxu0 }
 0x209   :  { %20875 = vst [vmem:[#allocation85_spill] sm:$0xff] %v14001_v20  ;;  %v20877_v44 = vrot.slane %v13824_v15, %v13020_v21  ;;  %v3169_v28 = vrot.slane %v13881_v33, %v12993_v31  ;;  %v11643_v40 = vrot.slane %v1782_v35, 9  ;;  %v3181_v14 = vrot.slane %v13832_v45, %v13020_v21 }
 0x20a   :  { %v11646_v58 = vrot.slane %v1791_v50, 9  ;;  %v20878_v59 = vrot.slane %v13830_v6, %v13020_v21  ;;  %v11644_v26 = vrot.slane %v1790_v62, 9  ;;  %v3189_v18 = vrot.slane %v13886_v11, %v13020_v21 }
 0x20b   :  { %v3560_v54 = vsel %vm3414_vm7, %v20877_v44, %v20876_v46  ;;  %v20879_v44 = vrot.slane %v13806_v51, %v12993_v31  ;;  %v20880_v30 = vrot.slane %v13824_v15, %v12993_v31  ;;  %v14041_v63 = vmax.f32 %v1789_v4, %v11645_v13  ;;  %v3614_v51 = vpop.permute.xlu0 %3613 }
 0x20c   :  { %v3561_v34 = vsel %vm3416_vm8, %v20878_v59, %v3560_v54  ;;  %v3177_v59 = vrot.slane %v13832_v45, %v12993_v31  ;;  %v20882_v54 = vrot.slane %v13830_v6, %v12993_v31  ;;  %v14050_v39 = vmax.f32 %v1791_v50, %v11646_v58 }
 0x20d   :  { %v3562_v46 = vsel %vm3418_vm9, %v3173_v17, %v3561_v34  ;;  %v3555_v33 = vsel %vm3414_vm7, %v20880_v30, %v20879_v44  ;;  %20881 = vst [vmem:[#allocation86_spill] sm:$0xff] %v14041_v63  ;;  %v3616_v17 = vpop.permute.xlu1 %3615  ;;  %v3185_v4 = vrot.slane %v13886_v11, %v12993_v31  ;;  %v1214_v13 = vadd.f32 %v1213_v24, %v13000_v22 }
 0x20e   :  { %v3563_v61 = vsel %vm3420_vm10, %v3181_v14, %v3562_v46  ;;  %v3556_v34 = vsel %vm3416_vm8, %v20882_v54, %v3555_v33  ;;  %20883 = vst [vmem:[#allocation87_spill] sm:$0xff] %v14050_v39  ;;  %v3711_v50 = vsel %vm3710_vm14, %v3616_v17, 0.0  ;;  %v3678_v58 = vsel %vm3677_vm15, %v3614_v51, %v3616_v17 }
 0x20f   :  { %v3564_v15 = vsel %vm3422_vm11, %v3189_v18, %v3563_v61  ;;  %v3557_v30 = vsel %vm3418_vm9, %v3169_v28, %v3556_v34  ;;  %v1216_v61 = vadd.f32 %v1215_v48, %v13004_v53  ;;  %v14065_v28 = vmax.f32 %v1782_v35, %v11643_v40 }
 0x210   :  { %3659 = vrot.lane.b32.xlu1 %v3564_v15, %s12098_s2  ;;  %v3558_v14 = vsel %vm3420_vm10, %v3177_v59, %v3557_v30  ;;  %v3743_v15 = vcombine.low %v3678_v58, %v3711_v50  ;;  %v3744_v46 = vcombine.high %v3678_v58, %v3711_v50  ;;  %v14068_v24 = vmax.f32 %v1790_v62, %v11644_v26  ;;  %v1219_v50 = vpop.f32.mrf.mxu0 }
 0x211   :  { %v3559_v33 = vsel %vm3422_vm11, %v3185_v4, %v3558_v14  ;;  %20884 = vst [vmem:[#allocation88_spill] sm:$0xff] %v14065_v28  ;;  %v1281_v59 = vmax.f32 %v1216_v61, 0.0  ;;  %v20886_v51 = vrot.slane %v13891_v55, %v13020_v21  ;;  %v1280_v35 = vmax.f32 %v1214_v13, 0.0 }
 0x212   :  { %3657 = vrot.lane.b32.xlu0 %v3559_v33, %s12098_s2  ;;  %20885 = vst [vmem:[#allocation89_spill] sm:$0xff] %v14068_v24  ;;  %v3751_v40 = vrot.slane %v3743_v15, %v13009_v27  ;;  %v3758_v34 = vrot.slane %v3744_v46, %v13009_v27  ;;  %v3237_v17 = vrot.slane %v13922_v47, %v13020_v21 }
 0x213   :  { %v3572_v48 = vsel %vm3414_vm7, %v3205_v41, %v20886_v51  ;;  %v20887_v41 = vrot.slane %v13893_v0, %v13020_v21  ;;  %v1792_v33 = vcombine.low %v1280_v35, %v1281_v59  ;;  %v1793_v15 = vcombine.high %v1280_v35, %v1281_v59 }
 0x214   :  { %v3759_v30 = vcombine.high %v3751_v40, %v3751_v40  ;;  %v3760_v14 = vcombine.high %v3758_v34, %v3758_v34  ;;  %v4023_v13 = vrot.slane %v3751_v40, 1  ;;  %v4025_v58 = vrot.slane %v3758_v34, 1 }
 0x215   :  { %v3573_v4 = vsel %vm3416_vm8, %v20887_v41, %v3572_v48  ;;  %v4191_v61 = vmax.f32 %v13017_v57, %v3751_v40  ;;  %v3245_v46 = vrot.slane %v13908_v5, %v13020_v21  ;;  %v4195_v48 = vmax.f32 %v13034_v25, %v3758_v34  ;;  %v1221_v25 = vpop.f32.mrf.mxu0 }
 0x216   :  { %v4024_v51 = vrot.slane %v3759_v30, 1  ;;  %v4026_v26 = vrot.slane %v3760_v14, 1  ;;  %v4192_v44 = vmax.f32 %v13024_v12, %v4023_v13  ;;  %v4193_v62 = vmax.f32 %v13026_v9, %v3759_v30 }
 0x217   :  { %v3253_v41 = vrot.slane %v13931_v23, %v13020_v21  ;;  %v20888_v54 = vrot.slane %v13912_v38, %v13020_v21  ;;  %v3233_v59 = vrot.slane %v13922_v47, %v12993_v31  ;;  %v1800_v9 = vrot.slane %v1792_v33, %v13009_v27 }
 0x218   :  { %v4194_v35 = vmax.f32 %v13032_v29, %v4024_v51  ;;  %v14106_v40 = vrot.slane %v4192_v44, %v12993_v31  ;;  %v14109_v12 = vrot.slane %v4192_v44, %v13020_v21  ;;  %v4196_v34 = vmax.f32 %v13039_v7, %v4025_v58 }
 0x219   :  { %v3574_v57 = vsel %vm3418_vm9, %v20888_v54, %v3573_v4  ;;  %v4197_v30 = vmax.f32 %v13043_v8, %v3760_v14  ;;  %v1807_v54 = vrot.slane %v1793_v15, %v13009_v27  ;;  %v3241_v4 = vrot.slane %v13908_v5, %v12993_v31 }
 0x21a   :  { %20889 = vst [vmem:[#allocation90_spill] sm:$0xff] %v14106_v40  ;;  %20890 = vst [vmem:[#allocation91_spill] sm:$0xff] %v14109_v12  ;;  %v4198_v29 = vmax.f32 %v13046_v49, %v4026_v26  ;;  %v4386_v13 = vrot.slane %v4191_v61, %v12993_v31  ;;  %v4390_v51 = vrot.slane %v4191_v61, %v13020_v21  ;;  %v1225_v61 = vpop.f32.mrf.mxu0  ;;  %v11647_v5 = vrot.slane %v1800_v9, 9 }
 0x21b   :  { %v14121_v44 = vrot.slane %v4193_v62, %v12993_v31  ;;  %v14124_v33 = vrot.slane %v4193_v62, %v13020_v21  ;;  %v14127_v7 = vrot.slane %v4194_v35, %v12993_v31  ;;  %v14130_v8 = vrot.slane %v4195_v48, %v12993_v31 }
 0x21c   :  { %v14133_v14 = vrot.slane %v4195_v48, %v13020_v21  ;;  %v14136_v49 = vrot.slane %v4194_v35, %v13020_v21  ;;  %v14140_v26 = vsel %vm3414_vm7, %v14106_v40, %v4386_v13  ;;  %v14144_v62 = vsel %vm3414_vm7, %v14109_v12, %v4390_v51 }
 0x21d   :  { %20891 = vst [vmem:[#allocation92_spill] sm:$0xff] %v14121_v44  ;;  %20892 = vst [vmem:[#allocation93_spill] sm:$0xff] %v14124_v33  ;;  %v1808_v58 = vcombine.high %v1800_v9, %v1800_v9  ;;  %v14147_v15 = vrot.slane %v4196_v34, %v13020_v21  ;;  %v1809_v18 = vcombine.high %v1807_v54, %v1807_v54  ;;  %v11649_v45 = vrot.slane %v1807_v54, 9 }
 0x21e   :  { %20893 = vst [vmem:[#allocation94_spill] sm:$0xff] %v14127_v7  ;;  %20894 = vst [vmem:[#allocation95_spill] sm:$0xff] %v14130_v8  ;;  %v20900_v48 = vrot.slane %v13906_v1, %v13020_v21  ;;  %v20901_v51 = vrot.slane %v13891_v55, %v12993_v31  ;;  %v14162_v11 = vrot.slane %v4196_v34, %v12993_v31 }
 0x21f   :  { %20895 = vst [vmem:[#allocation96_spill] sm:$0xff] %v14133_v14  ;;  %20896 = vst [vmem:[#allocation97_spill] sm:$0xff] %v14136_v49  ;;  %v11648_v47 = vrot.slane %v1808_v58, 9  ;;  %v14165_v6 = vrot.slane %v4197_v30, %v12993_v31  ;;  %v11650_v2 = vrot.slane %v1809_v18, 9 }
 0x220   :  { %20897 = vst [vmem:[#allocation98_spill] sm:$0xff] %v14140_v26  ;;  %20898 = vst [vmem:[#allocation99_spill] sm:$0xff] %v14144_v62  ;;  %v3575_v35 = vsel %vm3420_vm10, %v20900_v48, %v3574_v57  ;;  %v20902_v62 = vrot.slane %v13904_v56, %v12993_v31  ;;  %v14169_v48 = vrot.slane %v4197_v30, %v13020_v21 }
 0x221   :  { %20899 = vst [vmem:[#allocation100_spill] sm:$0xff] %v14147_v15  ;;  %v3576_v13 = vsel %vm3422_vm11, %v3237_v17, %v3575_v35  ;;  %20903 = vst [vmem:[#allocation101_spill] sm:$0xff] %v14162_v11  ;;  %v14172_v17 = vrot.slane %v4198_v29, %v12993_v31  ;;  %v14180_v56 = vrot.slane %v4198_v29, %v13020_v21 }
 0x222   :  { %v3565_v26 = vsel %vm3414_vm7, %v20902_v62, %v20901_v51  ;;  %20904 = vst [vmem:[#allocation102_spill] sm:$0xff] %v14165_v6  ;;  %v3577_v57 = vsel %vm3424_vm12, %v3245_v46, %v3576_v13  ;;  %20905 = vst [vmem:[#allocation103_spill] sm:$0xff] %v14169_v48  ;;  %v20907_v62 = vrot.slane %v13893_v0, %v12993_v31  ;;  %v1227_v51 = vpop.f32.mrf.mxu0  ;;  %v3620_v13 = vpop.permute.xlu1 %3619 }
 0x223   :  { %20906 = vst [vmem:[#allocation104_spill] sm:$0xff] %v14172_v17  ;;  %v3578_v35 = vsel %vm3426_vm13, %v3253_v41, %v3577_v57  ;;  %20908 = vst [vmem:[#allocation105_spill] sm:$0xff] %v14180_v56  ;;  %v14185_v46 = vsel %vm3414_vm7, %v14147_v15, %v14133_v14  ;;  %v3249_v30 = vrot.slane %v13931_v23, %v12993_v31  ;;  %v3618_v57 = vpop.permute.xlu0 %3617 }
 0x224   :  { %v3566_v34 = vsel %vm3416_vm8, %v20907_v62, %v3565_v26  ;;  %20909 = vst [vmem:[#allocation106_spill] sm:$0xff] %v14185_v46  ;;  %3663 = vrot.lane.b32.xlu1 %v3578_v35, %s12098_s2  ;;  %v1220_v41 = vadd.f32 %v1219_v50, %v13000_v22  ;;  %v14191_v0 = vmax.f32 %v1800_v9, %v11647_v5  ;;  %v3712_v9 = vsel %vm3710_vm14, %v3620_v13, 0.0 }
 0x225   :  { %v14193_v26 = vmax.f32 %v1808_v58, %v11648_v47  ;;  %v14195_v29 = vmax.f32 %v1807_v54, %v11649_v45  ;;  %v20913_v62 = vrot.slane %v13912_v38, %v12993_v31  ;;  %v14201_v46 = vmax.f32 %v1809_v18, %v11650_v2 }
 0x226   :  { %20910 = vst [vmem:[#allocation107_spill] sm:$0xff] %v14191_v0  ;;  %v20915_v35 = vrot.slane %v13906_v1, %v12993_v31  ;;  %v1222_v23 = vadd.f32 %v1221_v25, %v13004_v53  ;;  %v1226_v5 = vadd.f32 %v1225_v61, %v13000_v22  ;;  %v1228_v45 = vadd.f32 %v1227_v51, %v13004_v53 }
 0x227   :  { %20911 = vst [vmem:[#allocation108_spill] sm:$0xff] %v14193_v26  ;;  %20912 = vst [vmem:[#allocation109_spill] sm:$0xff] %v14195_v29  ;;  %v3567_v55 = vsel %vm3418_vm9, %v20913_v62, %v3566_v34  ;;  %v3679_v54 = vsel %vm3677_vm15, %v3618_v57, %v3620_v13  ;;  %v1282_v18 = vmax.f32 %v1220_v41, 0.0  ;;  %v3301_v1 = vrot.slane %v14068_v24, %v13020_v21 }
 0x228   :  { %20914 = vst [vmem:[#allocation110_spill] sm:$0xff] %v14201_v46  ;;  %v3568_v50 = vsel %vm3420_vm10, %v20915_v35, %v3567_v55  ;;  %v1283_v58 = vmax.f32 %v1222_v23, 0.0  ;;  %v1284_v34 = vmax.f32 %v1226_v5, 0.0  ;;  %v1285_v55 = vmax.f32 %v1228_v45, 0.0 }
 0x229   :  { %v3569_v47 = vsel %vm3422_vm11, %v3233_v59, %v3568_v50  ;;  %v3761_v35 = vcombine.low %v3679_v54, %v3712_v9  ;;  %v3762_v25 = vcombine.high %v3679_v54, %v3712_v9 }
 0x22a   :  { %v3570_v2 = vsel %vm3424_vm12, %v3241_v4, %v3569_v47  ;;  %v1810_v59 = vcombine.low %v1282_v18, %v1283_v58  ;;  %v1811_v61 = vcombine.high %v1282_v18, %v1283_v58  ;;  %v1828_v51 = vcombine.low %v1284_v34, %v1285_v55 }
 0x22b   :  { %v3571_v62 = vsel %vm3426_vm13, %v3249_v30, %v3570_v2  ;;  %v1829_v30 = vcombine.high %v1284_v34, %v1285_v55  ;;  %v3769_v45 = vrot.slane %v3761_v35, %v13009_v27  ;;  %v3776_v9 = vrot.slane %v3762_v25, %v13009_v27 }
 0x22c   :  { %3661 = vrot.lane.b32.xlu0 %v3571_v62, %s12098_s2  ;;  %v1818_v57 = vrot.slane %v1810_v59, %v13009_v27  ;;  %v1825_v50 = vrot.slane %v1811_v61, %v13009_v27  ;;  %v1836_v5 = vrot.slane %v1828_v51, %v13009_v27  ;;  %v3285_v61 = vrot.slane %v14001_v20, %v13020_v21 }
 0x22d   :  { %v1843_v47 = vrot.slane %v1829_v30, %v13009_v27  ;;  %v3293_v25 = vrot.slane %v14065_v28, %v13020_v21  ;;  %v14244_v41 = vcombine.high %v3769_v45, %v3769_v45  ;;  %v4027_v53 = vrot.slane %v3769_v45, 1 }
 0x22e   :  { %v1826_v54 = vcombine.high %v1818_v57, %v1818_v57  ;;  %v1827_v2 = vcombine.high %v1825_v50, %v1825_v50  ;;  %v11651_v18 = vrot.slane %v1818_v57, 9  ;;  %v11653_v58 = vrot.slane %v1825_v50, 9 }
 0x22f   :  { %v1844_v34 = vcombine.high %v1836_v5, %v1836_v5  ;;  %v1845_v62 = vcombine.high %v1843_v47, %v1843_v47  ;;  %v11655_v55 = vrot.slane %v1836_v5, 9  ;;  %v11657_v23 = vrot.slane %v1843_v47, 9 }
 0x230   :  { %v11652_v4 = vrot.slane %v1826_v54, 9  ;;  %v11654_v59 = vrot.slane %v1827_v2, 9  ;;  %v14234_v22 = vmax.f32 %v1825_v50, %v11653_v58  ;;  %v14248_v50 = vmax.f32 %v1818_v57, %v11651_v18 }
 0x231   :  { %v11656_v51 = vrot.slane %v1844_v34, 9  ;;  %v11658_v30 = vrot.slane %v1845_v62, 9  ;;  %v14238_v35 = vmax.f32 %v1836_v5, %v11655_v55  ;;  %v14250_v58 = vmax.f32 %v1843_v47, %v11657_v23 }
 0x232   :  { %20916 = vst [vmem:[#allocation111_spill] sm:$0xff] %v14234_v22  ;;  %v14242_v13 = vmax.f32 %v1827_v2, %v11654_v59  ;;  %20919 = vst [vmem:[#allocation114_spill] sm:$0xff] %v14248_v50  ;;  %v4029_v38 = vrot.slane %v3776_v9, 1  ;;  %v4199_v12 = vmax.f32 %v13063_v16, %v3769_v45  ;;  %v14253_v5 = vmax.f32 %v1826_v54, %v11652_v4  ;;  %v3624_v4 = vpop.permute.xlu1 %3623 }
 0x233   :  { %20917 = vst [vmem:[#allocation112_spill] sm:$0xff] %v14238_v35  ;;  %20920 = vst [vmem:[#allocation115_spill] sm:$0xff] %v14250_v58  ;;  %v14259_v59 = vmax.f32 %v1844_v34, %v11656_v51  ;;  %v14263_v57 = vmax.f32 %v1845_v62, %v11658_v30  ;;  %v4200_v45 = vmax.f32 %v13078_v10, %v4027_v53  ;;  %v3622_v51 = vpop.permute.xlu0 %3621 }
 0x234   :  { %20918 = vst [vmem:[#allocation113_spill] sm:$0xff] %v14242_v13  ;;  %20921 = vst [vmem:[#allocation116_spill] sm:$0xff] %v14253_v5  ;;  %v14274_v54 = vmax.f32 %v13069_v32, %v14244_v41  ;;  %v20924_v18 = vrot.slane %v13977_v36, %v13020_v21  ;;  %v20925_v34 = vrot.slane %v13998_v43, %v13020_v21 }
 0x235   :  { %20922 = vst [vmem:[#allocation117_spill] sm:$0xff] %v14259_v59  ;;  %20923 = vst [vmem:[#allocation118_spill] sm:$0xff] %v14263_v57  ;;  %v14284_v30 = vmax.f32 %v13117_v37, %v3776_v9  ;;  %v20927_v23 = vrot.slane %v13981_v52, %v13020_v21  ;;  %v3281_v32 = vrot.slane %v14001_v20, %v12993_v31 }
 0x236   :  { %v3584_v62 = vsel %vm3414_vm7, %v20925_v34, %v20924_v18  ;;  %v3289_v53 = vrot.slane %v14065_v28, %v12993_v31  ;;  %v3297_v18 = vrot.slane %v14068_v24, %v12993_v31  ;;  %v20928_v37 = vrot.slane %v13977_v36, %v12993_v31  ;;  %v20941_v28 = vld [vmem:[#allocation8_spill] sm:$0xff]  ;;  %v20943_v36 = vld [vmem:[#allocation10_spill] sm:$0xff] }
 0x237   :  { %20926 = vst [vmem:[#allocation119_spill] sm:$0xff] %v14284_v30  ;;  %v3585_v10 = vsel %vm3416_vm8, %v20927_v23, %v3584_v62  ;;  %v20929_v9 = vrot.slane %v13998_v43, %v12993_v31  ;;  %v3713_v23 = vsel %vm3710_vm14, %v3624_v4, 0.0  ;;  %v14306_v62 = vmax.f32 %v13125_v42, %v4029_v38 }
 0x238   :  { %v3586_v40 = vsel %vm3418_vm9, %v3285_v61, %v3585_v10  ;;  %v20931_v61 = vrot.slane %v13981_v52, %v12993_v31  ;;  %v3680_v16 = vsel %vm3677_vm15, %v3622_v51, %v3624_v4  ;;  %v14320_v42 = vrot.slane %v4199_v12, %v13020_v21 }
 0x239   :  { %v3579_v34 = vsel %vm3414_vm7, %v20929_v9, %v20928_v37  ;;  %20930 = vst [vmem:[#allocation120_spill] sm:$0xff] %v14306_v62  ;;  %v3587_v55 = vsel %vm3420_vm10, %v3293_v25, %v3586_v40  ;;  %v3778_v20 = vcombine.low %v3680_v16, %v3713_v23  ;;  %v3779_v37 = vcombine.high %v3680_v16, %v3713_v23  ;;  %v7451_v23 = vld [vmem:[%s20263_s3 + $0xe0] sm:$0xff] }
 0x23a   :  { %v3580_v10 = vsel %vm3416_vm8, %v20931_v61, %v3579_v34  ;;  %v3588_v47 = vsel %vm3422_vm11, %v3301_v1, %v3587_v55  ;;  %v14317_v9 = vrot.slane %v4199_v12, %v12993_v31  ;;  %20933 = vst [vmem:[#allocation122_spill] sm:$0xff] %v14320_v42  ;;  %v20934_v40 = vrot.slane %v14041_v63, %v13020_v21  ;;  %v7454_v55 = vld [vmem:[%s20263_s3 + $0xf8] sm:$0xff]  ;;  %v7453_v12 = vld [vmem:[%s20263_s3 + $0xf0] sm:$0xff] }
 0x23b   :  { %v3581_v2 = vsel %vm3418_vm9, %v3281_v32, %v3580_v10  ;;  %3667 = vrot.lane.b32.xlu1 %v3588_v47, %s12098_s2  ;;  %v20935_v1 = vrot.slane %v14050_v39, %v13020_v21  ;;  %v3793_v4 = vrot.slane %v3779_v37, %v13009_v27  ;;  %v20936_v47 = vrot.slane %v14191_v0, %v13020_v21  ;;  %v7452_v32 = vld [vmem:[%s20263_s3 + $0xe8] sm:$0xff] }
 0x23c   :  { %20932 = vst [vmem:[#allocation121_spill] sm:$0xff] %v14317_v9  ;;  %v3582_v38 = vsel %vm3420_vm10, %v3289_v53, %v3581_v2  ;;  %v3786_v2 = vrot.slane %v3778_v20, %v13009_v27  ;;  %8705 = vmatprep.subr.mxu1 %v7454_v55  ;;  %v14348_v53 = vrot.slane %v4200_v45, %v12993_v31 }
 0x23d   :  { %v3596_v25 = vsel %vm3414_vm7, %v20935_v1, %v20934_v40  ;;  %v3583_v16 = vsel %vm3422_vm11, %v3297_v18, %v3582_v38  ;;  %v14351_v34 = vrot.slane %v4200_v45, %v13020_v21  ;;  %v3349_v18 = vrot.slane %v14201_v46, %v13020_v21  ;;  %8706 = vmatpush1.msra.mxu1 %v7453_v12  ;;  %v7450_v45 = vld [vmem:[%s20263_s3 + $0xd8] sm:$0xff]  ;;  %v7449_v12 = vld [vmem:[%s20263_s3 + $0xd0] sm:$0xff] }
 0x23e   :  { %v3597_v51 = vsel %vm3416_vm8, %v20936_v47, %v3596_v25  ;;  %20937 = vst [vmem:[#allocation123_spill] sm:$0xff] %v14348_v53  ;;  %3665 = vrot.lane.b32.xlu0 %v3583_v16, %s12098_s2  ;;  %v3794_v61 = vcombine.high %v3786_v2, %v3786_v2  ;;  %v3795_v10 = vcombine.high %v3793_v4, %v3793_v4  ;;  %v4030_v37 = vrot.slane %v3786_v2, 1 }
 0x23f   :  { %20938 = vst [vmem:[#allocation124_spill] sm:$0xff] %v14351_v34  ;;  %v4032_v38 = vrot.slane %v3793_v4, 1  ;;  %v4205_v40 = vmax.f32 %v13103_v3, %v3786_v2  ;;  %v3357_v1 = vrot.slane %v14248_v50, %v13020_v21  ;;  %v3365_v25 = vrot.slane %v14253_v5, %v13020_v21  ;;  %8707 = vmatprep.subr.mxu1 %v7452_v32  ;;  %v20940_v2 = vld [vmem:[#allocation7_spill] sm:$0xff] }
 0x240   :  { %v20939_v55 = vrot.slane %v14193_v26, %v13020_v21  ;;  %v4031_v47 = vrot.slane %v3794_v61, 1  ;;  %v4033_v20 = vrot.slane %v3795_v10, 1  ;;  %v4206_v3 = vmax.f32 %v13111_v19, %v4030_v37  ;;  %8708 = vmatpush1.msra.mxu1 %v7451_v23 }
 0x241   :  { %v4207_v62 = vmax.f32 %v20940_v2, %v3794_v61  ;;  %v4209_v24 = vmax.f32 %v20941_v28, %v3793_v4  ;;  %v3345_v52 = vrot.slane %v14201_v46, %v12993_v31  ;;  %8709 = vmatprep.subr.mxu1 %v7450_v45  ;;  %v14387_v30 = vmax.f32 %v20943_v36, %v4032_v38  ;;  %v20944_v4 = vld [vmem:[#allocation12_spill] sm:$0xff] }
 0x242   :  { %v3598_v16 = vsel %vm3418_vm9, %v20939_v55, %v3597_v51  ;;  %v3353_v51 = vrot.slane %v14248_v50, %v12993_v31  ;;  %v20942_v55 = vld [vmem:[#allocation9_spill] sm:$0xff]  ;;  %v14390_v19 = vrot.slane %v4206_v3, %v12993_v31  ;;  %v14393_v28 = vrot.slane %v4206_v3, %v13020_v21  ;;  %8710 = vmatpush1.msra.mxu1 %v7449_v12  ;;  %v7447_v12 = vld [vmem:[%s20263_s3 + $0xc0] sm:$0xff]  ;;  %v20948_v3 = vld [vmem:[#allocation15_spill] sm:$0xff] }
 0x243   :  { %v4208_v43 = vmax.f32 %v20942_v55, %v4031_v47  ;;  %v14396_v23 = vmax.f32 %v20944_v4, %v3795_v10  ;;  %v4466_v61 = vrot.slane %v4205_v40, %v12993_v31  ;;  %v20945_v37 = vrot.slane %v14195_v29, %v13020_v21  ;;  %v7448_v10 = vld [vmem:[%s20263_s3 + $0xc8] sm:$0xff] }
 0x244   :  { %v20946_v36 = vrot.slane %v14041_v63, %v12993_v31  ;;  %v20947_v38 = vrot.slane %v14050_v39, %v12993_v31  ;;  %v14420_v2 = vmax.f32 %v20948_v3, %v4033_v20  ;;  %v4470_v55 = vrot.slane %v4205_v40, %v13020_v21  ;;  %8711 = vmatprep.subr.mxu1 %v7448_v10 }
 0x245   :  { %v3599_v45 = vsel %vm3420_vm10, %v20945_v37, %v3598_v16  ;;  %v7446_v16 = vld [vmem:[%s20263_s3 + $0xb8] sm:$0xff]  ;;  %v14424_v4 = vrot.slane %v4207_v62, %v12993_v31  ;;  %v14427_v37 = vrot.slane %v4207_v62, %v13020_v21  ;;  %v14436_v32 = vrot.slane %v4208_v43, %v13020_v21  ;;  %8712 = vmatpush1.msra.mxu1 %v7447_v12  ;;  %v7444_v62 = vld [vmem:[%s20263_s3 + $0xa8] sm:$0xff] }
 0x246   :  { %v3589_v47 = vsel %vm3414_vm7, %v20947_v38, %v20946_v36  ;;  %v7445_v36 = vld [vmem:[%s20263_s3 + $0xb0] sm:$0xff]  ;;  %v14433_v38 = vrot.slane %v4208_v43, %v12993_v31  ;;  %v14439_v20 = vrot.slane %v4209_v24, %v12993_v31  ;;  %v14442_v40 = vrot.slane %v4209_v24, %v13020_v21  ;;  %8713 = vmatprep.subr.mxu1 %v7446_v16 }
 0x247   :  { %20949 = vst [vmem:[#allocation7_spill] sm:$0xff] %v14424_v4  ;;  %20950 = vst [vmem:[#allocation8_spill] sm:$0xff] %v14427_v37  ;;  %v14449_v10 = vrot.slane %v14387_v30, %v12993_v31  ;;  %v14453_v3 = vsel %vm3414_vm7, %v14390_v19, %v4466_v61  ;;  %v14457_v43 = vsel %vm3414_vm7, %v14393_v28, %v4470_v55  ;;  %8714 = vmatpush1.msra.mxu1 %v7445_v36  ;;  %v7443_v55 = vld [vmem:[%s20263_s3 + $0xa0] sm:$0xff] }
 0x248   :  { %20951 = vst [vmem:[#allocation9_spill] sm:$0xff] %v14433_v38  ;;  %20952 = vst [vmem:[#allocation10_spill] sm:$0xff] %v14436_v32  ;;  %v3600_v24 = vsel %vm3422_vm11, %v3349_v18, %v3599_v45  ;;  %v20958_v50 = vrot.slane %v14191_v0, %v12993_v31  ;;  %v3397_v39 = vrot.slane %v14259_v59, %v13020_v21  ;;  %8715 = vmatprep.subr.mxu1 %v7444_v62 }
 0x249   :  { %20953 = vst [vmem:[#allocation12_spill] sm:$0xff] %v14439_v20  ;;  %20954 = vst [vmem:[#allocation15_spill] sm:$0xff] %v14442_v40  ;;  %v3601_v12 = vsel %vm3424_vm12, %v3357_v1, %v3600_v24  ;;  %v3405_v61 = vrot.slane %v14250_v58, %v13020_v21  ;;  %v20959_v1 = vrot.slane %v14193_v26, %v12993_v31  ;;  %v3628_v24 = vpop.permute.xlu1 %3627  ;;  %8716 = vmatpush1.msra.mxu1 %v7443_v55 }
 0x24a   :  { %20955 = vst [vmem:[#allocation125_spill] sm:$0xff] %v14449_v10  ;;  %20956 = vst [vmem:[#allocation126_spill] sm:$0xff] %v14453_v3  ;;  %v3590_v46 = vsel %vm3416_vm8, %v20958_v50, %v3589_v47  ;;  %v3602_v18 = vsel %vm3426_vm13, %v3365_v25, %v3601_v12  ;;  %v3413_v50 = vrot.slane %v14263_v57, %v13020_v21  ;;  %v7442_v25 = vld [vmem:[%s20263_s3 + $0x98] sm:$0xff]  ;;  %v3626_v3 = vpop.permute.xlu0 %3625 }
 0x24b   :  { %20957 = vst [vmem:[#allocation127_spill] sm:$0xff] %v14457_v43  ;;  %v3591_v45 = vsel %vm3418_vm9, %v20959_v1, %v3590_v46  ;;  %v20960_v47 = vrot.slane %v14234_v22, %v13020_v21  ;;  %v20961_v16 = vrot.slane %v14242_v13, %v13020_v21  ;;  %v7582_v46 = vld [vmem:[%s20263_s3 + $0x4f8] sm:$0xff]  ;;  %3671 = vrot.lane.b32.xlu1 %v3602_v18, %s12098_s2  ;;  %v7441_v18 = vld [vmem:[%s20263_s3 + $0x90] sm:$0xff] }
 0x24c   :  { %v20962_v12 = vrot.slane %v14195_v29, %v12993_v31  ;;  %v3401_v43 = vrot.slane %v14250_v58, %v12993_v31  ;;  %8717 = vmatprep.subr.mxu1 %v7442_v25  ;;  %8955 = vmatprep.subr.mxu0 %v7582_v46  ;;  %v20967_v55 = vrot.slane %v14253_v5, %v12993_v31 }
 0x24d   :  { %v3608_v36 = vsel %vm3414_vm7, %v20961_v16, %v20960_v47  ;;  %v20963_v47 = vrot.slane %v14238_v35, %v13020_v21  ;;  %v3393_v16 = vrot.slane %v14259_v59, %v12993_v31  ;;  %8718 = vmatpush1.msra.mxu1 %v7441_v18  ;;  %v7580_v18 = vld [vmem:[%s20263_s3 + $0x4e8] sm:$0xff] }
 0x24e   :  { %v3592_v1 = vsel %vm3420_vm10, %v20962_v12, %v3591_v45  ;;  %v3409_v12 = vrot.slane %v14263_v57, %v12993_v31  ;;  %v20978_v57 = vld [vmem:[#allocation18_spill] sm:$0xff] }
 0x24f   :  { %v3609_v62 = vsel %vm3416_vm8, %v20963_v47, %v3608_v36  ;;  %v3593_v29 = vsel %vm3422_vm11, %v3345_v52, %v3592_v1  ;;  %v20964_v36 = vrot.slane %v14234_v22, %v12993_v31  ;;  %v20965_v47 = vrot.slane %v14242_v13, %v12993_v31 }
 0x250   :  { %v3610_v45 = vsel %vm3418_vm9, %v3397_v39, %v3609_v62  ;;  %v3594_v58 = vsel %vm3424_vm12, %v3353_v51, %v3593_v29  ;;  %v20966_v52 = vrot.slane %v14238_v35, %v12993_v31  ;;  %v3714_v1 = vsel %vm3710_vm14, %v3628_v24, 0.0  ;;  %v7581_v62 = vld [vmem:[%s20263_s3 + $0x4f0] sm:$0xff] }
 0x251   :  { %v3603_v59 = vsel %vm3414_vm7, %v20965_v47, %v20964_v36  ;;  %v3611_v26 = vsel %vm3420_vm10, %v3405_v61, %v3610_v45  ;;  %v3595_v29 = vsel %vm3426_vm13, %v20967_v55, %v3594_v58  ;;  %v3681_v45 = vsel %vm3677_vm15, %v3626_v3, %v3628_v24  ;;  %8956 = vmatpush1.msra.mxu0 %v7581_v62  ;;  %v3632_v62 = vpop.permute.xlu1 %3631  ;;  %v7579_v55 = vld [vmem:[%s20263_s3 + $0x4e0] sm:$0xff] }
 0x252   :  { %v3604_v39 = vsel %vm3416_vm8, %v20966_v52, %v3603_v59  ;;  %v3612_v51 = vsel %vm3422_vm11, %v3413_v50, %v3611_v26  ;;  %3669 = vrot.lane.b32.xlu0 %v3595_v29, %s12098_s2  ;;  %v3796_v25 = vcombine.low %v3681_v45, %v3714_v1  ;;  %v3797_v46 = vcombine.high %v3681_v45, %v3714_v1  ;;  %v7438_v29 = vld [vmem:[%s20263_s3 + $0x78] sm:$0xff] }
 0x253   :  { %v3605_v61 = vsel %vm3418_vm9, %v3393_v16, %v3604_v39  ;;  %3675 = vrot.lane.b32.xlu1 %v3612_v51, %s12098_s2  ;;  %v14541_v36 = vrot.slane %v14387_v30, %v13020_v21  ;;  %v5551_v26 = vsel %vm3414_vm7, %v14127_v7, %v14121_v44  ;;  %v5558_v3 = vsel %vm3414_vm7, %v14136_v49, %v14124_v33  ;;  %v7440_v16 = vld [vmem:[%s20263_s3 + $0x88] sm:$0xff] }
 0x254   :  { %v3606_v59 = vsel %vm3420_vm10, %v3401_v43, %v3605_v61  ;;  %v3804_v50 = vrot.slane %v3796_v25, %v13009_v27  ;;  %v5552_v43 = vsel %vm3416_vm8, %v14130_v8, %v5551_v26  ;;  %v14555_v30 = vrot.slane %v14274_v54, %v12993_v31  ;;  %8719 = vmatprep.subr.mxu1 %v7440_v16  ;;  %v7578_v25 = vld [vmem:[%s20263_s3 + $0x4d8] sm:$0xff]  ;;  %v7437_v16 = vld [vmem:[%s20263_s3 + $0x70] sm:$0xff] }
 0x255   :  { %20968 = vst [vmem:[#allocation128_spill] sm:$0xff] %v14541_v36  ;;  %v3607_v58 = vsel %vm3422_vm11, %v3409_v12, %v3606_v59  ;;  %v5559_v24 = vsel %vm3416_vm8, %v14133_v14, %v5558_v3  ;;  %v7439_v12 = vld [vmem:[%s20263_s3 + $0x80] sm:$0xff]  ;;  %v14570_v47 = vrot.slane %v14396_v23, %v12993_v31  ;;  %v14573_v52 = vrot.slane %v3797_v46, %v13009_v27 }
 0x256   :  { %20969 = vst [vmem:[#allocation129_spill] sm:$0xff] %v14555_v30  ;;  %v5553_v39 = vsel %vm3418_vm9, %v14162_v11, %v5552_v43  ;;  %v5560_v1 = vsel %vm3418_vm9, %v14147_v15, %v5559_v24  ;;  %v14587_v51 = vrot.slane %v14396_v23, %v13020_v21  ;;  %3673 = vrot.lane.b32.xlu0 %v3607_v58, %s12098_s2  ;;  %v4034_v45 = vrot.slane %v3804_v50, 1  ;;  %v3630_v24 = vpop.permute.xlu0 %3629 }
 0x257   :  { %20970 = vst [vmem:[#allocation130_spill] sm:$0xff] %v14570_v47  ;;  %v14590_v61 = vcombine.high %v3804_v50, %v3804_v50  ;;  %v14594_v59 = vrot.slane %v14274_v54, %v13020_v21  ;;  %8957 = vmatprep.subr.mxu0 %v7580_v18  ;;  %v14601_v46 = vrot.slane %v14420_v2, %v12993_v31  ;;  %v3715_v43 = vsel %vm3710_vm14, %v3632_v62, 0.0 }
 0x258   :  { %20971 = vst [vmem:[#allocation131_spill] sm:$0xff] %v14587_v51  ;;  %v14605_v23 = vrot.slane %v14420_v2, %v13020_v21  ;;  %v5554_v58 = vsel %vm3420_vm10, %v14165_v6, %v5553_v39  ;;  %v5561_v54 = vsel %vm3420_vm10, %v14169_v48, %v5560_v1  ;;  %8720 = vmatpush1.msra.mxu1 %v7439_v12  ;;  %v4036_v18 = vrot.slane %v14573_v52, 1  ;;  %v20976_v12 = vld [vmem:[#allocation11_spill] sm:$0xff] }
 0x259   :  { %20972 = vst [vmem:[#allocation132_spill] sm:$0xff] %v14594_v59  ;;  %20973 = vst [vmem:[#allocation133_spill] sm:$0xff] %v14601_v46  ;;  %v14614_v26 = vsel %vm3414_vm7, %v14541_v36, %v14442_v40  ;;  %v14617_v3 = vmax.f32 %v13187_v60, %v4034_v45  ;;  %v5253_v2 = vsel %vm3414_vm7, %v14555_v30, %v14348_v53  ;;  %8958 = vmatpush1.msra.mxu0 %v7579_v55  ;;  %v20977_v60 = vld [vmem:[#allocation16_spill] sm:$0xff] }
 0x25a   :  { %20974 = vst [vmem:[#allocation134_spill] sm:$0xff] %v14605_v23  ;;  %20975 = vst [vmem:[#allocation135_spill] sm:$0xff] %v14614_v26  ;;  %8721 = vmatprep.subr.mxu1 %v7438_v29  ;;  %v4213_v39 = vmax.f32 %v20976_v12, %v3804_v50  ;;  %v14630_v1 = vmax.f32 %v20977_v60, %v14590_v61  ;;  %v5555_v45 = vsel %vm3422_vm11, %v14172_v17, %v5554_v58  ;;  %v3634_v0 = vpop.permute.xlu0 %3633  ;;  %v20990_v26 = vld [vmem:[#allocation14_spill] sm:$0xff] }
 0x25b   :  { %8959 = vmatprep.subr.mxu0 %v7578_v25  ;;  %v14636_v55 = vmax.f32 %v20978_v57, %v14573_v52  ;;  %v5556_v29 = vsel %vm3424_vm12, %v14317_v9, %v5555_v45  ;;  %5371 = vrot.lane.b32.xlu0 %v5253_v2, %s12094_s29  ;;  %v5562_v50 = vsel %vm3422_vm11, %v14180_v56, %v5561_v54  ;;  %v7577_v25 = vld [vmem:[%s20263_s3 + $0x4d0] sm:$0xff]  ;;  %v7436_v57 = vld [vmem:[%s20263_s3 + $0x68] sm:$0xff]  ;;  %v20981_v2 = vld [vmem:[#allocation90_spill] sm:$0xff] }
 0x25c   :  { %v5254_v12 = vsel %vm3414_vm7, %v14594_v59, %v14351_v34  ;;  %v14654_v52 = vrot.slane %v14617_v3, %v12993_v31  ;;  %v5557_v58 = vsel %vm3426_vm13, %v14348_v53, %v5556_v29  ;;  %v3682_v54 = vsel %vm3677_vm15, %v3630_v24, %v3632_v62  ;;  %8722 = vmatpush1.msra.mxu1 %v7437_v16  ;;  %v7576_v29 = vld [vmem:[%s20263_s3 + $0x4c8] sm:$0xff] }
 0x25d   :  { %20979 = vst [vmem:[#allocation11_spill] sm:$0xff] %v14636_v55  ;;  %v5239_v60 = vsel %vm3414_vm7, %v14121_v44, %v20981_v2  ;;  %5679 = vrot.lane.b32.xlu1 %v5557_v58, %s12096_s28  ;;  %v5563_v45 = vsel %vm3424_vm12, %v14320_v42, %v5562_v50  ;;  %v3813_v22 = vcombine.low %v3682_v54, %v3715_v43  ;;  %v20983_v58 = vld [vmem:[#allocation91_spill] sm:$0xff]  ;;  %v7435_v50 = vld [vmem:[%s20263_s3 + $0x60] sm:$0xff] }
 0x25e   :  { %20980 = vst [vmem:[#allocation16_spill] sm:$0xff] %v14654_v52  ;;  %v3814_v35 = vcombine.high %v3682_v54, %v3715_v43  ;;  %v5240_v13 = vsel %vm3416_vm8, %v14127_v7, %v5239_v60  ;;  %v14675_v16 = vrot.slane %v14630_v1, %v12993_v31  ;;  %v5246_v43 = vsel %vm3414_vm7, %v14124_v33, %v20983_v58  ;;  %v20988_v33 = vld [vmem:[#allocation13_spill] sm:$0xff]  ;;  %v20989_v55 = vld [vmem:[#allocation19_spill] sm:$0xff] }
 0x25f   :  { %v5241_v24 = vsel %vm3418_vm9, %v14130_v8, %v5240_v13  ;;  %8960 = vmatpush1.msra.mxu0 %v7577_v25  ;;  %8723 = vmatprep.subr.mxu1 %v7436_v57  ;;  %v3821_v54 = vrot.slane %v3813_v22, %v13009_v27  ;;  %v5247_v60 = vsel %vm3416_vm8, %v14136_v49, %v5246_v43  ;;  %v7575_v25 = vld [vmem:[%s20263_s3 + $0x4c0] sm:$0xff]  ;;  %v20984_v57 = vld [vmem:[#allocation23_spill] sm:$0xff]  ;;  %v3636_v49 = vpop.permute.xlu1 %3635 }
 0x260   :  { %20982 = vst [vmem:[#allocation18_spill] sm:$0xff] %v14675_v16  ;;  %5373 = vrot.lane.b32.xlu0 %v5254_v12, %s12094_s29  ;;  %v3828_v13 = vrot.slane %v3814_v35, %v13009_v27  ;;  %v5242_v2 = vsel %vm3420_vm10, %v14162_v11, %v5241_v24  ;;  %v14694_v58 = vmax.f32 %v20984_v57, %v4036_v18  ;;  %v7434_v12 = vld [vmem:[%s20263_s3 + $0x58] sm:$0xff] }
 0x261   :  { %v14697_v62 = vrot.slane %v4213_v39, %v12993_v31  ;;  %v14700_v22 = vrot.slane %v4213_v39, %v13020_v21  ;;  %v5564_v35 = vsel %vm3426_vm13, %v14351_v34, %v5563_v45  ;;  %8961 = vmatprep.subr.mxu0 %v7576_v29  ;;  %v7574_v24 = vld [vmem:[%s20263_s3 + $0x4b8] sm:$0xff]  ;;  %v3829_v18 = vcombine.high %v3821_v54, %v3821_v54  ;;  %v7433_v45 = vld [vmem:[%s20263_s3 + $0x50] sm:$0xff] }
 0x262   :  { %20985 = vst [vmem:[#allocation90_spill] sm:$0xff] %v14694_v58  ;;  %5681 = vrot.lane.b32.xlu1 %v5564_v35, %s12096_s28  ;;  %v3830_v43 = vcombine.high %v3828_v13, %v3828_v13  ;;  %v4037_v57 = vrot.slane %v3821_v54, 1  ;;  %v5243_v39 = vsel %vm3422_vm11, %v14165_v6, %v5242_v2  ;;  %8724 = vmatpush1.msra.mxu1 %v7435_v50  ;;  %v4039_v29 = vrot.slane %v3828_v13, 1 }
 0x263   :  { %20986 = vst [vmem:[#allocation91_spill] sm:$0xff] %v14697_v62  ;;  %20987 = vst [vmem:[#allocation23_spill] sm:$0xff] %v14700_v22  ;;  %v4219_v44 = vmax.f32 %v20988_v33, %v3821_v54  ;;  %v5269_v5 = vsel %vm3414_vm7, %v14675_v16, %v14654_v52  ;;  %v5248_v35 = vsel %vm3418_vm9, %v14133_v14, %v5247_v60  ;;  %8962 = vmatpush1.msra.mxu0 %v7575_v25  ;;  %v7573_v33 = vld [vmem:[%s20263_s3 + $0x4b0] sm:$0xff] }
 0x264   :  { %v4038_v63 = vrot.slane %v3829_v18, 1  ;;  %v4040_v2 = vrot.slane %v3830_v43, 1  ;;  %v4220_v50 = vmax.f32 %v20989_v55, %v4037_v57  ;;  %v4221_v22 = vmax.f32 %v20990_v26, %v3829_v18  ;;  %8725 = vmatprep.subr.mxu1 %v7434_v12  ;;  %8963 = vmatprep.subr.mxu0 %v7574_v24  ;;  %v20991_v25 = vld [vmem:[#allocation20_spill] sm:$0xff]  ;;  %v7432_v26 = vld [vmem:[%s20263_s3 + $0x48] sm:$0xff]  ;;  %v20992_v55 = vld [vmem:[#allocation21_spill] sm:$0xff] }
 0x265   :  { %v14729_v54 = vrot.slane %v14617_v3, %v13020_v21  ;;  %v4223_v14 = vmax.f32 %v20991_v25, %v3828_v13  ;;  %v3716_v16 = vsel %vm3710_vm14, %v3636_v49, 0.0  ;;  %8726 = vmatpush1.msra.mxu1 %v7433_v45  ;;  %v3683_v18 = vsel %vm3677_vm15, %v3634_v0, %v3636_v49  ;;  %v7572_v13 = vld [vmem:[%s20263_s3 + $0x4a8] sm:$0xff]  ;;  %v20993_v57 = vld [vmem:[#allocation22_spill] sm:$0xff]  ;;  %v20994_v25 = vld [vmem:[#allocation24_spill] sm:$0xff]  ;;  %8964 = vmatpush1.msra.mxu0 %v7573_v33 }
 0x266   :  { %v4222_v12 = vmax.f32 %v20992_v55, %v4038_v63  ;;  %v14740_v24 = vrot.slane %v4220_v50, %v12993_v31  ;;  %v14743_v3 = vrot.slane %v4220_v50, %v13020_v21  ;;  %5379 = vrot.lane.b32.xlu1 %v5269_v5, %s12094_s29  ;;  %v4224_v45 = vmax.f32 %v20993_v57, %v4039_v29  ;;  %v7431_v5 = vld [vmem:[%s20263_s3 + $0x40] sm:$0xff]  ;;  %v20995_v0 = vld [vmem:[#allocation32_spill] sm:$0xff] }
 0x267   :  { %v4225_v60 = vmax.f32 %v20994_v25, %v3830_v43  ;;  %v5244_v63 = vsel %vm3424_vm12, %v14172_v17, %v5243_v39  ;;  %v5249_v55 = vsel %vm3420_vm10, %v14147_v15, %v5248_v35  ;;  %v4226_v49 = vmax.f32 %v20995_v0, %v4040_v2  ;;  %8727 = vmatprep.subr.mxu1 %v7432_v26 }
 0x268   :  { %v4546_v50 = vrot.slane %v4219_v44, %v12993_v31  ;;  %v4550_v58 = vrot.slane %v4219_v44, %v13020_v21  ;;  %v14763_v29 = vrot.slane %v4221_v22, %v12993_v31  ;;  %v14766_v43 = vrot.slane %v4221_v22, %v13020_v21  ;;  %8965 = vmatprep.subr.mxu0 %v7572_v13  ;;  %v7571_v44 = vld [vmem:[%s20263_s3 + $0x4a0] sm:$0xff]  ;;  %v7430_v13 = vld [vmem:[%s20263_s3 + $0x38] sm:$0xff] }
 0x269   :  { %v14769_v39 = vrot.slane %v4222_v12, %v12993_v31  ;;  %v14772_v35 = vrot.slane %v4223_v14, %v12993_v31  ;;  %v14775_v33 = vrot.slane %v4223_v14, %v13020_v21  ;;  %v14781_v2 = vrot.slane %v4222_v12, %v13020_v21  ;;  %8728 = vmatpush1.msra.mxu1 %v7431_v5  ;;  %v21005_v5 = vld [vmem:[#allocation6_spill] sm:$0xff] }
 0x26a   :  { %20996 = vst [vmem:[#allocation13_spill] sm:$0xff] %v14763_v29  ;;  %20997 = vst [vmem:[#allocation19_spill] sm:$0xff] %v14766_v43  ;;  %v14785_v22 = vsel %vm3414_vm7, %v14740_v24, %v4546_v50  ;;  %v14789_v26 = vsel %vm3414_vm7, %v14743_v3, %v4550_v58  ;;  %v5245_v14 = vsel %vm3426_vm13, %v14317_v9, %v5244_v63  ;;  %v21004_v63 = vrot.slane %v14244_v41, 1 }
 0x26b   :  { %20998 = vst [vmem:[#allocation14_spill] sm:$0xff] %v14769_v39  ;;  %20999 = vst [vmem:[#allocation20_spill] sm:$0xff] %v14772_v35  ;;  %5367 = vrot.lane.b32.xlu0 %v5245_v14, %s12094_s29  ;;  %v5250_v12 = vsel %vm3422_vm11, %v14169_v48, %v5249_v55  ;;  %v3831_v57 = vcombine.low %v3683_v18, %v3716_v16  ;;  %v3832_v25 = vcombine.high %v3683_v18, %v3716_v16 }
 0x26c   :  { %21000 = vst [vmem:[#allocation21_spill] sm:$0xff] %v14775_v33  ;;  %21001 = vst [vmem:[#allocation22_spill] sm:$0xff] %v14781_v2  ;;  %v14801_v0 = vrot.slane %v14630_v1, %v13020_v21  ;;  %v5251_v58 = vsel %vm3424_vm12, %v14180_v56, %v5250_v12  ;;  %v4202_v50 = vmax.f32 %v21005_v5, %v21004_v63  ;;  %8966 = vmatpush1.msra.mxu0 %v7571_v44  ;;  %v7570_v1 = vld [vmem:[%s20263_s3 + $0x498] sm:$0xff]  ;;  %v7429_v44 = vld [vmem:[%s20263_s3 + $0x30] sm:$0xff] }
 0x26d   :  { %21002 = vst [vmem:[#allocation24_spill] sm:$0xff] %v14785_v22  ;;  %21003 = vst [vmem:[#allocation32_spill] sm:$0xff] %v14789_v26  ;;  %v5255_v14 = vsel %vm3414_vm7, %v14424_v4, %v14390_v19  ;;  %v5863_v55 = vsel %vm3414_vm7, %v14130_v8, %v14127_v7  ;;  %v14818_v16 = vrot.slane %v4224_v45, %v13020_v21  ;;  %8729 = vmatprep.subr.mxu1 %v7430_v13  ;;  %v7569_v13 = vld [vmem:[%s20263_s3 + $0x490] sm:$0xff] }
 0x26e   :  { %v5252_v41 = vsel %vm3426_vm13, %v14320_v42, %v5251_v58  ;;  %v3839_v18 = vrot.slane %v3831_v57, %v13009_v27  ;;  %v5270_v19 = vsel %vm3414_vm7, %v14801_v0, %v14729_v54  ;;  %v14830_v12 = vrot.slane %v3832_v25, %v13009_v27  ;;  %v7428_v25 = vld [vmem:[%s20263_s3 + $0x28] sm:$0xff]  ;;  %8967 = vmatprep.subr.mxu0 %v7570_v1 }
 0x26f   :  { %21006 = vst [vmem:[#allocation6_spill] sm:$0xff] %v14818_v16  ;;  %5381 = vrot.lane.b32.xlu1 %v5270_v19, %s12094_s29  ;;  %v14834_v63 = vrot.slane %v4202_v50, %v12993_v31  ;;  %v5256_v57 = vsel %vm3416_vm8, %v14433_v38, %v5255_v14  ;;  %v5864_v58 = vsel %vm3416_vm8, %v14162_v11, %v5863_v55  ;;  %v7568_v55 = vld [vmem:[%s20263_s3 + $0x488] sm:$0xff] }
 0x270   :  { %v14847_v5 = vrot.slane %v4224_v45, %v12993_v31  ;;  %v14850_v19 = vrot.slane %v4225_v60, %v12993_v31  ;;  %v14853_v26 = vrot.slane %v4225_v60, %v13020_v21  ;;  %5369 = vrot.lane.b32.xlu0 %v5252_v41, %s12094_s29  ;;  %v4041_v14 = vrot.slane %v3839_v18, 1  ;;  %8730 = vmatpush1.msra.mxu1 %v7429_v44  ;;  %v7567_v44 = vld [vmem:[%s20263_s3 + $0x480] sm:$0xff] }
 0x271   :  { %21007 = vst [vmem:[#allocation136_spill] sm:$0xff] %v14834_v63  ;;  %v14860_v22 = vrot.slane %v4226_v49, %v12993_v31  ;;  %v14863_v45 = vrot.slane %v4226_v49, %v13020_v21  ;;  %v5257_v15 = vsel %vm3418_vm9, %v14439_v20, %v5256_v57  ;;  %v5865_v60 = vsel %vm3418_vm9, %v14165_v6, %v5864_v58  ;;  %v3640_v49 = vpop.permute.xlu1 %3639  ;;  %v7427_v57 = vld [vmem:[%s20263_s3 + $0x20] sm:$0xff]  ;;  %v21014_v6 = vld [vmem:[#allocation25_spill] sm:$0xff] }
 0x272   :  { %21008 = vst [vmem:[#allocation137_spill] sm:$0xff] %v14847_v5  ;;  %21009 = vst [vmem:[#allocation138_spill] sm:$0xff] %v14850_v19  ;;  %v14872_v1 = vsel %vm3414_vm7, %v14818_v16, %v14775_v33  ;;  %v14874_v41 = vcombine.high %v3839_v18, %v3839_v18  ;;  %v5567_v11 = vsel %vm3414_vm7, %v14433_v38, %v14424_v4  ;;  %8968 = vmatpush1.msra.mxu0 %v7569_v13  ;;  %v21015_v4 = vld [vmem:[#allocation29_spill] sm:$0xff] }
 0x273   :  { %21010 = vst [vmem:[#allocation139_spill] sm:$0xff] %v14853_v26  ;;  %21011 = vst [vmem:[#allocation140_spill] sm:$0xff] %v14860_v22  ;;  %8731 = vmatprep.subr.mxu1 %v7428_v25  ;;  %v4043_v58 = vrot.slane %v14830_v12, 1  ;;  %v4227_v8 = vmax.f32 %v21014_v6, %v3839_v18  ;;  %v5565_v7 = vsel %vm3414_vm7, %v14834_v63, %v14555_v30  ;;  %8969 = vmatprep.subr.mxu0 %v7568_v55  ;;  %v7426_v25 = vld [vmem:[%s20263_s3 + $0x18] sm:$0xff]  ;;  %v21016_v22 = vld [vmem:[#allocation27_spill] sm:$0xff]  ;;  %v3638_v18 = vpop.permute.xlu0 %3637 }
 0x274   :  { %21012 = vst [vmem:[#allocation141_spill] sm:$0xff] %v14863_v45  ;;  %21013 = vst [vmem:[#allocation142_spill] sm:$0xff] %v14872_v1  ;;  %v5258_v13 = vsel %vm3420_vm10, %v14449_v10, %v5257_v15  ;;  %v14896_v1 = vmax.f32 %v21015_v4, %v4041_v14  ;;  %v14900_v19 = vmax.f32 %v21016_v22, %v14830_v12  ;;  %5683 = vrot.lane.b32.xlu0 %v5565_v7, %s12096_s28 }
 0x275   :  { %v5259_v6 = vsel %vm3422_vm11, %v14570_v47, %v5258_v13  ;;  %v5866_v15 = vsel %vm3420_vm10, %v14172_v17, %v5865_v60  ;;  %v5568_v14 = vsel %vm3416_vm8, %v14439_v20, %v5567_v11  ;;  %v3717_v22 = vsel %vm3710_vm14, %v3640_v49, 0.0  ;;  %8732 = vmatpush1.msra.mxu1 %v7427_v57  ;;  %8970 = vmatpush1.msra.mxu0 %v7567_v44  ;;  %v7566_v11 = vld [vmem:[%s20263_s3 + $0x478] sm:$0xff] }
 0x276   :  { %21017 = vst [vmem:[#allocation25_spill] sm:$0xff] %v14900_v19  ;;  %v5260_v55 = vsel %vm3424_vm12, %v14601_v46, %v5259_v6  ;;  %v5867_v4 = vsel %vm3422_vm11, %v14317_v9, %v5866_v15  ;;  %v5569_v60 = vsel %vm3418_vm9, %v14449_v10, %v5568_v14  ;;  %v14921_v13 = vrot.slane %v4202_v50, %v13020_v21  ;;  %v21019_v6 = vld [vmem:[#allocation106_spill] sm:$0xff]  ;;  %v21030_v19 = vld [vmem:[#allocation35_spill] sm:$0xff] }
 0x277   :  { %v5261_v7 = vsel %vm3426_vm13, %v14697_v62, %v5260_v55  ;;  %v5868_v12 = vsel %vm3424_vm12, %v14348_v53, %v5867_v4  ;;  %8733 = vmatprep.subr.mxu1 %v7426_v25  ;;  %v5570_v44 = vsel %vm3420_vm10, %v14570_v47, %v5569_v60  ;;  %v6167_v15 = vsel %vm3416_vm8, %v14169_v48, %v21019_v6  ;;  %v7425_v25 = vld [vmem:[%s20263_s3 + $0x10] sm:$0xff]  ;;  %v21020_v55 = vld [vmem:[#allocation26_spill] sm:$0xff] }
 0x278   :  { %21018 = vst [vmem:[#allocation29_spill] sm:$0xff] %v14921_v13  ;;  %5375 = vrot.lane.b32.xlu1 %v5261_v7, %s12094_s29  ;;  %v5869_v57 = vsel %vm3426_vm13, %v14555_v30, %v5868_v12  ;;  %v3684_v50 = vsel %vm3677_vm15, %v3638_v18, %v3640_v49  ;;  %v14940_v4 = vmax.f32 %v21020_v55, %v14874_v41  ;;  %v21021_v60 = vld [vmem:[#allocation34_spill] sm:$0xff]  ;;  %v7486_v30 = vld [vmem:[%s20263_s3 + $0x1f8] sm:$0xff]  ;;  %v21027_v53 = vld [vmem:[#allocation28_spill] sm:$0xff] }
 0x279   :  { %5991 = vrot.lane.b32.xlu0 %v5869_v57, %s12095_s30  ;;  %v5571_v14 = vsel %vm3422_vm11, %v14601_v46, %v5570_v44  ;;  %v6168_v7 = vsel %vm3418_vm9, %v14180_v56, %v6167_v15  ;;  %v3848_v12 = vcombine.low %v3684_v50, %v3717_v22  ;;  %v14948_v6 = vmax.f32 %v21021_v60, %v4043_v58  ;;  %v7565_v57 = vld [vmem:[%s20263_s3 + $0x470] sm:$0xff]  ;;  %v7423_v60 = vld [vmem:[%s20263_s3] sm:$0xff] }
 0x27a   :  { %v5572_v49 = vsel %vm3424_vm12, %v14697_v62, %v5571_v14  ;;  %v6169_v18 = vsel %vm3420_vm10, %v14320_v42, %v6168_v7  ;;  %v3849_v55 = vcombine.high %v3684_v50, %v3717_v22  ;;  %8971 = vmatprep.subr.mxu0 %v7566_v11  ;;  %v14958_v44 = vrot.slane %v4227_v8, %v12993_v31  ;;  %v7424_v22 = vld [vmem:[%s20263_s3 + $0x8] sm:$0xff] }
 0x27b   :  { %21022 = vst [vmem:[#allocation27_spill] sm:$0xff] %v14948_v6  ;;  %v5573_v15 = vsel %vm3426_vm13, %v14654_v52, %v5572_v49  ;;  %v6170_v58 = vsel %vm3422_vm11, %v14351_v34, %v6169_v18  ;;  %v3856_v14 = vrot.slane %v3848_v12, %v13009_v27  ;;  %8734 = vmatpush1.msra.mxu1 %v7425_v25  ;;  %v7564_v11 = vld [vmem:[%s20263_s3 + $0x468] sm:$0xff]  ;;  %v7563_v49 = vld [vmem:[%s20263_s3 + $0x460] sm:$0xff] }
 0x27c   :  { %21023 = vst [vmem:[#allocation106_spill] sm:$0xff] %v14958_v44  ;;  %5687 = vrot.lane.b32.xlu1 %v5573_v15, %s12096_s28  ;;  %v5566_v50 = vsel %vm3414_vm7, %v14921_v13, %v14594_v59  ;;  %v6171_v7 = vsel %vm3424_vm12, %v14594_v59, %v6170_v58  ;;  %v3863_v12 = vrot.slane %v3849_v55, %v13009_v27  ;;  %v7562_v59 = vld [vmem:[%s20263_s3 + $0x458] sm:$0xff]  ;;  %v21036_v6 = vld [vmem:[#allocation39_spill] sm:$0xff] }
 0x27d   :  { %v5574_v25 = vsel %vm3414_vm7, %v14436_v32, %v14427_v37  ;;  %v14988_v18 = vrot.slane %v4227_v8, %v13020_v21  ;;  %v6172_v15 = vsel %vm3426_vm13, %v14921_v13, %v6171_v7  ;;  %5685 = vrot.lane.b32.xlu0 %v5566_v50, %s12096_s28  ;;  %v3864_v55 = vcombine.high %v3856_v14, %v3856_v14  ;;  %v21026_v13 = vld [vmem:[#allocation31_spill] sm:$0xff] }
 0x27e   :  { %v4044_v58 = vrot.slane %v3856_v14, 1  ;;  %8972 = vmatpush1.msra.mxu0 %v7565_v57  ;;  %v6455_v8 = vcombine.high %v6172_v15, %v6172_v15  ;;  %v6462_v56 = vrot.slane %v6172_v15, %v13009_v27  ;;  %v3865_v48 = vcombine.high %v3863_v12, %v3863_v12  ;;  %8735 = vmatprep.subr.mxu1 %v7424_v22  ;;  %v7485_v57 = vld [vmem:[%s20263_s3 + $0x1f0] sm:$0xff] }
 0x27f   :  { %21024 = vst [vmem:[#allocation26_spill] sm:$0xff] %v14988_v18  ;;  %8973 = vmatprep.subr.mxu0 %v7564_v11  ;;  %v15006_v50 = vrot.slane %v14896_v1, %v12993_v31  ;;  %v4045_v7 = vrot.slane %v3864_v55, 1  ;;  %v5575_v17 = vsel %vm3416_vm8, %v14442_v40, %v5574_v25  ;;  %8736 = vmatpush1.msra.mxu1 %v7423_v60  ;;  %v7561_v22 = vld [vmem:[%s20263_s3 + $0x450] sm:$0xff]  ;;  %v4046_v42 = vrot.slane %v3863_v12, 1 }
 0x280   :  { %v4234_v34 = vmax.f32 %v21026_v13, %v4044_v58  ;;  %8974 = vmatpush1.msra.mxu0 %v7563_v49  ;;  %v6469_v11 = vrot.slane %v6455_v8, %v13009_v27  ;;  %v6470_v15 = vcombine.high %v6462_v56, %v6462_v56  ;;  %v4233_v9 = vmax.f32 %v21027_v53, %v3856_v14  ;;  %v7484_v13 = vld [vmem:[%s20263_s3 + $0x1e8] sm:$0xff]  ;;  %v21029_v49 = vld [vmem:[#allocation33_spill] sm:$0xff] }
 0x281   :  { %21025 = vst [vmem:[#allocation34_spill] sm:$0xff] %v15006_v50  ;;  %8737 = vmatprep.subr.mxu1 %v7486_v30  ;;  %8975 = vmatprep.subr.mxu0 %v7562_v59  ;;  %v15021_v25 = vrot.slane %v14896_v1, %v13020_v21  ;;  %v4047_v60 = vrot.slane %v3865_v48, 1  ;;  %v4235_v58 = vmax.f32 %v21029_v49, %v3864_v55  ;;  %v7560_v53 = vld [vmem:[%s20263_s3 + $0x448] sm:$0xff]  ;;  %v7483_v1 = vld [vmem:[%s20263_s3 + $0x1e0] sm:$0xff] }
 0x282   :  { %v4236_v44 = vmax.f32 %v21030_v19, %v4045_v7  ;;  %8738 = vmatpush2.msra.mxu1 %v7485_v57  ;;  %v6471_v59 = vcombine.high %v6469_v11, %v6469_v11  ;;  %v15030_v14 = vcombine.low %v6462_v56, %v6470_v15  ;;  %v15033_v8 = vrot.slane %v4234_v34, %v12993_v31  ;;  %v21032_v19 = vld [vmem:[#allocation36_spill] sm:$0xff]  ;;  %v21033_v49 = vld [vmem:[#allocation119_spill] sm:$0xff]  ;;  %v21035_v15 = vld [vmem:[#allocation37_spill] sm:$0xff] }
 0x283   :  { %21028 = vst [vmem:[#allocation31_spill] sm:$0xff] %v15021_v25  ;;  %8976 = vmatpush1.msra.mxu0 %v7561_v22  ;;  %v4237_v55 = vmax.f32 %v21032_v19, %v3863_v12  ;;  %v15040_v57 = vrot.slane %v4234_v34, %v13020_v21  ;;  %v5576_v7 = vsel %vm3418_vm9, %v14541_v36, %v5575_v17  ;;  %v7559_v22 = vld [vmem:[%s20263_s3 + $0x440] sm:$0xff]  ;;  %v7482_v17 = vld [vmem:[%s20263_s3 + $0x1d8] sm:$0xff] }
 0x284   :  { %21031 = vst [vmem:[#allocation28_spill] sm:$0xff] %v15030_v14  ;;  %v15046_v56 = vrot.slane %v21033_v49, %v12993_v31  ;;  %8739 = vmatprep.subr.mxu1 %v7484_v13  ;;  %v15052_v30 = vmax.f32 %v21035_v15, %v4046_v42  ;;  %v15055_v12 = vmax.f32 %v21036_v6, %v3865_v48  ;;  %v21037_v13 = vld [vmem:[#allocation43_spill] sm:$0xff]  ;;  %v3644_v6 = vpop.permute.xlu1 %3643 }
 0x285   :  { %v4626_v34 = vrot.slane %v4233_v9, %v12993_v31  ;;  %v4630_v19 = vrot.slane %v4233_v9, %v13020_v21  ;;  %8977 = vmatprep.subr.mxu0 %v7560_v53  ;;  %v15063_v49 = vmax.f32 %v21037_v13, %v4047_v60  ;;  %v15066_v18 = vrot.slane %v4235_v58, %v12993_v31  ;;  %v7558_v9 = vld [vmem:[%s20263_s3 + $0x438] sm:$0xff]  ;;  %v3642_v13 = vpop.permute.xlu0 %3641 }
 0x286   :  { %21034 = vst [vmem:[#allocation33_spill] sm:$0xff] %v15046_v56  ;;  %v15069_v42 = vrot.slane %v4235_v58, %v13020_v21  ;;  %v15072_v48 = vrot.slane %v4236_v44, %v12993_v31  ;;  %8740 = vmatpush2.msra.mxu1 %v7483_v1  ;;  %v15077_v53 = vcombine.low %v6469_v11, %v6471_v59  ;;  %v7481_v1 = vld [vmem:[%s20263_s3 + $0x1d0] sm:$0xff]  ;;  %v3718_v60 = vsel %vm3710_vm14, %v3644_v6, 0.0 }
 0x287   :  { %21038 = vst [vmem:[#allocation35_spill] sm:$0xff] %v15066_v18  ;;  %v15082_v15 = vrot.slane %v4236_v44, %v13020_v21  ;;  %v15086_v58 = vsel %vm3414_vm7, %v15033_v8, %v4626_v34  ;;  %8978 = vmatpush1.msra.mxu0 %v7559_v22  ;;  %v15096_v11 = vsel %vm3414_vm7, %v15040_v57, %v4630_v19  ;;  %v7557_v22 = vld [vmem:[%s20263_s3 + $0x430] sm:$0xff] }
 0x288   :  { %21039 = vst [vmem:[#allocation36_spill] sm:$0xff] %v15069_v42  ;;  %21040 = vst [vmem:[#allocation37_spill] sm:$0xff] %v15077_v53  ;;  %v15092_v42 = vrot.slane %v4237_v55, %v12993_v31  ;;  %v5577_v44 = vsel %vm3420_vm10, %v14587_v51, %v5576_v7  ;;  %v5877_v59 = vsel %vm3414_vm7, %v15046_v56, %v14834_v63  ;;  %8741 = vmatprep.subr.mxu1 %v7482_v17  ;;  %v21044_v17 = vld [vmem:[#allocation23_spill] sm:$0xff] }
 0x289   :  { %21041 = vst [vmem:[#allocation39_spill] sm:$0xff] %v15086_v58  ;;  %21043 = vst [vmem:[#allocation143_spill] sm:$0xff] %v15096_v11  ;;  %v5578_v34 = vsel %vm3422_vm11, %v14605_v23, %v5577_v44  ;;  %5995 = vrot.lane.b32.xlu0 %v5877_v59, %s12095_s30  ;;  %v5879_v19 = vsel %vm3414_vm7, %v14439_v20, %v14433_v38  ;;  %v5262_v7 = vsel %vm3414_vm7, %v14427_v37, %v14393_v28  ;;  %v7480_v63 = vld [vmem:[%s20263_s3 + $0x1c8] sm:$0xff]  ;;  %v3648_v58 = vpop.permute.xlu1 %3647  ;;  %v21073_v38 = vld [vmem:[#allocation44_spill] sm:$0xff] }
 0x28a   :  { %21042 = vst [vmem:[#allocation43_spill] sm:$0xff] %v15092_v42  ;;  %8979 = vmatprep.subr.mxu0 %v7558_v9  ;;  %v5579_v14 = vsel %vm3424_vm12, %v21044_v17, %v5578_v34  ;;  %v5880_v53 = vsel %vm3416_vm8, %v14449_v10, %v5879_v19  ;;  %v5263_v44 = vsel %vm3416_vm8, %v14436_v32, %v5262_v7  ;;  %v21046_v7 = vld [vmem:[#allocation17_spill] sm:$0xff]  ;;  %v21059_v10 = vld [vmem:[#allocation135_spill] sm:$0xff] }
 0x28b   :  { %v3685_v59 = vsel %vm3677_vm15, %v3642_v13, %v3644_v6  ;;  %8742 = vmatpush2.msra.mxu1 %v7481_v1  ;;  %v5580_v28 = vsel %vm3426_vm13, %v14729_v54, %v5579_v14  ;;  %v5881_v9 = vsel %vm3418_vm9, %v14570_v47, %v5880_v53  ;;  %v5264_v34 = vsel %vm3418_vm9, %v14442_v40, %v5263_v44  ;;  %v7556_v6 = vld [vmem:[%s20263_s3 + $0x428] sm:$0xff]  ;;  %v7555_v44 = vld [vmem:[%s20263_s3 + $0x420] sm:$0xff] }
 0x28c   :  { %v3866_v19 = vcombine.low %v3685_v59, %v3718_v60  ;;  %8980 = vmatpush1.msra.mxu0 %v7557_v22  ;;  %5689 = vrot.lane.b32.xlu1 %v5580_v28, %s12096_s28  ;;  %v5882_v13 = vsel %vm3420_vm10, %v14601_v46, %v5881_v9  ;;  %v5265_v14 = vsel %vm3420_vm10, %v14541_v36, %v5264_v34  ;;  %v21045_v53 = vrot.slane %v14590_v61, 1  ;;  %v7479_v22 = vld [vmem:[%s20263_s3 + $0x1c0] sm:$0xff] }
 0x28d   :  { %v3867_v1 = vcombine.high %v3685_v59, %v3718_v60  ;;  %v15150_v28 = vrot.slane %v4237_v55, %v13020_v21  ;;  %v15154_v9 = vrot.slane %v15052_v30, %v13020_v21  ;;  %v5883_v61 = vsel %vm3422_vm11, %v14697_v62, %v5882_v13  ;;  %8743 = vmatprep.subr.mxu1 %v7480_v63  ;;  %v7478_v13 = vld [vmem:[%s20263_s3 + $0x1b8] sm:$0xff]  ;;  %v7475_v46 = vld [vmem:[%s20263_s3 + $0x1a0] sm:$0xff] }
 0x28e   :  { %v4216_v56 = vmax.f32 %v21046_v7, %v21045_v53  ;;  %v5266_v60 = vsel %vm3422_vm11, %v14587_v51, %v5265_v14  ;;  %v5884_v59 = vsel %vm3424_vm12, %v14654_v52, %v5883_v61  ;;  %v3874_v55 = vrot.slane %v3866_v19, %v13009_v27  ;;  %8981 = vmatprep.subr.mxu0 %v7556_v6  ;;  %v7554_v63 = vld [vmem:[%s20263_s3 + $0x418] sm:$0xff]  ;;  %v21049_v14 = vld [vmem:[#allocation18_spill] sm:$0xff]  ;;  %v7477_v6 = vld [vmem:[%s20263_s3 + $0x1b0] sm:$0xff] }
 0x28f   :  { %21047 = vst [vmem:[#allocation23_spill] sm:$0xff] %v15150_v28  ;;  %21048 = vst [vmem:[#allocation17_spill] sm:$0xff] %v15154_v9  ;;  %v5267_v34 = vsel %vm3424_vm12, %v14605_v23, %v5266_v60  ;;  %v5886_v53 = vsel %vm3414_vm7, %v14442_v40, %v14436_v32  ;;  %v5885_v7 = vsel %vm3426_vm13, %v21049_v14, %v5884_v59  ;;  %8744 = vmatpush2.msra.mxu1 %v7479_v22  ;;  %v7553_v22 = vld [vmem:[%s20263_s3 + $0x410] sm:$0xff]  ;;  %v21058_v47 = vld [vmem:[#allocation38_spill] sm:$0xff] }
 0x290   :  { %v5268_v61 = vsel %vm3426_vm13, %v21044_v17, %v5267_v34  ;;  %v15179_v19 = vrot.slane %v4216_v56, %v12993_v31  ;;  %8982 = vmatpush1.msra.mxu0 %v7555_v44  ;;  %v15186_v60 = vrot.slane %v15052_v30, %v12993_v31  ;;  %v15190_v11 = vrot.slane %v15055_v12, %v12993_v31 }
 0x291   :  { %5999 = vrot.lane.b32.xlu1 %v5885_v7, %s12095_s30  ;;  %5377 = vrot.lane.b32.xlu0 %v5268_v61, %s12094_s29  ;;  %v3881_v59 = vrot.slane %v3867_v1, %v13009_v27  ;;  %v15201_v30 = vrot.slane %v15055_v12, %v13020_v21  ;;  %v15205_v34 = vrot.slane %v15063_v49, %v12993_v31 }
 0x292   :  { %21050 = vst [vmem:[#allocation144_spill] sm:$0xff] %v15179_v19  ;;  %21051 = vst [vmem:[#allocation145_spill] sm:$0xff] %v15186_v60  ;;  %v5887_v7 = vsel %vm3416_vm8, %v14541_v36, %v5886_v53  ;;  %8745 = vmatprep.subr.mxu1 %v7478_v13  ;;  %8983 = vmatprep.subr.mxu0 %v7554_v63  ;;  %v15211_v1 = vrot.slane %v15063_v49, %v13020_v21  ;;  %v7476_v53 = vld [vmem:[%s20263_s3 + $0x1a8] sm:$0xff]  ;;  %v4048_v13 = vrot.slane %v3874_v55, 1 }
 0x293   :  { %21052 = vst [vmem:[#allocation146_spill] sm:$0xff] %v15190_v11  ;;  %21053 = vst [vmem:[#allocation147_spill] sm:$0xff] %v15201_v30  ;;  %v15216_v61 = vsel %vm3414_vm7, %v15154_v9, %v15150_v28  ;;  %v15218_v12 = vcombine.high %v3874_v55, %v3874_v55  ;;  %v5888_v44 = vsel %vm3418_vm9, %v14587_v51, %v5887_v7  ;;  %8746 = vmatpush2.msra.mxu1 %v7477_v6  ;;  %v7552_v49 = vld [vmem:[%s20263_s3 + $0x408] sm:$0xff]  ;;  %v3646_v6 = vpop.permute.xlu0 %3645 }
 0x294   :  { %21054 = vst [vmem:[#allocation148_spill] sm:$0xff] %v15205_v34  ;;  %21055 = vst [vmem:[#allocation149_spill] sm:$0xff] %v15211_v1  ;;  %v5581_v63 = vsel %vm3414_vm7, %v15179_v19, %v21049_v14  ;;  %v15235_v7 = vrot.slane %v14940_v4, %v12993_v31  ;;  %8984 = vmatpush1.msra.mxu0 %v7553_v22  ;;  %v4050_v36 = vrot.slane %v3881_v59, 1  ;;  %8747 = vmatprep.subr.mxu1 %v7476_v53 }
 0x295   :  { %21056 = vst [vmem:[#allocation150_spill] sm:$0xff] %v15216_v61  ;;  %v5889_v61 = vsel %vm3420_vm10, %v14605_v23, %v5888_v44  ;;  %v4241_v40 = vmax.f32 %v21058_v47, %v3874_v55  ;;  %5691 = vrot.lane.b32.xlu1 %v5581_v63, %s12096_s28  ;;  %v6183_v44 = vsel %vm3416_vm8, %v14587_v51, %v21059_v10  ;;  %v3719_v47 = vsel %vm3710_vm14, %v3648_v58, 0.0 }
 0x296   :  { %21057 = vst [vmem:[#allocation151_spill] sm:$0xff] %v15235_v7  ;;  %v5890_v14 = vsel %vm3422_vm11, %v21044_v17, %v5889_v61  ;;  %v15250_v22 = vrot.slane %v4216_v56, %v13020_v21  ;;  %v6184_v20 = vsel %vm3418_vm9, %v14605_v23, %v6183_v44  ;;  %8985 = vmatprep.subr.mxu0 %v7552_v49  ;;  %v7551_v61 = vld [vmem:[%s20263_s3 + $0x400] sm:$0xff] }
 0x297   :  { %v5891_v32 = vsel %vm3424_vm12, %v14729_v54, %v5890_v14  ;;  %v5285_v10 = vsel %vm3414_vm7, %v15235_v7, %v15006_v50  ;;  %v6185_v14 = vsel %vm3420_vm10, %v21044_v17, %v6184_v20  ;;  %v3686_v56 = vsel %vm3677_vm15, %v3646_v6, %v3648_v58  ;;  %8748 = vmatpush2.msra.mxu1 %v7475_v46  ;;  %v7474_v20 = vld [vmem:[%s20263_s3 + $0x198] sm:$0xff]  ;;  %v21062_v46 = vld [vmem:[#allocation40_spill] sm:$0xff] }
 0x298   :  { %21060 = vst [vmem:[#allocation38_spill] sm:$0xff] %v15250_v22  ;;  %v5892_v55 = vsel %vm3426_vm13, %v14801_v0, %v5891_v32  ;;  %v6186_v53 = vsel %vm3422_vm11, %v14729_v54, %v6185_v14  ;;  %v3883_v32 = vcombine.low %v3686_v56, %v3719_v47  ;;  %v3884_v49 = vcombine.high %v3686_v56, %v3719_v47  ;;  %v21063_v6 = vld [vmem:[#allocation45_spill] sm:$0xff] }
 0x299   :  { %6001 = vrot.lane.b32.xlu0 %v5892_v55, %s12095_s30  ;;  %v15271_v63 = vrot.slane %v14940_v4, %v13020_v21  ;;  %v4242_v58 = vmax.f32 %v21062_v46, %v4048_v13  ;;  %v15279_v44 = vmax.f32 %v21063_v6, %v15218_v12  ;;  %v21064_v55 = vld [vmem:[#allocation47_spill] sm:$0xff]  ;;  %v21066_v14 = vld [vmem:[#allocation49_spill] sm:$0xff]  ;;  %5387 = vrot.lane.b32.xlu1 %v5285_v10, %s12094_s29 }
 0x29a   :  { %v15282_v23 = vmax.f32 %v21064_v55, %v3881_v59  ;;  %v15285_v51 = vmax.f32 %v21066_v14, %v4050_v36  ;;  %v7614_v4 = vld [vmem:[%s20263_s3 + $0x5f8] sm:$0xff]  ;;  %v6187_v47 = vsel %vm3424_vm12, %v14801_v0, %v6186_v53  ;;  %v3891_v13 = vrot.slane %v3883_v32, %v13009_v27  ;;  %8986 = vmatpush1.msra.mxu0 %v7551_v61  ;;  %v7613_v61 = vld [vmem:[%s20263_s3 + $0x5f0] sm:$0xff]  ;;  %v21070_v55 = vld [vmem:[#allocation11_spill] sm:$0xff] }
 0x29b   :  { %21061 = vst [vmem:[#allocation135_spill] sm:$0xff] %v15271_v63  ;;  %v3898_v56 = vrot.slane %v3884_v49, %v13009_v27  ;;  %v5278_v59 = vsel %vm3414_vm7, %v14766_v43, %v14743_v3  ;;  %v15299_v36 = vrot.slane %v4241_v40, %v12993_v31  ;;  %v15302_v10 = vrot.slane %v4241_v40, %v13020_v21  ;;  %v7473_v3 = vld [vmem:[%s20263_s3 + $0x190] sm:$0xff] }
 0x29c   :  { %21065 = vst [vmem:[#allocation40_spill] sm:$0xff] %v15282_v23  ;;  %21067 = vst [vmem:[#allocation45_spill] sm:$0xff] %v15285_v51  ;;  %v5582_v46 = vsel %vm3414_vm7, %v15250_v22, %v14801_v0  ;;  %v5271_v53 = vsel %vm3414_vm7, %v14763_v29, %v14740_v24  ;;  %8749 = vmatprep.subr.mxu1 %v7474_v20  ;;  %v3899_v40 = vcombine.high %v3891_v13, %v3891_v13  ;;  %v7472_v24 = vld [vmem:[%s20263_s3 + $0x188] sm:$0xff]  ;;  %v21079_v51 = vld [vmem:[#allocation53_spill] sm:$0xff] }
 0x29d   :  { %21068 = vst [vmem:[#allocation47_spill] sm:$0xff] %v15299_v36  ;;  %5693 = vrot.lane.b32.xlu0 %v5582_v46, %s12096_s28  ;;  %v3900_v32 = vcombine.high %v3898_v56, %v3898_v56  ;;  %v4051_v49 = vrot.slane %v3891_v13, 1  ;;  %v5286_v0 = vsel %vm3414_vm7, %v15271_v63, %v15021_v25  ;;  %8987 = vmatprep.subr.mxu0 %v7614_v4  ;;  %v4053_v6 = vrot.slane %v3898_v56, 1  ;;  %v21072_v4 = vld [vmem:[#allocation41_spill] sm:$0xff] }
 0x29e   :  { %v15325_v20 = vsel %vm3426_vm13, %v15250_v22, %v6187_v47  ;;  %5389 = vrot.lane.b32.xlu1 %v5286_v0, %s12094_s29  ;;  %v15330_v14 = vrot.slane %v21070_v55, %v12993_v31  ;;  %v5279_v46 = vsel %vm3416_vm8, %v14781_v2, %v5278_v59  ;;  %v4052_v23 = vrot.slane %v3899_v40, 1  ;;  %8750 = vmatpush2.msra.mxu1 %v7473_v3  ;;  %v7612_v0 = vld [vmem:[%s20263_s3 + $0x5e8] sm:$0xff]  ;;  %v21075_v59 = vld [vmem:[#allocation42_spill] sm:$0xff] }
 0x29f   :  { %21069 = vst [vmem:[#allocation49_spill] sm:$0xff] %v15325_v20  ;;  %v15335_v37 = vmax.f32 %v21072_v4, %v3891_v13  ;;  %v4248_v52 = vmax.f32 %v21073_v38, %v4051_v49  ;;  %v5272_v47 = vsel %vm3416_vm8, %v14769_v39, %v5271_v53  ;;  %8988 = vmatpush2.msra.mxu0 %v7613_v61  ;;  %v4054_v55 = vrot.slane %v3900_v32, 1  ;;  %v7471_v38 = vld [vmem:[%s20263_s3 + $0x180] sm:$0xff]  ;;  %v3652_v20 = vpop.permute.xlu1 %3651 }
 0x2a0   :  { %21071 = vst [vmem:[#allocation152_spill] sm:$0xff] %v15330_v14  ;;  %v15344_v22 = vrot.slane %v4242_v58, %v12993_v31  ;;  %v4249_v62 = vmax.f32 %v21075_v59, %v3899_v40  ;;  %v5893_v13 = vsel %vm3414_vm7, %v15330_v14, %v15179_v19  ;;  %8751 = vmatprep.subr.mxu1 %v7472_v24  ;;  %v21076_v61 = vld [vmem:[#allocation50_spill] sm:$0xff]  ;;  %v21077_v59 = vld [vmem:[#allocation52_spill] sm:$0xff] }
 0x2a1   :  { %v15354_v53 = vrot.slane %v4242_v58, %v13020_v21  ;;  %v4251_v49 = vmax.f32 %v21076_v61, %v3898_v56  ;;  %v15360_v4 = vrot.slane %v4248_v52, %v12993_v31  ;;  %6003 = vrot.lane.b32.xlu0 %v5893_v13, %s12095_s30  ;;  %v7611_v40 = vld [vmem:[%s20263_s3 + $0x5e0] sm:$0xff]  ;;  %v15369_v58 = vmax.f32 %v21077_v59, %v4053_v6  ;;  %v7470_v13 = vld [vmem:[%s20263_s3 + $0x178] sm:$0xff]  ;;  %v21078_v61 = vld [vmem:[#allocation48_spill] sm:$0xff] }
 0x2a2   :  { %21074 = vst [vmem:[#allocation41_spill] sm:$0xff] %v15344_v22  ;;  %v5280_v3 = vsel %vm3418_vm9, %v14775_v33, %v5279_v46  ;;  %v5273_v56 = vsel %vm3418_vm9, %v14772_v35, %v5272_v47  ;;  %8989 = vmatprep.subr.mxu0 %v7612_v0  ;;  %v15379_v14 = vmax.f32 %v21078_v61, %v4052_v23  ;;  %v7610_v47 = vld [vmem:[%s20263_s3 + $0x5d8] sm:$0xff]  ;;  %v21080_v0 = vld [vmem:[#allocation55_spill] sm:$0xff] }
 0x2a3   :  { %v15382_v19 = vmax.f32 %v21079_v51, %v3900_v32  ;;  %v4706_v6 = vrot.slane %v15335_v37, %v12993_v31  ;;  %8752 = vmatpush2.msra.mxu1 %v7471_v38  ;;  %v15392_v59 = vmax.f32 %v21080_v0, %v4054_v55  ;;  %v15395_v23 = vrot.slane %v4248_v52, %v13020_v21  ;;  %v7469_v38 = vld [vmem:[%s20263_s3 + $0x170] sm:$0xff] }
 0x2a4   :  { %v15398_v51 = vrot.slane %v4249_v62, %v12993_v31  ;;  %v15401_v32 = vrot.slane %v4249_v62, %v13020_v21  ;;  %8990 = vmatpush2.msra.mxu0 %v7611_v40  ;;  %v15407_v61 = vrot.slane %v4251_v49, %v12993_v31  ;;  %v15410_v55 = vrot.slane %v4251_v49, %v13020_v21  ;;  %v7609_v62 = vld [vmem:[%s20263_s3 + $0x5d0] sm:$0xff] }
 0x2a5   :  { %21081 = vst [vmem:[#allocation44_spill] sm:$0xff] %v15395_v23  ;;  %v15414_v52 = vsel %vm3414_vm7, %v15360_v4, %v4706_v6  ;;  %v5281_v0 = vsel %vm3420_vm10, %v14818_v16, %v5280_v3  ;;  %8753 = vmatprep.subr.mxu1 %v7470_v13  ;;  %v5274_v24 = vsel %vm3420_vm10, %v14847_v5, %v5273_v56  ;;  %v21087_v13 = vld [vmem:[#allocation138_spill] sm:$0xff] }
 0x2a6   :  { %21082 = vst [vmem:[#allocation42_spill] sm:$0xff] %v15398_v51  ;;  %21083 = vst [vmem:[#allocation50_spill] sm:$0xff] %v15401_v32  ;;  %v5282_v40 = vsel %vm3422_vm11, %v14853_v26, %v5281_v0  ;;  %v5583_v49 = vsel %vm3414_vm7, %v14769_v39, %v14763_v29  ;;  %v5590_v6 = vsel %vm3414_vm7, %v14781_v2, %v14766_v43  ;;  %8991 = vmatprep.subr.mxu0 %v7610_v47  ;;  %v21088_v2 = vld [vmem:[#allocation26_spill] sm:$0xff]  ;;  %v21089_v43 = vld [vmem:[#allocation140_spill] sm:$0xff] }
 0x2a7   :  { %21084 = vst [vmem:[#allocation52_spill] sm:$0xff] %v15407_v61  ;;  %21085 = vst [vmem:[#allocation48_spill] sm:$0xff] %v15410_v55  ;;  %v5283_v3 = vsel %vm3424_vm12, %v14863_v45, %v5282_v40  ;;  %v5275_v46 = vsel %vm3422_vm11, %v21087_v13, %v5274_v24  ;;  %v5584_v0 = vsel %vm3416_vm8, %v14772_v35, %v5583_v49  ;;  %8754 = vmatpush2.msra.mxu1 %v7469_v38  ;;  %v7608_v38 = vld [vmem:[%s20263_s3 + $0x5c8] sm:$0xff]  ;;  %v21092_v29 = vld [vmem:[#allocation30_spill] sm:$0xff] }
 0x2a8   :  { %21086 = vst [vmem:[#allocation53_spill] sm:$0xff] %v15414_v52  ;;  %v5591_v56 = vsel %vm3416_vm8, %v14775_v33, %v5590_v6  ;;  %v7468_v52 = vld [vmem:[%s20263_s3 + $0x168] sm:$0xff]  ;;  %v5284_v47 = vsel %vm3426_vm13, %v21088_v2, %v5283_v3  ;;  %v5276_v40 = vsel %vm3424_vm12, %v21089_v43, %v5275_v46  ;;  %v5585_v24 = vsel %vm3418_vm9, %v14847_v5, %v5584_v0  ;;  %v21090_v6 = vld [vmem:[#allocation106_spill] sm:$0xff] }
 0x2a9   :  { %v5592_v49 = vsel %vm3418_vm9, %v14818_v16, %v5591_v56  ;;  %8992 = vmatpush2.msra.mxu0 %v7609_v62  ;;  %5385 = vrot.lane.b32.xlu1 %v5284_v47, %s12094_s29  ;;  %v5277_v33 = vsel %vm3426_vm13, %v21090_v6, %v5276_v40  ;;  %v5586_v3 = vsel %vm3420_vm10, %v21087_v13, %v5585_v24  ;;  %v21091_v0 = vrot.slane %v14874_v41, 1  ;;  %v3650_v62 = vpop.permute.xlu0 %3649  ;;  %v7467_v16 = vld [vmem:[%s20263_s3 + $0x160] sm:$0xff] }
 0x2aa   :  { %v5593_v46 = vsel %vm3420_vm10, %v14853_v26, %v5592_v49  ;;  %5383 = vrot.lane.b32.xlu0 %v5277_v33, %s12094_s29  ;;  %v5587_v47 = vsel %vm3422_vm11, %v21089_v43, %v5586_v3  ;;  %v3720_v24 = vsel %vm3710_vm14, %v3652_v20, 0.0  ;;  %v5895_v41 = vsel %vm3414_vm7, %v14772_v35, %v14769_v39  ;;  %8755 = vmatprep.subr.mxu1 %v7468_v52  ;;  %v21111_v39 = vld [vmem:[#allocation60_spill] sm:$0xff] }
 0x2ab   :  { %v4230_v56 = vmax.f32 %v21092_v29, %v21091_v0  ;;  %v5594_v40 = vsel %vm3422_vm11, %v14863_v45, %v5593_v46  ;;  %v15477_v29 = vrot.slane %v15379_v14, %v12993_v31  ;;  %v5588_v33 = vsel %vm3424_vm12, %v21090_v6, %v5587_v47  ;;  %8993 = vmatprep.subr.mxu0 %v7608_v38  ;;  %v7607_v47 = vld [vmem:[%s20263_s3 + $0x5c0] sm:$0xff] }
 0x2ac   :  { %v5595_v49 = vsel %vm3424_vm12, %v21088_v2, %v5594_v40  ;;  %v5896_v3 = vsel %vm3416_vm8, %v14847_v5, %v5895_v41  ;;  %v5589_v46 = vsel %vm3426_vm13, %v15006_v50, %v5588_v33  ;;  %v3687_v35 = vsel %vm3677_vm15, %v3650_v62, %v3652_v20  ;;  %8756 = vmatpush2.msra.mxu1 %v7467_v16 }
 0x2ad   :  { %21093 = vst [vmem:[#allocation55_spill] sm:$0xff] %v15477_v29  ;;  %v15488_v0 = vrot.slane %v4230_v56, %v12993_v31  ;;  %v5897_v52 = vsel %vm3418_vm9, %v21087_v13, %v5896_v3  ;;  %5695 = vrot.lane.b32.xlu1 %v5589_v46, %s12096_s28  ;;  %v5596_v38 = vsel %vm3426_vm13, %v15021_v25, %v5595_v49  ;;  %v7466_v3 = vld [vmem:[%s20263_s3 + $0x158] sm:$0xff]  ;;  %v21097_v49 = vld [vmem:[#allocation142_spill] sm:$0xff] }
 0x2ae   :  { %v5898_v40 = vsel %vm3420_vm10, %v21089_v43, %v5897_v52  ;;  %v3901_v41 = vcombine.low %v3687_v35, %v3720_v24  ;;  %v3902_v33 = vcombine.high %v3687_v35, %v3720_v24  ;;  %v15506_v16 = vrot.slane %v15379_v14, %v13020_v21  ;;  %5697 = vrot.lane.b32.xlu0 %v5596_v38, %s12096_s28  ;;  %v7606_v24 = vld [vmem:[%s20263_s3 + $0x5b8] sm:$0xff] }
 0x2af   :  { %21094 = vst [vmem:[#allocation30_spill] sm:$0xff] %v15488_v0  ;;  %v15510_v20 = vrot.slane %v15369_v58, %v12993_v31  ;;  %v5899_v62 = vsel %vm3422_vm11, %v21090_v6, %v5898_v40  ;;  %v6199_v35 = vsel %vm3416_vm8, %v14853_v26, %v21097_v49  ;;  %v15523_v14 = vrot.slane %v15369_v58, %v13020_v21  ;;  %v21114_v6 = vld [vmem:[#allocation54_spill] sm:$0xff] }
 0x2b0   :  { %21095 = vst [vmem:[#allocation153_spill] sm:$0xff] %v15506_v16  ;;  %v15527_v46 = vrot.slane %v15382_v19, %v12993_v31  ;;  %v5900_v52 = vsel %vm3424_vm12, %v15006_v50, %v5899_v62  ;;  %v3909_v38 = vrot.slane %v3901_v41, %v13009_v27  ;;  %8994 = vmatpush2.msra.mxu0 %v7607_v47  ;;  %v7465_v47 = vld [vmem:[%s20263_s3 + $0x150] sm:$0xff] }
 0x2b1   :  { %21096 = vst [vmem:[#allocation154_spill] sm:$0xff] %v15510_v20  ;;  %21098 = vst [vmem:[#allocation142_spill] sm:$0xff] %v15523_v14  ;;  %v15534_v40 = vrot.slane %v15382_v19, %v13020_v21  ;;  %v15538_v49 = vrot.slane %v15392_v59, %v12993_v31  ;;  %v5597_v58 = vsel %vm3414_vm7, %v15488_v0, %v15235_v7  ;;  %8757 = vmatprep.subr.mxu1 %v7466_v3  ;;  %v7605_v19 = vld [vmem:[%s20263_s3 + $0x5b0] sm:$0xff]  ;;  %v7464_v3 = vld [vmem:[%s20263_s3 + $0x148] sm:$0xff] }
 0x2b2   :  { %21099 = vst [vmem:[#allocation155_spill] sm:$0xff] %v15527_v46  ;;  %v15544_v26 = vrot.slane %v4230_v56, %v13020_v21  ;;  %5699 = vrot.lane.b32.xlu1 %v5597_v58, %s12096_s28  ;;  %v5901_v41 = vsel %vm3426_vm13, %v15235_v7, %v5900_v52  ;;  %v3916_v62 = vrot.slane %v3902_v33, %v13009_v27  ;;  %v4055_v13 = vrot.slane %v3909_v38, 1  ;;  %v21103_v58 = vld [vmem:[#allocation25_spill] sm:$0xff] }
 0x2b3   :  { %21100 = vst [vmem:[#allocation156_spill] sm:$0xff] %v15534_v40  ;;  %21101 = vst [vmem:[#allocation157_spill] sm:$0xff] %v15538_v49  ;;  %v6200_v56 = vsel %vm3418_vm9, %v14863_v45, %v6199_v35  ;;  %8995 = vmatprep.subr.mxu0 %v7606_v24  ;;  %6007 = vrot.lane.b32.xlu0 %v5901_v41, %s12095_s30  ;;  %v15562_v43 = vcombine.high %v3909_v38, %v3909_v38 }
 0x2b4   :  { %21102 = vst [vmem:[#allocation158_spill] sm:$0xff] %v15544_v26  ;;  %v15566_v5 = vrot.slane %v21103_v58, %v12993_v31  ;;  %v6201_v33 = vsel %vm3420_vm10, %v21088_v2, %v6200_v56  ;;  %v15573_v35 = vrot.slane %v15392_v59, %v13020_v21  ;;  %v21106_v24 = vrot.slane %v15335_v37, %v13020_v21  ;;  %v3656_v58 = vpop.permute.xlu1 %3655  ;;  %v7604_v56 = vld [vmem:[%s20263_s3 + $0x5a8] sm:$0xff] }
 0x2b5   :  { %v5287_v7 = vsel %vm3414_vm7, %v15066_v18, %v15033_v8  ;;  %8758 = vmatpush2.msra.mxu1 %v7465_v47  ;;  %8996 = vmatpush2.msra.mxu0 %v7605_v19  ;;  %v15591_v59 = vsel %vm3414_vm7, %v15523_v14, %v15410_v55  ;;  %v5598_v8 = vsel %vm3414_vm7, %v15544_v26, %v15271_v63  ;;  %v3654_v19 = vpop.permute.xlu0 %3653  ;;  %v4057_v52 = vrot.slane %v3916_v62, 1 }
 0x2b6   :  { %21104 = vst [vmem:[#allocation159_spill] sm:$0xff] %v15566_v5  ;;  %21105 = vst [vmem:[#allocation160_spill] sm:$0xff] %v15573_v35  ;;  %v15580_v41 = vsel %vm3414_vm7, %v15395_v23, %v21106_v24  ;;  %v5909_v37 = vsel %vm3414_vm7, %v15566_v5, %v15488_v0  ;;  %v15601_v47 = vrot.slane %v15279_v44, %v12993_v31  ;;  %8759 = vmatprep.subr.mxu1 %v7464_v3  ;;  %v7463_v24 = vld [vmem:[%s20263_s3 + $0x140] sm:$0xff]  ;;  %v21113_v3 = vld [vmem:[#allocation56_spill] sm:$0xff] }
 0x2b7   :  { %21107 = vst [vmem:[#allocation161_spill] sm:$0xff] %v15580_v41  ;;  %21108 = vst [vmem:[#allocation162_spill] sm:$0xff] %v15591_v59  ;;  %v21110_v41 = vld [vmem:[#allocation51_spill] sm:$0xff]  ;;  %v15608_v59 = vmax.f32 %v21111_v39, %v3916_v62  ;;  %6011 = vrot.lane.b32.xlu1 %v5909_v37, %s12095_s30  ;;  %v6202_v5 = vsel %vm3422_vm11, %v15021_v25, %v6201_v33  ;;  %v7603_v0 = vld [vmem:[%s20263_s3 + $0x5a0] sm:$0xff]  ;;  %v4256_v50 = vmax.f32 %v21113_v3, %v4055_v13 }
 0x2b8   :  { %21109 = vst [vmem:[#allocation163_spill] sm:$0xff] %v15601_v47  ;;  %v4255_v45 = vmax.f32 %v21110_v41, %v3909_v38  ;;  %v15619_v2 = vmax.f32 %v21114_v6, %v15562_v43  ;;  %5701 = vrot.lane.b32.xlu0 %v5598_v8, %s12096_s28  ;;  %v5288_v39 = vsel %vm3416_vm8, %v15072_v48, %v5287_v7  ;;  %v3721_v38 = vsel %vm3710_vm14, %v3656_v58, 0.0  ;;  %v7462_v7 = vld [vmem:[%s20263_s3 + $0x138] sm:$0xff]  ;;  %v21116_v8 = vld [vmem:[#allocation71_spill] sm:$0xff]  ;;  %v21126_v25 = vld [vmem:[#allocation58_spill] sm:$0xff] }
 0x2b9   :  { %21112 = vst [vmem:[#allocation51_spill] sm:$0xff] %v15608_v59  ;;  %8997 = vmatprep.subr.mxu0 %v7604_v56  ;;  %v5289_v62 = vsel %vm3418_vm9, %v15092_v42, %v5288_v39  ;;  %v15629_v33 = vrot.slane %v15279_v44, %v13020_v21  ;;  %v3688_v13 = vsel %vm3677_vm15, %v3654_v19, %v3656_v58  ;;  %v7602_v58 = vld [vmem:[%s20263_s3 + $0x598] sm:$0xff]  ;;  %v21118_v39 = vld [vmem:[#allocation36_spill] sm:$0xff]  ;;  %v7459_v59 = vld [vmem:[%s20263_s3 + $0x120] sm:$0xff] }
 0x2ba   :  { %21115 = vst [vmem:[#allocation60_spill] sm:$0xff] %v15619_v2  ;;  %v5599_v6 = vsel %vm3414_vm7, %v15072_v48, %v15066_v18  ;;  %8760 = vmatpush2.msra.mxu1 %v7463_v24  ;;  %v5301_v41 = vsel %vm3414_vm7, %v15601_v47, %v15344_v22  ;;  %v5290_v56 = vsel %vm3420_vm10, %v15186_v60, %v5289_v62  ;;  %v21123_v18 = vrot.slane %v15218_v12, 1  ;;  %v21127_v35 = vld [vmem:[#allocation59_spill] sm:$0xff]  ;;  %v7599_v12 = vld [vmem:[%s20263_s3 + $0x580] sm:$0xff]  ;;  %v21247_v23 = vld [vmem:[#allocation101_spill] sm:$0xff] }
 0x2bb   :  { %v3918_v44 = vcombine.low %v3688_v13, %v3721_v38  ;;  %v3919_v37 = vcombine.high %v3688_v13, %v3721_v38  ;;  %8998 = vmatpush2.msra.mxu0 %v7603_v0  ;;  %v15647_v19 = vmax.f32 %v21116_v8, %v4057_v52  ;;  %5395 = vrot.lane.b32.xlu1 %v5301_v41, %s12094_s29  ;;  %v7461_v0 = vld [vmem:[%s20263_s3 + $0x130] sm:$0xff] }
 0x2bc   :  { %v5291_v24 = vsel %vm3422_vm11, %v15190_v11, %v5290_v56  ;;  %v5600_v3 = vsel %vm3416_vm8, %v15092_v42, %v5599_v6  ;;  %v5294_v38 = vsel %vm3414_vm7, %v21118_v39, %v15040_v57  ;;  %v6203_v52 = vsel %vm3424_vm12, %v15271_v63, %v6202_v5  ;;  %8761 = vmatprep.subr.mxu1 %v7462_v7  ;;  %v7460_v7 = vld [vmem:[%s20263_s3 + $0x128] sm:$0xff] }
 0x2bd   :  { %21117 = vst [vmem:[#allocation56_spill] sm:$0xff] %v15647_v19  ;;  %v5292_v62 = vsel %vm3424_vm12, %v15205_v34, %v5291_v24  ;;  %v3926_v13 = vrot.slane %v3918_v44, %v13009_v27  ;;  %v3933_v41 = vrot.slane %v3919_v37, %v13009_v27  ;;  %v15667_v6 = vrot.slane %v4255_v45, %v12993_v31  ;;  %v7601_v44 = vld [vmem:[%s20263_s3 + $0x590] sm:$0xff] }
 0x2be   :  { %v5293_v57 = vsel %vm3426_vm13, %v15299_v36, %v5292_v62  ;;  %v5302_v56 = vsel %vm3414_vm7, %v15629_v33, %v15354_v53  ;;  %v5601_v5 = vsel %vm3418_vm9, %v15186_v60, %v5600_v3  ;;  %8999 = vmatprep.subr.mxu0 %v7602_v58  ;;  %v5295_v62 = vsel %vm3416_vm8, %v15082_v15, %v5294_v38  ;;  %v7600_v58 = vld [vmem:[%s20263_s3 + $0x588] sm:$0xff]  ;;  %v21124_v38 = vld [vmem:[#allocation46_spill] sm:$0xff] }
 0x2bf   :  { %21119 = vst [vmem:[#allocation54_spill] sm:$0xff] %v15667_v6  ;;  %5391 = vrot.lane.b32.xlu0 %v5293_v57, %s12094_s29  ;;  %v3934_v37 = vcombine.high %v3926_v13, %v3926_v13  ;;  %v3935_v8 = vcombine.high %v3933_v41, %v3933_v41  ;;  %v4058_v24 = vrot.slane %v3926_v13, 1  ;;  %8762 = vmatpush2.msra.mxu1 %v7461_v0 }
 0x2c0   :  { %v15689_v3 = vrot.slane %v4255_v45, %v13020_v21  ;;  %v15692_v63 = vrot.slane %v4256_v50, %v12993_v31  ;;  %v15696_v57 = vsel %vm3426_vm13, %v15544_v26, %v6203_v52  ;;  %5397 = vrot.lane.b32.xlu1 %v5302_v56, %s12094_s29  ;;  %v15702_v0 = vmax.f32 %v21124_v38, %v21123_v18  ;;  %v21128_v38 = vld [vmem:[#allocation61_spill] sm:$0xff] }
 0x2c1   :  { %21122 = vst [vmem:[#allocation165_spill] sm:$0xff] %v15696_v57  ;;  %v4060_v45 = vrot.slane %v3933_v41, 1  ;;  %v4262_v40 = vmax.f32 %v21127_v35, %v4058_v24  ;;  %v5602_v52 = vsel %vm3420_vm10, %v15190_v11, %v5601_v5  ;;  %9000 = vmatpush2.msra.mxu0 %v7601_v44  ;;  %8763 = vmatprep.subr.mxu1 %v7460_v7  ;;  %v4059_v18 = vrot.slane %v3934_v37, 1  ;;  %v7598_v7 = vld [vmem:[%s20263_s3 + $0x578] sm:$0xff]  ;;  %v21130_v24 = vld [vmem:[#allocation62_spill] sm:$0xff]  ;;  %v21133_v57 = vld [vmem:[#allocation63_spill] sm:$0xff] }
 0x2c2   :  { %21120 = vst [vmem:[#allocation71_spill] sm:$0xff] %v15689_v3  ;;  %21121 = vst [vmem:[#allocation164_spill] sm:$0xff] %v15692_v63  ;;  %v4261_v3 = vmax.f32 %v21126_v25, %v3926_v13  ;;  %v4061_v56 = vrot.slane %v3935_v8, 1  ;;  %v4263_v26 = vmax.f32 %v21128_v38, %v3934_v37  ;;  %v5296_v14 = vsel %vm3418_vm9, %v15150_v28, %v5295_v62  ;;  %v7458_v25 = vld [vmem:[%s20263_s3 + $0x118] sm:$0xff] }
 0x2c3   :  { %21125 = vst [vmem:[#allocation46_spill] sm:$0xff] %v15702_v0  ;;  %9001 = vmatprep.subr.mxu0 %v7600_v58  ;;  %v15721_v35 = vrot.slane %v4256_v50, %v13020_v21  ;;  %v15726_v5 = vrot.slane %v4262_v40, %v12993_v31  ;;  %v15729_v44 = vrot.slane %v4262_v40, %v13020_v21  ;;  %v7457_v40 = vld [vmem:[%s20263_s3 + $0x110] sm:$0xff] }
 0x2c4   :  { %8764 = vmatpush2.msra.mxu1 %v7459_v59  ;;  %v4265_v50 = vmax.f32 %v21130_v24, %v3933_v41  ;;  %v5603_v62 = vsel %vm3422_vm11, %v15205_v34, %v5602_v52  ;;  %v15741_v58 = vrot.slane %v15702_v0, %v12993_v31  ;;  %9002 = vmatpush2.msra.mxu0 %v7599_v12  ;;  %v21132_v59 = vld [vmem:[#allocation64_spill] sm:$0xff]  ;;  %v3660_v52 = vpop.permute.xlu1 %3659  ;;  %v7456_v24 = vld [vmem:[%s20263_s3 + $0x108] sm:$0xff] }
 0x2c5   :  { %21129 = vst [vmem:[#allocation58_spill] sm:$0xff] %v15721_v35  ;;  %v15747_v38 = vmax.f32 %v21132_v59, %v4060_v45  ;;  %v4786_v13 = vrot.slane %v4261_v3, %v12993_v31  ;;  %v4790_v37 = vrot.slane %v4261_v3, %v13020_v21  ;;  %v5297_v41 = vsel %vm3420_vm10, %v15154_v9, %v5296_v14  ;;  %v7597_v12 = vld [vmem:[%s20263_s3 + $0x570] sm:$0xff]  ;;  %v21134_v59 = vld [vmem:[#allocation66_spill] sm:$0xff]  ;;  %v21135_v35 = vld [vmem:[#allocation67_spill] sm:$0xff] }
 0x2c6   :  { %21131 = vst [vmem:[#allocation59_spill] sm:$0xff] %v15741_v58  ;;  %8765 = vmatprep.subr.mxu1 %v7458_v25  ;;  %v4264_v45 = vmax.f32 %v21133_v57, %v4059_v18  ;;  %v15761_v19 = vmax.f32 %v21134_v59, %v3935_v8  ;;  %v15764_v3 = vmax.f32 %v21135_v35, %v4061_v56  ;;  %v3658_v25 = vpop.permute.xlu0 %3657  ;;  %v7596_v18 = vld [vmem:[%s20263_s3 + $0x568] sm:$0xff] }
 0x2c7   :  { %v15767_v14 = vrot.slane %v4263_v26, %v12993_v31  ;;  %9003 = vmatprep.subr.mxu0 %v7598_v7  ;;  %v15770_v55 = vrot.slane %v4263_v26, %v13020_v21  ;;  %v15774_v16 = vsel %vm3414_vm7, %v15726_v5, %v4786_v13  ;;  %v15778_v57 = vsel %vm3414_vm7, %v15729_v44, %v4790_v37  ;;  %v7455_v7 = vld [vmem:[%s20263_s3 + $0x100] sm:$0xff] }
 0x2c8   :  { %21138 = vst [vmem:[#allocation64_spill] sm:$0xff] %v15774_v16  ;;  %21139 = vst [vmem:[#allocation63_spill] sm:$0xff] %v15778_v57  ;;  %v5604_v8 = vsel %vm3424_vm12, %v15299_v36, %v5603_v62  ;;  %8766 = vmatpush2.msra.mxu1 %v7457_v40  ;;  %v15786_v56 = vrot.slane %v4265_v50, %v12993_v31  ;;  %v5298_v35 = vsel %vm3422_vm11, %v15201_v30, %v5297_v41 }
 0x2c9   :  { %21136 = vst [vmem:[#allocation61_spill] sm:$0xff] %v15767_v14  ;;  %21137 = vst [vmem:[#allocation62_spill] sm:$0xff] %v15770_v55  ;;  %v5605_v26 = vsel %vm3426_vm13, %v15344_v22, %v5604_v8  ;;  %v3722_v13 = vsel %vm3710_vm14, %v3660_v52, 0.0  ;;  %9004 = vmatpush2.msra.mxu0 %v7597_v12  ;;  %8767 = vmatprep.subr.mxu1 %v7456_v24  ;;  %v5299_v37 = vsel %vm3424_vm12, %v15211_v1, %v5298_v35  ;;  %v7595_v12 = vld [vmem:[%s20263_s3 + $0x560] sm:$0xff]  ;;  %v3664_v35 = vpop.permute.xlu1 %3663 }
 0x2ca   :  { %21140 = vst [vmem:[#allocation66_spill] sm:$0xff] %v15786_v56  ;;  %5703 = vrot.lane.b32.xlu0 %v5605_v26, %s12096_s28  ;;  %v5613_v62 = vsel %vm3414_vm7, %v15741_v58, %v15601_v47  ;;  %v5606_v40 = vsel %vm3414_vm7, %v15082_v15, %v21118_v39  ;;  %v3689_v41 = vsel %vm3677_vm15, %v3658_v25, %v3660_v52 }
 0x2cb   :  { %v5300_v24 = vsel %vm3426_vm13, %v15302_v10, %v5299_v37  ;;  %v5607_v59 = vsel %vm3416_vm8, %v15150_v28, %v5606_v40  ;;  %v3936_v8 = vcombine.low %v3689_v41, %v3722_v13  ;;  %v3937_v26 = vcombine.high %v3689_v41, %v3722_v13  ;;  %9005 = vmatprep.subr.mxu0 %v7596_v18  ;;  %v3662_v37 = vpop.permute.xlu0 %3661  ;;  %v7594_v13 = vld [vmem:[%s20263_s3 + $0x558] sm:$0xff] }
 0x2cc   :  { %5393 = vrot.lane.b32.xlu1 %v5300_v24, %s12094_s29  ;;  %v5608_v57 = vsel %vm3418_vm9, %v15154_v9, %v5607_v59  ;;  %v15818_v52 = vrot.slane %v15619_v2, %v12993_v31  ;;  %v5303_v25 = vsel %vm3414_vm7, %v15398_v51, %v15360_v4  ;;  %8768 = vmatpush2.msra.mxu1 %v7455_v7  ;;  %v7593_v4 = vld [vmem:[%s20263_s3 + $0x550] sm:$0xff]  ;;  %v21147_v2 = vld [vmem:[#allocation69_spill] sm:$0xff] }
 0x2cd   :  { %v5609_v18 = vsel %vm3420_vm10, %v15201_v30, %v5608_v57  ;;  %v3944_v40 = vrot.slane %v3936_v8, %v13009_v27  ;;  %v3951_v41 = vrot.slane %v3937_v26, %v13009_v27  ;;  %v5304_v24 = vsel %vm3416_vm8, %v15477_v29, %v5303_v25  ;;  %9006 = vmatpush2.msra.mxu0 %v7595_v12  ;;  %v7592_v12 = vld [vmem:[%s20263_s3 + $0x548] sm:$0xff] }
 0x2ce   :  { %21141 = vst [vmem:[#allocation67_spill] sm:$0xff] %v15818_v52  ;;  %v15836_v7 = vrot.slane %v4265_v50, %v13020_v21  ;;  %5707 = vrot.lane.b32.xlu0 %v5613_v62, %s12096_s28  ;;  %v5610_v57 = vsel %vm3422_vm11, %v15211_v1, %v5609_v18  ;;  %v5305_v59 = vsel %vm3418_vm9, %v15407_v61, %v5304_v24  ;;  %v3723_v8 = vsel %vm3710_vm14, %v3664_v35, 0.0  ;;  %v21156_v61 = vld [vmem:[#allocation73_spill] sm:$0xff] }
 0x2cf   :  { %v5611_v26 = vsel %vm3424_vm12, %v15302_v10, %v5610_v57  ;;  %v15849_v25 = vcombine.high %v3944_v40, %v3944_v40  ;;  %v4062_v50 = vrot.slane %v3944_v40, 1  ;;  %v3690_v62 = vsel %vm3677_vm15, %v3662_v37, %v3664_v35  ;;  %9007 = vmatprep.subr.mxu0 %v7594_v13  ;;  %v7591_v57 = vld [vmem:[%s20263_s3 + $0x540] sm:$0xff]  ;;  %v21146_v37 = vld [vmem:[#allocation68_spill] sm:$0xff] }
 0x2d0   :  { %21142 = vst [vmem:[#allocation166_spill] sm:$0xff] %v15836_v7  ;;  %v15853_v18 = vrot.slane %v4264_v45, %v12993_v31  ;;  %v15856_v24 = vrot.slane %v4264_v45, %v13020_v21  ;;  %v5612_v16 = vsel %vm3426_vm13, %v15354_v53, %v5611_v26  ;;  %v5306_v39 = vsel %vm3420_vm10, %v15510_v20, %v5305_v59 }
 0x2d1   :  { %21143 = vst [vmem:[#allocation167_spill] sm:$0xff] %v15849_v25  ;;  %9008 = vmatpush2.msra.mxu0 %v7593_v4  ;;  %5705 = vrot.lane.b32.xlu1 %v5612_v16, %s12096_s28  ;;  %v4064_v35 = vrot.slane %v3951_v41, 1  ;;  %v4270_v13 = vmax.f32 %v21146_v37, %v4062_v50  ;;  %v15869_v45 = vmax.f32 %v21147_v2, %v15849_v25  ;;  %v7590_v4 = vld [vmem:[%s20263_s3 + $0x538] sm:$0xff] }
 0x2d2   :  { %21144 = vst [vmem:[#allocation168_spill] sm:$0xff] %v15853_v18  ;;  %21145 = vst [vmem:[#allocation169_spill] sm:$0xff] %v15856_v24  ;;  %v5317_v26 = vsel %vm3414_vm7, %v15818_v52, %v15692_v63  ;;  %9009 = vmatprep.subr.mxu0 %v7592_v12  ;;  %v15879_v59 = vrot.slane %v15747_v38, %v12993_v31  ;;  %v15883_v16 = vrot.slane %v15747_v38, %v13020_v21  ;;  %v7589_v12 = vld [vmem:[%s20263_s3 + $0x530] sm:$0xff] }
 0x2d3   :  { %21148 = vst [vmem:[#allocation68_spill] sm:$0xff] %v15869_v45  ;;  %5403 = vrot.lane.b32.xlu0 %v5317_v26, %s12094_s29  ;;  %v5307_v2 = vsel %vm3422_vm11, %v15527_v46, %v5306_v39  ;;  %v3953_v50 = vcombine.low %v3690_v62, %v3723_v8  ;;  %v15893_v37 = vrot.slane %v15761_v19, %v12993_v31  ;;  %v7588_v26 = vld [vmem:[%s20263_s3 + $0x528] sm:$0xff] }
 0x2d4   :  { %21149 = vst [vmem:[#allocation69_spill] sm:$0xff] %v15879_v59  ;;  %21150 = vst [vmem:[#allocation170_spill] sm:$0xff] %v15883_v16  ;;  %v15897_v52 = vrot.slane %v15761_v19, %v13020_v21  ;;  %v15900_v38 = vrot.slane %v4270_v13, %v12993_v31  ;;  %v5326_v39 = vsel %vm3414_vm7, %v15770_v55, %v15729_v44  ;;  %9010 = vmatpush2.msra.mxu0 %v7591_v57  ;;  %v7587_v44 = vld [vmem:[%s20263_s3 + $0x520] sm:$0xff]  ;;  %v21155_v57 = vld [vmem:[#allocation65_spill] sm:$0xff] }
 0x2d5   :  { %21151 = vst [vmem:[#allocation171_spill] sm:$0xff] %v15893_v37  ;;  %v15910_v63 = vrot.slane %v15764_v3, %v12993_v31  ;;  %v5308_v19 = vsel %vm3424_vm12, %v15538_v49, %v5307_v2  ;;  %v3954_v46 = vcombine.high %v3690_v62, %v3723_v8  ;;  %v3961_v20 = vrot.slane %v3953_v50, %v13009_v27  ;;  %v7586_v8 = vld [vmem:[%s20263_s3 + $0x518] sm:$0xff] }
 0x2d6   :  { %21152 = vst [vmem:[#allocation172_spill] sm:$0xff] %v15897_v52  ;;  %21153 = vst [vmem:[#allocation173_spill] sm:$0xff] %v15900_v38  ;;  %9011 = vmatprep.subr.mxu0 %v7590_v4  ;;  %v4269_v55 = vmax.f32 %v21155_v57, %v3944_v40  ;;  %v15920_v58 = vmax.f32 %v21156_v61, %v4064_v35  ;;  %v5309_v29 = vsel %vm3426_vm13, %v15667_v6, %v5308_v19  ;;  %v7585_v35 = vld [vmem:[%s20263_s3 + $0x510] sm:$0xff]  ;;  %v21163_v19 = vld [vmem:[#allocation74_spill] sm:$0xff] }
 0x2d7   :  { %21154 = vst [vmem:[#allocation174_spill] sm:$0xff] %v15910_v63  ;;  %v15926_v51 = vrot.slane %v15869_v45, %v12993_v31  ;;  %9012 = vmatpush2.msra.mxu0 %v7589_v12  ;;  %5399 = vrot.lane.b32.xlu0 %v5309_v29, %s12094_s29  ;;  %v3968_v62 = vrot.slane %v3954_v46, %v13009_v27  ;;  %v4065_v4 = vrot.slane %v3961_v20, 1  ;;  %v21161_v46 = vld [vmem:[#allocation70_spill] sm:$0xff]  ;;  %v21164_v45 = vld [vmem:[#allocation76_spill] sm:$0xff] }
 0x2d8   :  { %21157 = vst [vmem:[#allocation65_spill] sm:$0xff] %v15920_v58  ;;  %v3969_v40 = vcombine.high %v3961_v20, %v3961_v20  ;;  %v5327_v61 = vsel %vm3416_vm8, %v15856_v24, %v5326_v39  ;;  %9013 = vmatprep.subr.mxu0 %v7588_v26  ;;  %v15940_v2 = vrot.slane %v15764_v3, %v13020_v21  ;;  %v7584_v39 = vld [vmem:[%s20263_s3 + $0x508] sm:$0xff] }
 0x2d9   :  { %21158 = vst [vmem:[#allocation73_spill] sm:$0xff] %v15926_v51  ;;  %v15945_v29 = vsel %vm3414_vm7, %v15883_v16, %v15836_v7  ;;  %v15948_v50 = vmax.f32 %v21161_v46, %v3951_v41  ;;  %v5333_v12 = vsel %vm3414_vm7, %v15926_v51, %v15900_v38  ;;  %9014 = vmatpush2.msra.mxu0 %v7587_v44  ;;  %v3668_v41 = vpop.permute.xlu1 %3667  ;;  %v7583_v46 = vld [vmem:[%s20263_s3 + $0x500] sm:$0xff] }
 0x2da   :  { %21159 = vst [vmem:[#allocation175_spill] sm:$0xff] %v15940_v2  ;;  %21160 = vst [vmem:[#allocation176_spill] sm:$0xff] %v15945_v29  ;;  %v3970_v26 = vcombine.high %v3968_v62, %v3968_v62  ;;  %v4066_v3 = vrot.slane %v3969_v40, 1  ;;  %v15957_v57 = vmax.f32 %v21163_v19, %v3961_v20  ;;  %v4276_v24 = vmax.f32 %v21164_v45, %v4065_v4  ;;  %v3666_v45 = vpop.permute.xlu0 %3665  ;;  %v21168_v19 = vld [vmem:[#allocation75_spill] sm:$0xff] }
 0x2db   :  { %21162 = vst [vmem:[#allocation70_spill] sm:$0xff] %v15948_v50  ;;  %5411 = vrot.lane.b32.xlu1 %v5333_v12, %s12094_s29  ;;  %9015 = vmatprep.subr.mxu0 %v7586_v8  ;;  %v15965_v44 = vrot.slane %v4269_v55, %v12993_v31  ;;  %v4067_v50 = vrot.slane %v3968_v62, 1  ;;  %v5328_v29 = vsel %vm3418_vm9, %v15836_v7, %v5327_v61  ;;  %v21169_v61 = vld [vmem:[#allocation79_spill] sm:$0xff]  ;;  %v21171_v12 = vld [vmem:[#allocation80_spill] sm:$0xff] }
 0x2dc   :  { %v5319_v20 = vsel %vm3414_vm7, %v15767_v14, %v15726_v5  ;;  %9016 = vmatpush2.msra.mxu0 %v7585_v35  ;;  %v15973_v4 = vrot.slane %v4269_v55, %v13020_v21  ;;  %v15976_v8 = vrot.slane %v4270_v13, %v13020_v21  ;;  %v4277_v51 = vmax.f32 %v21168_v19, %v3969_v40 }
 0x2dd   :  { %21165 = vst [vmem:[#allocation74_spill] sm:$0xff] %v15965_v44  ;;  %9017 = vmatprep.subr.mxu0 %v7584_v39  ;;  %v4068_v6 = vrot.slane %v3970_v26, 1  ;;  %v4278_v7 = vmax.f32 %v21169_v61, %v4066_v3  ;;  %v4874_v49 = vrot.slane %v4276_v24, %v12993_v31  ;;  %v3724_v5 = vsel %vm3710_vm14, %v3668_v41, 0.0  ;;  %v21170_v39 = vld [vmem:[#allocation77_spill] sm:$0xff]  ;;  %v21172_v61 = vld [vmem:[#allocation78_spill] sm:$0xff] }
 0x2de   :  { %21166 = vst [vmem:[#allocation76_spill] sm:$0xff] %v15973_v4  ;;  %21167 = vst [vmem:[#allocation177_spill] sm:$0xff] %v15976_v8  ;;  %9018 = vmatpush2.msra.mxu0 %v7583_v46  ;;  %v4866_v55 = vrot.slane %v15957_v57, %v12993_v31  ;;  %v5329_v13 = vsel %vm3420_vm10, %v15883_v16, %v5328_v29  ;;  %v5320_v35 = vsel %vm3416_vm8, %v15853_v18, %v5319_v20  ;;  %v3670_v8 = vpop.permute.xlu0 %3669 }
 0x2df   :  { %v3691_v40 = vsel %vm3677_vm15, %v3666_v45, %v3668_v41  ;;  %v4279_v19 = vmax.f32 %v21170_v39, %v3968_v62  ;;  %v4280_v3 = vmax.f32 %v21171_v12, %v4067_v50  ;;  %v15994_v58 = vmax.f32 %v21172_v61, %v3970_v26  ;;  %v21177_v50 = vld [vmem:[#allocation81_spill] sm:$0xff]  ;;  %v3672_v12 = vpop.permute.xlu1 %3671 }
 0x2e0   :  { %v15999_v32 = vrot.slane %v4276_v24, %v13020_v21  ;;  %v16002_v29 = vrot.slane %v4277_v51, %v12993_v31  ;;  %v16005_v20 = vrot.slane %v4277_v51, %v13020_v21  ;;  %v16008_v62 = vsel %vm3414_vm7, %v4874_v49, %v4866_v55 }
 0x2e1   :  { %21176 = vst [vmem:[#allocation80_spill] sm:$0xff] %v16008_v62  ;;  %v16011_v41 = vmax.f32 %v21177_v50, %v4068_v6  ;;  %v16014_v26 = vrot.slane %v4278_v7, %v12993_v31  ;;  %v5330_v45 = vsel %vm3422_vm11, %v15897_v52, %v5329_v13  ;;  %v5321_v24 = vsel %vm3418_vm9, %v15786_v56, %v5320_v35  ;;  %v21182_v62 = vld [vmem:[#allocation82_spill] sm:$0xff]  ;;  %v21241_v52 = vld [vmem:[#allocation111_spill] sm:$0xff] }
 0x2e2   :  { %21173 = vst [vmem:[#allocation75_spill] sm:$0xff] %v15999_v32  ;;  %21174 = vst [vmem:[#allocation79_spill] sm:$0xff] %v16002_v29  ;;  %v5331_v51 = vsel %vm3424_vm12, %v15940_v2, %v5330_v45  ;;  %v5322_v55 = vsel %vm3420_vm10, %v15879_v59, %v5321_v24  ;;  %v3971_v39 = vcombine.low %v3691_v40, %v3724_v5  ;;  %v3674_v46 = vpop.permute.xlu0 %3673  ;;  %v21239_v2 = vld [vmem:[#allocation122_spill] sm:$0xff] }
 0x2e3   :  { %21175 = vst [vmem:[#allocation77_spill] sm:$0xff] %v16005_v20  ;;  %21178 = vst [vmem:[#allocation78_spill] sm:$0xff] %v16014_v26  ;;  %v3972_v61 = vcombine.high %v3691_v40, %v3724_v5  ;;  %v16025_v6 = vrot.slane %v4278_v7, %v13020_v21  ;;  %v5332_v50 = vsel %vm3426_vm13, %v15973_v4, %v5331_v51  ;;  %v3725_v40 = vsel %vm3710_vm14, %v3672_v12, 0.0  ;;  %v21186_v20 = vld [vmem:[#allocation83_spill] sm:$0xff] }
 0x2e4   :  { %v5323_v13 = vsel %vm3422_vm11, %v15893_v37, %v5322_v55  ;;  %v5631_v35 = vsel %vm3414_vm7, %v15853_v18, %v15767_v14  ;;  %5409 = vrot.lane.b32.xlu0 %v5332_v50, %s12094_s29  ;;  %v3979_v5 = vrot.slane %v3971_v39, %v13009_v27  ;;  %v5335_v55 = vsel %vm3414_vm7, %v16002_v29, %v4874_v49  ;;  %v21185_v29 = vld [vmem:[#allocation84_spill] sm:$0xff] }
 0x2e5   :  { %21179 = vst [vmem:[#allocation81_spill] sm:$0xff] %v16025_v6  ;;  %v5324_v45 = vsel %vm3424_vm12, %v15910_v63, %v5323_v13  ;;  %v5632_v7 = vsel %vm3416_vm8, %v15786_v56, %v5631_v35  ;;  %v3692_v50 = vsel %vm3677_vm15, %v3670_v8, %v3672_v12  ;;  %v16049_v13 = vrot.slane %v4279_v19, %v12993_v31 }
 0x2e6   :  { %v5325_v24 = vsel %vm3426_vm13, %v15965_v44, %v5324_v45  ;;  %v5633_v51 = vsel %vm3418_vm9, %v15879_v59, %v5632_v7  ;;  %v16052_v39 = vcombine.high %v3979_v5, %v3979_v5  ;;  %v4069_v35 = vrot.slane %v3979_v5, 1 }
 0x2e7   :  { %21180 = vst [vmem:[#allocation178_spill] sm:$0xff] %v16049_v13  ;;  %5407 = vrot.lane.b32.xlu1 %v5325_v24, %s12094_s29  ;;  %v4283_v14 = vmax.f32 %v21182_v62, %v3979_v5  ;;  %v16056_v45 = vrot.slane %v4279_v19, %v13020_v21  ;;  %v5634_v7 = vsel %vm3420_vm10, %v15893_v37, %v5633_v51 }
 0x2e8   :  { %21181 = vst [vmem:[#allocation179_spill] sm:$0xff] %v16052_v39  ;;  %v5336_v49 = vsel %vm3416_vm8, %v16014_v26, %v5335_v55  ;;  %v3988_v8 = vcombine.low %v3692_v50, %v3725_v40  ;;  %v16063_v12 = vrot.slane %v4280_v3, %v12993_v31  ;;  %v3986_v24 = vrot.slane %v3972_v61, %v13009_v27  ;;  %v3676_v61 = vpop.permute.xlu1 %3675  ;;  %v16082_v26 = vpop.permute.xlu0 %5371 }
 0x2e9   :  { %21183 = vst [vmem:[#allocation82_spill] sm:$0xff] %v16056_v45  ;;  %v4284_v6 = vmax.f32 %v21185_v29, %v4069_v35  ;;  %v16069_v62 = vmax.f32 %v21186_v20, %v16052_v39  ;;  %v16072_v19 = vrot.slane %v4280_v3, %v13020_v21  ;;  %v16076_v5 = vrot.slane %v15994_v58, %v12993_v31 }
 0x2ea   :  { %21184 = vst [vmem:[#allocation180_spill] sm:$0xff] %v16063_v12  ;;  %v5635_v51 = vsel %vm3422_vm11, %v15910_v63, %v5634_v7  ;;  %v5337_v55 = vsel %vm3418_vm9, %v16049_v13, %v5336_v49  ;;  %v16086_v29 = vrot.slane %v16011_v41, %v12993_v31  ;;  %v16089_v3 = vrot.slane %v4283_v14, %v12993_v31 }
 0x2eb   :  { %21187 = vst [vmem:[#allocation84_spill] sm:$0xff] %v16069_v62  ;;  %21188 = vst [vmem:[#allocation83_spill] sm:$0xff] %v16072_v19  ;;  %v16092_v20 = vrot.slane %v4284_v6, %v12993_v31  ;;  %v5636_v35 = vsel %vm3424_vm12, %v15965_v44, %v5635_v51  ;;  %v5338_v49 = vsel %vm3420_vm10, %v16063_v12, %v5337_v55  ;;  %v4071_v37 = vrot.slane %v3986_v24, 1 }
 0x2ec   :  { %21189 = vst [vmem:[#allocation181_spill] sm:$0xff] %v16076_v5  ;;  %21190 = vst [vmem:[#allocation182_spill] sm:$0xff] %v16086_v29  ;;  %v5637_v7 = vsel %vm3426_vm13, %v15900_v38, %v5636_v35  ;;  %v3989_v13 = vcombine.high %v3692_v50, %v3725_v40  ;;  %v3996_v63 = vrot.slane %v3988_v8, %v13009_v27  ;;  %v3726_v51 = vsel %vm3710_vm14, %v3676_v61, 0.0  ;;  %v21195_v38 = vld [vmem:[#allocation87_spill] sm:$0xff] }
 0x2ed   :  { %21191 = vst [vmem:[#allocation183_spill] sm:$0xff] %v16089_v3  ;;  %21192 = vst [vmem:[#allocation184_spill] sm:$0xff] %v16092_v20  ;;  %5719 = vrot.lane.b32.xlu1 %v5637_v7, %s12096_s28  ;;  %v5339_v59 = vsel %vm3422_vm11, %v16076_v5, %v5338_v49  ;;  %v16106_v56 = vrot.slane %v16069_v62, %v12993_v31  ;;  %v21194_v7 = vld [vmem:[#allocation86_spill] sm:$0xff]  ;;  %v3693_v62 = vsel %vm3677_vm15, %v3674_v46, %v3676_v61  ;;  %v7518_v5 = vld [vmem:[%s20263_s3 + $0x2f8] sm:$0xff] }
 0x2ee   :  { %v5340_v35 = vsel %vm3424_vm12, %v16086_v29, %v5339_v59  ;;  %v4003_v55 = vrot.slane %v3989_v13, %v13009_v27  ;;  %v4004_v40 = vcombine.high %v3996_v63, %v3996_v63  ;;  %v4072_v50 = vrot.slane %v3996_v63, 1  ;;  %8830 = vmatprep.subr.mxu1 %v7518_v5  ;;  %v16145_v5 = vpop.permute.xlu1 %5679 }
 0x2ef   :  { %21193 = vst [vmem:[#allocation185_spill] sm:$0xff] %v16106_v56  ;;  %v5341_v8 = vsel %vm3426_vm13, %v16089_v3, %v5340_v35  ;;  %v4289_v12 = vmax.f32 %v21194_v7, %v3996_v63  ;;  %v5349_v49 = vsel %vm3414_vm7, %v16106_v56, %v16092_v20  ;;  %v16124_v35 = vpop.permute.xlu0 %5373  ;;  %v16128_v63 = vrot.slane %v15994_v58, %v13020_v21  ;;  %v21200_v7 = vld [vmem:[#allocation89_spill] sm:$0xff]  ;;  %v21205_v56 = vld [vmem:[#allocation107_spill] sm:$0xff] }
 0x2f0   :  { %5415 = vrot.lane.b32.xlu0 %v5341_v8, %s12094_s29  ;;  %v4005_v59 = vcombine.high %v4003_v55, %v4003_v55  ;;  %v4073_v13 = vrot.slane %v4004_v40, 1  ;;  %v4074_v29 = vrot.slane %v4003_v55, 1  ;;  %v4290_v44 = vmax.f32 %v21195_v38, %v4072_v50 }
 0x2f1   :  { %21196 = vst [vmem:[#allocation86_spill] sm:$0xff] %v16128_v63  ;;  %v16132_v46 = vrot.slane %v16011_v41, %v13020_v21  ;;  %v21198_v61 = vrot.slane %v15957_v57, %v13020_v21  ;;  %v16142_v38 = vmax.f32 %v21200_v7, %v4071_v37  ;;  %5419 = vrot.lane.b32.xlu1 %v5349_v49, %s12094_s29  ;;  %v21203_v41 = vld [vmem:[#allocation88_spill] sm:$0xff] }
 0x2f2   :  { %v16150_v58 = vsel %vm3414_vm7, %v16072_v19, %v16056_v45  ;;  %v16153_v50 = vmax.f32 %v21203_v41, %v3986_v24  ;;  %v4075_v57 = vrot.slane %v4005_v59, 1  ;;  %v4291_v20 = vmax.f32 %v21205_v56, %v4004_v40  ;;  %v21211_v40 = vld [vmem:[#allocation114_spill] sm:$0xff]  ;;  %v21232_v45 = vld [vmem:[#allocation99_spill] sm:$0xff] }
 0x2f3   :  { %21197 = vst [vmem:[#allocation87_spill] sm:$0xff] %v16132_v46  ;;  %v16139_v8 = vsel %vm3414_vm7, %v15999_v32, %v21198_v61  ;;  %21201 = vst [vmem:[#allocation89_spill] sm:$0xff] %v16142_v38  ;;  %v21206_v61 = vld [vmem:[#allocation108_spill] sm:$0xff]  ;;  %v4954_v37 = vrot.slane %v4290_v44, %v12993_v31  ;;  %v16159_v7 = vrot.slane %v4290_v44, %v13020_v21  ;;  %v21208_v46 = vld [vmem:[#allocation109_spill] sm:$0xff] }
 0x2f4   :  { %21199 = vst [vmem:[#allocation186_spill] sm:$0xff] %v16139_v8  ;;  %21202 = vst [vmem:[#allocation187_spill] sm:$0xff] %v16150_v58  ;;  %v4292_v8 = vmax.f32 %v21206_v61, %v4073_v13  ;;  %v4006_v49 = vcombine.low %v3693_v62, %v3726_v51  ;;  %v16162_v3 = vrot.slane %v4283_v14, %v13020_v21  ;;  %v21209_v58 = vld [vmem:[#allocation110_spill] sm:$0xff]  ;;  %v21212_v61 = vld [vmem:[#allocation116_spill] sm:$0xff] }
 0x2f5   :  { %21204 = vst [vmem:[#allocation88_spill] sm:$0xff] %v16153_v50  ;;  %v4293_v63 = vmax.f32 %v21208_v46, %v4003_v55  ;;  %v4294_v19 = vmax.f32 %v21209_v58, %v4074_v29  ;;  %v4946_v24 = vrot.slane %v4289_v12, %v12993_v31  ;;  %v16168_v41 = vrot.slane %v4284_v6, %v13020_v21  ;;  %v16184_v6 = vpop.permute.xlu0 %5367  ;;  %v21233_v32 = vld [vmem:[#allocation93_spill] sm:$0xff] }
 0x2f6   :  { %21207 = vst [vmem:[#allocation107_spill] sm:$0xff] %v16162_v3  ;;  %v4295_v13 = vmax.f32 %v21211_v40, %v4005_v59  ;;  %v4950_v44 = vrot.slane %v4289_v12, %v13020_v21  ;;  %v4296_v50 = vmax.f32 %v21212_v61, %v4075_v57  ;;  %v16176_v14 = vrot.slane %v4291_v20, %v12993_v31  ;;  %v16194_v57 = vpop.permute.xlu1 %5681 }
 0x2f7   :  { %21210 = vst [vmem:[#allocation108_spill] sm:$0xff] %v16168_v41  ;;  %v16179_v55 = vrot.slane %v4291_v20, %v13020_v21  ;;  %v16182_v29 = vsel %vm3414_vm7, %v4954_v37, %v4946_v24  ;;  %v16187_v46 = vrot.slane %v4292_v8, %v12993_v31  ;;  %v4007_v12 = vcombine.high %v3693_v62, %v3726_v51  ;;  %v21231_v41 = vld [vmem:[#allocation113_spill] sm:$0xff] }
 0x2f8   :  { %21213 = vst [vmem:[#allocation109_spill] sm:$0xff] %v16176_v14  ;;  %21215 = vst [vmem:[#allocation114_spill] sm:$0xff] %v16182_v29  ;;  %v16191_v59 = vsel %vm3414_vm7, %v16159_v7, %v4950_v44  ;;  %v4014_v58 = vrot.slane %v4006_v49, %v13009_v27  ;;  %v16197_v20 = vrot.slane %v4292_v8, %v13020_v21  ;;  %v21230_v29 = vld [vmem:[#allocation92_spill] sm:$0xff] }
 0x2f9   :  { %21214 = vst [vmem:[#allocation110_spill] sm:$0xff] %v16179_v55  ;;  %21216 = vst [vmem:[#allocation116_spill] sm:$0xff] %v16187_v46  ;;  %v16200_v24 = vrot.slane %v4293_v63, %v12993_v31  ;;  %v16203_v40 = vrot.slane %v4293_v63, %v13020_v21  ;;  %v16206_v61 = vrot.slane %v4294_v19, %v13020_v21 }
 0x2fa   :  { %21217 = vst [vmem:[#allocation188_spill] sm:$0xff] %v16191_v59  ;;  %21218 = vst [vmem:[#allocation189_spill] sm:$0xff] %v16194_v57  ;;  %v16209_v44 = vrot.slane %v4294_v19, %v12993_v31  ;;  %v16212_v62 = vrot.slane %v4295_v13, %v12993_v31  ;;  %v16214_v51 = vcombine.high %v4014_v58, %v4014_v58  ;;  %v4076_v49 = vrot.slane %v4014_v58, 1  ;;  %v21229_v59 = vld [vmem:[#allocation98_spill] sm:$0xff]  ;;  %v16235_v4 = vpop.permute.xlu1 %5379 }
 0x2fb   :  { %21219 = vst [vmem:[#allocation190_spill] sm:$0xff] %v16197_v20  ;;  %21220 = vst [vmem:[#allocation191_spill] sm:$0xff] %v16200_v24  ;;  %v16217_v8 = vrot.slane %v4295_v13, %v13020_v21  ;;  %v16220_v56 = vrot.slane %v4296_v50, %v12993_v31  ;;  %v16223_v63 = vrot.slane %v4296_v50, %v13020_v21 }
 0x2fc   :  { %21221 = vst [vmem:[#allocation192_spill] sm:$0xff] %v16203_v40  ;;  %21222 = vst [vmem:[#allocation193_spill] sm:$0xff] %v16206_v61  ;;  %v5024_v19 = vsel %vm3416_vm8, %v21230_v29, %v21229_v59  ;;  %v4021_v38 = vrot.slane %v4007_v12, %v13009_v27  ;;  %v4298_v3 = vmax.f32 %v21231_v41, %v4076_v49  ;;  %v21235_v29 = vld [vmem:[#allocation112_spill] sm:$0xff]  ;;  %v21237_v12 = vld [vmem:[#allocation121_spill] sm:$0xff] }
 0x2fd   :  { %21223 = vst [vmem:[#allocation194_spill] sm:$0xff] %v16209_v44  ;;  %21224 = vst [vmem:[#allocation195_spill] sm:$0xff] %v16212_v62  ;;  %v5031_v18 = vsel %vm3416_vm8, %v21233_v32, %v21232_v45  ;;  %v5351_v13 = vsel %vm3414_vm7, %v16176_v14, %v4954_v37  ;;  %v16240_v50 = vsel %vm3414_vm7, %v16206_v61, %v16203_v40  ;;  %v21238_v41 = vld [vmem:[#allocation123_spill] sm:$0xff]  ;;  %v21240_v32 = vld [vmem:[#allocation124_spill] sm:$0xff]  ;;  %v16252_v37 = vpop.permute.xlu0 %5369 }
 0x2fe   :  { %21225 = vst [vmem:[#allocation196_spill] sm:$0xff] %v16214_v51  ;;  %21226 = vst [vmem:[#allocation197_spill] sm:$0xff] %v16217_v8  ;;  %v16244_v59 = vmax.f32 %v21235_v29, %v16214_v51  ;;  %v5037_v49 = vsel %vm3414_vm7, %v21238_v41, %v21237_v12  ;;  %v5038_v45 = vsel %vm3414_vm7, %v21240_v32, %v21239_v2  ;;  %v21245_v12 = vld [vmem:[#allocation95_spill] sm:$0xff]  ;;  %v21246_v2 = vld [vmem:[#allocation97_spill] sm:$0xff] }
 0x2ff   :  { %21227 = vst [vmem:[#allocation198_spill] sm:$0xff] %v16220_v56  ;;  %21228 = vst [vmem:[#allocation199_spill] sm:$0xff] %v16223_v63  ;;  %v4297_v16 = vmax.f32 %v21241_v52, %v4014_v58  ;;  %v6288_v39 = vsel %vm684_vm6, %v5038_v45, %v16082_v26  ;;  %v16260_v29 = vsel %vm651_vm5, %v16145_v5, %v16194_v57  ;;  %v4078_v45 = vrot.slane %v4021_v38, 1 }
 0x300   :  { %21234 = vst [vmem:[#allocation98_spill] sm:$0xff] %v16240_v50  ;;  %21236 = vst [vmem:[#allocation92_spill] sm:$0xff] %v16244_v59  ;;  %v21243_v50 = vld [vmem:[#allocation94_spill] sm:$0xff]  ;;  %v16265_v41 = vrot.slane %v4298_v3, %v12993_v31  ;;  %v5032_v52 = vsel %vm3418_vm9, %v21246_v2, %v5031_v18  ;;  %v5352_v58 = vsel %vm3416_vm8, %v16187_v46, %v5351_v13 }
 0x301   :  { %21242 = vst [vmem:[#allocation113_spill] sm:$0xff] %v16260_v29  ;;  %v5025_v51 = vsel %vm3418_vm9, %v21243_v50, %v5024_v19  ;;  %v21248_v29 = vld [vmem:[#allocation96_spill] sm:$0xff]  ;;  %v5353_v19 = vsel %vm3418_vm9, %v16200_v24, %v5352_v58  ;;  %v21249_v50 = vld [vmem:[#allocation102_spill] sm:$0xff]  ;;  %v16287_v13 = vrot.slane %v16244_v59, %v12993_v31  ;;  %v21253_v58 = vld [vmem:[#allocation103_spill] sm:$0xff]  ;;  %v16310_v2 = vpop.permute.xlu0 %5683 }
 0x302   :  { %21244 = vst [vmem:[#allocation99_spill] sm:$0xff] %v16265_v41  ;;  %v5026_v32 = vsel %vm3420_vm10, %v21245_v12, %v5025_v51  ;;  %v5033_v57 = vsel %vm3420_vm10, %v21248_v29, %v5032_v52  ;;  %v21250_v51 = vld [vmem:[#allocation100_spill] sm:$0xff]  ;;  %v5354_v18 = vsel %vm3420_vm10, %v16209_v44, %v5353_v19  ;;  %v16295_v52 = vsel %vm684_vm6, %v16082_v26, %v16124_v35  ;;  %v21255_v59 = vld [vmem:[#allocation118_spill] sm:$0xff] }
 0x303   :  { %v5027_v25 = vsel %vm3422_vm11, %v21247_v23, %v5026_v32  ;;  %v5034_v12 = vsel %vm3422_vm11, %v21250_v51, %v5033_v57  ;;  %21251 = vst [vmem:[#allocation93_spill] sm:$0xff] %v16287_v13  ;;  %v16290_v32 = vrot.slane %v4297_v16, %v12993_v31  ;;  %v5355_v57 = vsel %vm3422_vm11, %v16212_v62, %v5354_v18  ;;  %v21254_v23 = vld [vmem:[#allocation105_spill] sm:$0xff] }
 0x304   :  { %v5028_v0 = vsel %vm3424_vm12, %v21249_v50, %v5027_v25  ;;  %v5035_v25 = vsel %vm3424_vm12, %v21253_v58, %v5034_v12  ;;  %v16301_v50 = vpop.permute.xlu1 %5381  ;;  %v6472_v19 = vcombine.low %v5037_v49, %v6288_v39  ;;  %v5356_v29 = vsel %vm3424_vm12, %v16220_v56, %v5355_v57  ;;  %v21257_v58 = vld [vmem:[#allocation104_spill] sm:$0xff] }
 0x305   :  { %21252 = vst [vmem:[#allocation112_spill] sm:$0xff] %v16290_v32  ;;  %v5036_v51 = vsel %vm3426_vm13, %v21254_v23, %v5035_v25  ;;  %v5365_v26 = vsel %vm3414_vm7, %v16287_v13, %v16265_v41  ;;  %v16313_v12 = vmax.f32 %v21255_v59, %v4078_v45  ;;  %v16317_v18 = vsel %vm3426_vm13, %v21257_v58, %v5028_v0  ;;  %v21258_v25 = vld [vmem:[#allocation115_spill] sm:$0xff] }
 0x306   :  { %v16321_v39 = vsel %vm684_vm6, %v5036_v51, %v16184_v6  ;;  %v5357_v49 = vsel %vm3426_vm13, %v16290_v32, %v5356_v29  ;;  %5427 = vrot.lane.b32.xlu1 %v5365_v26, %s12094_s29  ;;  %v16327_v57 = vmax.f32 %v21258_v25, %v4021_v38  ;;  %v16330_v23 = vrot.slane %v4297_v16, %v13020_v21 }
 0x307   :  { %21256 = vst [vmem:[#allocation111_spill] sm:$0xff] %v16313_v12  ;;  %v6383_v59 = vcombine.low %v16317_v18, %v16321_v39  ;;  %v6384_v0 = vcombine.high %v16317_v18, %v16321_v39  ;;  %5423 = vrot.lane.b32.xlu0 %v5357_v49, %s12094_s29  ;;  %v16338_v45 = vrot.slane %v4298_v3, %v13020_v21  ;;  %v21262_v18 = vld [vmem:[#allocation91_spill] sm:$0xff]  ;;  %v21263_v39 = vld [vmem:[#allocation16_spill] sm:$0xff] }
 0x308   :  { %21259 = vst [vmem:[#allocation94_spill] sm:$0xff] %v16327_v57  ;;  %21260 = vst [vmem:[#allocation118_spill] sm:$0xff] %v16330_v23  ;;  %v5054_v29 = vsel %vm3414_vm7, %v14729_v54, %v21044_v17  ;;  %v5663_v16 = vsel %vm3414_vm7, %v16187_v46, %v16176_v14  ;;  %v5358_v38 = vsel %vm3414_vm7, %v16179_v55, %v16159_v7  ;;  %v16371_v25 = vpop.permute.xlu1 %5375  ;;  %v16385_v17 = vpop.permute.xlu0 %5991  ;;  %v21269_v57 = vld [vmem:[#allocation8_spill] sm:$0xff] }
 0x309   :  { %21261 = vst [vmem:[#allocation115_spill] sm:$0xff] %v16338_v45  ;;  %v16350_v51 = vrot.slane %v6472_v19, %v13009_v27  ;;  %v16354_v26 = vsel %vm684_vm6, %v5054_v29, %v16235_v4  ;;  %v5664_v3 = vsel %vm3416_vm8, %v16200_v24, %v5663_v16  ;;  %v5359_v54 = vsel %vm3416_vm8, %v16197_v20, %v5358_v38 }
 0x30a   :  { %v16365_v7 = vsel %vm3414_vm7, %v21263_v39, %v21262_v18  ;;  %v5665_v19 = vsel %vm3418_vm9, %v16209_v44, %v5664_v3  ;;  %v5360_v49 = vsel %vm3418_vm9, %v16203_v40, %v5359_v54  ;;  %v16376_v29 = vsel %vm684_vm6, %v16184_v6, %v16252_v37  ;;  %21264 = vst [vmem:[#allocation91_spill] sm:$0xff] %v16385_v17 }
 0x30b   :  { %v5666_v16 = vsel %vm3420_vm10, %v16212_v62, %v5665_v19  ;;  %v5361_v38 = vsel %vm3420_vm10, %v16206_v61, %v5360_v49  ;;  %v5911_v3 = vsel %vm3414_vm7, %v15092_v42, %v15072_v48  ;;  %v6602_v54 = vcombine.low %v16365_v7, %v16354_v26  ;;  %v21294_v61 = vld [vmem:[#allocation55_spill] sm:$0xff] }
 0x30c   :  { %v5667_v58 = vsel %vm3422_vm11, %v16220_v56, %v5666_v16  ;;  %v5362_v6 = vsel %vm3422_vm11, %v16217_v8, %v5361_v38  ;;  %v5912_v19 = vsel %vm3416_vm8, %v15186_v60, %v5911_v3  ;;  %v5918_v26 = vsel %vm3414_vm7, %v15150_v28, %v15082_v15  ;;  %v21267_v3 = vld [vmem:[#allocation9_spill] sm:$0xff]  ;;  %v16444_v56 = vpop.permute.xlu0 %5685 }
 0x30d   :  { %v5668_v49 = vsel %vm3424_vm12, %v16290_v32, %v5667_v58  ;;  %v5363_v14 = vsel %vm3424_vm12, %v16223_v63, %v5362_v6  ;;  %v5913_v12 = vsel %vm3418_vm9, %v15190_v11, %v5912_v19  ;;  %v16407_v7 = vsel %vm651_vm5, %v16252_v37, %v16145_v5  ;;  %v21265_v37 = vld [vmem:[#allocation126_spill] sm:$0xff]  ;;  %v21266_v19 = vld [vmem:[#allocation7_spill] sm:$0xff]  ;;  %v21292_v8 = vld [vmem:[#allocation153_spill] sm:$0xff] }
 0x30e   :  { %v5669_v16 = vsel %vm3426_vm13, %v16265_v41, %v5668_v49  ;;  %v5364_v58 = vsel %vm3426_vm13, %v16330_v23, %v5363_v14  ;;  %v5914_v38 = vsel %vm3420_vm10, %v15205_v34, %v5913_v12  ;;  %v5919_v5 = vsel %vm3416_vm8, %v15154_v9, %v5918_v26  ;;  %v16434_v41 = vpop.permute.xlu1 %5687  ;;  %v21271_v32 = vld [vmem:[#allocation10_spill] sm:$0xff] }
 0x30f   :  { %5735 = vrot.lane.b32.xlu0 %v5669_v16, %s12096_s28  ;;  %5425 = vrot.lane.b32.xlu1 %v5364_v58, %s12094_s29  ;;  %v5915_v6 = vsel %vm3422_vm11, %v15299_v36, %v5914_v38  ;;  %v5040_v49 = vsel %vm3416_vm8, %v21266_v19, %v21265_v37  ;;  %v5920_v12 = vsel %vm3418_vm9, %v15201_v30, %v5919_v5  ;;  %v21268_v58 = vld [vmem:[#allocation127_spill] sm:$0xff]  ;;  %v21270_v19 = vld [vmem:[#allocation12_spill] sm:$0xff]  ;;  %v21305_v36 = vld [vmem:[#allocation157_spill] sm:$0xff] }
 0x310   :  { %v5916_v14 = vsel %vm3424_vm12, %v15344_v22, %v5915_v6  ;;  %v5041_v16 = vsel %vm3418_vm9, %v21267_v3, %v5040_v49  ;;  %v5047_v38 = vsel %vm3416_vm8, %v21269_v57, %v21268_v58  ;;  %v5921_v37 = vsel %vm3420_vm10, %v15211_v1, %v5920_v12  ;;  %v21272_v57 = vld [vmem:[#allocation125_spill] sm:$0xff]  ;;  %v21273_v58 = vld [vmem:[#allocation15_spill] sm:$0xff]  ;;  %v16491_v23 = vpop.permute.xlu0 %5995 }
 0x311   :  { %v5917_v26 = vsel %vm3426_vm13, %v15601_v47, %v5916_v14  ;;  %v5042_v6 = vsel %vm3420_vm10, %v21270_v19, %v5041_v16  ;;  %v5048_v5 = vsel %vm3418_vm9, %v21271_v32, %v5047_v38  ;;  %v5922_v3 = vsel %vm3422_vm11, %v15302_v10, %v5921_v37  ;;  %v21274_v16 = vld [vmem:[#allocation130_spill] sm:$0xff]  ;;  %v21275_v38 = vld [vmem:[#allocation128_spill] sm:$0xff]  ;;  %21283 = vst [vmem:[#allocation126_spill] sm:$0xff] %v16491_v23 }
 0x312   :  { %v5043_v49 = vsel %vm3422_vm11, %v21272_v57, %v5042_v6  ;;  %v5049_v14 = vsel %vm3420_vm10, %v21273_v58, %v5048_v5  ;;  %v6393_v47 = vrot.slane %v6383_v59, %v13009_v27  ;;  %v5923_v12 = vsel %vm3424_vm12, %v15354_v53, %v5922_v3  ;;  %v21276_v59 = vld [vmem:[#allocation131_spill] sm:$0xff] }
 0x313   :  { %6015 = vrot.lane.b32.xlu0 %v5917_v26, %s12095_s30  ;;  %v5044_v32 = vsel %vm3424_vm12, %v21274_v16, %v5043_v49  ;;  %v5050_v62 = vsel %vm3422_vm11, %v21275_v38, %v5049_v14  ;;  %v6400_v37 = vrot.slane %v6384_v0, %v13009_v27  ;;  %v6385_v6 = vcombine.low %v16376_v29, %v16407_v7  ;;  %v21277_v49 = vld [vmem:[#allocation134_spill] sm:$0xff] }
 0x314   :  { %v5924_v5 = vsel %vm3426_vm13, %v15629_v33, %v5923_v12  ;;  %v5051_v26 = vsel %vm3424_vm12, %v21276_v59, %v5050_v62  ;;  %v7725_v58 = vrot.slane %v6393_v47, %v13009_v27  ;;  %v6304_v3 = vsel %vm651_vm5, %v16124_v35, %v16310_v2  ;;  %v21278_v38 = vld [vmem:[#allocation46_spill] sm:$0xff]  ;;  %v21280_v12 = vld [vmem:[#allocation133_spill] sm:$0xff] }
 0x315   :  { %6017 = vrot.lane.b32.xlu1 %v5924_v5, %s12095_s30  ;;  %v5052_v0 = vsel %vm3426_vm13, %v21277_v49, %v5051_v26  ;;  %v7739_v14 = vrot.slane %v6400_v37, %v13009_v27  ;;  %v16477_v44 = vrot.slane %v21278_v38, %v13020_v21  ;;  %v5045_v62 = vsel %vm3426_vm13, %v21280_v12, %v5044_v32  ;;  %v21281_v59 = vld [vmem:[#allocation189_spill] sm:$0xff]  ;;  %v21282_v5 = vld [vmem:[#allocation150_spill] sm:$0xff]  ;;  %v16489_v49 = vpop.permute.xlu1 %5689 }
 0x316   :  { %v6289_v47 = vsel %vm684_vm6, %v5052_v0, %v16371_v25  ;;  %v6319_v35 = vsel %vm618_vm4, %v21281_v59, %v16385_v17  ;;  %v6215_v26 = vsel %vm3416_vm8, %v15201_v30, %v21282_v5  ;;  %v16494_v32 = vrot.slane %v6602_v54, %v13009_v27  ;;  %v21286_v54 = vld [vmem:[#allocation113_spill] sm:$0xff] }
 0x317   :  { %21279 = vst [vmem:[#allocation16_spill] sm:$0xff] %v16477_v44  ;;  %v6513_v37 = vcombine.low %v5045_v62, %v6289_v47  ;;  %v6514_v24 = vcombine.high %v5045_v62, %v6289_v47  ;;  %v7748_v38 = vcombine.high %v7725_v58, %v7739_v14  ;;  %v7747_v46 = vcombine.low %v7725_v58, %v7739_v14  ;;  %v7517_v62 = vld [vmem:[%s20263_s3 + $0x2f0] sm:$0xff]  ;;  %v21285_v58 = vld [vmem:[#allocation167_spill] sm:$0xff] }
 0x318   :  { %21284 = vst [vmem:[#allocation7_spill] sm:$0xff] %v16494_v32  ;;  %v6386_v0 = vcombine.high %v16376_v29, %v16407_v7  ;;  %v5614_v59 = vsel %vm3414_vm7, %v16477_v44, %v15629_v33  ;;  %v6216_v5 = vsel %vm3418_vm9, %v15211_v1, %v6215_v26  ;;  %v6473_v47 = vcombine.low %v16295_v52, %v6304_v3  ;;  %v7516_v7 = vld [vmem:[%s20263_s3 + $0x2e8] sm:$0xff]  ;;  %v21287_v3 = vld [vmem:[#allocation40_spill] sm:$0xff] }
 0x319   :  { %8769 = vmatprep.mubr.f32.mxu1 %v7748_v38  ;;  %v6419_v17 = vcombine.low %v21286_v54, %v6319_v35  ;;  %v6217_v29 = vsel %vm3420_vm10, %v15302_v10, %v6216_v5  ;;  %5709 = vrot.lane.b32.xlu0 %v5614_v59, %s12096_s28  ;;  %v16518_v26 = vsel %vm684_vm6, %v16235_v4, %v16301_v50  ;;  %v21289_v14 = vld [vmem:[#allocation44_spill] sm:$0xff]  ;;  %v21290_v5 = vld [vmem:[#allocation50_spill] sm:$0xff]  ;;  %v16551_v20 = vpop.permute.xlu1 %5999 }
 0x31a   :  { %8770 = vmatmul.mubr.f32.vlgmr.msra.gmra.mxu1 %v7747_v46  ;;  %v6420_v52 = vcombine.high %v21286_v54, %v6319_v35  ;;  %v16523_v38 = vrot.slane %v21287_v3, %v12993_v31  ;;  %v5310_v59 = vsel %vm3414_vm7, %v21290_v5, %v21289_v14  ;;  %v16529_v13 = vrot.slane %v6385_v6, %v13009_v27  ;;  %v21293_v46 = vld [vmem:[#allocation42_spill] sm:$0xff]  ;;  %v21296_v6 = vld [vmem:[#allocation59_spill] sm:$0xff]  ;;  %v21306_v1 = vld [vmem:[#allocation60_spill] sm:$0xff] }
 0x31b   :  { %v6218_v63 = vsel %vm3422_vm11, %v15354_v53, %v6217_v29  ;;  %v5311_v4 = vsel %vm3416_vm8, %v21292_v8, %v5310_v59  ;;  %v5615_v35 = vsel %vm3414_vm7, %v21294_v61, %v21293_v46  ;;  %8831 = vmatpush1.msra.mxu1 %v7517_v62  ;;  %v7515_v54 = vld [vmem:[%s20263_s3 + $0x2e0] sm:$0xff]  ;;  %v16542_v14 = vrot.slane %v6386_v0, %v13009_v27  ;;  %v21297_v29 = vld [vmem:[#allocation48_spill] sm:$0xff]  ;;  %v7514_v62 = vld [vmem:[%s20263_s3 + $0x2d8] sm:$0xff]  ;;  %v5378_v46 = vpop.permute.xlu0 %5377 }
 0x31c   :  { %21288 = vst [vmem:[#allocation9_spill] sm:$0xff] %v16523_v38  ;;  %21291 = vst [vmem:[#allocation127_spill] sm:$0xff] %v16529_v13  ;;  %v5925_v13 = vsel %vm3414_vm7, %v16523_v38, %v21296_v6  ;;  %v5312_v3 = vsel %vm3418_vm9, %v21297_v29, %v5311_v4  ;;  %v21298_v59 = vld [vmem:[#allocation52_spill] sm:$0xff]  ;;  %8832 = vmatprep.subr.mxu1 %v7516_v7  ;;  %v16557_v0 = vrot.slane %v6473_v47, %v13009_v27  ;;  %v21300_v38 = vld [vmem:[#allocation142_spill] sm:$0xff] }
 0x31d   :  { %21295 = vst [vmem:[#allocation8_spill] sm:$0xff] %v16542_v14  ;;  %v5616_v40 = vsel %vm3416_vm8, %v21298_v59, %v5615_v35  ;;  %v6429_v14 = vrot.slane %v6419_v17, %v13009_v27  ;;  %6019 = vrot.lane.b32.xlu1 %v5925_v13, %s12095_s30  ;;  %v5313_v4 = vsel %vm3420_vm10, %v21300_v38, %v5312_v3  ;;  %v21301_v6 = vld [vmem:[#allocation154_spill] sm:$0xff]  ;;  %v7513_v7 = vld [vmem:[%s20263_s3 + $0x2d0] sm:$0xff]  ;;  %v21303_v13 = vld [vmem:[#allocation155_spill] sm:$0xff] }
 0x31e   :  { %21299 = vst [vmem:[#allocation12_spill] sm:$0xff] %v16557_v0  ;;  %v5617_v35 = vsel %vm3418_vm9, %v21301_v6, %v5616_v40  ;;  %v6436_v55 = vrot.slane %v6420_v52, %v13009_v27  ;;  %v6219_v47 = vsel %vm3424_vm12, %v15629_v33, %v6218_v63  ;;  %v21302_v0 = vld [vmem:[#allocation156_spill] sm:$0xff]  ;;  %8833 = vmatpush1.msra.mxu1 %v7515_v54  ;;  %v21309_v54 = vld [vmem:[#allocation71_spill] sm:$0xff] }
 0x31f   :  { %v5314_v17 = vsel %vm3422_vm11, %v21302_v0, %v5313_v4  ;;  %v5618_v22 = vsel %vm3420_vm10, %v21303_v13, %v5617_v35  ;;  %v21304_v3 = vld [vmem:[#allocation160_spill] sm:$0xff]  ;;  %v16581_v30 = vrot.slane %v21306_v1, %v13020_v21  ;;  %v5622_v33 = vsel %vm3414_vm7, %v21292_v8, %v21290_v5  ;;  %8834 = vmatprep.subr.mxu1 %v7514_v62  ;;  %v21310_v35 = vld [vmem:[#allocation54_spill] sm:$0xff]  ;;  %v7512_v1 = vld [vmem:[%s20263_s3 + $0x2c8] sm:$0xff]  ;;  %v16626_v8 = vpop.permute.xlu1 %5691 }
 0x320   :  { %v5315_v40 = vsel %vm3424_vm12, %v21304_v3, %v5314_v17  ;;  %v5619_v45 = vsel %vm3422_vm11, %v21305_v36, %v5618_v22  ;;  %v16587_v63 = vrot.slane %v6513_v37, %v13009_v27  ;;  %v16590_v52 = vrot.slane %v6514_v24, %v13009_v27  ;;  %8835 = vmatpush1.msra.mxu1 %v7513_v7  ;;  %v21311_v24 = vld [vmem:[#allocation164_spill] sm:$0xff]  ;;  %v7511_v7 = vld [vmem:[%s20263_s3 + $0x2c0] sm:$0xff] }
 0x321   :  { %21307 = vst [vmem:[#allocation10_spill] sm:$0xff] %v16581_v30  ;;  %v5316_v4 = vsel %vm3426_vm13, %v21309_v54, %v5315_v40  ;;  %v5620_v22 = vsel %vm3424_vm12, %v21310_v35, %v5619_v45  ;;  %v16602_v62 = vsel %vm651_vm5, %v16310_v2, %v16444_v56  ;;  %v16610_v17 = vsel %vm651_vm5, %v16434_v41, %v16489_v49  ;;  %v21322_v5 = vld [vmem:[#allocation172_spill] sm:$0xff] }
 0x322   :  { %21308 = vst [vmem:[#allocation125_spill] sm:$0xff] %v16590_v52  ;;  %5401 = vrot.lane.b32.xlu0 %v5316_v4, %s12094_s29  ;;  %v5621_v37 = vsel %vm3426_vm13, %v21311_v24, %v5620_v22  ;;  %v5623_v45 = vsel %vm3416_vm8, %v21297_v29, %v5622_v33  ;;  %v16619_v2 = vsel %vm3426_vm13, %v16477_v44, %v6219_v47  ;;  %v21313_v29 = vld [vmem:[#allocation58_spill] sm:$0xff] }
 0x323   :  { %21312 = vst [vmem:[#allocation15_spill] sm:$0xff] %v16619_v2  ;;  %5711 = vrot.lane.b32.xlu1 %v5621_v37, %s12096_s28  ;;  %v5624_v40 = vsel %vm3418_vm9, %v21300_v38, %v5623_v45  ;;  %v7761_v4 = vrot.slane %v6429_v14, %v13009_v27  ;;  %v7775_v22 = vrot.slane %v6436_v55, %v13009_v27  ;;  %v6002_v55 = vpop.permute.xlu0 %6001  ;;  %v21315_v38 = vld [vmem:[#allocation57_spill] sm:$0xff]  ;;  %v16698_v9 = vpop.permute.xlu1 %5387 }
 0x324   :  { %v16631_v33 = vsel %vm618_vm4, %v16444_v56, %v16491_v23  ;;  %v5318_v47 = vsel %vm3414_vm7, %v16581_v30, %v21313_v29  ;;  %v5625_v37 = vsel %vm3420_vm10, %v21302_v0, %v5624_v40  ;;  %v16641_v14 = vsel %vm618_vm4, %v16489_v49, %v16551_v20  ;;  %8836 = vmatprep.subr.mxu1 %v7512_v1 }
 0x325   :  { %v5626_v45 = vsel %vm3422_vm11, %v21304_v3, %v5625_v37  ;;  %v7783_v44 = vcombine.low %v7761_v4, %v7775_v22  ;;  %v7784_v56 = vcombine.high %v7761_v4, %v7775_v22  ;;  %v16647_v23 = vsel %vm684_vm6, %v16371_v25, %v5378_v46  ;;  %8837 = vmatpush1.msra.mxu1 %v7511_v7  ;;  %v21316_v4 = vld [vmem:[#allocation62_spill] sm:$0xff]  ;;  %v21317_v22 = vld [vmem:[#allocation169_spill] sm:$0xff] }
 0x326   :  { %5405 = vrot.lane.b32.xlu0 %v5318_v47, %s12094_s29  ;;  %v5627_v40 = vsel %vm3424_vm12, %v21309_v54, %v5626_v45  ;;  %v16654_v49 = vsel %vm651_vm5, %v5378_v46, %v16434_v41  ;;  %v21314_v1 = vrot.slane %v15562_v43, 1  ;;  %v5638_v25 = vsel %vm3414_vm7, %v21317_v22, %v21316_v4  ;;  %v7510_v7 = vld [vmem:[%s20263_s3 + $0x2b8] sm:$0xff]  ;;  %v7509_v45 = vld [vmem:[%s20263_s3 + $0x2b0] sm:$0xff] }
 0x327   :  { %v6489_v47 = vcombine.low %v16602_v62, %v16631_v33  ;;  %v5628_v41 = vsel %vm3426_vm13, %v21313_v29, %v5627_v40  ;;  %v6549_v43 = vcombine.low %v16610_v17, %v16641_v14  ;;  %9019 = vmatprep.mubr.f32.mxu0 %v7784_v56  ;;  %v21321_v33 = vld [vmem:[#allocation170_spill] sm:$0xff]  ;;  %v6306_v56 = vsel %vm651_vm5, %v16301_v50, %v16626_v8  ;;  %v7508_v50 = vld [vmem:[%s20263_s3 + $0x2a8] sm:$0xff] }
 0x328   :  { %v16659_v37 = vmax.f32 %v21315_v38, %v21314_v1  ;;  %v21318_v38 = vld [vmem:[#allocation166_spill] sm:$0xff]  ;;  %v21319_v1 = vld [vmem:[#allocation179_spill] sm:$0xff]  ;;  %5713 = vrot.lane.b32.xlu1 %v5628_v41, %s12096_s28  ;;  %9020 = vmatmul.mubr.f32.vlgmr.msra.gmra.mxu0 %v7783_v44  ;;  %v6515_v4 = vcombine.low %v16647_v23, %v16654_v49  ;;  %v6175_v41 = vsel %vm3414_vm7, %v21272_v57, %v21270_v19  ;;  %v16713_v57 = vpop.permute.xlu0 %5693 }
 0x329   :  { %v5639_v46 = vsel %vm3416_vm8, %v21318_v38, %v5638_v25  ;;  %v6550_v25 = vcombine.high %v16610_v17, %v16641_v14  ;;  %8838 = vmatprep.subr.mxu1 %v7510_v7  ;;  %v21324_v14 = vld [vmem:[#allocation175_spill] sm:$0xff]  ;;  %v5927_v19 = vsel %vm3414_vm7, %v21298_v59, %v21294_v61  ;;  %v21325_v7 = vld [vmem:[#allocation76_spill] sm:$0xff]  ;;  %v6603_v11 = vcombine.low %v16518_v26, %v6306_v56  ;;  %v21326_v59 = vld [vmem:[#allocation177_spill] sm:$0xff] }
 0x32a   :  { %v16682_v62 = vrot.slane %v16659_v37, %v12993_v31  ;;  %v5640_v40 = vsel %vm3418_vm9, %v21321_v33, %v5639_v46  ;;  %v21323_v46 = vld [vmem:[#allocation67_spill] sm:$0xff]  ;;  %8839 = vmatpush1.msra.mxu1 %v7509_v45  ;;  %v21327_v26 = vld [vmem:[#allocation168_spill] sm:$0xff]  ;;  %v21328_v56 = vld [vmem:[#allocation66_spill] sm:$0xff] }
 0x32b   :  { %v5641_v44 = vsel %vm3420_vm10, %v21322_v5, %v5640_v40  ;;  %v6176_v40 = vsel %vm3416_vm8, %v21274_v16, %v6175_v41  ;;  %v5928_v16 = vsel %vm3416_vm8, %v21301_v6, %v5927_v19  ;;  %v7507_v41 = vld [vmem:[%s20263_s3 + $0x2a0] sm:$0xff]  ;;  %8840 = vmatprep.subr.mxu1 %v7508_v50  ;;  %v6516_v19 = vcombine.high %v16647_v23, %v16654_v49  ;;  %v7505_v50 = vld [vmem:[%s20263_s3 + $0x290] sm:$0xff] }
 0x32c   :  { %21320 = vst [vmem:[#allocation130_spill] sm:$0xff] %v16682_v62  ;;  %v5629_v17 = vsel %vm3414_vm7, %v16682_v62, %v21323_v46  ;;  %v5642_v34 = vsel %vm3422_vm11, %v21324_v14, %v5641_v44  ;;  %v6177_v44 = vsel %vm3418_vm9, %v21280_v12, %v6176_v40  ;;  %v5943_v12 = vsel %vm3414_vm7, %v21328_v56, %v21327_v26  ;;  %v7506_v40 = vld [vmem:[%s20263_s3 + $0x298] sm:$0xff]  ;;  %v21330_v56 = vld [vmem:[#allocation18_spill] sm:$0xff] }
 0x32d   :  { %5715 = vrot.lane.b32.xlu0 %v5629_v17, %s12096_s28  ;;  %v5643_v28 = vsel %vm3424_vm12, %v21325_v7, %v5642_v34  ;;  %v6178_v17 = vsel %vm3420_vm10, %v21262_v18, %v6177_v44  ;;  %v5929_v34 = vsel %vm3418_vm9, %v21303_v13, %v5928_v16  ;;  %v21329_v44 = vld [vmem:[#allocation69_spill] sm:$0xff]  ;;  %v6057_v23 = vsel %vm618_vm4, %v16551_v20, %v6002_v55  ;;  %v16767_v20 = vpop.permute.xlu1 %5389  ;;  %v7504_v55 = vld [vmem:[%s20263_s3 + $0x288] sm:$0xff] }
 0x32e   :  { %v5644_v45 = vsel %vm3426_vm13, %v21326_v59, %v5643_v28  ;;  %v6179_v28 = vsel %vm3422_vm11, %v21263_v39, %v6178_v17  ;;  %v5930_v18 = vsel %vm3420_vm10, %v21305_v36, %v5929_v34  ;;  %v5944_v16 = vsel %vm3416_vm8, %v21329_v44, %v5943_v12  ;;  %v21331_v39 = vld [vmem:[#allocation171_spill] sm:$0xff]  ;;  %8841 = vmatpush1.msra.mxu1 %v7507_v41 }
 0x32f   :  { %5721 = vrot.lane.b32.xlu1 %v5644_v45, %s12096_s28  ;;  %v6180_v26 = vsel %vm3424_vm12, %v21330_v56, %v6179_v28  ;;  %v5931_v49 = vsel %vm3422_vm11, %v21310_v35, %v5930_v18  ;;  %v5945_v45 = vsel %vm3418_vm9, %v21331_v39, %v5944_v16  ;;  %v16761_v34 = vrot.slane %v6489_v47, %v13009_v27  ;;  %v21332_v56 = vld [vmem:[#allocation174_spill] sm:$0xff]  ;;  %v21334_v18 = vld [vmem:[#allocation144_spill] sm:$0xff]  ;;  %v21361_v35 = vld [vmem:[#allocation21_spill] sm:$0xff] }
 0x330   :  { %v5932_v12 = vsel %vm3424_vm12, %v21311_v24, %v5931_v49  ;;  %v5946_v28 = vsel %vm3420_vm10, %v21332_v56, %v5945_v45  ;;  %8842 = vmatprep.subr.mxu1 %v7506_v40  ;;  %v16773_v41 = vrot.slane %v6603_v11, %v13009_v27  ;;  %v6181_v47 = vsel %vm3426_vm13, %v21334_v18, %v6180_v26  ;;  %v21335_v49 = vld [vmem:[#allocation74_spill] sm:$0xff]  ;;  %v16781_v45 = vpop.permute.xlu0 %6003  ;;  %v21337_v11 = vld [vmem:[#allocation173_spill] sm:$0xff]  ;;  %v21338_v26 = vld [vmem:[#allocation68_spill] sm:$0xff] }
 0x331   :  { %v5933_v16 = vsel %vm3426_vm13, %v21323_v46, %v5932_v12  ;;  %v5947_v17 = vsel %vm3422_vm11, %v21335_v49, %v5946_v28  ;;  %21336 = vst [vmem:[#allocation131_spill] sm:$0xff] %v16781_v45  ;;  %8843 = vmatpush1.msra.mxu1 %v7505_v50  ;;  %v16784_v40 = vrot.slane %v6549_v43, %v13009_v27  ;;  %v7503_v12 = vld [vmem:[%s20263_s3 + $0x280] sm:$0xff] }
 0x332   :  { %21333 = vst [vmem:[#allocation128_spill] sm:$0xff] %v16773_v41  ;;  %v6551_v2 = vcombine.low %v6057_v23, %v6181_v47  ;;  %6023 = vrot.lane.b32.xlu0 %v5933_v16, %s12095_s30  ;;  %v5948_v56 = vsel %vm3424_vm12, %v21337_v11, %v5947_v17  ;;  %v16791_v18 = vrot.slane %v21338_v26, %v13020_v21  ;;  %v21342_v16 = vld [vmem:[#allocation73_spill] sm:$0xff]  ;;  %v21343_v39 = vld [vmem:[#allocation26_spill] sm:$0xff] }
 0x333   :  { %v16797_v28 = vrot.slane %v6550_v25, %v13009_v27  ;;  %v16800_v43 = vrot.slane %v6515_v4, %v13009_v27  ;;  %v16803_v50 = vrot.slane %v6516_v19, %v13009_v27  ;;  %v5949_v17 = vsel %vm3426_vm13, %v21342_v16, %v5948_v56  ;;  %8844 = vmatprep.subr.mxu1 %v7504_v55  ;;  %v7502_v26 = vld [vmem:[%s20263_s3 + $0x278] sm:$0xff]  ;;  %v21344_v25 = vld [vmem:[#allocation31_spill] sm:$0xff]  ;;  %v7501_v56 = vld [vmem:[%s20263_s3 + $0x270] sm:$0xff] }
 0x334   :  { %v6552_v46 = vcombine.high %v6057_v23, %v6181_v47  ;;  %6031 = vrot.lane.b32.xlu1 %v5949_v17, %s12095_s30  ;;  %v5070_v44 = vsel %vm3414_vm7, %v21344_v25, %v21343_v39  ;;  %v5950_v4 = vsel %vm3414_vm7, %v21318_v38, %v21317_v22  ;;  %v16820_v19 = vsel %vm684_vm6, %v16698_v9, %v16767_v20  ;;  %v21345_v55 = vld [vmem:[#allocation106_spill] sm:$0xff] }
 0x335   :  { %21339 = vst [vmem:[#allocation134_spill] sm:$0xff] %v16797_v28  ;;  %21340 = vst [vmem:[#allocation46_spill] sm:$0xff] %v16800_v43  ;;  %v21346_v47 = vld [vmem:[#allocation34_spill] sm:$0xff]  ;;  %v16834_v38 = vsel %vm684_vm6, %v5070_v44, %v16698_v9  ;;  %v5951_v22 = vsel %vm3416_vm8, %v21321_v33, %v5950_v4  ;;  %8845 = vmatpush1.msra.mxu1 %v7503_v12  ;;  %v16839_v25 = vrot.slane %v6551_v2, %v13009_v27  ;;  %v5386_v9 = vpop.permute.xlu1 %5385  ;;  %v7500_v44 = vld [vmem:[%s20263_s3 + $0x268] sm:$0xff] }
 0x336   :  { %21341 = vst [vmem:[#allocation133_spill] sm:$0xff] %v16803_v50  ;;  %v16830_v17 = vsel %vm3414_vm7, %v21346_v47, %v21345_v55  ;;  %v5952_v39 = vsel %vm3418_vm9, %v21322_v5, %v5951_v22  ;;  %v5334_v23 = vsel %vm3414_vm7, %v16791_v18, %v21326_v59  ;;  %v16848_v47 = vrot.slane %v16659_v37, %v13020_v21  ;;  %v21348_v12 = vld [vmem:[#allocation162_spill] sm:$0xff]  ;;  %v21350_v55 = vld [vmem:[#allocation72_spill] sm:$0xff] }
 0x337   :  { %21347 = vst [vmem:[#allocation189_spill] sm:$0xff] %v16839_v25  ;;  %8846 = vmatprep.subr.mxu1 %v7502_v26  ;;  %v5953_v2 = vsel %vm3420_vm10, %v21324_v14, %v5952_v39  ;;  %v6231_v22 = vsel %vm3416_vm8, %v21302_v0, %v21348_v12  ;;  %v21349_v4 = vrot.slane %v21285_v58, 1  ;;  %v6546_v37 = vcombine.high %v16587_v63, %v16800_v43  ;;  %v5384_v26 = vpop.permute.xlu0 %5383  ;;  %v7499_v33 = vld [vmem:[%s20263_s3 + $0x260] sm:$0xff]  ;;  %v21357_v43 = vld [vmem:[#allocation19_spill] sm:$0xff] }
 0x338   :  { %8847 = vmatpush1.msra.mxu1 %v7501_v56  ;;  %v16869_v39 = vrot.slane %v6552_v46, %v13009_v27  ;;  %v16874_v12 = vsel %vm651_vm5, %v16626_v8, %v16713_v57  ;;  %v5954_v58 = vsel %vm3422_vm11, %v21325_v7, %v5953_v2  ;;  %5413 = vrot.lane.b32.xlu1 %v5334_v23, %s12094_s29 }
 0x339   :  { %v16861_v41 = vmax.f32 %v21350_v55, %v21349_v4  ;;  %v16882_v56 = vsel %vm618_vm4, %v16713_v57, %v16781_v45  ;;  %v5955_v55 = vsel %vm3424_vm12, %v21326_v59, %v5954_v58  ;;  %v6232_v46 = vsel %vm3418_vm9, %v21304_v3, %v6231_v22  ;;  %8848 = vmatprep.subr.mxu1 %v7500_v44  ;;  %v7498_v22 = vld [vmem:[%s20263_s3 + $0x258] sm:$0xff]  ;;  %v21356_v45 = vld [vmem:[#allocation32_spill] sm:$0xff]  ;;  %v16927_v11 = vpop.permute.xlu1 %5695  ;;  %v21364_v3 = vld [vmem:[#allocation51_spill] sm:$0xff] }
 0x33a   :  { %21351 = vst [vmem:[#allocation150_spill] sm:$0xff] %v16869_v39  ;;  %v11659_v2 = vcombine.low %v16350_v51, %v16587_v63  ;;  %v5956_v57 = vsel %vm3426_vm13, %v16791_v18, %v5955_v55  ;;  %v6233_v4 = vsel %vm3420_vm10, %v21309_v54, %v6232_v46  ;;  %v11661_v58 = vcombine.low %v6546_v37, %v16590_v52  ;;  %v21353_v55 = vld [vmem:[#allocation24_spill] sm:$0xff]  ;;  %v21354_v37 = vld [vmem:[#allocation13_spill] sm:$0xff] }
 0x33b   :  { %v16890_v8 = vrot.slane %v16861_v41, %v12993_v31  ;;  %8849 = vmatpush1.msra.mxu1 %v7499_v33  ;;  %6033 = vrot.lane.b32.xlu0 %v5956_v57, %s12095_s30  ;;  %v6619_v51 = vcombine.low %v16874_v12, %v16882_v56  ;;  %v5630_v63 = vsel %vm3414_vm7, %v16848_v47, %v16581_v30  ;;  %v7497_v46 = vld [vmem:[%s20263_s3 + $0x250] sm:$0xff]  ;;  %v21355_v57 = vld [vmem:[#allocation14_spill] sm:$0xff]  ;;  %v16938_v24 = vpop.permute.xlu0 %5697 }
 0x33c   :  { %v5056_v33 = vsel %vm3416_vm8, %v21354_v37, %v21353_v55  ;;  %v7814_v12 = vrot.slane %v11659_v2, %v13009_v27  ;;  %v7828_v56 = vrot.slane %v11661_v58, %v13009_v27  ;;  %v6234_v55 = vsel %vm3422_vm11, %v21313_v29, %v6233_v4  ;;  %v21358_v37 = vld [vmem:[#allocation20_spill] sm:$0xff]  ;;  %8850 = vmatprep.subr.mxu1 %v7498_v22 }
 0x33d   :  { %21352 = vst [vmem:[#allocation167_spill] sm:$0xff] %v16890_v8  ;;  %v5645_v44 = vsel %vm3414_vm7, %v16890_v8, %v21342_v16  ;;  %v5057_v23 = vsel %vm3418_vm9, %v21355_v57, %v5056_v33  ;;  %v5063_v16 = vsel %vm3416_vm8, %v21357_v43, %v21356_v45  ;;  %v16936_v58 = vsel %vm684_vm6, %v5384_v26, %v5386_v9  ;;  %v21360_v45 = vld [vmem:[#allocation137_spill] sm:$0xff] }
 0x33e   :  { %5723 = vrot.lane.b32.xlu1 %v5645_v44, %s12096_s28  ;;  %v5058_v49 = vsel %vm3420_vm10, %v21358_v37, %v5057_v23  ;;  %v21359_v44 = vld [vmem:[#allocation22_spill] sm:$0xff]  ;;  %v7837_v33 = vcombine.high %v7814_v12, %v7828_v56  ;;  %v7836_v57 = vcombine.low %v7814_v12, %v7828_v56  ;;  %8851 = vmatpush1.msra.mxu1 %v7497_v46  ;;  %v21366_v12 = vld [vmem:[#allocation75_spill] sm:$0xff]  ;;  %v21367_v56 = vld [vmem:[#allocation77_spill] sm:$0xff] }
 0x33f   :  { %v5064_v2 = vsel %vm3418_vm9, %v21359_v44, %v5063_v16  ;;  %v5059_v43 = vsel %vm3422_vm11, %v21360_v45, %v5058_v49  ;;  %5717 = vrot.lane.b32.xlu0 %v5630_v63, %s12096_s28  ;;  %v21362_v23 = vld [vmem:[#allocation138_spill] sm:$0xff]  ;;  %v16951_v22 = vrot.slane %v21364_v3, %v12993_v31  ;;  %v5342_v49 = vsel %vm3414_vm7, %v21367_v56, %v21366_v12  ;;  %v7496_v46 = vld [vmem:[%s20263_s3 + $0x248] sm:$0xff]  ;;  %v21368_v63 = vld [vmem:[#allocation140_spill] sm:$0xff] }
 0x340   :  { %v5065_v4 = vsel %vm3420_vm10, %v21361_v35, %v5064_v2  ;;  %v5060_v16 = vsel %vm3424_vm12, %v21362_v23, %v5059_v43  ;;  %v21363_v37 = vld [vmem:[#allocation6_spill] sm:$0xff]  ;;  %8775 = vmatprep.mubr.f32.mxu1 %v7837_v33  ;;  %v21369_v43 = vld [vmem:[#allocation139_spill] sm:$0xff]  ;;  %v21370_v23 = vld [vmem:[#allocation81_spill] sm:$0xff]  ;;  %v16969_v3 = vsel %vm651_vm5, %v5386_v9, %v16927_v11  ;;  %8852 = vmatprep.subr.mxu1 %v7496_v46 }
 0x341   :  { %v5066_v44 = vsel %vm3422_vm11, %v21363_v37, %v5065_v4  ;;  %21365 = vst [vmem:[#allocation113_spill] sm:$0xff] %v16951_v22  ;;  %v16961_v2 = vsel %vm3426_vm13, %v21368_v63, %v5060_v16  ;;  %v5343_v45 = vsel %vm3416_vm8, %v21370_v23, %v5342_v49  ;;  %8776 = vmatmul.mubr.f32.gmra.mxu1 %v7836_v57  ;;  %v21371_v12 = vld [vmem:[#allocation141_spill] sm:$0xff]  ;;  %v21372_v16 = vld [vmem:[#allocation82_spill] sm:$0xff]  ;;  %v21373_v57 = vld [vmem:[#allocation83_spill] sm:$0xff] }
 0x342   :  { %v5067_v4 = vsel %vm3424_vm12, %v21369_v43, %v5066_v44  ;;  %v5941_v33 = vsel %vm3414_vm7, %v16951_v22, %v16682_v62  ;;  %v5344_v63 = vsel %vm3418_vm9, %v21372_v16, %v5343_v45  ;;  %v7495_v49 = vld [vmem:[%s20263_s3 + $0x240] sm:$0xff]  ;;  %v11663_v62 = vcombine.low %v16761_v34, %v16784_v40  ;;  %v16992_v45 = vpop.permute.xlu1 %5699  ;;  %v7494_v44 = vld [vmem:[%s20263_s3 + $0x238] sm:$0xff]  ;;  %v17006_v22 = vpop.permute.xlu0 %6007 }
 0x343   :  { %v5068_v37 = vsel %vm3426_vm13, %v21371_v12, %v5067_v4  ;;  %v5345_v4 = vsel %vm3420_vm10, %v21373_v57, %v5344_v63  ;;  %6027 = vrot.lane.b32.xlu0 %v5941_v33, %s12095_s30  ;;  %v21374_v12 = vld [vmem:[#allocation86_spill] sm:$0xff]  ;;  %21375 = vst [vmem:[#allocation44_spill] sm:$0xff] %v17006_v22  ;;  %v6584_v43 = vcombine.high %v16797_v28, %v16869_v39  ;;  %v7493_v33 = vld [vmem:[%s20263_s3 + $0x230] sm:$0xff]  ;;  %v21379_v39 = vld [vmem:[#allocation107_spill] sm:$0xff] }
 0x344   :  { %v16984_v9 = vsel %vm684_vm6, %v5068_v37, %v5384_v26  ;;  %v6732_v26 = vcombine.low %v16830_v17, %v16834_v38  ;;  %v5346_v34 = vsel %vm3422_vm11, %v21374_v12, %v5345_v4  ;;  %v21376_v38 = vld [vmem:[#allocation87_spill] sm:$0xff]  ;;  %v21377_v63 = vcombine.high %v16784_v40, %v16839_v25  ;;  %8853 = vmatpush1.msra.mxu1 %v7495_v49  ;;  %v21382_v25 = vld [vmem:[#allocation78_spill] sm:$0xff] }
 0x345   :  { %v6643_v37 = vcombine.low %v16961_v2, %v16984_v9  ;;  %v5347_v17 = vsel %vm3424_vm12, %v21376_v38, %v5346_v34  ;;  %v17022_v4 = vrot.slane %v6619_v51, %v13009_v27  ;;  %v6235_v46 = vsel %vm3424_vm12, %v16581_v30, %v6234_v55  ;;  %8854 = vmatprep.subr.mxu1 %v7494_v44  ;;  %v7492_v40 = vld [vmem:[%s20263_s3 + $0x228] sm:$0xff] }
 0x346   :  { %v11665_v35 = vcombine.low %v21377_v63, %v16797_v28  ;;  %v5348_v0 = vsel %vm3426_vm13, %v21379_v39, %v5347_v17  ;;  %v7850_v34 = vrot.slane %v11663_v62, %v13009_v27  ;;  %v17036_v51 = vrot.slane %v16861_v41, %v13020_v21  ;;  %v21380_v63 = vld [vmem:[#allocation176_spill] sm:$0xff]  ;;  %v21381_v17 = vld [vmem:[#allocation79_spill] sm:$0xff]  ;;  %v21383_v28 = vld [vmem:[#allocation178_spill] sm:$0xff]  ;;  %8855 = vmatpush1.msra.mxu1 %v7493_v33 }
 0x347   :  { %21378 = vst [vmem:[#allocation55_spill] sm:$0xff] %v17022_v4  ;;  %5417 = vrot.lane.b32.xlu1 %v5348_v0, %s12094_s29  ;;  %v6247_v55 = vsel %vm3416_vm8, %v21322_v5, %v21380_v63  ;;  %v5647_v62 = vsel %vm3414_vm7, %v21382_v25, %v21381_v17  ;;  %v17056_v41 = vsel %vm618_vm4, %v16938_v24, %v17006_v22  ;;  %v17063_v17 = vpop.permute.xlu1 %6011 }
 0x348   :  { %v7864_v49 = vrot.slane %v11665_v35, %v13009_v27  ;;  %v6248_v44 = vsel %vm3418_vm9, %v21324_v14, %v6247_v55  ;;  %v5648_v0 = vsel %vm3416_vm8, %v21383_v28, %v5647_v62  ;;  %v17051_v35 = vsel %vm651_vm5, %v16767_v20, %v16992_v45  ;;  %21384 = vst [vmem:[#allocation60_spill] sm:$0xff] %v17063_v17 }
 0x349   :  { %v5646_v55 = vsel %vm3414_vm7, %v17036_v51, %v16791_v18  ;;  %v6249_v62 = vsel %vm3420_vm10, %v21325_v7, %v6248_v44  ;;  %8856 = vmatprep.subr.mxu1 %v7492_v40  ;;  %v17068_v20 = vsel %vm651_vm5, %v16927_v11, %v16938_v24  ;;  %v5702_v44 = vpop.permute.xlu0 %5701  ;;  %v7491_v40 = vld [vmem:[%s20263_s3 + $0x220] sm:$0xff]  ;;  %v21386_v11 = vld [vmem:[#allocation181_spill] sm:$0xff]  ;;  %v17091_v22 = vrot.slane %v6732_v26, %v13009_v27 }
 0x34a   :  { %v7873_v63 = vcombine.high %v7850_v34, %v7864_v49  ;;  %v7872_v30 = vcombine.low %v7850_v34, %v7864_v49  ;;  %v6250_v33 = vsel %vm3422_vm11, %v21326_v59, %v6249_v62  ;;  %5725 = vrot.lane.b32.xlu0 %v5646_v55, %s12096_s28  ;;  %v21385_v34 = vld [vmem:[#allocation180_spill] sm:$0xff]  ;;  %v6653_v5 = vrot.slane %v6643_v37, %v13009_v27  ;;  %v7490_v37 = vld [vmem:[%s20263_s3 + $0x218] sm:$0xff] }
 0x34b   :  { %v5649_v49 = vsel %vm3418_vm9, %v21385_v34, %v5648_v0  ;;  %v6251_v24 = vsel %vm3424_vm12, %v16791_v18, %v6250_v33  ;;  %v21387_v0 = vld [vmem:[#allocation70_spill] sm:$0xff]  ;;  %v17105_v55 = vsel %vm3426_vm13, %v16848_v47, %v6235_v46  ;;  %8857 = vmatpush1.msra.mxu1 %v7491_v40  ;;  %v21394_v46 = vld [vmem:[#allocation84_spill] sm:$0xff] }
 0x34c   :  { %9025 = vmatprep.mubr.f32.mxu0 %v7873_v63  ;;  %v5650_v62 = vsel %vm3420_vm10, %v21386_v11, %v5649_v49  ;;  %v17088_v14 = vrot.slane %v21387_v0, %v12993_v31  ;;  %v17096_v63 = vsel %vm3426_vm13, %v17036_v51, %v6251_v24  ;;  %v21390_v18 = vld [vmem:[#allocation182_spill] sm:$0xff]  ;;  %v17101_v49 = vcombine.low %v6584_v43, %v17022_v4  ;;  %v21392_v0 = vld [vmem:[#allocation183_spill] sm:$0xff]  ;;  %v21393_v24 = vld [vmem:[#allocation184_spill] sm:$0xff] }
 0x34d   :  { %9026 = vmatmul.mubr.f32.gmra.mxu0 %v7872_v30  ;;  %21389 = vst [vmem:[#allocation58_spill] sm:$0xff] %v17096_v63  ;;  %v5651_v33 = vsel %vm3422_vm11, %v21390_v18, %v5650_v62  ;;  %21391 = vst [vmem:[#allocation57_spill] sm:$0xff] %v17105_v55  ;;  %v6679_v62 = vcombine.low %v17068_v20, %v17056_v41  ;;  %v6548_v4 = vcombine.high %v16590_v52, %v16803_v50  ;;  %v7489_v40 = vld [vmem:[%s20263_s3 + $0x210] sm:$0xff]  ;;  %v21398_v63 = vld [vmem:[#allocation85_spill] sm:$0xff]  ;;  %v5396_v52 = vpop.permute.xlu1 %5395 }
 0x34e   :  { %21388 = vst [vmem:[#allocation71_spill] sm:$0xff] %v17088_v14  ;;  %v5652_v26 = vsel %vm3424_vm12, %v21392_v0, %v5651_v33  ;;  %v5957_v30 = vsel %vm3414_vm7, %v17088_v14, %v16890_v8  ;;  %v17122_v33 = vrot.slane %v21394_v46, %v13020_v21  ;;  %v5654_v46 = vsel %vm3414_vm7, %v21370_v23, %v21367_v56  ;;  %v17155_v56 = vpop.permute.xlu0 %5391  ;;  %v21403_v55 = vld [vmem:[#allocation35_spill] sm:$0xff] }
 0x34f   :  { %v5653_v43 = vsel %vm3426_vm13, %v21393_v24, %v5652_v26  ;;  %6035 = vrot.lane.b32.xlu0 %v5957_v30, %s12095_s30  ;;  %v17132_v26 = vsel %vm651_vm5, %v16992_v45, %v5702_v44  ;;  %v17136_v30 = vsel %vm618_vm4, %v5702_v44, %v17063_v17  ;;  %v21397_v14 = vrot.slane %v21319_v1, 1  ;;  %8858 = vmatprep.subr.mxu1 %v7490_v37  ;;  %v7487_v37 = vld [vmem:[%s20263_s3 + $0x200] sm:$0xff] }
 0x350   :  { %5727 = vrot.lane.b32.xlu1 %v5653_v43, %s12096_s28  ;;  %21395 = vst [vmem:[#allocation179_spill] sm:$0xff] %v17132_v26  ;;  %21396 = vst [vmem:[#allocation76_spill] sm:$0xff] %v17136_v30  ;;  %v7488_v43 = vld [vmem:[%s20263_s3 + $0x208] sm:$0xff]  ;;  %v11667_v45 = vcombine.low %v6548_v4, %v16494_v32  ;;  %v7917_v50 = vrot.slane %v6653_v5, %v13009_v27  ;;  %v5655_v17 = vsel %vm3416_vm8, %v21372_v16, %v5654_v46  ;;  %v21401_v46 = vld [vmem:[#allocation108_spill] sm:$0xff] }
 0x351   :  { %v17144_v8 = vmax.f32 %v21398_v63, %v21397_v14  ;;  %v21399_v14 = vcombine.high %v16961_v2, %v16984_v9  ;;  %v5656_v5 = vsel %vm3418_vm9, %v21373_v57, %v5655_v17  ;;  %8859 = vmatpush1.msra.mxu1 %v7489_v40  ;;  %v5350_v1 = vsel %vm3414_vm7, %v17122_v33, %v21401_v46  ;;  %v7550_v40 = vld [vmem:[%s20263_s3 + $0x3f8] sm:$0xff]  ;;  %v21420_v26 = vld [vmem:[#allocation88_spill] sm:$0xff] }
 0x352   :  { %v7903_v2 = vrot.slane %v11667_v45, %v13009_v27  ;;  %v5657_v9 = vsel %vm3420_vm10, %v21374_v12, %v5656_v5  ;;  %v5086_v17 = vsel %vm3414_vm7, %v15354_v53, %v15302_v10  ;;  %8860 = vmatprep.subr.mxu1 %v7488_v43  ;;  %v21402_v5 = vld [vmem:[#allocation39_spill] sm:$0xff] }
 0x353   :  { %v17163_v63 = vrot.slane %v21399_v14, %v13009_v27  ;;  %v17169_v4 = vrot.slane %v17144_v8, %v12993_v31  ;;  %v6689_v14 = vrot.slane %v6679_v62, %v13009_v27  ;;  %v5658_v44 = vsel %vm3422_vm11, %v21376_v38, %v5657_v9  ;;  %8861 = vmatpush1.msra.mxu1 %v7487_v37  ;;  %v21404_v9 = vld [vmem:[#allocation185_spill] sm:$0xff] }
 0x354   :  { %5421 = vrot.lane.b32.xlu1 %v5350_v1, %s12094_s29  ;;  %v17191_v45 = vsel %vm684_vm6, %v5086_v17, %v5396_v52  ;;  %v5072_v32 = vsel %vm3416_vm8, %v21403_v55, %v21402_v5  ;;  %v7926_v10 = vcombine.high %v7903_v2, %v7917_v50  ;;  %v7925_v53 = vcombine.low %v7903_v2, %v7917_v50  ;;  %v21405_v55 = vld [vmem:[#allocation143_spill] sm:$0xff]  ;;  %v21406_v5 = vld [vmem:[#allocation36_spill] sm:$0xff]  ;;  %v5398_v2 = vpop.permute.xlu1 %5397 }
 0x355   :  { %21400 = vst [vmem:[#allocation177_spill] sm:$0xff] %v17169_v4  ;;  %v5659_v43 = vsel %vm3424_vm12, %v21379_v39, %v5658_v44  ;;  %v5073_v62 = vsel %vm3418_vm9, %v15072_v48, %v5072_v32  ;;  %v5661_v17 = vsel %vm3414_vm7, %v17169_v4, %v21404_v9  ;;  %v5079_v50 = vsel %vm3416_vm8, %v21406_v5, %v21405_v55  ;;  %v7549_v48 = vld [vmem:[%s20263_s3 + $0x3f0] sm:$0xff]  ;;  %v21409_v55 = vld [vmem:[#allocation23_spill] sm:$0xff] }
 0x356   :  { %v5660_v1 = vsel %vm3426_vm13, %v21401_v46, %v5659_v43  ;;  %v5074_v30 = vsel %vm3420_vm10, %v15092_v42, %v5073_v62  ;;  %8862 = vmatprep.subr.mxu1 %v7550_v40  ;;  %8781 = vmatprep.mubr.f32.mxu1 %v7926_v10  ;;  %v5080_v44 = vsel %vm3418_vm9, %v15082_v15, %v5079_v50  ;;  %v17221_v43 = vpop.permute.xlu0 %5703  ;;  %v7548_v40 = vld [vmem:[%s20263_s3 + $0x3e8] sm:$0xff]  ;;  %v21407_v62 = vld [vmem:[#allocation196_spill] sm:$0xff]  ;;  %v7547_v50 = vld [vmem:[%s20263_s3 + $0x3e0] sm:$0xff] }
 0x357   :  { %5729 = vrot.lane.b32.xlu0 %v5660_v1, %s12096_s28  ;;  %v5075_v32 = vsel %vm3422_vm11, %v15186_v60, %v5074_v30  ;;  %v5959_v37 = vsel %vm3414_vm7, %v21383_v28, %v21382_v25  ;;  %v4077_v10 = vrot.slane %v21407_v62, 1  ;;  %8782 = vmatmul.mubr.f32.gmra.mxu1 %v7925_v53  ;;  %v21408_v1 = vld [vmem:[#allocation146_spill] sm:$0xff]  ;;  %v5081_v15 = vsel %vm3420_vm10, %v21409_v55, %v5080_v44  ;;  %v21410_v60 = vld [vmem:[#allocation148_spill] sm:$0xff]  ;;  %v21411_v53 = vld [vmem:[#allocation17_spill] sm:$0xff] }
 0x358   :  { %5731 = vrot.lane.b32.xlu1 %v5661_v17, %s12096_s28  ;;  %v5076_v30 = vsel %vm3424_vm12, %v21408_v1, %v5075_v32  ;;  %v5960_v5 = vsel %vm3416_vm8, %v21385_v34, %v5959_v37  ;;  %v5082_v17 = vsel %vm3422_vm11, %v21411_v53, %v5081_v15  ;;  %v21412_v62 = vld [vmem:[#allocation92_spill] sm:$0xff]  ;;  %8863 = vmatpush2.msra.mxu1 %v7549_v48  ;;  %v21413_v37 = vld [vmem:[#allocation147_spill] sm:$0xff]  ;;  %v7546_v15 = vld [vmem:[%s20263_s3 + $0x3d8] sm:$0xff] }
 0x359   :  { %v17239_v42 = vsel %vm3426_vm13, %v21410_v60, %v5076_v30  ;;  %v5961_v32 = vsel %vm3418_vm9, %v21386_v11, %v5960_v5  ;;  %v17247_v44 = vrot.slane %v21412_v62, %v13020_v21  ;;  %v5083_v55 = vsel %vm3424_vm12, %v21413_v37, %v5082_v17  ;;  %8864 = vmatprep.subr.mxu1 %v7548_v40  ;;  %v21414_v5 = vld [vmem:[#allocation149_spill] sm:$0xff]  ;;  %v21415_v17 = vld [vmem:[#allocation115_spill] sm:$0xff] }
 0x35a   :  { %v5962_v1 = vsel %vm3420_vm10, %v21390_v18, %v5961_v32  ;;  %v5438_v30 = vsel %vm684_vm6, %v5396_v52, %v5398_v2  ;;  %v7939_v60 = vrot.slane %v17101_v49, %v13009_v27  ;;  %v5084_v53 = vsel %vm3426_vm13, %v21414_v5, %v5083_v55  ;;  %8865 = vmatpush2.msra.mxu1 %v7547_v50  ;;  %v5394_v55 = vpop.permute.xlu1 %5393 }
 0x35b   :  { %v5963_v48 = vsel %vm3422_vm11, %v21392_v0, %v5962_v1  ;;  %v5366_v32 = vsel %vm3414_vm7, %v17247_v44, %v21415_v17  ;;  %v7953_v52 = vrot.slane %v6689_v14, %v13009_v27  ;;  %v6293_v49 = vsel %vm684_vm6, %v5084_v53, %v17155_v56  ;;  %v21416_v1 = vld [vmem:[#allocation187_spill] sm:$0xff]  ;;  %8866 = vmatprep.subr.mxu1 %v7546_v15 }
 0x35c   :  { %v5964_v40 = vsel %vm3424_vm12, %v21393_v24, %v5963_v48  ;;  %5429 = vrot.lane.b32.xlu1 %v5366_v32, %s12094_s29  ;;  %v17274_v62 = vrot.slane %v17144_v8, %v13020_v21  ;;  %v6263_v37 = vsel %vm3416_vm8, %v21374_v12, %v21416_v1  ;;  %v6773_v14 = vcombine.low %v17239_v42, %v6293_v49  ;;  %v17283_v48 = vpop.permute.xlu0 %5707  ;;  %v21418_v32 = vld [vmem:[#allocation47_spill] sm:$0xff]  ;;  %v21419_v24 = vld [vmem:[#allocation41_spill] sm:$0xff] }
 0x35d   :  { %v6774_v50 = vcombine.high %v17239_v42, %v6293_v49  ;;  %v5965_v5 = vsel %vm3426_vm13, %v21404_v9, %v5964_v40  ;;  %v7962_v53 = vcombine.high %v7939_v60, %v7953_v52  ;;  %21417 = vst [vmem:[#allocation18_spill] sm:$0xff] %v17283_v48  ;;  %v5085_v8 = vsel %vm3414_vm7, %v21419_v24, %v21418_v32  ;;  %v21439_v24 = vld [vmem:[#allocation197_spill] sm:$0xff] }
 0x35e   :  { %6039 = vrot.lane.b32.xlu0 %v5965_v5, %s12095_s30  ;;  %v7961_v0 = vcombine.low %v7939_v60, %v7953_v52  ;;  %v6264_v1 = vsel %vm3418_vm9, %v21376_v38, %v6263_v37  ;;  %v17293_v42 = vrot.slane %v21420_v26, %v12993_v31  ;;  %v6862_v49 = vcombine.low %v5085_v8, %v17191_v45 }
 0x35f   :  { %v17297_v40 = vrot.slane %v6773_v14, %v13009_v27  ;;  %9031 = vmatprep.mubr.f32.mxu0 %v7962_v53  ;;  %v6265_v15 = vsel %vm3420_vm10, %v21379_v39, %v6264_v1  ;;  %v5437_v5 = vsel %vm684_vm6, %v17155_v56, %v5394_v55  ;;  %v6309_v45 = vsel %vm651_vm5, %v5394_v55, %v17221_v43  ;;  %v7545_v14 = vld [vmem:[%s20263_s3 + $0x3d0] sm:$0xff]  ;;  %v7544_v55 = vld [vmem:[%s20263_s3 + $0x3c8] sm:$0xff] }
 0x360   :  { %21421 = vst [vmem:[#allocation144_spill] sm:$0xff] %v17293_v42  ;;  %9032 = vmatmul.mubr.f32.gmra.mxu0 %v7961_v0  ;;  %v6266_v60 = vsel %vm3422_vm11, %v21401_v46, %v6265_v15  ;;  %v5973_v52 = vsel %vm3414_vm7, %v17293_v42, %v17169_v4  ;;  %v6310_v37 = vsel %vm651_vm5, %v5398_v2, %v17283_v48  ;;  %v21423_v15 = vld [vmem:[#allocation110_spill] sm:$0xff] }
 0x361   :  { %v5662_v56 = vsel %vm3414_vm7, %v17274_v62, %v17122_v33  ;;  %v6267_v0 = vsel %vm3424_vm12, %v17122_v33, %v6266_v60  ;;  %6043 = vrot.lane.b32.xlu1 %v5973_v52, %s12095_s30  ;;  %v6775_v53 = vcombine.low %v5437_v5, %v6309_v45  ;;  %v6776_v8 = vcombine.high %v5437_v5, %v6309_v45  ;;  %v21424_v42 = vld [vmem:[#allocation190_spill] sm:$0xff]  ;;  %v21425_v60 = vld [vmem:[#allocation117_spill] sm:$0xff] }
 0x362   :  { %v17326_v2 = vsel %vm3426_vm13, %v17274_v62, %v6267_v0  ;;  %5733 = vrot.lane.b32.xlu0 %v5662_v56, %s12096_s28  ;;  %v6863_v1 = vcombine.low %v5438_v30, %v6310_v37  ;;  %v5670_v4 = vsel %vm3414_vm7, %v21424_v42, %v21423_v15  ;;  %v17333_v9 = vmax.f32 %v21425_v60, %v4077_v10  ;;  %v7543_v5 = vld [vmem:[%s20263_s3 + $0x3c0] sm:$0xff]  ;;  %v21428_v30 = vld [vmem:[#allocation192_spill] sm:$0xff]  ;;  %v7542_v10 = vld [vmem:[%s20263_s3 + $0x3b8] sm:$0xff] }
 0x363   :  { %21422 = vst [vmem:[#allocation68_spill] sm:$0xff] %v17326_v2  ;;  %v17339_v52 = vrot.slane %v6862_v49, %v13009_v27  ;;  %v11671_v45 = vcombine.low %v17091_v22, %v17297_v40  ;;  %v17344_v56 = vrot.slane %v6775_v53, %v13009_v27  ;;  %v5671_v37 = vsel %vm3416_vm8, %v21428_v30, %v5670_v4  ;;  %v21431_v60 = vld [vmem:[#allocation193_spill] sm:$0xff]  ;;  %v7539_v15 = vld [vmem:[%s20263_s3 + $0x3a0] sm:$0xff] }
 0x364   :  { %8867 = vmatpush2.msra.mxu1 %v7545_v14  ;;  %v17352_v0 = vrot.slane %v6776_v8, %v13009_v27  ;;  %v17355_v49 = vrot.slane %v6863_v1, %v13009_v27  ;;  %v5672_v22 = vsel %vm3418_vm9, %v21431_v60, %v5671_v37  ;;  %v17361_v53 = vrot.slane %v17333_v9, %v12993_v31 }
 0x365   :  { %21426 = vst [vmem:[#allocation162_spill] sm:$0xff] %v17339_v52  ;;  %21427 = vst [vmem:[#allocation72_spill] sm:$0xff] %v17344_v56  ;;  %8868 = vmatprep.subr.mxu1 %v7544_v55  ;;  %v21433_v4 = vcombine.low %v16936_v58, %v16969_v3  ;;  %v21435_v8 = vcombine.high %v16936_v58, %v16969_v3  ;;  %v21437_v37 = vcombine.low %v16820_v19, %v17051_v35  ;;  %v21441_v58 = vld [vmem:[#allocation199_spill] sm:$0xff]  ;;  %v21442_v19 = vld [vmem:[#allocation93_spill] sm:$0xff] }
 0x366   :  { %21429 = vst [vmem:[#allocation24_spill] sm:$0xff] %v17352_v0  ;;  %21430 = vst [vmem:[#allocation13_spill] sm:$0xff] %v17355_v49  ;;  %v5673_v55 = vsel %vm3420_vm10, %v21439_v24, %v5672_v22  ;;  %8869 = vmatpush2.msra.mxu1 %v7543_v5  ;;  %v5677_v35 = vsel %vm3414_vm7, %v17361_v53, %v21442_v19  ;;  %v6806_v5 = vcombine.high %v17297_v40, %v17344_v56  ;;  %v21443_v22 = vld [vmem:[#allocation118_spill] sm:$0xff]  ;;  %v17411_v49 = vpop.permute.xlu0 %5403 }
 0x367   :  { %21432 = vst [vmem:[#allocation14_spill] sm:$0xff] %v17361_v53  ;;  %v17367_v14 = vrot.slane %v21433_v4, %v13009_v27  ;;  %v17373_v1 = vrot.slane %v21435_v8, %v13009_v27  ;;  %v17379_v2 = vrot.slane %v21437_v37, %v13009_v27  ;;  %v7541_v4 = vld [vmem:[%s20263_s3 + $0x3b0] sm:$0xff]  ;;  %v5674_v8 = vsel %vm3422_vm11, %v21441_v58, %v5673_v55  ;;  %v7540_v55 = vld [vmem:[%s20263_s3 + $0x3a8] sm:$0xff] }
 0x368   :  { %8870 = vmatprep.subr.mxu1 %v7542_v10  ;;  %v5675_v37 = vsel %vm3424_vm12, %v21443_v22, %v5674_v8  ;;  %5739 = vrot.lane.b32.xlu0 %v5677_v35, %s12096_s28  ;;  %v8006_v3 = vrot.slane %v11671_v45, %v13009_v27  ;;  %21444 = vst [vmem:[#allocation82_spill] sm:$0xff] %v17411_v49  ;;  %v21445_v35 = vld [vmem:[#allocation116_spill] sm:$0xff] }
 0x369   :  { %21434 = vst [vmem:[#allocation32_spill] sm:$0xff] %v17367_v14  ;;  %21436 = vst [vmem:[#allocation19_spill] sm:$0xff] %v17373_v1  ;;  %v17387_v14 = vrot.slane %v6774_v50, %v13009_v27  ;;  %v7992_v50 = vrot.slane %v17163_v63, %v13009_v27  ;;  %v5676_v40 = vsel %vm3426_vm13, %v21415_v17, %v5675_v37  ;;  %v21446_v63 = vld [vmem:[#allocation191_spill] sm:$0xff]  ;;  %8871 = vmatpush2.msra.mxu1 %v7541_v4  ;;  %v17420_v1 = vpop.permute.xlu1 %5705 }
 0x36a   :  { %21438 = vst [vmem:[#allocation75_spill] sm:$0xff] %v17379_v2  ;;  %v5982_v8 = vsel %vm3414_vm7, %v21428_v30, %v21424_v42  ;;  %v5975_v45 = vsel %vm3414_vm7, %v21446_v63, %v21445_v35  ;;  %5737 = vrot.lane.b32.xlu1 %v5676_v40, %s12096_s28  ;;  %v5102_v37 = vsel %vm3414_vm7, %v21313_v29, %v21309_v54  ;;  %v21448_v30 = vld [vmem:[#allocation195_spill] sm:$0xff]  ;;  %v21449_v63 = vld [vmem:[#allocation53_spill] sm:$0xff]  ;;  %v21450_v42 = vld [vmem:[#allocation42_spill] sm:$0xff] }
 0x36b   :  { %21440 = vst [vmem:[#allocation81_spill] sm:$0xff] %v17387_v14  ;;  %v6808_v10 = vcombine.high %v17387_v14, %v17352_v0  ;;  %v8015_v2 = vcombine.high %v7992_v50, %v8006_v3  ;;  %v5983_v56 = vsel %vm3416_vm8, %v21431_v60, %v5982_v8  ;;  %v21447_v0 = vld [vmem:[#allocation194_spill] sm:$0xff]  ;;  %v8014_v40 = vcombine.low %v7992_v50, %v8006_v3  ;;  %v21452_v50 = vld [vmem:[#allocation112_spill] sm:$0xff]  ;;  %v21457_v60 = vld [vmem:[#allocation153_spill] sm:$0xff] }
 0x36c   :  { %v5976_v48 = vsel %vm3416_vm8, %v21447_v0, %v5975_v45  ;;  %v5984_v32 = vsel %vm3418_vm9, %v21439_v24, %v5983_v56  ;;  %v5088_v35 = vsel %vm3416_vm8, %v21450_v42, %v21449_v63  ;;  %8872 = vmatprep.subr.mxu1 %v7540_v55  ;;  %v17441_v8 = vsel %vm684_vm6, %v5102_v37, %v17411_v49  ;;  %v21451_v45 = vld [vmem:[#allocation198_spill] sm:$0xff]  ;;  %v7538_v42 = vld [vmem:[%s20263_s3 + $0x398] sm:$0xff]  ;;  %v21453_v63 = vld [vmem:[#allocation52_spill] sm:$0xff] }
 0x36d   :  { %v5977_v4 = vsel %vm3418_vm9, %v21448_v30, %v5976_v48  ;;  %8787 = vmatprep.mubr.f32.mxu1 %v8015_v2  ;;  %v5985_v56 = vsel %vm3420_vm10, %v21441_v58, %v5984_v32  ;;  %v5089_v3 = vsel %vm3418_vm9, %v21294_v61, %v5088_v35  ;;  %v21454_v37 = vld [vmem:[#allocation161_spill] sm:$0xff]  ;;  %v21455_v49 = vld [vmem:[#allocation50_spill] sm:$0xff]  ;;  %v21456_v35 = vld [vmem:[#allocation99_spill] sm:$0xff]  ;;  %8873 = vmatpush2.msra.mxu1 %v7539_v15 }
 0x36e   :  { %v5978_v48 = vsel %vm3420_vm10, %v21451_v45, %v5977_v4  ;;  %v5986_v2 = vsel %vm3422_vm11, %v21443_v22, %v5985_v56  ;;  %8788 = vmatmul.mubr.f32.gmra.mxu1 %v8014_v40  ;;  %v5090_v32 = vsel %vm3420_vm10, %v21453_v63, %v5089_v3  ;;  %v5095_v4 = vsel %vm3416_vm8, %v21455_v49, %v21454_v37  ;;  %v17469_v40 = vpop.permute.xlu1 %5411  ;;  %v7537_v3 = vld [vmem:[%s20263_s3 + $0x390] sm:$0xff]  ;;  %v7536_v15 = vld [vmem:[%s20263_s3 + $0x388] sm:$0xff]  ;;  %v21505_v0 = vld [vmem:[#allocation166_spill] sm:$0xff] }
 0x36f   :  { %v5979_v55 = vsel %vm3422_vm11, %v21452_v50, %v5978_v48  ;;  %v5987_v61 = vsel %vm3424_vm12, %v21415_v17, %v5986_v2  ;;  %v5091_v56 = vsel %vm3422_vm11, %v21301_v6, %v5090_v32  ;;  %v5096_v48 = vsel %vm3418_vm9, %v21457_v60, %v5095_v4  ;;  %21458 = vst [vmem:[#allocation83_spill] sm:$0xff] %v17469_v40  ;;  %v21459_v32 = vld [vmem:[#allocation48_spill] sm:$0xff]  ;;  %v17491_v6 = vpop.permute.xlu0 %5399 }
 0x370   :  { %v5980_v45 = vsel %vm3424_vm12, %v21456_v35, %v5979_v55  ;;  %v5988_v49 = vsel %vm3426_vm13, %v17247_v44, %v5987_v61  ;;  %v5092_v55 = vsel %vm3424_vm12, %v21303_v13, %v5091_v56  ;;  %v5097_v37 = vsel %vm3420_vm10, %v21459_v32, %v5096_v48  ;;  %8874 = vmatprep.subr.mxu1 %v7538_v42  ;;  %v21460_v61 = vld [vmem:[#allocation142_spill] sm:$0xff]  ;;  %v21464_v13 = vld [vmem:[#allocation156_spill] sm:$0xff] }
 0x371   :  { %v5981_v2 = vsel %vm3426_vm13, %v21442_v19, %v5980_v45  ;;  %6049 = vrot.lane.b32.xlu1 %v5988_v49, %s12095_s30  ;;  %v5093_v4 = vsel %vm3426_vm13, %v21305_v36, %v5092_v55  ;;  %v5098_v45 = vsel %vm3422_vm11, %v21460_v61, %v5097_v37  ;;  %21461 = vst [vmem:[#allocation86_spill] sm:$0xff] %v17491_v6  ;;  %v21462_v56 = vld [vmem:[#allocation94_spill] sm:$0xff]  ;;  %v21466_v63 = vld [vmem:[#allocation160_spill] sm:$0xff] }
 0x372   :  { %6047 = vrot.lane.b32.xlu0 %v5981_v2, %s12095_s30  ;;  %v17495_v48 = vrot.slane %v21462_v56, %v12993_v31  ;;  %v7535_v42 = vld [vmem:[%s20263_s3 + $0x380] sm:$0xff]  ;;  %v5099_v49 = vsel %vm3424_vm12, %v21464_v13, %v5098_v45  ;;  %v17504_v2 = vrot.slane %v17333_v9, %v13020_v21  ;;  %v11675_v36 = vcombine.low %v6806_v5, %v17387_v14  ;;  %v21471_v14 = vld [vmem:[#allocation164_spill] sm:$0xff] }
 0x373   :  { %v21465_v55 = vld [vmem:[#allocation98_spill] sm:$0xff]  ;;  %8875 = vmatpush2.msra.mxu1 %v7537_v3  ;;  %v5100_v19 = vsel %vm3426_vm13, %v21466_v63, %v5099_v49  ;;  %v11677_v9 = vcombine.low %v6808_v10, %v17339_v52  ;;  %v7533_v10 = vld [vmem:[%s20263_s3 + $0x370] sm:$0xff] }
 0x374   :  { %21463 = vst [vmem:[#allocation87_spill] sm:$0xff] %v17495_v48  ;;  %v6279_v37 = vsel %vm3416_vm8, %v21439_v24, %v21465_v55  ;;  %v5989_v31 = vsel %vm3414_vm7, %v17495_v48, %v17361_v53  ;;  %8876 = vmatprep.subr.mxu1 %v7536_v15  ;;  %v7534_v55 = vld [vmem:[%s20263_s3 + $0x378] sm:$0xff]  ;;  %v6295_v5 = vsel %vm684_vm6, %v5100_v19, %v17491_v6  ;;  %v17536_v53 = vpop.permute.xlu1 %5407  ;;  %v21469_v52 = vld [vmem:[#allocation96_spill] sm:$0xff] }
 0x375   :  { %v6280_v45 = vsel %vm3418_vm9, %v21441_v58, %v6279_v37  ;;  %v5678_v3 = vsel %vm3414_vm7, %v17504_v2, %v17247_v44  ;;  %v8081_v48 = vrot.slane %v11675_v36, %v13009_v27  ;;  %8877 = vmatpush2.msra.mxu1 %v7535_v42  ;;  %v6903_v15 = vcombine.low %v5093_v4, %v6295_v5  ;;  %v7532_v36 = vld [vmem:[%s20263_s3 + $0x368] sm:$0xff]  ;;  %v21475_v24 = vld [vmem:[#allocation120_spill] sm:$0xff] }
 0x376   :  { %v6281_v49 = vsel %vm3420_vm10, %v21443_v22, %v6280_v45  ;;  %v6904_v37 = vcombine.high %v5093_v4, %v6295_v5  ;;  %6051 = vrot.lane.b32.xlu1 %v5989_v31, %s12095_s30  ;;  %5741 = vrot.lane.b32.xlu0 %v5678_v3, %s12096_s28  ;;  %v8095_v45 = vrot.slane %v11677_v9, %v13009_v27  ;;  %v21467_v4 = vld [vmem:[#allocation119_spill] sm:$0xff]  ;;  %v21468_v31 = vld [vmem:[#allocation97_spill] sm:$0xff]  ;;  %v21470_v3 = vld [vmem:[#allocation54_spill] sm:$0xff] }
 0x377   :  { %v6282_v19 = vsel %vm3422_vm11, %v21415_v17, %v6281_v49  ;;  %v5806_v5 = vrot.slane %v21467_v4, %v13020_v21  ;;  %v5870_v49 = vsel %vm3414_vm7, %v21469_v52, %v21468_v31  ;;  %8878 = vmatprep.subr.mxu1 %v7534_v55  ;;  %v17552_v6 = vsel %vm3414_vm7, %v21471_v14, %v21470_v3  ;;  %v21473_v9 = vld [vmem:[#allocation100_spill] sm:$0xff]  ;;  %v21474_v55 = vld [vmem:[#allocation29_spill] sm:$0xff] }
 0x378   :  { %v6283_v42 = vsel %vm3424_vm12, %v17247_v44, %v6282_v19  ;;  %v6913_v58 = vrot.slane %v6903_v15, %v13009_v27  ;;  %v5871_v19 = vsel %vm3416_vm8, %v21473_v9, %v5870_v49  ;;  %8879 = vmatpush2.msra.mxu1 %v7533_v10  ;;  %v8104_v52 = vcombine.high %v8081_v48, %v8095_v45  ;;  %v21478_v49 = vld [vmem:[#allocation103_spill] sm:$0xff]  ;;  %v21501_v30 = vld [vmem:[#allocation168_spill] sm:$0xff] }
 0x379   :  { %v17557_v44 = vsel %vm3426_vm13, %v17504_v2, %v6283_v42  ;;  %v5878_v31 = vsel %vm3414_vm7, %v5806_v5, %v21474_v55  ;;  %v21476_v14 = vrot.slane %v21475_v24, %v13020_v21  ;;  %8880 = vmatprep.subr.mxu1 %v7532_v36  ;;  %v6920_v42 = vrot.slane %v6904_v37, %v13009_v27  ;;  %v17578_v55 = vpop.permute.xlu0 %5409  ;;  %v21479_v36 = vld [vmem:[#allocation105_spill] sm:$0xff]  ;;  %v21494_v24 = vld [vmem:[#allocation38_spill] sm:$0xff] }
 0x37a   :  { %21472 = vst [vmem:[#allocation107_spill] sm:$0xff] %v17557_v44  ;;  %5997 = vrot.lane.b32.xlu1 %v5878_v31, %s12095_s30  ;;  %v5872_v10 = vsel %vm3418_vm9, %v21478_v49, %v5871_v19  ;;  %v8103_v9 = vcombine.low %v8081_v48, %v8095_v45  ;;  %v5118_v4 = vsel %vm3414_vm7, %v21326_v59, %v21325_v7  ;;  %v21480_v19 = vld [vmem:[#allocation22_spill] sm:$0xff]  ;;  %v21481_v48 = vld [vmem:[#allocation21_spill] sm:$0xff]  ;;  %v21482_v59 = vld [vmem:[#allocation11_spill] sm:$0xff] }
 0x37b   :  { %v17569_v15 = vsel %vm3414_vm7, %v21476_v14, %v5806_v5  ;;  %v7531_v14 = vld [vmem:[%s20263_s3 + $0x360] sm:$0xff]  ;;  %8793 = vmatprep.mubr.f32.mxu1 %v8104_v52  ;;  %v5873_v37 = vsel %vm3420_vm10, %v21479_v36, %v5872_v10  ;;  %v17587_v5 = vsel %vm684_vm6, %v5118_v4, %v17469_v40  ;;  %v5902_v45 = vsel %vm3414_vm7, %v21481_v48, %v21480_v19  ;;  %v7530_v31 = vld [vmem:[%s20263_s3 + $0x358] sm:$0xff]  ;;  %v17607_v48 = vpop.permute.xlu1 %5719 }
 0x37c   :  { %21477 = vst [vmem:[#allocation176_spill] sm:$0xff] %v17569_v15  ;;  %v5814_v7 = vrot.slane %v21482_v59, %v13020_v21  ;;  %v21483_v49 = vld [vmem:[#allocation122_spill] sm:$0xff]  ;;  %8794 = vmatmul.mubr.f32.gmra.mxu1 %v8103_v9  ;;  %v21485_v36 = vld [vmem:[#allocation173_spill] sm:$0xff]  ;;  %v8170_v19 = vrot.slane %v6913_v58, %v13009_v27  ;;  %v21487_v59 = vld [vmem:[#allocation124_spill] sm:$0xff] }
 0x37d   :  { %v5874_v52 = vsel %vm3422_vm11, %v21483_v49, %v5873_v37  ;;  %v21484_v10 = vld [vmem:[#allocation74_spill] sm:$0xff]  ;;  %v21488_v37 = vld [vmem:[#allocation139_spill] sm:$0xff]  ;;  %8881 = vmatpush2.msra.mxu1 %v7531_v14  ;;  %v7529_v58 = vld [vmem:[%s20263_s3 + $0x350] sm:$0xff] }
 0x37e   :  { %v17602_v4 = vsel %vm3414_vm7, %v21485_v36, %v21484_v10  ;;  %v21486_v44 = vld [vmem:[#allocation6_spill] sm:$0xff]  ;;  %v5875_v3 = vsel %vm3424_vm12, %v21487_v59, %v5874_v52  ;;  %v21493_v52 = vld [vmem:[#allocation141_spill] sm:$0xff]  ;;  %8882 = vmatprep.subr.mxu1 %v7530_v31  ;;  %v7528_v14 = vld [vmem:[%s20263_s3 + $0x348] sm:$0xff] }
 0x37f   :  { %v5903_v15 = vsel %vm3416_vm8, %v21486_v44, %v5902_v45  ;;  %v21489_v49 = vld [vmem:[#allocation90_spill] sm:$0xff]  ;;  %v21492_v44 = vld [vmem:[#allocation132_spill] sm:$0xff]  ;;  %v21500_v31 = vld [vmem:[#allocation31_spill] sm:$0xff]  ;;  %8883 = vmatpush2.msra.mxu1 %v7529_v58 }
 0x380   :  { %v5904_v9 = vsel %vm3418_vm9, %v21488_v37, %v5903_v15  ;;  %v21490_v36 = vrot.slane %v21489_v49, %v13020_v21  ;;  %v5876_v45 = vsel %vm3426_vm13, %v21492_v44, %v5875_v3  ;;  %v5894_v15 = vsel %vm3414_vm7, %v5814_v7, %v21494_v24  ;;  %v17631_v49 = vpop.permute.xlu0 %5415  ;;  %v21496_v44 = vld [vmem:[#allocation64_spill] sm:$0xff]  ;;  %v21499_v24 = vld [vmem:[#allocation62_spill] sm:$0xff]  ;;  %8884 = vmatprep.subr.mxu1 %v7528_v14 }
 0x381   :  { %v5905_v59 = vsel %vm3420_vm10, %v21493_v52, %v5904_v9  ;;  %v8184_v37 = vrot.slane %v6920_v42, %v13009_v27  ;;  %5993 = vrot.lane.b32.xlu0 %v5876_v45, %s12095_s30  ;;  %v21498_v52 = vld [vmem:[#allocation63_spill] sm:$0xff] }
 0x382   :  { %v17619_v10 = vsel %vm3414_vm7, %v21490_v36, %v5814_v7  ;;  %v21495_v36 = vld [vmem:[#allocation26_spill] sm:$0xff]  ;;  %v5111_v42 = vsel %vm3416_vm8, %v21499_v24, %v21498_v52  ;;  %v17648_v7 = vsel %vm684_vm6, %v17536_v53, %v17578_v55 }
 0x383   :  { %21491 = vst [vmem:[#allocation78_spill] sm:$0xff] %v17619_v10  ;;  %v5906_v3 = vsel %vm3422_vm11, %v21495_v36, %v5905_v59  ;;  %v21497_v10 = vld [vmem:[#allocation61_spill] sm:$0xff]  ;;  %v8193_v45 = vcombine.high %v8170_v19, %v8184_v37  ;;  %v21504_v24 = vld [vmem:[#allocation66_spill] sm:$0xff] }
 0x384   :  { %v5104_v9 = vsel %vm3416_vm8, %v21497_v10, %v21496_v44  ;;  %v5907_v40 = vsel %vm3424_vm12, %v21500_v31, %v5906_v3  ;;  %v21502_v36 = vld [vmem:[#allocation169_spill] sm:$0xff]  ;;  %v17656_v10 = vpop.permute.xlu1 %5419  ;;  %v21503_v44 = vld [vmem:[#allocation135_spill] sm:$0xff]  ;;  %v8192_v3 = vcombine.low %v8170_v19, %v8184_v37  ;;  %v21508_v31 = vld [vmem:[#allocation40_spill] sm:$0xff] }
 0x385   :  { %v5105_v59 = vsel %vm3418_vm9, %v21501_v30, %v5104_v9  ;;  %v5112_v35 = vsel %vm3418_vm9, %v21502_v36, %v5111_v42  ;;  %v5908_v52 = vsel %vm3426_vm13, %v21503_v44, %v5907_v40  ;;  %v7527_v30 = vld [vmem:[%s20263_s3 + $0x340] sm:$0xff]  ;;  %8799 = vmatprep.mubr.f32.mxu1 %v8193_v45  ;;  %v21506_v9 = vld [vmem:[#allocation69_spill] sm:$0xff]  ;;  %v17674_v36 = vpop.permute.xlu0 %5423  ;;  %6005 = vrot.lane.b32.xlu0 %v5894_v15, %s12095_s30  ;;  %v21510_v37 = vld [vmem:[#allocation172_spill] sm:$0xff] }
 0x386   :  { %v5106_v50 = vsel %vm3420_vm10, %v21504_v24, %v5105_v59  ;;  %v5113_v17 = vsel %vm3420_vm10, %v21505_v0, %v5112_v35  ;;  %6009 = vrot.lane.b32.xlu1 %v5908_v52, %s12095_s30  ;;  %v21507_v42 = vld [vmem:[#allocation170_spill] sm:$0xff]  ;;  %v5830_v59 = vrot.slane %v21508_v31, %v13020_v21  ;;  %v7526_v0 = vld [vmem:[%s20263_s3 + $0x338] sm:$0xff]  ;;  %v21509_v35 = vld [vmem:[#allocation171_spill] sm:$0xff]  ;;  %8800 = vmatmul.mubr.f32.gmra.mxu1 %v8192_v3 }
 0x387   :  { %v5107_v58 = vsel %vm3422_vm11, %v21506_v9, %v5106_v50  ;;  %v5114_v40 = vsel %vm3422_vm11, %v21507_v42, %v5113_v17  ;;  %v21511_v17 = vld [vmem:[#allocation25_spill] sm:$0xff]  ;;  %v21512_v45 = vld [vmem:[#allocation174_spill] sm:$0xff]  ;;  %v21513_v52 = vld [vmem:[#allocation175_spill] sm:$0xff]  ;;  %8885 = vmatpush2.msra.mxu1 %v7527_v30 }
 0x388   :  { %v5108_v19 = vsel %vm3424_vm12, %v21509_v35, %v5107_v58  ;;  %v5115_v50 = vsel %vm3424_vm12, %v21510_v37, %v5114_v40  ;;  %v5822_v14 = vrot.slane %v21511_v17, %v13020_v21  ;;  %v21514_v31 = vld [vmem:[#allocation16_spill] sm:$0xff]  ;;  %v21515_v15 = vld [vmem:[#allocation45_spill] sm:$0xff]  ;;  %v17698_v40 = vpop.permute.xlu1 %5427  ;;  %v21518_v37 = vld [vmem:[#allocation158_spill] sm:$0xff]  ;;  %8886 = vmatprep.subr.mxu1 %v7526_v0 }
 0x389   :  { %v5109_v44 = vsel %vm3426_vm13, %v21512_v45, %v5108_v19  ;;  %v5116_v42 = vsel %vm3426_vm13, %v21513_v52, %v5115_v50  ;;  %v5926_v9 = vsel %vm3414_vm7, %v5830_v59, %v21514_v31  ;;  %v21516_v24 = vrot.slane %v21515_v15, %v13020_v21  ;;  %v21519_v17 = vld [vmem:[#allocation27_spill] sm:$0xff]  ;;  %v7525_v30 = vld [vmem:[%s20263_s3 + $0x330] sm:$0xff] }
 0x38a   :  { %v6297_v3 = vsel %vm684_vm6, %v5116_v42, %v17536_v53  ;;  %v5910_v19 = vsel %vm3414_vm7, %v5822_v14, %v21518_v37  ;;  %v21520_v50 = vrot.slane %v21519_v17, %v13020_v21  ;;  %6021 = vrot.lane.b32.xlu1 %v5926_v9, %s12095_s30  ;;  %v5934_v9 = vsel %vm3414_vm7, %v21459_v32, %v21457_v60  ;;  %v17751_v60 = vpop.permute.xlu0 %5735  ;;  %v7523_v32 = vld [vmem:[%s20263_s3 + $0x320] sm:$0xff] }
 0x38b   :  { %v17696_v58 = vsel %vm3414_vm7, %v21516_v24, %v5830_v59  ;;  %v6313_v24 = vsel %vm651_vm5, %v17578_v55, %v17607_v48  ;;  %v7033_v59 = vcombine.low %v5109_v44, %v6297_v3  ;;  %v7034_v53 = vcombine.high %v5109_v44, %v6297_v3  ;;  %6013 = vrot.lane.b32.xlu0 %v5910_v19, %s12095_s30  ;;  %v21523_v44 = vld [vmem:[#allocation51_spill] sm:$0xff] }
 0x38c   :  { %21517 = vst [vmem:[#allocation178_spill] sm:$0xff] %v17696_v58  ;;  %v17708_v52 = vsel %vm3414_vm7, %v21520_v50, %v5822_v14  ;;  %v7035_v42 = vcombine.low %v17648_v7, %v6313_v24  ;;  %v7036_v31 = vcombine.high %v17648_v7, %v6313_v24  ;;  %v7524_v14 = vld [vmem:[%s20263_s3 + $0x328] sm:$0xff]  ;;  %v21522_v55 = vcombine.high %v17068_v20, %v17056_v41  ;;  %v21525_v50 = vld [vmem:[#allocation70_spill] sm:$0xff]  ;;  %v21537_v58 = vld [vmem:[#allocation77_spill] sm:$0xff] }
 0x38d   :  { %21521 = vst [vmem:[#allocation180_spill] sm:$0xff] %v17708_v52  ;;  %v5838_v3 = vrot.slane %v21523_v44, %v13020_v21  ;;  %v5966_v7 = vsel %vm3414_vm7, %v21372_v16, %v21370_v23  ;;  %v21524_v37 = vcombine.low %v17552_v6, %v17441_v8  ;;  %v17744_v20 = vrot.slane %v7033_v59, %v13009_v27  ;;  %v21527_v8 = vld [vmem:[#allocation56_spill] sm:$0xff] }
 0x38e   :  { %v17726_v0 = vrot.slane %v21522_v55, %v13009_v27  ;;  %v17747_v19 = vrot.slane %v7035_v42, %v13009_v27  ;;  %v5846_v24 = vrot.slane %v21525_v50, %v13020_v21  ;;  %21526 = vst [vmem:[#allocation181_spill] sm:$0xff] %v17751_v60  ;;  %8887 = vmatpush2.msra.mxu1 %v7525_v30  ;;  %v7522_v30 = vld [vmem:[%s20263_s3 + $0x318] sm:$0xff] }
 0x38f   :  { %v17741_v41 = vrot.slane %v21524_v37, %v13009_v27  ;;  %v5942_v6 = vsel %vm3414_vm7, %v5838_v3, %v16848_v47  ;;  %v21528_v59 = vrot.slane %v21527_v8, %v13020_v21  ;;  %v5935_v42 = vsel %vm3416_vm8, %v21460_v61, %v5934_v9  ;;  %8888 = vmatprep.subr.mxu1 %v7524_v14  ;;  %v17786_v14 = vpop.permute.xlu1 %5425  ;;  %v7521_v9 = vld [vmem:[%s20263_s3 + $0x310] sm:$0xff] }
 0x390   :  { %v5967_v44 = vsel %vm3416_vm8, %v21373_v57, %v5966_v7  ;;  %v21530_v47 = vcombine.low %v17602_v4, %v17587_v5  ;;  %v17781_v50 = vrot.slane %v7036_v31, %v13009_v27  ;;  %v7066_v61 = vcombine.high %v17744_v20, %v17747_v19  ;;  %6029 = vrot.lane.b32.xlu1 %v5942_v6, %s12095_s30  ;;  %v21531_v31 = vld [vmem:[#allocation65_spill] sm:$0xff] }
 0x391   :  { %v17762_v55 = vsel %vm3414_vm7, %v21528_v59, %v5838_v3  ;;  %v17778_v3 = vrot.slane %v7034_v53, %v13009_v27  ;;  %v5936_v5 = vsel %vm3418_vm9, %v21464_v13, %v5935_v42  ;;  %v5968_v4 = vsel %vm3418_vm9, %v21374_v12, %v5967_v44  ;;  %8889 = vmatpush2.msra.mxu1 %v7523_v32  ;;  %v7520_v59 = vld [vmem:[%s20263_s3 + $0x308] sm:$0xff]  ;;  %v21534_v44 = vld [vmem:[#allocation80_spill] sm:$0xff]  ;;  %v7519_v32 = vld [vmem:[%s20263_s3 + $0x300] sm:$0xff] }
 0x392   :  { %21529 = vst [vmem:[#allocation182_spill] sm:$0xff] %v17762_v55  ;;  %v17775_v37 = vrot.slane %v21530_v47, %v13009_v27  ;;  %v5958_v53 = vsel %vm3414_vm7, %v5846_v24, %v17036_v51  ;;  %v21532_v7 = vrot.slane %v21531_v31, %v13020_v21  ;;  %v5937_v13 = vsel %vm3420_vm10, %v21466_v63, %v5936_v5  ;;  %v21535_v47 = vld [vmem:[#allocation79_spill] sm:$0xff]  ;;  %v21536_v55 = vld [vmem:[#allocation186_spill] sm:$0xff] }
 0x393   :  { %v5969_v42 = vsel %vm3420_vm10, %v21376_v38, %v5968_v4  ;;  %v5120_v51 = vsel %vm3416_vm8, %v21535_v47, %v21534_v44  ;;  %8890 = vmatprep.subr.mxu1 %v7522_v30 }
 0x394   :  { %v17801_v6 = vsel %vm3414_vm7, %v21532_v7, %v5846_v24  ;;  %v5127_v24 = vsel %vm3416_vm8, %v21537_v58, %v21536_v55  ;;  %v5938_v7 = vsel %vm3422_vm11, %v21309_v54, %v5937_v13  ;;  %v5970_v63 = vsel %vm3422_vm11, %v21379_v39, %v5969_v42  ;;  %8891 = vmatpush2.msra.mxu1 %v7521_v9  ;;  %v17835_v13 = vpop.permute.xlu0 %6015 }
 0x395   :  { %21533 = vst [vmem:[#allocation84_spill] sm:$0xff] %v17801_v6  ;;  %v5121_v5 = vsel %vm3418_vm9, %v21382_v25, %v5120_v51  ;;  %v5128_v4 = vsel %vm3418_vm9, %v21370_v23, %v5127_v24  ;;  %v5939_v58 = vsel %vm3424_vm12, %v21313_v29, %v5938_v7  ;;  %v5971_v55 = vsel %vm3424_vm12, %v21401_v46, %v5970_v63  ;;  %v7646_v25 = vld [vmem:[%s20263_s3 + $0x6f8] sm:$0xff]  ;;  %v21538_v23 = vld [vmem:[#allocation10_spill] sm:$0xff]  ;;  %v17859_v51 = vpop.permute.xlu1 %6017 }
 0x396   :  { %v5122_v30 = vsel %vm3420_vm10, %v21383_v28, %v5121_v5  ;;  %v5129_v54 = vsel %vm3420_vm10, %v21372_v16, %v5128_v4  ;;  %8892 = vmatprep.subr.mxu1 %v7520_v59  ;;  %v5940_v9 = vsel %vm3426_vm13, %v21538_v23, %v5939_v58  ;;  %v5972_v29 = vsel %vm3426_vm13, %v17122_v33, %v5971_v55  ;;  %v7702_v16 = vld [vmem:[%s20263_s3 + $0x8b8] sm:$0xff] }
 0x397   :  { %v5123_v42 = vsel %vm3422_vm11, %v21385_v34, %v5122_v30  ;;  %v5130_v44 = vsel %vm3422_vm11, %v21373_v57, %v5129_v54  ;;  %8893 = vmatpush2.msra.mxu1 %v7519_v32  ;;  %v11683_v59 = vcombine.low %v17741_v41, %v17744_v20  ;;  %6025 = vrot.lane.b32.xlu0 %v5940_v9, %s12095_s30  ;;  %v7701_v57 = vld [vmem:[%s20263_s3 + $0x8b0] sm:$0xff]  ;;  %v21542_v54 = vld [vmem:[#allocation89_spill] sm:$0xff]  ;;  %v21545_v9 = vld [vmem:[#allocation179_spill] sm:$0xff] }
 0x398   :  { %6041 = vrot.lane.b32.xlu1 %v5972_v29, %s12095_s30  ;;  %v5124_v33 = vsel %vm3424_vm12, %v21386_v11, %v5123_v42  ;;  %v5131_v47 = vsel %vm3424_vm12, %v21374_v12, %v5130_v44  ;;  %v7068_v24 = vcombine.high %v17778_v3, %v17781_v50  ;;  %v5862_v32 = vrot.slane %v21462_v56, %v13020_v21  ;;  %v17908_v23 = vpop.permute.xlu0 %5709  ;;  %v21546_v29 = vld [vmem:[#allocation76_spill] sm:$0xff]  ;;  %v21568_v6 = vld [vmem:[#allocation197_spill] sm:$0xff] }
 0x399   :  { %v5125_v41 = vsel %vm3426_vm13, %v21390_v18, %v5124_v33  ;;  %v5132_v20 = vsel %vm3426_vm13, %v21376_v38, %v5131_v47  ;;  %9080 = vmatprep.subr.mxu1 %v7646_v25  ;;  %v5134_v7 = vsel %vm3414_vm7, %v21401_v46, %v21379_v39  ;;  %v5854_v63 = vrot.slane %v21420_v26, %v13020_v21  ;;  %v7700_v38 = vld [vmem:[%s20263_s3 + $0x8a8] sm:$0xff]  ;;  %v7699_v39 = vld [vmem:[%s20263_s3 + $0x8a0] sm:$0xff]  ;;  %v21549_v47 = vld [vmem:[#allocation184_spill] sm:$0xff] }
 0x39a   :  { %v6299_v12 = vsel %vm684_vm6, %v5132_v20, %v17631_v49  ;;  %v11685_v5 = vcombine.low %v7066_v61, %v17778_v3  ;;  %9213 = vmatprep.subr.mxu0 %v7702_v16  ;;  %v17885_v58 = vsel %vm684_vm6, %v5134_v7, %v17656_v10  ;;  %v5990_v55 = vsel %vm3414_vm7, %v5862_v32, %v17504_v2  ;;  %v21539_v26 = vld [vmem:[#allocation111_spill] sm:$0xff]  ;;  %v17935_v7 = vpop.permute.xlu1 %6019 }
 0x39b   :  { %v7163_v4 = vcombine.low %v5125_v41, %v6299_v12  ;;  %v7164_v56 = vcombine.high %v5125_v41, %v6299_v12  ;;  %9214 = vmatpush1.msra.mxu0 %v7701_v57  ;;  %6037 = vrot.lane.b32.xlu0 %v5958_v53, %s12095_s30  ;;  %v21540_v46 = vrot.slane %v21539_v26, %v13020_v21  ;;  %v7698_v53 = vld [vmem:[%s20263_s3 + $0x898] sm:$0xff]  ;;  %v21548_v33 = vld [vmem:[#allocation183_spill] sm:$0xff]  ;;  %v21557_v41 = vld [vmem:[#allocation190_spill] sm:$0xff] }
 0x39c   :  { %6053 = vrot.lane.b32.xlu1 %v5990_v55, %s12095_s30  ;;  %v5974_v30 = vsel %vm3414_vm7, %v5854_v63, %v17274_v62  ;;  %v21543_v2 = vrot.slane %v21542_v54, %v13020_v21  ;;  %v21547_v42 = vcombine.low %v21545_v9, %v21546_v29  ;;  %v17922_v62 = vsel %vm651_vm5, %v17221_v43, %v17420_v1  ;;  %v7697_v43 = vld [vmem:[%s20263_s3 + $0x890] sm:$0xff]  ;;  %v21552_v55 = vld [vmem:[#allocation109_spill] sm:$0xff] }
 0x39d   :  { %v17897_v61 = vsel %vm3414_vm7, %v21540_v46, %v5862_v32  ;;  %v7173_v16 = vrot.slane %v7163_v4, %v13009_v27  ;;  %v17928_v57 = vsel %vm3414_vm7, %v21549_v47, %v21548_v33  ;;  %9215 = vmatprep.subr.mxu0 %v7700_v38  ;;  %v8259_v20 = vrot.slane %v11683_v59, %v13009_v27  ;;  %v21551_v4 = vld [vmem:[#allocation114_spill] sm:$0xff]  ;;  %v21553_v46 = vld [vmem:[#allocation188_spill] sm:$0xff] }
 0x39e   :  { %21541 = vst [vmem:[#allocation85_spill] sm:$0xff] %v17897_v61  ;;  %v17906_v25 = vsel %vm3414_vm7, %v21543_v2, %v5854_v63  ;;  %v17917_v44 = vrot.slane %v21547_v42, %v13009_v27  ;;  %v8273_v32 = vrot.slane %v11685_v5, %v13009_v27  ;;  %v11691_v12 = vcombine.low %v7068_v24, %v17775_v37  ;;  %v21554_v5 = vld [vmem:[#allocation110_spill] sm:$0xff]  ;;  %v21556_v42 = vld [vmem:[#allocation116_spill] sm:$0xff] }
 0x39f   :  { %21544 = vst [vmem:[#allocation108_spill] sm:$0xff] %v17906_v25  ;;  %21550 = vst [vmem:[#allocation39_spill] sm:$0xff] %v17935_v7  ;;  %9216 = vmatpush1.msra.mxu0 %v7699_v39  ;;  %v17941_v63 = vrot.slane %v7164_v56, %v13009_v27  ;;  %v8362_v38 = vrot.slane %v7173_v16, %v13009_v27  ;;  %v5136_v59 = vsel %vm3416_vm8, %v21552_v55, %v21551_v4  ;;  %v21555_v56 = vld [vmem:[#allocation115_spill] sm:$0xff]  ;;  %v21567_v61 = vld [vmem:[#allocation198_spill] sm:$0xff] }
 0x3a0   :  { %v5143_v24 = vsel %vm3416_vm8, %v21554_v5, %v21553_v46  ;;  %9217 = vmatprep.subr.mxu0 %v7698_v53  ;;  %6045 = vrot.lane.b32.xlu0 %v5974_v30, %s12095_s30  ;;  %v8282_v39 = vcombine.high %v8259_v20, %v8273_v32  ;;  %v8281_v2 = vcombine.low %v8259_v20, %v8273_v32  ;;  %v21559_v46 = vld [vmem:[#allocation194_spill] sm:$0xff] }
 0x3a1   :  { %v8348_v9 = vrot.slane %v11691_v12, %v13009_v27  ;;  %v5150_v29 = vsel %vm3414_vm7, %v21555_v56, %v21443_v22  ;;  %v5137_v16 = vsel %vm3418_vm9, %v21556_v42, %v5136_v59  ;;  %v5144_v4 = vsel %vm3418_vm9, %v21557_v41, %v5143_v24  ;;  %9218 = vmatpush1.msra.mxu0 %v7697_v43  ;;  %v21558_v12 = vld [vmem:[#allocation191_spill] sm:$0xff]  ;;  %v17969_v59 = vpop.permute.xlu0 %5401  ;;  %v21560_v43 = vld [vmem:[#allocation192_spill] sm:$0xff] }
 0x3a2   :  { %v5445_v53 = vsel %vm684_vm6, %v17674_v36, %v17786_v14  ;;  %v6317_v30 = vsel %vm651_vm5, %v17786_v14, %v17751_v60  ;;  %8805 = vmatprep.mubr.f32.mxu1 %v8282_v39  ;;  %v6302_v22 = vsel %vm684_vm6, %v5150_v29, %v17698_v40  ;;  %v5138_v55 = vsel %vm3420_vm10, %v21558_v12, %v5137_v16  ;;  %v7696_v41 = vld [vmem:[%s20263_s3 + $0x888] sm:$0xff]  ;;  %v17978_v39 = vpop.permute.xlu1 %5711  ;;  %v21561_v56 = vld [vmem:[#allocation112_spill] sm:$0xff] }
 0x3a3   :  { %v8371_v20 = vcombine.high %v8348_v9, %v8362_v38  ;;  %v8370_v32 = vcombine.low %v8348_v9, %v8362_v38  ;;  %8806 = vmatmul.mubr.f32.gmra.mxu1 %v8281_v2  ;;  %v5139_v14 = vsel %vm3422_vm11, %v21559_v46, %v5138_v55  ;;  %v5145_v5 = vsel %vm3420_vm10, %v21560_v43, %v5144_v4  ;;  %v7695_v9 = vld [vmem:[%s20263_s3 + $0x880] sm:$0xff]  ;;  %v21562_v29 = vld [vmem:[#allocation99_spill] sm:$0xff]  ;;  %v21564_v55 = vld [vmem:[#allocation193_spill] sm:$0xff] }
 0x3a4   :  { %v7295_v38 = vcombine.low %v5445_v53, %v6317_v30  ;;  %v7296_v24 = vcombine.high %v5445_v53, %v6317_v30  ;;  %v5149_v42 = vsel %vm3414_vm7, %v21562_v29, %v21561_v56  ;;  %v21563_v2 = vld [vmem:[#allocation195_spill] sm:$0xff]  ;;  %v5146_v21 = vsel %vm3422_vm11, %v21564_v55, %v5145_v5  ;;  %v21566_v43 = vld [vmem:[#allocation145_spill] sm:$0xff]  ;;  %9219 = vmatprep.subr.mxu0 %v7696_v41 }
 0x3a5   :  { %8811 = vmatprep.mubr.f32.mxu1 %v8371_v20  ;;  %v5140_v16 = vsel %vm3424_vm12, %v21563_v2, %v5139_v14  ;;  %v21565_v4 = vld [vmem:[#allocation43_spill] sm:$0xff]  ;;  %v7382_v30 = vcombine.low %v5149_v42, %v6302_v22  ;;  %v5147_v20 = vsel %vm3424_vm12, %v21568_v6, %v5146_v21  ;;  %v7694_v14 = vld [vmem:[%s20263_s3 + $0x878] sm:$0xff]  ;;  %v21570_v22 = vld [vmem:[#allocation146_spill] sm:$0xff]  ;;  %v6325_v21 = vsel %vm618_vm4, %v17420_v1, %v17835_v13 }
 0x3a6   :  { %v6207_v53 = vsel %vm3414_vm7, %v21566_v43, %v21565_v4  ;;  %v5141_v25 = vsel %vm3426_vm13, %v21567_v61, %v5140_v16  ;;  %v17998_v52 = vrot.slane %v7295_v38, %v13009_v27  ;;  %v21569_v5 = vld [vmem:[#allocation199_spill] sm:$0xff]  ;;  %v18006_v4 = vrot.slane %v7296_v24, %v13009_v27  ;;  %9220 = vmatpush1.msra.mxu0 %v7695_v9  ;;  %v7693_v6 = vld [vmem:[%s20263_s3 + $0x870] sm:$0xff] }
 0x3a7   :  { %v5148_v55 = vsel %vm3426_vm13, %v21569_v5, %v5147_v20  ;;  %v6208_v42 = vsel %vm3416_vm8, %v21570_v22, %v6207_v53  ;;  %8812 = vmatmul.mubr.f32.gmra.mxu1 %v8370_v32  ;;  %v21571_v38 = vld [vmem:[#allocation148_spill] sm:$0xff]  ;;  %v6809_v16 = vcombine.low %v17922_v62, %v6325_v21  ;;  %v6810_v43 = vcombine.high %v17922_v62, %v6325_v21  ;;  %v7692_v1 = vld [vmem:[%s20263_s3 + $0x868] sm:$0xff]  ;;  %v21573_v32 = vld [vmem:[#allocation18_spill] sm:$0xff]  ;;  %v18032_v22 = vpop.permute.xlu0 %5405 }
 0x3a8   :  { %v6301_v41 = vsel %vm684_vm6, %v5148_v55, %v17674_v36  ;;  %v6209_v24 = vsel %vm3418_vm9, %v21571_v38, %v6208_v42  ;;  %v21572_v20 = vld [vmem:[#allocation47_spill] sm:$0xff]  ;;  %v5750_v36 = vsel %vm651_vm5, %v21573_v32, %v17908_v23  ;;  %v18030_v55 = vpop.permute.xlu1 %5713  ;;  %9221 = vmatprep.subr.mxu0 %v7694_v14  ;;  %v7691_v62 = vld [vmem:[%s20263_s3 + $0x860] sm:$0xff]  ;;  %v21575_v21 = vld [vmem:[#allocation41_spill] sm:$0xff]  ;;  %v6061_v38 = vsel %vm618_vm4, %v17835_v13, %v17859_v51 }
 0x3a9   :  { %v7293_v9 = vcombine.low %v5141_v25, %v6301_v41  ;;  %v7294_v53 = vcombine.high %v5141_v25, %v6301_v41  ;;  %v6210_v5 = vsel %vm3420_vm10, %v21572_v20, %v6209_v24  ;;  %v21574_v25 = vcombine.low %v17928_v57, %v17885_v58  ;;  %9222 = vmatpush1.msra.mxu0 %v7693_v6  ;;  %v7690_v24 = vld [vmem:[%s20263_s3 + $0x858] sm:$0xff]  ;;  %v21576_v57 = vld [vmem:[#allocation163_spill] sm:$0xff]  ;;  %v7689_v13 = vld [vmem:[%s20263_s3 + $0x850] sm:$0xff] }
 0x3aa   :  { %v6211_v41 = vsel %vm3422_vm11, %v21575_v21, %v6210_v5  ;;  %v6326_v14 = vsel %vm618_vm4, %v17908_v23, %v17935_v7  ;;  %v18059_v32 = vrot.slane %v6809_v16, %v13009_v27  ;;  %9223 = vmatprep.subr.mxu0 %v7692_v1  ;;  %v18065_v51 = vrot.slane %v7382_v30, %v13009_v27  ;;  %v7688_v16 = vld [vmem:[%s20263_s3 + $0x848] sm:$0xff] }
 0x3ab   :  { %v7260_v42 = vrot.slane %v21574_v25, %v13009_v27  ;;  %v7303_v20 = vrot.slane %v7293_v9, %v13009_v27  ;;  %v18054_v58 = vrot.slane %v7294_v53, %v13009_v27  ;;  %v6212_v5 = vsel %vm3424_vm12, %v21576_v57, %v6211_v41  ;;  %9224 = vmatpush1.msra.mxu0 %v7691_v62  ;;  %v21578_v30 = vld [vmem:[#allocation59_spill] sm:$0xff]  ;;  %v21579_v62 = vld [vmem:[#allocation86_spill] sm:$0xff] }
 0x3ac   :  { %21577 = vst [vmem:[#allocation35_spill] sm:$0xff] %v18065_v51  ;;  %v18068_v23 = vrot.slane %v6810_v43, %v13009_v27  ;;  %v8437_v6 = vrot.slane %v17941_v63, %v13009_v27  ;;  %v6879_v9 = vcombine.low %v5750_v36, %v6326_v14  ;;  %v6213_v21 = vsel %vm3426_vm13, %v21578_v30, %v6212_v5  ;;  %v7687_v63 = vld [vmem:[%s20263_s3 + $0x840] sm:$0xff]  ;;  %v18093_v14 = vpop.permute.xlu1 %5721  ;;  %v18103_v30 = vpop.permute.xlu0 %5715 }
 0x3ad   :  { %v11695_v1 = vcombine.low %v7260_v42, %v7303_v20  ;;  %v7326_v53 = vcombine.high %v7303_v20, %v17998_v52  ;;  %v7328_v25 = vcombine.high %v18054_v58, %v18006_v4  ;;  %9225 = vmatprep.subr.mxu0 %v7690_v24  ;;  %v6811_v43 = vcombine.low %v6061_v38, %v6213_v21  ;;  %v7686_v24 = vld [vmem:[%s20263_s3 + $0x838] sm:$0xff] }
 0x3ae   :  { %v6812_v36 = vcombine.high %v6061_v38, %v6213_v21  ;;  %v18086_v41 = vsel %vm684_vm6, %v21579_v62, %v17969_v59  ;;  %v18091_v42 = vsel %vm651_vm5, %v17969_v59, %v17978_v39  ;;  %9226 = vmatpush1.msra.mxu0 %v7689_v13  ;;  %v11673_v38 = vcombine.low %v17917_v44, %v18059_v32  ;;  %v7685_v59 = vld [vmem:[%s20263_s3 + $0x830] sm:$0xff]  ;;  %v21581_v21 = vld [vmem:[#allocation81_spill] sm:$0xff] }
 0x3af   :  { %v8451_v20 = vrot.slane %v11695_v1, %v13009_v27  ;;  %v11699_v57 = vcombine.low %v7326_v53, %v18054_v58  ;;  %v11701_v5 = vcombine.low %v7328_v25, %v18065_v51  ;;  %9227 = vmatprep.subr.mxu0 %v7688_v16  ;;  %v21580_v13 = vld [vmem:[#allocation24_spill] sm:$0xff]  ;;  %v18111_v7 = vrot.slane %v6811_v43, %v13009_v27 }
 0x3b0   :  { %v18114_v44 = vrot.slane %v6812_v36, %v13009_v27  ;;  %v18117_v1 = vrot.slane %v6879_v9, %v13009_v27  ;;  %9228 = vmatpush1.msra.mxu0 %v7687_v63  ;;  %v6905_v16 = vcombine.low %v18086_v41, %v18091_v42  ;;  %v21584_v63 = vld [vmem:[#allocation127_spill] sm:$0xff]  ;;  %v8042_v62 = vrot.slane %v11673_v38, %v13009_v27  ;;  %v18150_v38 = vpop.permute.xlu0 %6023 }
 0x3b1   :  { %21582 = vst [vmem:[#allocation143_spill] sm:$0xff] %v18111_v7  ;;  %v8460_v53 = vcombine.high %v8437_v6, %v8451_v20  ;;  %v8459_v25 = vcombine.low %v8437_v6, %v8451_v20  ;;  %v8526_v54 = vrot.slane %v11699_v57, %v13009_v27  ;;  %9229 = vmatprep.subr.mxu0 %v7686_v24  ;;  %v7684_v6 = vld [vmem:[%s20263_s3 + $0x828] sm:$0xff]  ;;  %v21585_v20 = vld [vmem:[#allocation8_spill] sm:$0xff]  ;;  %21587 = vst [vmem:[#allocation196_spill] sm:$0xff] %v18150_v38 }
 0x3b2   :  { %21583 = vst [vmem:[#allocation36_spill] sm:$0xff] %v18117_v1  ;;  %v6842_v43 = vcombine.high %v18059_v32, %v18111_v7  ;;  %v6844_v36 = vcombine.high %v18068_v23, %v18114_v44  ;;  %v8540_v9 = vrot.slane %v11701_v5, %v13009_v27  ;;  %9230 = vmatpush1.msra.mxu0 %v7685_v59 }
 0x3b3   :  { %8817 = vmatprep.mubr.f32.mxu1 %v8460_v53  ;;  %v7732_v24 = vrot.slane %v21584_v63, %v13009_v27  ;;  %v7746_v57 = vrot.slane %v21585_v20, %v13009_v27  ;;  %v8028_v32 = vrot.slane %v17726_v0, %v13009_v27  ;;  %v6906_v5 = vcombine.high %v18086_v41, %v18091_v42  ;;  %v18142_v53 = vpop.permute.xlu1 %6031  ;;  %v21586_v20 = vld [vmem:[#allocation82_spill] sm:$0xff]  ;;  %v21589_v41 = vld [vmem:[#allocation125_spill] sm:$0xff] }
 0x3b4   :  { %v11681_v7 = vcombine.low %v6844_v36, %v18117_v1  ;;  %8818 = vmatmul.mubr.f32.gmra.mxu1 %v8459_v25  ;;  %v8549_v59 = vcombine.high %v8526_v54, %v8540_v9  ;;  %v8548_v26 = vcombine.low %v8526_v54, %v8540_v9  ;;  %v18145_v63 = vrot.slane %v6905_v16, %v13009_v27  ;;  %v21588_v36 = vld [vmem:[#allocation133_spill] sm:$0xff]  ;;  %v21590_v54 = vld [vmem:[#allocation46_spill] sm:$0xff]  ;;  %v21591_v9 = vld [vmem:[#allocation12_spill] sm:$0xff] }
 0x3b5   :  { %v8051_v47 = vcombine.high %v8028_v32, %v8042_v62  ;;  %v5440_v0 = vsel %vm684_vm6, %v21586_v20, %v18032_v22  ;;  %v8050_v60 = vcombine.low %v8028_v32, %v8042_v62  ;;  %9231 = vmatprep.subr.mxu0 %v7684_v6  ;;  %v7749_v25 = vcombine.low %v7732_v24, %v7746_v57  ;;  %v21592_v32 = vld [vmem:[#allocation7_spill] sm:$0xff]  ;;  %v21593_v6 = vld [vmem:[#allocation128_spill] sm:$0xff] }
 0x3b6   :  { %8823 = vmatprep.mubr.f32.mxu1 %v8549_v59  ;;  %v6547_v42 = vcombine.low %v21589_v41, %v21588_v36  ;;  %v11660_v1 = vcombine.low %v21591_v9, %v21590_v54  ;;  %v11679_v16 = vcombine.low %v6842_v43, %v18068_v23  ;;  %v7750_v33 = vcombine.high %v7732_v24, %v7746_v57  ;;  %v7683_v41 = vld [vmem:[%s20263_s3 + $0x820] sm:$0xff]  ;;  %v7682_v24 = vld [vmem:[%s20263_s3 + $0x818] sm:$0xff]  ;;  %v7645_v9 = vld [vmem:[%s20263_s3 + $0x6f0] sm:$0xff] }
 0x3b7   :  { %9037 = vmatprep.mubr.f32.mxu0 %v8051_v47  ;;  %v8131_v51 = vrot.slane %v11681_v7, %v13009_v27  ;;  %v6312_v62 = vsel %vm651_vm5, %v18032_v22, %v18103_v30  ;;  %v21594_v59 = vcombine.low %v21592_v32, %v21593_v6  ;;  %v18173_v7 = vsel %vm618_vm4, %v18093_v14, %v18142_v53  ;;  %v5414_v22 = vpop.permute.xlu1 %5413 }
 0x3b8   :  { %8824 = vmatmul.mubr.f32.gmra.mxu1 %v8548_v26  ;;  %9038 = vmatmul.mubr.f32.gmra.mxu0 %v8050_v60  ;;  %v11662_v43 = vcombine.high %v21590_v54, %v6547_v42  ;;  %v8117_v47 = vrot.slane %v11679_v16, %v13009_v27  ;;  %v18181_v26 = vsel %vm651_vm5, %v17607_v48, %v18093_v14 }
 0x3b9   :  { %v11668_v20 = vcombine.high %v21588_v36, %v21594_v59  ;;  %8894 = vmatprep.mubr.f32.mxu1 %v7750_v33  ;;  %v7821_v60 = vrot.slane %v11660_v1, %v13009_v27  ;;  %v6993_v57 = vcombine.low %v5440_v0, %v6312_v62  ;;  %v21595_v33 = vld [vmem:[#allocation32_spill] sm:$0xff]  ;;  %9232 = vmatpush1.msra.mxu0 %v7683_v41  ;;  %v7644_v1 = vld [vmem:[%s20263_s3 + $0x6e8] sm:$0xff]  ;;  %v6034_v62 = vpop.permute.xlu0 %6033 }
 0x3ba   :  { %v7835_v42 = vrot.slane %v11662_v43, %v13009_v27  ;;  %v8140_v54 = vcombine.high %v8117_v47, %v8131_v51  ;;  %v8139_v16 = vcombine.low %v8117_v47, %v8131_v51  ;;  %v7924_v32 = vrot.slane %v21595_v33, %v13009_v27  ;;  %9233 = vmatprep.subr.mxu0 %v7682_v24  ;;  %v7641_v47 = vld [vmem:[%s20263_s3 + $0x6d0] sm:$0xff] }
 0x3bb   :  { %v18185_v36 = vrot.slane %v11668_v20, %v13009_v27  ;;  %v18194_v48 = vrot.slane %v6906_v5, %v13009_v27  ;;  %v5751_v14 = vsel %vm651_vm5, %v17978_v39, %v18030_v55  ;;  %v7069_v0 = vcombine.low %v18181_v26, %v18173_v7  ;;  %v7643_v39 = vld [vmem:[%s20263_s3 + $0x6e0] sm:$0xff]  ;;  %v18225_v33 = vpop.permute.xlu1 %5723 }
 0x3bc   :  { %v6327_v51 = vsel %vm618_vm4, %v18030_v55, %v18150_v38  ;;  %8895 = vmatmul.mubr.f32.vlgmr.msra.gmra.mxu1 %v7749_v25  ;;  %v7839_v5 = vcombine.high %v7821_v60, %v7835_v42  ;;  %9043 = vmatprep.mubr.f32.mxu0 %v8140_v54  ;;  %v18214_v20 = vrot.slane %v6993_v57, %v13009_v27  ;;  %v7642_v55 = vld [vmem:[%s20263_s3 + $0x6d8] sm:$0xff]  ;;  %v21596_v54 = vld [vmem:[#allocation72_spill] sm:$0xff] }
 0x3bd   :  { %v7928_v59 = vcombine.high %v18185_v36, %v7924_v32  ;;  %9081 = vmatpush1.msra.mxu1 %v7645_v9  ;;  %9044 = vmatmul.mubr.f32.gmra.mxu0 %v8139_v16  ;;  %v6939_v25 = vcombine.low %v5751_v14, %v6327_v51  ;;  %v6940_v41 = vcombine.high %v5751_v14, %v6327_v51  ;;  %v21597_v9 = vld [vmem:[#allocation75_spill] sm:$0xff]  ;;  %v21600_v51 = vld [vmem:[#allocation69_spill] sm:$0xff] }
 0x3be   :  { %8900 = vmatprep.mubr.f32.mxu1 %v7839_v5  ;;  %9082 = vmatprep.subr.mxu1 %v7644_v1  ;;  %v7838_v43 = vcombine.low %v7821_v60, %v7835_v42  ;;  %v7927_v24 = vcombine.low %v18185_v36, %v7924_v32  ;;  %v11672_v57 = vcombine.low %v21597_v9, %v21596_v54  ;;  %v7640_v60 = vld [vmem:[%s20263_s3 + $0x6c8] sm:$0xff]  ;;  %v21599_v1 = vld [vmem:[#allocation66_spill] sm:$0xff]  ;;  %v5718_v32 = vpop.permute.xlu0 %5717 }
 0x3bf   :  { %9083 = vmatpush1.msra.mxu1 %v7643_v39  ;;  %v6949_v16 = vrot.slane %v6939_v25, %v13009_v27  ;;  %v6956_v6 = vrot.slane %v6940_v41, %v13009_v27  ;;  %v21598_v42 = vld [vmem:[#allocation83_spill] sm:$0xff]  ;;  %v6239_v36 = vsel %vm3414_vm7, %v21600_v51, %v21599_v1  ;;  %v7639_v5 = vld [vmem:[%s20263_s3 + $0x6c0] sm:$0xff]  ;;  %v21602_v1 = vcombine.low %v21581_v21, %v21580_v13 }
 0x3c0   :  { %v5442_v14 = vsel %vm684_vm6, %v21598_v42, %v5414_v22  ;;  %8901 = vmatmul.mubr.f32.gmra.mxu1 %v7838_v43  ;;  %9084 = vmatprep.subr.mxu1 %v7642_v55  ;;  %v21601_v39 = vld [vmem:[#allocation19_spill] sm:$0xff]  ;;  %v8013_v41 = vrot.slane %v11672_v57, %v13009_v27  ;;  %v6240_v9 = vsel %vm3416_vm8, %v21509_v35, %v6239_v36  ;;  %v7638_v42 = vld [vmem:[%s20263_s3 + $0x6b8] sm:$0xff]  ;;  %v7637_v35 = vld [vmem:[%s20263_s3 + $0x6b0] sm:$0xff] }
 0x3c1   :  { %v7999_v25 = vrot.slane %v21601_v39, %v13009_v27  ;;  %8906 = vmatprep.mubr.f32.mxu1 %v7928_v59  ;;  %9085 = vmatpush1.msra.mxu1 %v7641_v47  ;;  %v6241_v55 = vsel %vm3418_vm9, %v21512_v45, %v6240_v9  ;;  %v6314_v43 = vsel %vm651_vm5, %v5414_v22, %v18225_v33  ;;  %v21603_v59 = vld [vmem:[#allocation74_spill] sm:$0xff]  ;;  %v21604_v22 = vld [vmem:[#allocation173_spill] sm:$0xff] }
 0x3c2   :  { %v11676_v57 = vcombine.high %v21596_v54, %v21602_v1  ;;  %9086 = vmatprep.subr.mxu1 %v7640_v60  ;;  %v6242_v47 = vsel %vm3420_vm10, %v21603_v59, %v6241_v55  ;;  %v7123_v39 = vcombine.low %v5442_v14, %v6314_v43  ;;  %v18262_v45 = vrot.slane %v7069_v0, %v13009_v27  ;;  %v7636_v60 = vld [vmem:[%s20263_s3 + $0x6a8] sm:$0xff]  ;;  %v21605_v9 = vld [vmem:[#allocation162_spill] sm:$0xff]  ;;  %v21606_v1 = vld [vmem:[#allocation13_spill] sm:$0xff]  ;;  %v18275_v14 = vpop.permute.xlu0 %6027 }
 0x3c3   :  { %v8017_v51 = vcombine.high %v7999_v25, %v8013_v41  ;;  %v8016_v36 = vcombine.low %v7999_v25, %v8013_v41  ;;  %9087 = vmatpush1.msra.mxu1 %v7639_v5  ;;  %v6243_v21 = vsel %vm3422_vm11, %v21604_v22, %v6242_v47  ;;  %v6065_v54 = vsel %vm618_vm4, %v18142_v53, %v6034_v62  ;;  %v21608_v0 = vld [vmem:[#allocation73_spill] sm:$0xff]  ;;  %v7635_v53 = vld [vmem:[%s20263_s3 + $0x6a0] sm:$0xff]  ;;  %v21609_v55 = vld [vmem:[#allocation167_spill] sm:$0xff] }
 0x3c4   :  { %v21607_v38 = vcombine.low %v21605_v9, %v21606_v1  ;;  %8907 = vmatmul.mubr.f32.gmra.mxu1 %v7927_v24  ;;  %9088 = vmatprep.subr.mxu1 %v7638_v42  ;;  %v6244_v5 = vsel %vm3424_vm12, %v21608_v0, %v6243_v21  ;;  %v8088_v62 = vrot.slane %v11676_v57, %v13009_v27  ;;  %v7633_v57 = vld [vmem:[%s20263_s3 + $0x690] sm:$0xff]  ;;  %v5418_v9 = vpop.permute.xlu1 %5417  ;;  %v7630_v1 = vld [vmem:[%s20263_s3 + $0x678] sm:$0xff] }
 0x3c5   :  { %v8206_v41 = vrot.slane %v6949_v16, %v13009_v27  ;;  %8912 = vmatprep.mubr.f32.mxu1 %v8017_v51  ;;  %9089 = vmatpush1.msra.mxu1 %v7637_v35  ;;  %v8220_v42 = vrot.slane %v6956_v6, %v13009_v27  ;;  %v11684_v43 = vcombine.low %v18214_v20, %v17747_v19  ;;  %v7632_v6 = vld [vmem:[%s20263_s3 + $0x688] sm:$0xff] }
 0x3c6   :  { %v11678_v25 = vcombine.high %v21580_v13, %v21607_v38  ;;  %v6245_v13 = vsel %vm3426_vm13, %v21609_v55, %v6244_v5  ;;  %v7634_v38 = vld [vmem:[%s20263_s3 + $0x698] sm:$0xff]  ;;  %9090 = vmatprep.subr.mxu1 %v7636_v60  ;;  %v7137_v16 = vrot.slane %v7123_v39, %v13009_v27  ;;  %v8177_v51 = vrot.slane %v18145_v63, %v13009_v27  ;;  %v7631_v63 = vld [vmem:[%s20263_s3 + $0x680] sm:$0xff]  ;;  %v5726_v0 = vpop.permute.xlu0 %5725 }
 0x3c7   :  { %v7071_v59 = vcombine.low %v6065_v54, %v6245_v13  ;;  %9091 = vmatpush1.msra.mxu1 %v7635_v53  ;;  %v8229_v47 = vcombine.high %v8206_v41, %v8220_v42  ;;  %v8228_v20 = vcombine.low %v8206_v41, %v8220_v42  ;;  %v7072_v21 = vcombine.high %v6065_v54, %v6245_v13  ;;  %v21612_v41 = vld [vmem:[#allocation58_spill] sm:$0xff]  ;;  %v7626_v42 = vld [vmem:[%s20263_s3 + $0x658] sm:$0xff] }
 0x3c8   :  { %v8102_v24 = vrot.slane %v11678_v25, %v13009_v27  ;;  %8913 = vmatmul.mubr.f32.gmra.mxu1 %v8016_v36  ;;  %9092 = vmatprep.subr.mxu1 %v7634_v38  ;;  %v5752_v39 = vsel %vm651_vm5, %v18103_v30, %v5718_v32  ;;  %v8191_v54 = vrot.slane %v18194_v48, %v13009_v27  ;;  %v7629_v48 = vld [vmem:[%s20263_s3 + $0x670] sm:$0xff] }
 0x3c9   :  { %v18303_v60 = vrot.slane %v7071_v59, %v13009_v27  ;;  %9093 = vmatpush1.msra.mxu1 %v7633_v57  ;;  %v6328_v36 = vsel %vm618_vm4, %v5718_v32, %v18275_v14  ;;  %v21610_v30 = vcombine.low %v17778_v3, %v17781_v50  ;;  %v21611_v5 = vcombine.high %v18181_v26, %v18173_v7  ;;  %v7628_v7 = vld [vmem:[%s20263_s3 + $0x668] sm:$0xff] }
 0x3ca   :  { %v8106_v35 = vcombine.high %v8088_v62, %v8102_v24  ;;  %v8105_v22 = vcombine.low %v8088_v62, %v8102_v24  ;;  %9094 = vmatprep.subr.mxu1 %v7632_v6  ;;  %9049 = vmatprep.mubr.f32.mxu0 %v8229_v47  ;;  %v7009_v32 = vcombine.low %v5752_v39, %v6328_v36  ;;  %v18352_v59 = vpop.permute.xlu0 %6035  ;;  %v18356_v6 = vpop.permute.xlu1 %5727 }
 0x3cb   :  { %v11686_v25 = vcombine.high %v17747_v19, %v21610_v30  ;;  %v18325_v53 = vrot.slane %v21611_v5, %v13009_v27  ;;  %v7102_v62 = vcombine.high %v18262_v45, %v18303_v60  ;;  %v7138_v3 = vcombine.low %v17775_v37, %v7137_v16  ;;  %9095 = vmatpush1.msra.mxu1 %v7631_v63  ;;  %v7627_v37 = vld [vmem:[%s20263_s3 + $0x660] sm:$0xff] }
 0x3cc   :  { %8918 = vmatprep.mubr.f32.mxu1 %v8106_v35  ;;  %9050 = vmatmul.mubr.f32.gmra.mxu0 %v8228_v20  ;;  %v8195_v19 = vcombine.high %v8177_v51, %v8191_v54  ;;  %v8266_v26 = vrot.slane %v11684_v43, %v13009_v27  ;;  %v7105_v55 = vcombine.high %v21612_v41, %v21612_v41 }
 0x3cd   :  { %v18340_v13 = vrot.slane %v7072_v21, %v13009_v27  ;;  %8919 = vmatmul.mubr.f32.gmra.mxu1 %v8105_v22  ;;  %9096 = vmatprep.subr.mxu1 %v7630_v1  ;;  %v7017_v38 = vrot.slane %v7009_v32, %v13009_v27  ;;  %v5443_v24 = vsel %vm684_vm6, %v17631_v49, %v5418_v9  ;;  %v7625_v49 = vld [vmem:[%s20263_s3 + $0x650] sm:$0xff] }
 0x3ce   :  { %8924 = vmatprep.mubr.f32.mxu1 %v8195_v19  ;;  %9097 = vmatpush1.msra.mxu1 %v7629_v48  ;;  %v8280_v43 = vrot.slane %v11686_v25, %v13009_v27  ;;  %v11689_v16 = vcombine.low %v7102_v62, %v18325_v53  ;;  %v8194_v35 = vcombine.low %v8177_v51, %v8191_v54  ;;  %v5422_v5 = vpop.permute.xlu1 %5421 }
 0x3cf   :  { %v11687_v57 = vcombine.low %v7017_v38, %v18262_v45  ;;  %9098 = vmatprep.subr.mxu1 %v7628_v7  ;;  %v5754_v47 = vsel %vm651_vm5, %v18225_v33, %v5726_v0  ;;  %v6330_v22 = vsel %vm618_vm4, %v5726_v0, %v18352_v59  ;;  %v6315_v20 = vsel %vm651_vm5, %v5418_v9, %v18356_v6  ;;  %v7624_v45 = vld [vmem:[%s20263_s3 + $0x648] sm:$0xff]  ;;  %v7623_v33 = vld [vmem:[%s20263_s3 + $0x640] sm:$0xff] }
 0x3d0   :  { %9099 = vmatpush1.msra.mxu1 %v7627_v37  ;;  %v8284_v21 = vcombine.high %v8266_v26, %v8280_v43  ;;  %v7139_v51 = vcombine.low %v5754_v47, %v6330_v22  ;;  %v11692_v39 = vcombine.high %v17781_v50, %v7138_v3  ;;  %v7165_v63 = vcombine.low %v5443_v24, %v6315_v20  ;;  %v7622_v50 = vld [vmem:[%s20263_s3 + $0x638] sm:$0xff]  ;;  %v7619_v7 = vld [vmem:[%s20263_s3 + $0x620] sm:$0xff]  ;;  %v21613_v37 = vld [vmem:[#allocation3_spill] sm:$0xff] }
 0x3d1   :  { %8925 = vmatmul.mubr.f32.gmra.mxu1 %v8194_v35  ;;  %9100 = vmatprep.subr.mxu1 %v7626_v42  ;;  %v8295_v1 = vrot.slane %v11687_v57, %v13009_v27  ;;  %v8309_v54 = vrot.slane %v11689_v16, %v13009_v27  ;;  %v7327_v9 = vcombine.low %v18054_v58, %v18006_v4  ;;  %v7621_v58 = vld [vmem:[%s20263_s3 + $0x630] sm:$0xff]  ;;  %v21615_v57 = vld [vmem:[#allocation95_spill] sm:$0xff]  ;;  %v21616_v35 = vld [vmem:[#allocation101_spill] sm:$0xff] }
 0x3d2   :  { %v7166_v36 = vcombine.high %v5443_v24, %v6315_v20  ;;  %8930 = vmatprep.mubr.f32.mxu1 %v8284_v21  ;;  %9101 = vmatpush1.msra.mxu1 %v7625_v49  ;;  %v6271_v30 = vsel %vm3414_vm7, %v21559_v46, %v21558_v12  ;;  %v7187_v25 = vrot.slane %v7165_v63, %v13009_v27  ;;  %v7620_v12 = vld [vmem:[%s20263_s3 + $0x628] sm:$0xff]  ;;  %v21614_v24 = vld [vmem:[#allocation120_spill] sm:$0xff]  ;;  %v18418_v47 = vpop.permute.xlu1 %5731  ;;  %v5730_v20 = vpop.permute.xlu0 %5729 }
 0x3d3   :  { %9102 = vmatprep.subr.mxu1 %v7624_v45  ;;  %v8283_v0 = vcombine.low %v8266_v26, %v8280_v43  ;;  %v8318_v62 = vcombine.high %v8295_v1, %v8309_v54  ;;  %v8317_v48 = vcombine.low %v8295_v1, %v8309_v54  ;;  %v7104_v32 = vcombine.high %v18325_v53, %v18340_v13  ;;  %v7617_v22 = vld [vmem:[%s20263_s3 + $0x610] sm:$0xff] }
 0x3d4   :  { %9103 = vmatpush1.msra.mxu1 %v7623_v33  ;;  %v18391_v3 = vrot.slane %v7139_v51, %v13009_v27  ;;  %v8355_v46 = vrot.slane %v11692_v39, %v13009_v27  ;;  %v6272_v19 = vsel %vm3416_vm8, %v21563_v2, %v6271_v30  ;;  %v8369_v26 = vrot.slane %v7187_v25, %v13009_v27  ;;  %v7618_v2 = vld [vmem:[%s20263_s3 + $0x618] sm:$0xff]  ;;  %v7616_v51 = vld [vmem:[%s20263_s3 + $0x608] sm:$0xff]  ;;  %v21617_v39 = vld [vmem:[#allocation102_spill] sm:$0xff] }
 0x3d5   :  { %8931 = vmatmul.mubr.f32.gmra.mxu1 %v8283_v0  ;;  %9104 = vmatprep.subr.mxu1 %v7622_v50  ;;  %v6273_v38 = vsel %vm3418_vm9, %v21567_v61, %v6272_v19  ;;  %v6098_v42 = vrot.slane %v21614_v24, %v21613_v37  ;;  %v7194_v43 = vrot.slane %v7166_v36, %v13009_v27  ;;  %v21618_v1 = vld [vmem:[#allocation68_spill] sm:$0xff]  ;;  %v7615_v50 = vld [vmem:[%s20263_s3 + $0x600] sm:$0xff] }
 0x3d6   :  { %9105 = vmatpush1.msra.mxu1 %v7621_v58  ;;  %9055 = vmatprep.mubr.f32.mxu0 %v8318_v62  ;;  %v6274_v16 = vsel %vm3420_vm10, %v21561_v56, %v6273_v38  ;;  %v6159_v49 = vsel %vm3414_vm7, %v21616_v35, %v21615_v57  ;;  %v5444_v61 = vsel %vm684_vm6, %v17656_v10, %v5422_v5  ;;  %v21619_v30 = vld [vmem:[#allocation104_spill] sm:$0xff]  ;;  %v21624_v24 = vld [vmem:[#allocation138_spill] sm:$0xff]  ;;  %v7676_v57 = vld [vmem:[%s20263_s3 + $0x7e8] sm:$0xff] }
 0x3d7   :  { %9106 = vmatprep.subr.mxu1 %v7620_v12  ;;  %9056 = vmatmul.mubr.f32.gmra.mxu0 %v8317_v48  ;;  %v8373_v21 = vcombine.high %v8355_v46, %v8369_v26  ;;  %v8372_v45 = vcombine.low %v8355_v46, %v8369_v26  ;;  %v6316_v56 = vsel %vm651_vm5, %v5422_v5, %v18418_v47  ;;  %v21620_v5 = vld [vmem:[#allocation121_spill] sm:$0xff]  ;;  %v21621_v62 = vld [vmem:[#allocation20_spill] sm:$0xff] }
 0x3d8   :  { %9107 = vmatpush1.msra.mxu1 %v7619_v7  ;;  %v6275_v10 = vsel %vm3422_vm11, %v21562_v29, %v6274_v16  ;;  %v6160_v63 = vsel %vm3416_vm8, %v21617_v39, %v6159_v49  ;;  %v11700_v33 = vcombine.high %v17998_v52, %v7327_v9  ;;  %v7235_v54 = vcombine.high %v21618_v1, %v21618_v1  ;;  %v7678_v9 = vld [vmem:[%s20263_s3 + $0x7f8] sm:$0xff]  ;;  %v7681_v46 = vld [vmem:[%s20263_s3 + $0x810] sm:$0xff] }
 0x3d9   :  { %9108 = vmatprep.subr.mxu1 %v7618_v2  ;;  %v7253_v36 = vcombine.low %v5444_v61, %v6316_v56  ;;  %8936 = vmatprep.mubr.f32.mxu1 %v8373_v21  ;;  %v6161_v25 = vsel %vm3418_vm9, %v21619_v30, %v6160_v63  ;;  %v6843_v29 = vcombine.low %v18068_v23, %v18114_v44  ;;  %v21622_v48 = vld [vmem:[#allocation137_spill] sm:$0xff]  ;;  %v7677_v7 = vld [vmem:[%s20263_s3 + $0x7f0] sm:$0xff]  ;;  %v18477_v56 = vpop.permute.xlu0 %6039 }
 0x3da   :  { %v11693_v0 = vcombine.low %v7104_v32, %v18391_v3  ;;  %9109 = vmatpush1.msra.mxu1 %v7617_v22  ;;  %v6162_v58 = vsel %vm3420_vm10, %v21620_v5, %v6161_v25  ;;  %v6191_v12 = vsel %vm3414_vm7, %v21622_v48, %v21621_v62  ;;  %v18455_v32 = vpop.permute.xlu1 %5429  ;;  %v21623_v26 = vld [vmem:[#allocation93_spill] sm:$0xff]  ;;  %v7103_v16 = vcombine.low %v18325_v53, %v18340_v13  ;;  %v21626_v22 = vld [vmem:[#allocation140_spill] sm:$0xff]  ;;  %v21629_v25 = vld [vmem:[#allocation14_spill] sm:$0xff] }
 0x3db   :  { %v7267_v19 = vrot.slane %v7253_v36, %v13009_v27  ;;  %9110 = vmatprep.subr.mxu1 %v7616_v51  ;;  %8937 = vmatmul.mubr.f32.gmra.mxu1 %v8372_v45  ;;  %v6276_v38 = vsel %vm3424_vm12, %v21623_v26, %v6275_v10  ;;  %v6192_v2 = vsel %vm3416_vm8, %v21624_v24, %v6191_v12  ;;  %v21625_v49 = vld [vmem:[#allocation33_spill] sm:$0xff]  ;;  %v7675_v51 = vld [vmem:[%s20263_s3 + $0x7e0] sm:$0xff]  ;;  %v21627_v10 = vld [vmem:[#allocation123_spill] sm:$0xff] }
 0x3dc   :  { %9111 = vmatpush1.msra.mxu1 %v7615_v50  ;;  %v8444_v35 = vrot.slane %v7194_v43, %v13009_v27  ;;  %v18472_v61 = vsel %vm3414_vm7, %v6098_v42, %v21625_v49  ;;  %v6193_v21 = vsel %vm3418_vm9, %v21626_v22, %v6192_v2  ;;  %v6163_v39 = vsel %vm3422_vm11, %v21627_v10, %v6162_v58  ;;  %v21628_v43 = vld [vmem:[#allocation106_spill] sm:$0xff]  ;;  %v7680_v42 = vld [vmem:[%s20263_s3 + $0x808] sm:$0xff]  ;;  %v7674_v50 = vld [vmem:[%s20263_s3 + $0x7d8] sm:$0xff] }
 0x3dd   :  { %v11696_v45 = vcombine.low %v7267_v19, %v17998_v52  ;;  %9112 = vmatprep.subr.mxu1 %v7678_v9  ;;  %v6194_v63 = vsel %vm3420_vm10, %v21628_v43, %v6193_v21  ;;  %9234 = vmatpush1.msra.mxu0 %v7681_v46  ;;  %v5755_v52 = vsel %vm651_vm5, %v18356_v6, %v5730_v20  ;;  %v7673_v6 = vld [vmem:[%s20263_s3 + $0x7d0] sm:$0xff]  ;;  %v21630_v62 = vld [vmem:[#allocation34_spill] sm:$0xff]  ;;  %v7672_v46 = vld [vmem:[%s20263_s3 + $0x7c8] sm:$0xff] }
 0x3de   :  { %9113 = vmatpush2.msra.mxu1 %v7677_v7  ;;  %v6331_v36 = vsel %vm618_vm4, %v5730_v20, %v18477_v56  ;;  %v18497_v30 = vrot.slane %v11693_v0, %v13009_v27  ;;  %v18501_v9 = vsel %vm3426_vm13, %v21629_v25, %v6276_v38  ;;  %v6195_v48 = vsel %vm3422_vm11, %v21630_v62, %v6194_v63  ;;  %v7679_v0 = vld [vmem:[%s20263_s3 + $0x800] sm:$0xff]  ;;  %v18512_v12 = vpop.permute.xlu1 %6043  ;;  %v21631_v19 = vld [vmem:[#allocation129_spill] sm:$0xff]  ;;  %v21633_v10 = vld [vmem:[#allocation151_spill] sm:$0xff] }
 0x3df   :  { %v7199_v5 = vcombine.low %v5755_v52, %v6331_v36  ;;  %v7200_v58 = vcombine.high %v5755_v52, %v6331_v36  ;;  %9114 = vmatprep.subr.mxu1 %v7676_v57  ;;  %v8458_v20 = vrot.slane %v11696_v45, %v13009_v27  ;;  %v6164_v7 = vsel %vm3424_vm12, %v21631_v19, %v6163_v39  ;;  %v21632_v38 = vld [vmem:[#allocation90_spill] sm:$0xff]  ;;  %v5734_v57 = vpop.permute.xlu0 %5733  ;;  %v7669_v63 = vld [vmem:[%s20263_s3 + $0x7b0] sm:$0xff] }
 0x3e0   :  { %9115 = vmatpush2.msra.mxu1 %v7675_v51  ;;  %v18520_v26 = vrot.slane %v11700_v33, %v13009_v27  ;;  %v6106_v24 = vrot.slane %v21632_v38, %v21613_v37  ;;  %9235 = vmatprep.subr.mxu0 %v7680_v42  ;;  %v7671_v49 = vld [vmem:[%s20263_s3 + $0x7c0] sm:$0xff]  ;;  %v6122_v45 = vrot.slane %v21515_v15, %v21613_v37  ;;  %v7670_v51 = vld [vmem:[%s20263_s3 + $0x7b8] sm:$0xff] }
 0x3e1   :  { %v7209_v2 = vrot.slane %v7199_v5, %v13009_v27  ;;  %9116 = vmatprep.subr.mxu1 %v7674_v50  ;;  %v8462_v22 = vcombine.high %v8444_v35, %v8458_v20  ;;  %v8461_v21 = vcombine.low %v8444_v35, %v8458_v20  ;;  %v7216_v33 = vrot.slane %v7200_v58, %v13009_v27  ;;  %v21635_v50 = vld [vmem:[#allocation152_spill] sm:$0xff]  ;;  %v21637_v58 = vld [vmem:[#allocation154_spill] sm:$0xff]  ;;  %v21639_v38 = vld [vmem:[#allocation9_spill] sm:$0xff] }
 0x3e2   :  { %9117 = vmatpush2.msra.mxu1 %v7673_v6  ;;  %v6196_v39 = vsel %vm3424_vm12, %v21633_v10, %v6195_v48  ;;  %v6114_v43 = vrot.slane %v21519_v17, %v21613_v37  ;;  %9236 = vmatpush1.msra.mxu0 %v7679_v0  ;;  %v5756_v35 = vsel %vm651_vm5, %v18418_v47, %v5734_v57  ;;  %v7668_v17 = vld [vmem:[%s20263_s3 + $0x7a8] sm:$0xff]  ;;  %v21634_v47 = vld [vmem:[#allocation136_spill] sm:$0xff]  ;;  %v7667_v20 = vld [vmem:[%s20263_s3 + $0x7a0] sm:$0xff] }
 0x3e3   :  { %v6332_v15 = vsel %vm618_vm4, %v5734_v57, %v18512_v12  ;;  %9118 = vmatprep.subr.mxu1 %v7672_v46  ;;  %8942 = vmatprep.mubr.f32.mxu1 %v8462_v22  ;;  %v8398_v42 = vrot.slane %v7209_v2, %v13009_v27  ;;  %v5446_v52 = vsel %vm684_vm6, %v17698_v40, %v18455_v32  ;;  %v21636_v5 = vld [vmem:[#allocation52_spill] sm:$0xff]  ;;  %v21638_v48 = vld [vmem:[#allocation30_spill] sm:$0xff]  ;;  %v18572_v19 = vpop.permute.xlu0 %5739  ;;  %v21640_v2 = vld [vmem:[#allocation159_spill] sm:$0xff] }
 0x3e4   :  { %9119 = vmatpush2.msra.mxu1 %v7671_v49  ;;  %v18554_v36 = vsel %vm3426_vm13, %v21634_v47, %v6164_v7  ;;  %v18558_v25 = vsel %vm3414_vm7, %v6106_v24, %v21635_v50  ;;  %v6223_v6 = vsel %vm3414_vm7, %v21637_v58, %v21636_v5  ;;  %v18570_v0 = vsel %vm3426_vm13, %v21638_v48, %v6196_v39  ;;  %v7666_v7 = vld [vmem:[%s20263_s3 + $0x798] sm:$0xff]  ;;  %v5738_v39 = vpop.permute.xlu1 %5737  ;;  %v21648_v5 = vld [vmem:[#allocation164_spill] sm:$0xff] }
 0x3e5   :  { %9120 = vmatprep.subr.mxu1 %v7670_v51  ;;  %8943 = vmatmul.mubr.f32.gmra.mxu1 %v8461_v21  ;;  %v8407_v40 = vcombine.high %v18497_v30, %v8398_v42  ;;  %v8406_v62 = vcombine.low %v18497_v30, %v8398_v42  ;;  %v7269_v46 = vcombine.low %v5756_v35, %v6332_v15  ;;  %v21641_v30 = vld [vmem:[#allocation155_spill] sm:$0xff]  ;;  %v7665_v21 = vld [vmem:[%s20263_s3 + $0x790] sm:$0xff]  ;;  %v21642_v51 = vld [vmem:[#allocation157_spill] sm:$0xff] }
 0x3e6   :  { %9121 = vmatpush2.msra.mxu1 %v7669_v63  ;;  %v18579_v24 = vsel %vm3414_vm7, %v6122_v45, %v21639_v38  ;;  %v18583_v57 = vsel %vm3414_vm7, %v6114_v43, %v21640_v2  ;;  %v6224_v49 = vsel %vm3416_vm8, %v21641_v30, %v6223_v6  ;;  %v6318_v22 = vsel %vm651_vm5, %v18455_v32, %v18572_v19  ;;  %v7664_v32 = vld [vmem:[%s20263_s3 + $0x788] sm:$0xff]  ;;  %v21643_v15 = vld [vmem:[#allocation54_spill] sm:$0xff]  ;;  %v21647_v47 = vld [vmem:[#allocation189_spill] sm:$0xff] }
 0x3e7   :  { %9122 = vmatprep.subr.mxu1 %v7668_v17  ;;  %9061 = vmatprep.mubr.f32.mxu0 %v8407_v40  ;;  %v18594_v45 = vrot.slane %v7216_v33, %v13009_v27  ;;  %v6225_v10 = vsel %vm3418_vm9, %v21642_v51, %v6224_v49  ;;  %v7383_v43 = vcombine.low %v5446_v52, %v6318_v22  ;;  %v7663_v33 = vld [vmem:[%s20263_s3 + $0x780] sm:$0xff]  ;;  %v21649_v6 = vld [vmem:[#allocation37_spill] sm:$0xff]  ;;  %v21651_v30 = vld [vmem:[#allocation176_spill] sm:$0xff] }
 0x3e8   :  { %9123 = vmatpush2.msra.mxu1 %v7667_v20  ;;  %9062 = vmatmul.mubr.f32.gmra.mxu0 %v8406_v62  ;;  %v6130_v35 = vrot.slane %v21527_v8, %v21613_v37  ;;  %v6226_v63 = vsel %vm3420_vm10, %v21643_v15, %v6225_v10  ;;  %v21644_v42 = vld [vmem:[#allocation134_spill] sm:$0xff]  ;;  %v7802_v40 = vrot.slane %v21649_v6, %v13009_v27  ;;  %v7662_v48 = vld [vmem:[%s20263_s3 + $0x778] sm:$0xff] }
 0x3e9   :  { %9124 = vmatprep.subr.mxu1 %v7666_v7  ;;  %v21645_v17 = vld [vmem:[#allocation150_spill] sm:$0xff]  ;;  %v6227_v58 = vsel %vm3422_vm11, %v21648_v5, %v6226_v63  ;;  %v6255_v8 = vsel %vm3414_vm7, %v21385_v34, %v21383_v28  ;;  %v18620_v20 = vrot.slane %v7269_v46, %v13009_v27  ;;  %v7397_v62 = vrot.slane %v7383_v43, %v13009_v27  ;;  %v7661_v28 = vld [vmem:[%s20263_s3 + $0x770] sm:$0xff]  ;;  %v21650_v34 = vld [vmem:[#allocation67_spill] sm:$0xff] }
 0x3ea   :  { %v21646_v52 = vcombine.low %v21644_v42, %v21645_v17  ;;  %9125 = vmatpush2.msra.mxu1 %v7665_v21  ;;  %v6256_v7 = vsel %vm3416_vm8, %v21386_v11, %v6255_v8  ;;  %v6138_v38 = vrot.slane %v21531_v31, %v21613_v37  ;;  %v6228_v46 = vsel %vm3424_vm12, %v21650_v34, %v6227_v58  ;;  %v21652_v22 = vld [vmem:[#allocation49_spill] sm:$0xff]  ;;  %v21653_v21 = vld [vmem:[#allocation35_spill] sm:$0xff]  ;;  %v6048_v34 = vpop.permute.xlu0 %6047 }
 0x3eb   :  { %9126 = vmatprep.subr.mxu1 %v7664_v32  ;;  %v6257_v2 = vsel %vm3418_vm9, %v21390_v18, %v6256_v7  ;;  %v6512_v49 = vrot.slane %v21651_v30, %v13009_v27  ;;  %v6592_v11 = vrot.slane %v21652_v22, %v13009_v27  ;;  %v7398_v51 = vcombine.low %v21653_v21, %v7397_v62  ;;  %v7660_v31 = vld [vmem:[%s20263_s3 + $0x768] sm:$0xff]  ;;  %v21654_v10 = vld [vmem:[#allocation113_spill] sm:$0xff]  ;;  %v6050_v7 = vpop.permute.xlu1 %6049 }
 0x3ec   :  { %v11666_v50 = vcombine.high %v21647_v47, %v21646_v52  ;;  %9127 = vmatpush2.msra.mxu1 %v7663_v33  ;;  %v18647_v43 = vsel %vm3414_vm7, %v6130_v35, %v21654_v10  ;;  %v21655_v32 = vld [vmem:[#allocation183_spill] sm:$0xff]  ;;  %v21656_v15 = vcombine.high %v21652_v22, %v21652_v22  ;;  %v7659_v33 = vld [vmem:[%s20263_s3 + $0x760] sm:$0xff]  ;;  %v21657_v52 = vld [vmem:[#allocation28_spill] sm:$0xff] }
 0x3ed   :  { %v6258_v18 = vsel %vm3420_vm10, %v21655_v32, %v6257_v2  ;;  %9128 = vmatprep.subr.mxu1 %v7662_v48  ;;  %v21658_v35 = vrot.slane %v21657_v52, %v13009_v27  ;;  %v6600_v58 = vcombine.high %v6592_v11, %v6592_v11  ;;  %v7876_v6 = vcombine.low %v6512_v49, %v6592_v11  ;;  %v21659_v8 = vld [vmem:[#allocation181_spill] sm:$0xff]  ;;  %v21660_v2 = vld [vmem:[#allocation130_spill] sm:$0xff]  ;;  %v21662_v21 = vld [vmem:[#allocation71_spill] sm:$0xff] }
 0x3ee   :  { %v18655_v63 = vrot.slane %v21656_v15, %v13009_v27  ;;  %v18661_v42 = vrot.slane %v11666_v50, %v13009_v27  ;;  %v5757_v62 = vsel %vm651_vm5, %v21659_v8, %v5738_v39  ;;  %9129 = vmatpush2.msra.mxu1 %v7661_v28  ;;  %v7658_v48 = vld [vmem:[%s20263_s3 + $0x758] sm:$0xff]  ;;  %v11702_v50 = vcombine.high %v18006_v4, %v7398_v51  ;;  %v7657_v28 = vld [vmem:[%s20263_s3 + $0x750] sm:$0xff] }
 0x3ef   :  { %v18666_v5 = vcombine.low %v21658_v35, %v7802_v40  ;;  %v18676_v30 = vsel %vm3426_vm13, %v21660_v2, %v6228_v46  ;;  %v21661_v40 = vld [vmem:[#allocation184_spill] sm:$0xff]  ;;  %v6069_v49 = vsel %vm618_vm4, %v6048_v34, %v6050_v7  ;;  %v6333_v11 = vsel %vm618_vm4, %v5738_v39, %v6048_v34  ;;  %9130 = vmatprep.subr.mxu1 %v7660_v31  ;;  %v7656_v39 = vld [vmem:[%s20263_s3 + $0x748] sm:$0xff]  ;;  %v21663_v15 = vld [vmem:[#allocation185_spill] sm:$0xff]  ;;  %v18713_v7 = vpop.permute.xlu1 %6051  ;;  %v5742_v34 = vpop.permute.xlu0 %5741 }
 0x3f0   :  { %v6259_v22 = vsel %vm3422_vm11, %v21661_v40, %v6258_v18  ;;  %v18687_v10 = vsel %vm3414_vm7, %v6138_v38, %v21662_v21  ;;  %v7877_v4 = vcombine.low %v6600_v58, %v18655_v63  ;;  %v7329_v46 = vcombine.low %v5757_v62, %v6333_v11  ;;  %9131 = vmatpush2.msra.mxu1 %v7659_v33  ;;  %v7655_v38 = vld [vmem:[%s20263_s3 + $0x740] sm:$0xff]  ;;  %v21665_v21 = vld [vmem:[#allocation89_spill] sm:$0xff] }
 0x3f1   :  { %v7330_v51 = vcombine.high %v5757_v62, %v6333_v11  ;;  %v7331_v32 = vcombine.low %v6069_v49, %v18501_v9  ;;  %v7332_v18 = vcombine.high %v6069_v49, %v18501_v9  ;;  %9132 = vmatprep.subr.mxu1 %v7658_v48  ;;  %v8547_v31 = vrot.slane %v11702_v50, %v13009_v27  ;;  %v7653_v11 = vld [vmem:[%s20263_s3 + $0x730] sm:$0xff] }
 0x3f2   :  { %v6260_v52 = vsel %vm3424_vm12, %v21663_v15, %v6259_v22  ;;  %v7884_v35 = vrot.slane %v7876_v6, %v13009_v27  ;;  %v7891_v58 = vrot.slane %v7877_v4, %v13009_v27  ;;  %v7339_v9 = vrot.slane %v7329_v46, %v13009_v27  ;;  %9133 = vmatpush2.msra.mxu1 %v7657_v28  ;;  %v7654_v6 = vld [vmem:[%s20263_s3 + $0x738] sm:$0xff]  ;;  %v21664_v28 = vld [vmem:[#allocation111_spill] sm:$0xff] }
 0x3f3   :  { %v18705_v33 = vrot.slane %v7330_v51, %v13009_v27  ;;  %v18708_v8 = vrot.slane %v7331_v32, %v13009_v27  ;;  %v18711_v62 = vrot.slane %v7332_v18, %v13009_v27  ;;  %v5758_v48 = vsel %vm651_vm5, %v18572_v19, %v5742_v34  ;;  %9134 = vmatprep.subr.mxu1 %v7656_v39  ;;  %v21666_v51 = vld [vmem:[#allocation177_spill] sm:$0xff]  ;;  %v5998_v39 = vpop.permute.xlu1 %5997 }
 0x3f4   :  { %v6334_v50 = vsel %vm618_vm4, %v5742_v34, %v18713_v7  ;;  %v8551_v2 = vcombine.high %v18520_v26, %v8547_v31  ;;  %v8550_v40 = vcombine.low %v18520_v26, %v8547_v31  ;;  %v11697_v49 = vcombine.low %v18620_v20, %v7339_v9  ;;  %9135 = vmatpush2.msra.mxu1 %v7655_v38  ;;  %v7652_v26 = vld [vmem:[%s20263_s3 + $0x728] sm:$0xff]  ;;  %v7651_v38 = vld [vmem:[%s20263_s3 + $0x720] sm:$0xff]  ;;  %v7650_v34 = vld [vmem:[%s20263_s3 + $0x718] sm:$0xff] }
 0x3f5   :  { %v7362_v22 = vcombine.high %v7339_v9, %v18708_v8  ;;  %v6154_v19 = vrot.slane %v21664_v28, %v21613_v37  ;;  %v6146_v4 = vrot.slane %v21665_v21, %v21613_v37  ;;  %v7399_v46 = vcombine.low %v5758_v48, %v6334_v50  ;;  %9136 = vmatprep.subr.mxu1 %v7654_v6  ;;  %v21668_v6 = vld [vmem:[#allocation78_spill] sm:$0xff]  ;;  %v21669_v50 = vld [vmem:[#allocation165_spill] sm:$0xff] }
 0x3f6   :  { %8948 = vmatprep.mubr.f32.mxu1 %v8551_v2  ;;  %v18738_v20 = vsel %vm3426_vm13, %v21666_v51, %v6260_v52  ;;  %v18740_v32 = vcombine.low %v7884_v35, %v7891_v58  ;;  %v7364_v18 = vcombine.high %v18705_v33, %v18711_v62  ;;  %v8487_v31 = vrot.slane %v11697_v49, %v13009_v27  ;;  %v21667_v35 = vld [vmem:[#allocation126_spill] sm:$0xff]  ;;  %v7649_v49 = vld [vmem:[%s20263_s3 + $0x710] sm:$0xff]  ;;  %v21671_v51 = vld [vmem:[#allocation87_spill] sm:$0xff] }
 0x3f7   :  { %8949 = vmatmul.mubr.f32.gmra.mxu1 %v8550_v40  ;;  %v11703_v15 = vcombine.low %v7362_v22, %v18705_v33  ;;  %v6601_v9 = vcombine.high %v18655_v63, %v18655_v63  ;;  %v18752_v52 = vrot.slane %v7399_v46, %v13009_v27  ;;  %v6056_v58 = vsel %vm618_vm4, %v21667_v35, %v5998_v39 }
 0x3f8   :  { %9137 = vmatpush2.msra.mxu1 %v7653_v11  ;;  %v6642_v48 = vrot.slane %v21668_v6, %v13009_v27  ;;  %v6722_v2 = vrot.slane %v21669_v50, %v13009_v27  ;;  %v6490_v40 = vcombine.low %v6056_v58, %v18472_v61  ;;  %v8496_v63 = vcombine.high %v18594_v45, %v8487_v31  ;;  %v21670_v11 = vld [vmem:[#allocation143_spill] sm:$0xff] }
 0x3f9   :  { %v8495_v22 = vcombine.low %v18594_v45, %v8487_v31  ;;  %9138 = vmatprep.subr.mxu1 %v7652_v26  ;;  %v11680_v28 = vcombine.high %v21670_v11, %v6843_v29  ;;  %v11705_v46 = vcombine.low %v7364_v18, %v18752_v52  ;;  %v7648_v61 = vld [vmem:[%s20263_s3 + $0x708] sm:$0xff]  ;;  %v18779_v45 = vsel %vm3414_vm7, %v6154_v19, %v21671_v51  ;;  %v7647_v29 = vld [vmem:[%s20263_s3 + $0x700] sm:$0xff]  ;;  %v5994_v19 = vpop.permute.xlu0 %5993 }
 0x3fa   :  { %9139 = vmatpush2.msra.mxu1 %v7651_v38  ;;  %v6730_v26 = vcombine.high %v6722_v2, %v6722_v2  ;;  %v7965_v39 = vcombine.low %v6601_v9, %v6642_v48  ;;  %v7363_v31 = vcombine.low %v18705_v33, %v18711_v62  ;;  %v6504_v23 = vrot.slane %v6490_v40, %v13009_v27  ;;  %v21692_v33 = vld [vmem:[#allocation85_spill] sm:$0xff] }
 0x3fb   :  { %9067 = vmatprep.mubr.f32.mxu0 %v8496_v63  ;;  %9140 = vmatprep.subr.mxu1 %v7650_v34  ;;  %v21672_v18 = vcombine.high %v21669_v50, %v21669_v50  ;;  %v8562_v9 = vrot.slane %v11703_v15, %v13009_v27  ;;  %v8576_v35 = vrot.slane %v11705_v46, %v13009_v27  ;;  %v21673_v34 = vld [vmem:[#allocation91_spill] sm:$0xff]  ;;  %v6010_v46 = vpop.permute.xlu1 %6009 }
 0x3fc   :  { %9068 = vmatmul.mubr.f32.gmra.mxu0 %v8495_v22  ;;  %9141 = vmatpush2.msra.mxu1 %v7649_v49  ;;  %v7966_v58 = vcombine.low %v6722_v2, %v6730_v26  ;;  %v11664_v6 = vcombine.low %v6504_v23, %v21647_v47  ;;  %v6055_v48 = vsel %vm618_vm4, %v21673_v34, %v5994_v19  ;;  %v21674_v49 = vld [vmem:[#allocation180_spill] sm:$0xff] }
 0x3fd   :  { %v6729_v38 = vrot.slane %v21672_v18, %v13009_v27  ;;  %9142 = vmatprep.subr.mxu1 %v7648_v61  ;;  %v18797_v40 = vrot.slane %v11680_v28, %v13009_v27  ;;  %v6421_v50 = vcombine.low %v6055_v48, %v18554_v36  ;;  %v6422_v22 = vcombine.high %v6055_v48, %v18554_v36  ;;  %v21675_v28 = vld [vmem:[#allocation15_spill] sm:$0xff]  ;;  %v21676_v36 = vld [vmem:[#allocation44_spill] sm:$0xff] }
 0x3fe   :  { %v8585_v51 = vcombine.high %v8562_v9, %v8576_v35  ;;  %v8584_v15 = vcombine.low %v8562_v9, %v8576_v35  ;;  %9143 = vmatpush2.msra.mxu1 %v7647_v29  ;;  %v18802_v2 = vrot.slane %v11664_v6, %v13009_v27  ;;  %v7980_v47 = vrot.slane %v7966_v58, %v13009_v27  ;;  %v6006_v29 = vpop.permute.xlu0 %6005  ;;  %v21677_v6 = vld [vmem:[#allocation131_spill] sm:$0xff] }
 0x3ff   :  { %v6731_v63 = vcombine.high %v6729_v38, %v6729_v38  ;;  %v6772_v61 = vrot.slane %v21674_v49, %v13009_v27  ;;  %v6852_v26 = vrot.slane %v21675_v28, %v13009_v27  ;;  %v6443_v23 = vrot.slane %v6421_v50, %v13009_v27 }
 0x400   :  { %v6450_v18 = vrot.slane %v6422_v22, %v13009_v27  ;;  %v6059_v19 = vsel %vm618_vm4, %v21676_v36, %v6010_v46  ;;  %9073 = vmatprep.mubr.f32.mxu0 %v8585_v51  ;;  %v6058_v34 = vsel %vm618_vm4, %v21677_v6, %v6006_v29  ;;  %v7875_v48 = vcombine.high %v18802_v2, %v18661_v42 }
 0x401   :  { %v8054_v9 = vcombine.low %v6729_v38, %v6731_v63  ;;  %v6681_v35 = vcombine.low %v6059_v19, %v18570_v0  ;;  %v6682_v58 = vcombine.high %v6059_v19, %v18570_v0  ;;  %9074 = vmatmul.mubr.f32.gmra.mxu0 %v8584_v15  ;;  %v6620_v50 = vcombine.low %v6058_v34, %v18558_v25  ;;  %v6022_v63 = vpop.permute.xlu1 %6021 }
 0x402   :  { %v7768_v22 = vrot.slane %v6443_v23, %v13009_v27  ;;  %v7782_v46 = vrot.slane %v6450_v18, %v13009_v27  ;;  %v20742_v49 = vmov 0.0   ;;  %v7874_v38 = vcombine.low %v18802_v2, %v18661_v42  ;;  %v21679_v18 = vld [vmem:[#allocation39_spill] sm:$0xff]  ;;  %v6014_v29 = vpop.permute.xlu0 %6013 }
 0x403   :  { %9269 = vmatprep.mubr.f32.mxu0 %v20742_v49  ;;  %v6703_v0 = vrot.slane %v6681_v35, %v13009_v27  ;;  %v7973_v51 = vrot.slane %v7965_v39, %v13009_v27  ;;  %v8055_v15 = vcombine.low %v6772_v61, %v6852_v26  ;;  %v21678_v25 = vcombine.high %v21675_v28, %v21675_v28  ;;  %v21680_v35 = vld [vmem:[#allocation60_spill] sm:$0xff]  ;;  %v21681_v28 = vld [vmem:[#allocation55_spill] sm:$0xff] }
 0x404   :  { %v6634_v23 = vrot.slane %v6620_v50, %v13009_v27  ;;  %v6062_v19 = vsel %vm618_vm4, %v21679_v18, %v6022_v63  ;;  %v7785_v6 = vcombine.low %v7768_v22, %v7782_v46  ;;  %v7786_v34 = vcombine.high %v7768_v22, %v7782_v46  ;;  %v21682_v18 = vld [vmem:[#allocation178_spill] sm:$0xff] }
 0x405   :  { %v6859_v36 = vrot.slane %v21678_v25, %v13009_v27  ;;  %v6710_v42 = vrot.slane %v6682_v58, %v13009_v27  ;;  %v6880_v2 = vcombine.low %v6062_v19, %v18579_v24  ;;  %v6060_v39 = vsel %vm618_vm4, %v21680_v35, %v6014_v29  ;;  %11707 = vmatmul.mubr.msk.f32.vlgmr.msra.gmra.mxu0 %vm684_vm6, %v18666_v5  ;;  %v6030_v24 = vpop.permute.xlu1 %6029 }
 0x406   :  { %v7981_v61 = vcombine.low %v7973_v51, %v7980_v47  ;;  %v6635_v25 = vcombine.low %v21681_v28, %v6634_v23  ;;  %v6750_v50 = vcombine.low %v6060_v39, %v18583_v57  ;;  %9144 = vmatprep.mubr.f32.mxu1 %v7786_v34  ;;  %9275 = vmatprep.mubr.f32.mxu0 %v20742_v49 }
 0x407   :  { %v8062_v22 = vrot.slane %v8054_v9, %v13009_v27  ;;  %v6894_v58 = vrot.slane %v6880_v2, %v13009_v27  ;;  %9145 = vmatmul.mubr.f32.vlgmr.msra.gmra.mxu1 %v7785_v6  ;;  %v6860_v46 = vcombine.high %v6852_v26, %v6852_v26  ;;  %v6861_v63 = vcombine.high %v6859_v36, %v6859_v36  ;;  %v21683_v9 = vld [vmem:[#allocation36_spill] sm:$0xff] }
 0x408   :  { %v6902_v19 = vrot.slane %v21682_v18, %v13009_v27  ;;  %v6764_v5 = vrot.slane %v6750_v50, %v13009_v27  ;;  %v6064_v47 = vsel %vm618_vm4, %v18275_v14, %v6030_v24  ;;  %9150 = vmatprep.mubr.f32.mxu1 %v7875_v48  ;;  %v11670_v57 = vcombine.high %v21645_v17, %v6635_v25  ;;  %v21685_v25 = vld [vmem:[#allocation196_spill] sm:$0xff] }
 0x409   :  { %v8069_v51 = vrot.slane %v8055_v15, %v13009_v27  ;;  %v6895_v23 = vcombine.low %v21683_v9, %v6894_v58  ;;  %v7010_v29 = vcombine.low %v6064_v47, %v18647_v43  ;;  %11708 = vmatmul.mubr.msk.f32.gmra.mxu0 %vm684_vm6, %v18740_v32  ;;  %v8143_v26 = vcombine.low %v6860_v46, %v6859_v36  ;;  %v6026_v28 = vpop.permute.xlu0 %6025 }
 0x40a   :  { %v8144_v6 = vcombine.low %v6861_v63, %v6902_v19  ;;  %v11674_v34 = vcombine.low %v6764_v5, %v21670_v11  ;;  %v7946_v2 = vrot.slane %v11670_v57, %v13009_v27  ;;  %v7960_v14 = vrot.slane %v6703_v0, %v13009_v27  ;;  %9281 = vmatprep.mubr.f32.mxu0 %v20742_v49  ;;  %v6042_v53 = vpop.permute.xlu1 %6041 }
 0x40b   :  { %v11690_v17 = vcombine.high %v18303_v60, %v7103_v16  ;;  %v7024_v43 = vrot.slane %v7010_v29, %v13009_v27  ;;  %9151 = vmatmul.mubr.f32.gmra.mxu1 %v7874_v38  ;;  %v8035_v32 = vrot.slane %v6710_v42, %v13009_v27  ;;  %v11682_v48 = vcombine.high %v18114_v44, %v6895_v23  ;;  %v21684_v42 = vld [vmem:[#allocation57_spill] sm:$0xff] }
 0x40c   :  { %v8158_v11 = vrot.slane %v8144_v6, %v13009_v27  ;;  %v7964_v15 = vcombine.high %v7946_v2, %v7960_v14  ;;  %v7963_v36 = vcombine.low %v7946_v2, %v7960_v14  ;;  %v8049_v0 = vrot.slane %v11674_v34, %v13009_v27 }
 0x40d   :  { %v8070_v35 = vcombine.low %v8062_v22, %v8069_v51  ;;  %v11688_v39 = vcombine.low %v7024_v43, %v18303_v60  ;;  %11709 = vmatmul.mubr.msk.f32.gmra.mxu0 %vm684_vm6, %v7981_v61  ;;  %v8138_v16 = vrot.slane %v11682_v48, %v13009_v27  ;;  %v8151_v38 = vrot.slane %v8143_v26, %v13009_v27  ;;  %v6038_v51 = vpop.permute.xlu0 %6037  ;;  %v21687_v43 = vld [vmem:[#allocation144_spill] sm:$0xff] }
 0x40e   :  { %v6982_v44 = vrot.slane %v21684_v42, %v13009_v27  ;;  %v6063_v50 = vsel %vm618_vm4, %v21685_v25, %v6026_v28  ;;  %v18879_v58 = vsel %vm618_vm4, %v18477_v56, %v6042_v53  ;;  %9156 = vmatprep.mubr.f32.mxu1 %v7964_v15  ;;  %v8053_v60 = vcombine.high %v8035_v32, %v8049_v0  ;;  %v6054_v9 = vpop.permute.xlu1 %6053  ;;  %v21688_v28 = vld [vmem:[#allocation182_spill] sm:$0xff] }
 0x40f   :  { %v18882_v22 = vrot.slane %v11690_v17, %v13009_v27  ;;  %v6941_v61 = vcombine.low %v6063_v50, %v18676_v30  ;;  %v6942_v24 = vcombine.high %v6063_v50, %v18676_v30  ;;  %9157 = vmatmul.mubr.f32.gmra.mxu1 %v7963_v36  ;;  %v8159_v46 = vcombine.low %v8151_v38, %v8158_v11 }
 0x410   :  { %v21686_v63 = vcombine.high %v21684_v42, %v21684_v42  ;;  %9162 = vmatprep.mubr.f32.mxu1 %v8053_v60  ;;  %v8142_v56 = vcombine.high %v18797_v40, %v8138_v16  ;;  %9287 = vmatprep.mubr.f32.mxu0 %v20742_v49  ;;  %v8141_v19 = vcombine.low %v18797_v40, %v8138_v16 }
 0x411   :  { %v18894_v5 = vrot.slane %v11688_v39, %v13009_v27  ;;  %v6963_v47 = vrot.slane %v6941_v61, %v13009_v27  ;;  %v6970_v30 = vrot.slane %v6942_v24, %v13009_v27  ;;  %v7201_v57 = vcombine.low %v18879_v58, %v18738_v20  ;;  %11710 = vmatmul.mubr.msk.f32.gmra.mxu0 %vm684_vm6, %v8070_v35 }
 0x412   :  { %v6989_v18 = vrot.slane %v21686_v63, %v13009_v27  ;;  %v8052_v23 = vcombine.low %v8035_v32, %v8049_v0  ;;  %v6066_v29 = vsel %vm618_vm4, %v18352_v59, %v6038_v51  ;;  %v6070_v40 = vsel %vm618_vm4, %v18713_v7, %v6054_v9  ;;  %9293 = vmatprep.mubr.f32.mxu0 %v20742_v49  ;;  %v6046_v36 = vpop.permute.xlu0 %6045 }
 0x413   :  { %v8320_v26 = vcombine.high %v18894_v5, %v18882_v22  ;;  %v6990_v6 = vcombine.high %v6982_v44, %v6982_v44  ;;  %v7140_v34 = vcombine.low %v6066_v29, %v18687_v10  ;;  %v7400_v2 = vcombine.low %v6070_v40, %v18779_v45 }
 0x414   :  { %9163 = vmatmul.mubr.f32.gmra.mxu1 %v8052_v23  ;;  %v8213_v14 = vrot.slane %v6963_v47, %v13009_v27  ;;  %v8227_v17 = vrot.slane %v6970_v30, %v13009_v27  ;;  %v6269_v59 = vsel %vm3414_vm7, %v6146_v4, %v21687_v43  ;;  %v6991_v7 = vcombine.high %v6989_v18, %v6989_v18  ;;  %v21691_v43 = vld [vmem:[#allocation108_spill] sm:$0xff] }
 0x415   :  { %9168 = vmatprep.mubr.f32.mxu1 %v8142_v56  ;;  %v8232_v32 = vcombine.low %v6982_v44, %v6990_v6  ;;  %v8319_v48 = vcombine.low %v18894_v5, %v18882_v22  ;;  %v7202_v10 = vcombine.high %v18879_v58, %v18738_v20  ;;  %v7223_v45 = vrot.slane %v7201_v57, %v13009_v27 }
 0x416   :  { %v7154_v11 = vrot.slane %v7140_v34, %v13009_v27  ;;  %v7414_v15 = vrot.slane %v7400_v2, %v13009_v27  ;;  %11711 = vmatmul.mubr.msk.f32.gmra.mxu0 %vm684_vm6, %v8159_v46  ;;  %v6068_v21 = vsel %vm618_vm4, %v18512_v12, %v6046_v36  ;;  %v8231_v4 = vcombine.high %v8213_v14, %v8227_v17 }
 0x417   :  { %v8230_v0 = vcombine.low %v8213_v14, %v8227_v17  ;;  %9299 = vmatprep.mubr.f32.mxu0 %v20742_v49  ;;  %v8233_v35 = vcombine.low %v6989_v18, %v6991_v7  ;;  %v7270_v20 = vcombine.low %v6068_v21, %v6269_v59  ;;  %v7032_v53 = vrot.slane %v21688_v28, %v13009_v27 }
 0x418   :  { %v7155_v39 = vcombine.low %v18391_v3, %v7154_v11  ;;  %9169 = vmatmul.mubr.f32.gmra.mxu1 %v8141_v19  ;;  %v7112_v16 = vrot.slane %v21612_v41, %v13009_v27  ;;  %v7415_v38 = vcombine.low %v18752_v52, %v7414_v15  ;;  %v8240_v12 = vrot.slane %v8232_v32, %v13009_v27  ;;  %v21689_v52 = vld [vmem:[#allocation84_spill] sm:$0xff]  ;;  %v21690_v19 = vld [vmem:[#allocation107_spill] sm:$0xff] }
 0x419   :  { %9174 = vmatprep.mubr.f32.mxu1 %v8231_v4  ;;  %v8247_v42 = vrot.slane %v8233_v35, %v13009_v27  ;;  %v7119_v3 = vrot.slane %v7105_v55, %v13009_v27  ;;  %v7284_v44 = vrot.slane %v7270_v20, %v13009_v27  ;;  %v7162_v61 = vrot.slane %v21689_v52, %v13009_v27 }
 0x41a   :  { %v11694_v25 = vcombine.high %v18340_v13, %v7155_v39  ;;  %v7120_v50 = vcombine.high %v7112_v16, %v7112_v16  ;;  %v8321_v58 = vcombine.low %v7032_v53, %v7112_v16  ;;  %v7242_v24 = vrot.slane %v21618_v1, %v13009_v27 }
 0x41b   :  { %v8248_v60 = vcombine.low %v8240_v12, %v8247_v42  ;;  %v7121_v22 = vcombine.high %v7119_v3, %v7119_v3  ;;  %v7230_v46 = vrot.slane %v7202_v10, %v13009_v27  ;;  %v11698_v63 = vcombine.low %v7284_v44, %v18708_v8 }
 0x41c   :  { %9175 = vmatmul.mubr.f32.gmra.mxu1 %v8230_v0  ;;  %v8391_v41 = vrot.slane %v11694_v25, %v13009_v27  ;;  %v8322_v55 = vcombine.low %v7120_v50, %v7119_v3  ;;  %v8405_v13 = vrot.slane %v7223_v45, %v13009_v27  ;;  %v7250_v18 = vcombine.high %v7242_v24, %v7242_v24 }
 0x41d   :  { %9180 = vmatprep.mubr.f32.mxu1 %v8320_v26  ;;  %11712 = vmatmul.mubr.msk.f32.gmra.mxu0 %vm684_vm6, %v8248_v60  ;;  %v8410_v56 = vcombine.low %v7121_v22, %v7162_v61  ;;  %v7365_v5 = vcombine.high %v21690_v19, %v21690_v19  ;;  %v8329_v47 = vrot.slane %v8321_v58, %v13009_v27 }
 0x41e   :  { %9305 = vmatprep.mubr.f32.mxu0 %v20742_v49  ;;  %v8336_v30 = vrot.slane %v8322_v55, %v13009_v27  ;;  %v8409_v57 = vcombine.high %v8391_v41, %v8405_v13  ;;  %v8494_v51 = vrot.slane %v11698_v63, %v13009_v27  ;;  %v8411_v9 = vcombine.low %v7242_v24, %v7250_v18 }
 0x41f   :  { %v11706_v23 = vcombine.high %v18711_v62, %v7415_v38  ;;  %v8480_v40 = vrot.slane %v7230_v46, %v13009_v27  ;;  %v7249_v26 = vrot.slane %v7235_v54, %v13009_v27  ;;  %v8408_v6 = vcombine.low %v8391_v41, %v8405_v13  ;;  %v8771_v38 = vpop.f32.mrf.mxu1 }
 0x420   :  { %9181 = vmatmul.mubr.f32.gmra.mxu1 %v8319_v48  ;;  %v8337_v29 = vcombine.low %v8329_v47, %v8336_v30  ;;  %v8418_v34 = vrot.slane %v8410_v56, %v13009_v27  ;;  %v8425_v2 = vrot.slane %v8411_v9, %v13009_v27  ;;  %v11704_v14 = vcombine.high %v18708_v8, %v7363_v31  ;;  %v19009_v30 = vpop.f32.mrf.mxu0 }
 0x421   :  { %9186 = vmatprep.mubr.f32.mxu1 %v8409_v57  ;;  %v7251_v17 = vcombine.high %v7249_v26, %v7249_v26  ;;  %v7292_v59 = vrot.slane %v21691_v43, %v13009_v27  ;;  %v7372_v1 = vrot.slane %v21690_v19, %v13009_v27  ;;  %v7379_v54 = vrot.slane %v7365_v5, %v13009_v27  ;;  %v8773_v12 = vpop.f32.mrf.mxu1 }
 0x422   :  { %11713 = vmatmul.mubr.msk.f32.gmra.mxu0 %vm684_vm6, %v8337_v29  ;;  %v8498_v7 = vcombine.high %v8480_v40, %v8494_v51  ;;  %v8426_v32 = vcombine.low %v8418_v34, %v8425_v2  ;;  %v8583_v48 = vrot.slane %v11706_v23, %v13009_v27  ;;  %v7422_v8 = vrot.slane %v21692_v33, %v13009_v27 }
 0x423   :  { %9311 = vmatprep.mubr.f32.mxu0 %v20742_v49  ;;  %v8499_v62 = vcombine.low %v7249_v26, %v7251_v17  ;;  %v8500_v31 = vcombine.low %v7292_v59, %v7372_v1  ;;  %v7380_v10 = vcombine.high %v7372_v1, %v7372_v1  ;;  %v7381_v45 = vcombine.high %v7379_v54, %v7379_v54  ;;  %v8777_v42 = vpop.f32.mrf.mxu1 }
 0x424   :  { %9187 = vmatmul.mubr.f32.gmra.mxu1 %v8408_v6  ;;  %v8497_v11 = vcombine.low %v8480_v40, %v8494_v51  ;;  %v8569_v15 = vrot.slane %v11704_v14, %v13009_v27  ;;  %v19011_v51 = vpop.f32.mrf.mxu0 }
 0x425   :  { %9192 = vmatprep.mubr.f32.mxu1 %v8498_v7  ;;  %v8507_v36 = vrot.slane %v8499_v62, %v13009_v27  ;;  %v8514_v21 = vrot.slane %v8500_v31, %v13009_v27  ;;  %v8588_v4 = vcombine.low %v7380_v10, %v7379_v54  ;;  %v8589_v0 = vcombine.low %v7381_v45, %v7422_v8  ;;  %v8779_v3 = vpop.f32.mrf.mxu1 }
 0x426   :  { %11714 = vmatmul.mubr.msk.f32.gmra.mxu0 %vm684_vm6, %v8426_v32  ;;  %v8587_v35 = vcombine.high %v8569_v15, %v8583_v48  ;;  %v8586_v53 = vcombine.low %v8569_v15, %v8583_v48  ;;  %v19013_v23 = vpop.f32.mrf.mxu0  ;;  %v7703_v15 = vld [vmem:[%s20264_s4] sm:$0x3]  ;;  %s12100_s4 = smov 112  }
 0x427   :  { %9317 = vmatprep.mubr.f32.mxu0 %v20742_v49  ;;  %v8515_v39 = vcombine.low %v8507_v36, %v8514_v21  ;;  %v8596_v20 = vrot.slane %v8588_v4, %v13009_v27  ;;  %v8603_v28 = vrot.slane %v8589_v0, %v13009_v27  ;;  %v8783_v44 = vpop.f32.mrf.mxu1  ;;  %v7708_v0 = vrot.slane %v7703_v15, %v21613_v37 }
 0x428   :  { %9193 = vmatmul.mubr.f32.gmra.mxu1 %v8497_v11  ;;  %v19015_v40 = vpop.f32.mrf.mxu0 }
 0x429   :  { %9198 = vmatprep.mubr.f32.mxu1 %v8587_v35  ;;  %v8604_v16 = vcombine.low %v8596_v20, %v8603_v28  ;;  %v8785_v25 = vpop.f32.mrf.mxu1  ;;  %v21700_v35 = vld [vmem:[#allocation2_spill] sm:$0xff] }
 0x42a   :  { %11715 = vmatmul.mubr.msk.f32.gmra.mxu0 %vm684_vm6, %v8515_v39  ;;  %v19017_v26 = vpop.f32.mrf.mxu0  ;;  %v21701_v39 = vsub.s32 1, %v21700_v35 }
 0x42b   :  { %9323 = vmatprep.mubr.f32.mxu0 %v20742_v49  ;;  %v8772_v49 = vadd.f32 %v8771_v38, %v7708_v0 }
 0x42c   :  { %9199 = vmatmul.mubr.f32.gmra.mxu1 %v8586_v53  ;;  %v19019_v34 = vpop.f32.mrf.mxu0  ;;  %v7712_v20 = vrot.slane %v7703_v15, %v21701_v39 }
 0x42e   :  { %11716 = vmatmul.mubr.msk.f32.gmra.mxu0 %vm684_vm6, %v8604_v16  ;;  %v8789_v50 = vpop.f32.mrf.mxu1  ;;  %v8774_v27 = vadd.f32 %v8773_v12, %v7712_v20 }
 0x430   :  { %v8791_v58 = vpop.f32.mrf.mxu1 }
 0x431   :  { %v8792_v37 = vadd.f32 %v8791_v58, %v7712_v20 }
 0x43c   :  { %v8795_v60 = vpop.f32.mrf.mxu1 }
 0x43d   :  { %v8796_v35 = vadd.f32 %v8795_v60, %v7708_v0 }
 0x43e   :  { %v8797_v22 = vpop.f32.mrf.mxu1 }
 0x43f   :  { %v8798_v15 = vadd.f32 %v8797_v22, %v7712_v20 }
 0x446   :  { %v18989_v52 = vpop.f32.mrf.mxu1 }
 0x448   :  { %v18991_v61 = vpop.f32.mrf.mxu1 }
 0x463   :  { %v18993_v24 = vpop.f32.mrf.mxu1 }
 0x464   :  { %v8808_v38 = vadd.f32 %v18993_v24, %v7708_v0 }
 0x465   :  { %v18995_v46 = vpop.f32.mrf.mxu1 }
 0x466   :  { %v8810_v12 = vadd.f32 %v18995_v46, %v7712_v20 }
 0x467   :  { %v18997_v63 = vpop.f32.mrf.mxu1 }
 0x469   :  { %v18999_v41 = vpop.f32.mrf.mxu1 }
 0x474   :  { %v19001_v55 = vpop.f32.mrf.mxu1 }
 0x476   :  { %v19003_v13 = vpop.f32.mrf.mxu1 }
 0x478   :  { %v19005_v18 = vpop.f32.mrf.mxu1  ;;  %v19021_v14 = vpop.f32.mrf.mxu0 }
 0x47a   :  { %v19007_v56 = vpop.f32.mrf.mxu1  ;;  %v19023_v43 = vpop.f32.mrf.mxu0 }
 0x47c   :  { %v8896_v19 = vpop.f32.mrf.mxu1 }
 0x47d   :  { %v19025_v1 = vpop.f32.mrf.mxu0  ;;  %v8897_v39 = vadd.f32 %v8896_v19, %v8772_v49 }
 0x47e   :  { %v8898_v5 = vpop.f32.mrf.mxu1 }
 0x47f   :  { %v19027_v7 = vpop.f32.mrf.mxu0  ;;  %v9022_v46 = vadd.f32 %v19009_v30, %v8897_v39 }
 0x480   :  { %v8902_v47 = vpop.f32.mrf.mxu1 }
 0x482   :  { %v8904_v57 = vpop.f32.mrf.mxu1 }
 0x484   :  { %v8908_v9 = vpop.f32.mrf.mxu1 }
 0x486   :  { %v8910_v29 = vpop.f32.mrf.mxu1 }
 0x488   :  { %v8914_v6 = vpop.f32.mrf.mxu1 }
 0x48a   :  { %v8916_v2 = vpop.f32.mrf.mxu1 }
 0x48c   :  { %v19029_v32 = vpop.f32.mrf.mxu0 }
 0x48d   :  { %v8920_v17 = vpop.f32.mrf.mxu1 }
 0x48e   :  { %v19031_v33 = vpop.f32.mrf.mxu0 }
 0x48f   :  { %v8922_v59 = vpop.f32.mrf.mxu1 }
 0x491   :  { %v8926_v54 = vpop.f32.mrf.mxu1 }
 0x493   :  { %v8928_v48 = vpop.f32.mrf.mxu1 }
 0x495   :  { %v19033_v8 = vpop.f32.mrf.mxu1 }
 0x497   :  { %v19035_v62 = vpop.f32.mrf.mxu0  ;;  %v19037_v31 = vpop.f32.mrf.mxu1 }
 0x498   :  { %21693 = vst [vmem:[#allocation23_spill] sm:$0xff] %v19035_v62 }
 0x499   :  { %v19039_v10 = vpop.f32.mrf.mxu0 }
 0x49a   :  { %21694 = vst [vmem:[#allocation17_spill] sm:$0xff] %v19039_v10  ;;  %v8780_v10 = vadd.f32 %v8779_v3, %v7712_v20  ;;  %v8814_v3 = vadd.f32 %v18997_v63, %v7708_v0  ;;  %v8828_v63 = vadd.f32 %v19007_v56, %v7712_v20 }
 0x49b   :  { %v19041_v45 = vpop.f32.mrf.mxu1 }
 0x49c   :  { %21695 = vst [vmem:[#allocation92_spill] sm:$0xff] %v19041_v45  ;;  %v8786_v45 = vadd.f32 %v8785_v25, %v7712_v20  ;;  %v8820_v25 = vadd.f32 %v19001_v55, %v7708_v0  ;;  %v8905_v60 = vadd.f32 %v8904_v57, %v8780_v10 }
 0x49d   :  { %v19048_v36 = vpop.f32.mrf.mxu1 }
 0x49e   :  { %21697 = vst [vmem:[#allocation149_spill] sm:$0xff] %v19048_v36  ;;  %v8784_v36 = vadd.f32 %v8783_v44, %v7708_v0  ;;  %v8816_v44 = vadd.f32 %v18999_v41, %v7712_v20  ;;  %v8911_v22 = vadd.f32 %v8910_v29, %v8786_v45  ;;  %v8921_v41 = vadd.f32 %v8920_v17, %v8796_v35 }
 0x4a0   :  { %v8909_v49 = vadd.f32 %v8908_v9, %v8784_v36 }
 0x4a1   :  { %v21709_v36 = vld [vmem:[#allocation17_spill] sm:$0xff] }
 0x4a2   :  { %v9034_v30 = vadd.f32 %v19017_v26, %v8909_v49 }
 0x4a5   :  { %v19052_v4 = vpop.f32.mrf.mxu1 }
 0x4a6   :  { %21699 = vst [vmem:[#allocation88_spill] sm:$0xff] %v19052_v4 }
 0x4a7   :  { %v19061_v16 = vpop.f32.mrf.mxu1 }
 0x4a8   :  { %v19043_v11 = vpop.f32.mrf.mxu0 }
 0x4a9   :  { %21696 = vst [vmem:[#allocation147_spill] sm:$0xff] %v19043_v11  ;;  %v8778_v11 = vadd.f32 %v8777_v42, %v7708_v0 }
 0x4aa   :  { %v19050_v21 = vpop.f32.mrf.mxu0 }
 0x4ab   :  { %21698 = vst [vmem:[#allocation187_spill] sm:$0xff] %v19050_v21  ;;  %v8790_v21 = vadd.f32 %v8789_v50, %v7708_v0  ;;  %v8899_v50 = vadd.f32 %v8898_v5, %v8774_v27  ;;  %v8903_v58 = vadd.f32 %v8902_v47, %v8778_v11 }
 0x4ad   :  { %v8915_v24 = vadd.f32 %v8914_v6, %v8790_v21  ;;  %v9024_v9 = vadd.f32 %v19011_v51, %v8899_v50  ;;  %v8935_v51 = vadd.f32 %v19037_v31, %v8810_v12  ;;  %v21708_v31 = vld [vmem:[#allocation92_spill] sm:$0xff] }
 0x4ae   :  { %v8939_v11 = vadd.f32 %v21708_v31, %v8814_v3 }
 0x4af   :  { %v9040_v17 = vadd.f32 %v19021_v14, %v8915_v24  ;;  %v19108_v21 = vadd.f32 %v21709_v36, %v8935_v51 }
 0x4b2   :  { %v21713_v39 = vld [vmem:[#allocation187_spill] sm:$0xff] }
 0x4b7   :  { %v19063_v62 = vpop.f32.mrf.mxu1 }
 0x4b8   :  { %21704 = vst [vmem:[#allocation53_spill] sm:$0xff] %v19063_v62  ;;  %v8923_v62 = vadd.f32 %v8922_v59, %v8798_v15 }
 0x4ba   :  { %v19095_v26 = vadd.f32 %v19027_v7, %v8923_v62 }
 0x4bc   :  { %v19057_v28 = vpop.f32.mrf.mxu0 }
 0x4bd   :  { %21702 = vst [vmem:[#allocation117_spill] sm:$0xff] %v19057_v28  ;;  %v8802_v28 = vadd.f32 %v18989_v52, %v7708_v0  ;;  %v8952_v52 = vpop.f32.mrf.mxu1 }
 0x4be   :  { %v19059_v53 = vpop.f32.mrf.mxu0 }
 0x4bf   :  { %21703 = vst [vmem:[#allocation118_spill] sm:$0xff] %v19059_v53  ;;  %v8804_v53 = vadd.f32 %v18991_v61, %v7712_v20  ;;  %v8822_v61 = vadd.f32 %v19003_v13, %v7712_v20  ;;  %v8927_v5 = vadd.f32 %v8926_v54, %v8802_v28  ;;  %v9028_v13 = vadd.f32 %v19013_v23, %v8903_v58  ;;  %v21714_v58 = vld [vmem:[#allocation53_spill] sm:$0xff] }
 0x4c0   :  { %v8933_v54 = vadd.f32 %v19033_v8, %v8808_v38 }
 0x4c1   :  { %v19065_v4 = vpop.f32.mrf.mxu0  ;;  %v8929_v47 = vadd.f32 %v8928_v48, %v8804_v53  ;;  %v19098_v45 = vadd.f32 %v19029_v32, %v8927_v5  ;;  %v21712_v53 = vld [vmem:[#allocation147_spill] sm:$0xff] }
 0x4c2   :  { %21705 = vst [vmem:[#allocation42_spill] sm:$0xff] %v19065_v4  ;;  %v8917_v4 = vadd.f32 %v8916_v2, %v8792_v37  ;;  %v9030_v37 = vadd.f32 %v19015_v40, %v8905_v60  ;;  %v19092_v40 = vadd.f32 %v19025_v1, %v8921_v41  ;;  %v21710_v1 = vld [vmem:[#allocation149_spill] sm:$0xff]  ;;  %v19114_v15 = vadd.f32 %v21712_v53, %v8939_v11 }
 0x4c3   :  { %v19071_v42 = vpop.f32.mrf.mxu0  ;;  %v19101_v14 = vadd.f32 %v19031_v33, %v8929_v47  ;;  %v8947_v33 = vadd.f32 %v19061_v16, %v8822_v61  ;;  %v21718_v47 = vld [vmem:[#allocation4_spill] sm:$0xff] }
 0x4c4   :  { %21706 = vst [vmem:[#allocation161_spill] sm:$0xff] %v19071_v42  ;;  %v8826_v42 = vadd.f32 %v19005_v18, %v7708_v0  ;;  %v9036_v18 = vadd.f32 %v19019_v34, %v8911_v22  ;;  %v19087_v59 = vadd.f32 %v19023_v43, %v8917_v4  ;;  %v21707_v43 = vld [vmem:[#allocation23_spill] sm:$0xff]  ;;  %v8941_v4 = vadd.f32 %v21710_v1, %v8816_v44  ;;  %v21711_v0 = vld [vmem:[#allocation88_spill] sm:$0xff] }
 0x4c5   :  { %v9271_v19 = vpop.f32.mrf.mxu0  ;;  %v19104_v8 = vadd.f32 %v21707_v43, %v8933_v54  ;;  %v8945_v35 = vadd.f32 %v21711_v0, %v8820_v25  ;;  %v8953_v25 = vadd.f32 %v8952_v52, %v8828_v63 }
 0x4c6   :  { %v19117_v38 = vadd.f32 %v21713_v39, %v8941_v4  ;;  %v8951_v44 = vadd.f32 %v21714_v58, %v8826_v42 }
 0x4c7   :  { %v9146_v55 = vpop.f32.mrf.mxu1  ;;  %v9273_v27 = vpop.f32.mrf.mxu0 }
 0x4c8   :  { %v9147_v57 = vadd.f32 %v9146_v55, %v9022_v46  ;;  %v21716_v46 = vld [vmem:[#allocation118_spill] sm:$0xff] }
 0x4c9   :  { %v9148_v29 = vpop.f32.mrf.mxu1  ;;  %v9277_v6 = vpop.f32.mrf.mxu0  ;;  %v19124_v16 = vadd.f32 %v21716_v46, %v8947_v33  ;;  %v21721_v33 = vld [vmem:[#allocation5_spill] sm:$0xff] }
 0x4ca   :  { %v9149_v56 = vadd.f32 %v9148_v29, %v9024_v9  ;;  %v9272_v2 = vadd.f32 %v9271_v19, %v9147_v57  ;;  %v21715_v19 = vld [vmem:[#allocation117_spill] sm:$0xff] }
 0x4cb   :  { %v9152_v48 = vpop.f32.mrf.mxu1  ;;  %v9279_v23 = vpop.f32.mrf.mxu0  ;;  %v19121_v24 = vadd.f32 %v21715_v19, %v8945_v35  ;;  %v21719_v29 = vld [vmem:[#allocation161_spill] sm:$0xff] }
 0x4cc   :  { %v9153_v34 = vadd.f32 %v9152_v48, %v9028_v13  ;;  %v9274_v10 = vadd.f32 %v9273_v27, %v9149_v56  ;;  %v9330_v20 = vmax.f32 %v9272_v2, 0.0  ;;  %v21717_v27 = vld [vmem:[#allocation42_spill] sm:$0xff]  ;;  %v19132_v13 = vadd.f32 %v21719_v29, %v8953_v25 }
 0x4cd   :  { %v9154_v7 = vpop.f32.mrf.mxu1  ;;  %v9283_v62 = vpop.f32.mrf.mxu0  ;;  %v19127_v5 = vadd.f32 %v21717_v27, %v8951_v44 }
 0x4ce   :  { %v9331_v32 = vmax.f32 %v9274_v10, 0.0  ;;  %v9155_v28 = vadd.f32 %v9154_v7, %v9030_v37  ;;  %v9278_v12 = vadd.f32 %v9277_v6, %v9153_v34 }
 0x4cf   :  { %v9158_v3 = vpop.f32.mrf.mxu1  ;;  %v9285_v50 = vpop.f32.mrf.mxu0 }
 0x4d0   :  { %v9370_v60 = vcombine.low %v9330_v20, %v9331_v32  ;;  %v9371_v49 = vcombine.high %v9330_v20, %v9331_v32  ;;  %v9159_v22 = vadd.f32 %v9158_v3, %v9034_v30  ;;  %v9280_v61 = vadd.f32 %v9279_v23, %v9155_v28 }
 0x4d1   :  { %v9160_v41 = vpop.f32.mrf.mxu1  ;;  %v9289_v55 = vpop.f32.mrf.mxu0  ;;  %v9332_v52 = vmax.f32 %v9278_v12, 0.0 }
 0x4d2   :  { %v9378_v57 = vrot.slane %v9370_v60, %v21718_v47  ;;  %v9385_v42 = vrot.slane %v9371_v49, %v21718_v47  ;;  %v9284_v9 = vadd.f32 %v9283_v62, %v9159_v22  ;;  %v9333_v63 = vmax.f32 %v9280_v61, 0.0 }
 0x4d3   :  { %v9161_v37 = vadd.f32 %v9160_v41, %v9036_v18  ;;  %v9291_v30 = vpop.f32.mrf.mxu0 }
 0x4d4   :  { %v9164_v6 = vpop.f32.mrf.mxu1  ;;  %v9386_v56 = vcombine.high %v9378_v57, %v9378_v57  ;;  %v9387_v2 = vcombine.high %v9385_v42, %v9385_v42  ;;  %v11717_v54 = vrot.slane %v9378_v57, 9  ;;  %v11719_v51 = vrot.slane %v9385_v42, 9 }
 0x4d5   :  { %v9388_v48 = vcombine.low %v9332_v52, %v9333_v63  ;;  %v9389_v23 = vcombine.high %v9332_v52, %v9333_v63  ;;  %v9334_v34 = vmax.f32 %v9284_v9, 0.0  ;;  %v9165_v10 = vadd.f32 %v9164_v6, %v9040_v17  ;;  %v21720_v17 = vld [vmem:[#allocation3_spill] sm:$0xff] }
 0x4d6   :  { %v9166_v43 = vpop.f32.mrf.mxu1  ;;  %v11718_v31 = vrot.slane %v9386_v56, 9  ;;  %v11720_v11 = vrot.slane %v9387_v2, 9  ;;  %v19134_v36 = vmax.f32 %v9378_v57, %v11717_v54  ;;  %v19136_v1 = vmax.f32 %v9385_v42, %v11719_v51  ;;  %v9295_v35 = vpop.f32.mrf.mxu0 }
 0x4d7   :  { %v9396_v4 = vrot.slane %v9388_v48, %v21718_v47  ;;  %v9403_v18 = vrot.slane %v9389_v23, %v21718_v47  ;;  %v9286_v7 = vadd.f32 %v9285_v50, %v9161_v37  ;;  %v9167_v62 = vadd.f32 %v9166_v43, %v19087_v59 }
 0x4d8   :  { %v9170_v0 = vpop.f32.mrf.mxu1  ;;  %v19141_v20 = vmax.f32 %v9386_v56, %v11718_v31  ;;  %v19143_v32 = vmax.f32 %v9387_v2, %v11720_v11  ;;  %v9793_v28 = vrot.slane %v19134_v36, %v21720_v17  ;;  %v9797_v53 = vrot.slane %v19134_v36, %v21721_v33  ;;  %v9297_v41 = vpop.f32.mrf.mxu0 }
 0x4d9   :  { %v9404_v39 = vcombine.high %v9396_v4, %v9396_v4  ;;  %v9405_v12 = vcombine.high %v9403_v18, %v9403_v18  ;;  %v11721_v3 = vrot.slane %v9396_v4, 9  ;;  %v11723_v58 = vrot.slane %v9403_v18, 9 }
 0x4da   :  { %v9172_v44 = vpop.f32.mrf.mxu1  ;;  %v9335_v50 = vmax.f32 %v9286_v7, 0.0  ;;  %v9290_v60 = vadd.f32 %v9289_v55, %v9165_v10  ;;  %v9171_v59 = vadd.f32 %v9170_v0, %v19092_v40  ;;  %v9292_v49 = vadd.f32 %v9291_v30, %v9167_v62 }
 0x4db   :  { %v11722_v22 = vrot.slane %v9404_v39, 9  ;;  %v11724_v25 = vrot.slane %v9405_v12, 9  ;;  %v19150_v19 = vmax.f32 %v9396_v4, %v11721_v3  ;;  %v19152_v46 = vmax.f32 %v9403_v18, %v11723_v58 }
 0x4dc   :  { %v9176_v61 = vpop.f32.mrf.mxu1  ;;  %v9406_v27 = vcombine.low %v9334_v34, %v9335_v50  ;;  %v9407_v57 = vcombine.high %v9334_v34, %v9335_v50  ;;  %v9336_v42 = vmax.f32 %v9290_v60, 0.0  ;;  %v9337_v9 = vmax.f32 %v9292_v49, 0.0 }
 0x4dd   :  { %v19154_v29 = vmax.f32 %v9404_v39, %v11722_v22  ;;  %v19156_v52 = vmax.f32 %v9405_v12, %v11724_v25  ;;  %v9841_v40 = vrot.slane %v19152_v46, %v21720_v17  ;;  %v9845_v55 = vrot.slane %v19152_v46, %v21721_v33  ;;  %v9301_v23 = vpop.f32.mrf.mxu0 }
 0x4de   :  { %v9178_v63 = vpop.f32.mrf.mxu1  ;;  %v9414_v37 = vrot.slane %v9406_v27, %v21718_v47  ;;  %v9421_v6 = vrot.slane %v9407_v57, %v21718_v47  ;;  %v9424_v30 = vcombine.low %v9336_v42, %v9337_v9  ;;  %v9425_v56 = vcombine.high %v9336_v42, %v9337_v9 }
 0x4df   :  { %v9173_v2 = vadd.f32 %v9172_v44, %v19095_v26  ;;  %v9296_v54 = vadd.f32 %v9295_v35, %v9171_v59  ;;  %v9177_v51 = vadd.f32 %v9176_v61, %v19098_v45  ;;  %v9179_v48 = vadd.f32 %v9178_v63, %v19101_v14  ;;  %v9303_v58 = vpop.f32.mrf.mxu0 }
 0x4e0   :  { %v9422_v34 = vcombine.high %v9414_v37, %v9414_v37  ;;  %v9423_v10 = vcombine.high %v9421_v6, %v9421_v6  ;;  %v11725_v43 = vrot.slane %v9414_v37, 9  ;;  %v11727_v31 = vrot.slane %v9421_v6, 9  ;;  %v9182_v3 = vpop.f32.mrf.mxu1 }
 0x4e1   :  { %v9432_v11 = vrot.slane %v9424_v30, %v21718_v47  ;;  %v9439_v4 = vrot.slane %v9425_v56, %v21718_v47  ;;  %v9338_v18 = vmax.f32 %v9296_v54, 0.0  ;;  %v9298_v7 = vadd.f32 %v9297_v41, %v9173_v2 }
 0x4e2   :  { %v11726_v62 = vrot.slane %v9422_v34, 9  ;;  %v11728_v0 = vrot.slane %v9423_v10, 9  ;;  %v19169_v39 = vmax.f32 %v9414_v37, %v11725_v43  ;;  %v19171_v26 = vmax.f32 %v9421_v6, %v11727_v31 }
 0x4e3   :  { %v9440_v45 = vcombine.high %v9432_v11, %v9432_v11  ;;  %v9441_v35 = vcombine.high %v9439_v4, %v9439_v4  ;;  %v11729_v14 = vrot.slane %v9432_v11, 9  ;;  %v11731_v12 = vrot.slane %v9439_v4, 9 }
 0x4e4   :  { %v19173_v44 = vmax.f32 %v9422_v34, %v11726_v62  ;;  %v19175_v50 = vmax.f32 %v9423_v10, %v11728_v0  ;;  %v9873_v60 = vrot.slane %v19171_v26, %v21720_v17  ;;  %v9877_v59 = vrot.slane %v19171_v26, %v21721_v33  ;;  %v9184_v34 = vpop.f32.mrf.mxu1  ;;  %v9307_v10 = vpop.f32.mrf.mxu0 }
 0x4e5   :  { %v11730_v49 = vrot.slane %v9440_v45, 9  ;;  %v11732_v22 = vrot.slane %v9441_v35, 9  ;;  %v19181_v25 = vmax.f32 %v9432_v11, %v11729_v14  ;;  %v19183_v61 = vmax.f32 %v9439_v4, %v11731_v12 }
 0x4e6   :  { %v9339_v41 = vmax.f32 %v9298_v7, 0.0  ;;  %v9302_v27 = vadd.f32 %v9301_v23, %v9177_v51  ;;  %v9183_v57 = vadd.f32 %v9182_v3, %v19104_v8  ;;  %v9304_v42 = vadd.f32 %v9303_v58, %v9179_v48  ;;  %v9188_v12 = vpop.f32.mrf.mxu1  ;;  %v9309_v3 = vpop.f32.mrf.mxu0 }
 0x4e7   :  { %21722 = vst [vmem:[#allocation50_spill] sm:$0xff] %v19181_v25  ;;  %v19186_v9 = vmax.f32 %v9440_v45, %v11730_v49  ;;  %v19188_v63 = vmax.f32 %v9441_v35, %v11732_v22  ;;  %v9805_v37 = vrot.slane %v19141_v20, %v21721_v33  ;;  %v9813_v6 = vrot.slane %v19136_v1, %v21721_v33 }
 0x4e8   :  { %v9442_v30 = vcombine.low %v9338_v18, %v9339_v41  ;;  %v9443_v56 = vcombine.high %v9338_v18, %v9339_v41  ;;  %v9340_v2 = vmax.f32 %v9302_v27, 0.0  ;;  %v9341_v54 = vmax.f32 %v9304_v42, 0.0 }
 0x4e9   :  { %v9821_v8 = vrot.slane %v19143_v32, %v21721_v33  ;;  %v9829_v51 = vrot.slane %v19150_v19, %v21721_v33  ;;  %v10114_v48 = vsel %vm3414_vm7, %v9805_v37, %v9797_v53  ;;  %v9801_v23 = vrot.slane %v19141_v20, %v21720_v17 }
 0x4ea   :  { %v9450_v43 = vrot.slane %v9442_v30, %v21718_v47  ;;  %v9457_v31 = vrot.slane %v9443_v56, %v21718_v47  ;;  %v9460_v11 = vcombine.low %v9340_v2, %v9341_v54  ;;  %v9461_v4 = vcombine.high %v9340_v2, %v9341_v54 }
 0x4eb   :  { %v10115_v18 = vsel %vm3416_vm8, %v9813_v6, %v10114_v48  ;;  %v9809_v7 = vrot.slane %v19136_v1, %v21720_v17  ;;  %v9817_v62 = vrot.slane %v19143_v32, %v21720_v17  ;;  %v9825_v53 = vrot.slane %v19150_v19, %v21720_v17 }
 0x4ec   :  { %v9458_v0 = vcombine.high %v9450_v43, %v9450_v43  ;;  %v9459_v45 = vcombine.high %v9457_v31, %v9457_v31  ;;  %v11733_v35 = vrot.slane %v9450_v43, 9  ;;  %v11735_v14 = vrot.slane %v9457_v31, 9 }
 0x4ed   :  { %v9468_v58 = vrot.slane %v9460_v11, %v21718_v47  ;;  %v9475_v49 = vrot.slane %v9461_v4, %v21718_v47  ;;  %v10116_v22 = vsel %vm3418_vm9, %v9821_v8, %v10115_v18  ;;  %v10110_v41 = vsel %vm3414_vm7, %v9801_v23, %v9793_v28  ;;  %v9313_v23 = vpop.f32.mrf.mxu0  ;;  %v9190_v4 = vpop.f32.mrf.mxu1 }
 0x4ee   :  { %v11734_v27 = vrot.slane %v9458_v0, 9  ;;  %v11736_v42 = vrot.slane %v9459_v45, 9  ;;  %v19220_v37 = vmax.f32 %v9450_v43, %v11733_v35  ;;  %v19222_v6 = vmax.f32 %v9457_v31, %v11735_v14 }
 0x4ef   :  { %v9476_v30 = vcombine.high %v9468_v58, %v9468_v58  ;;  %v9477_v56 = vcombine.high %v9475_v49, %v9475_v49  ;;  %v11737_v2 = vrot.slane %v9468_v58, 9  ;;  %v11739_v54 = vrot.slane %v9475_v49, 9 }
 0x4f0   :  { %v19224_v48 = vmax.f32 %v9458_v0, %v11734_v27  ;;  %v19226_v11 = vmax.f32 %v9459_v45, %v11736_v42  ;;  %v10117_v14 = vsel %vm3420_vm10, %v9829_v51, %v10116_v22  ;;  %v10111_v0 = vsel %vm3416_vm8, %v9809_v7, %v10110_v41 }
 0x4f1   :  { %v11738_v43 = vrot.slane %v9476_v30, 9  ;;  %v11740_v18 = vrot.slane %v9477_v56, 9  ;;  %v19232_v31 = vmax.f32 %v9468_v58, %v11737_v2  ;;  %v19234_v35 = vmax.f32 %v9475_v49, %v11739_v54  ;;  %10176 = vrot.lane.b32.xlu1 %v10117_v14, %s12100_s4 }
 0x4f2   :  { %v9185_v45 = vadd.f32 %v9184_v34, %v19108_v21  ;;  %v9308_v27 = vadd.f32 %v9307_v10, %v9183_v57  ;;  %v10112_v51 = vsel %vm3418_vm9, %v9817_v62, %v10111_v0  ;;  %v9189_v7 = vadd.f32 %v9188_v12, %v19114_v15  ;;  %v9194_v57 = vpop.f32.mrf.mxu1  ;;  %v9315_v34 = vpop.f32.mrf.mxu0 }
 0x4f3   :  { %v19239_v42 = vmax.f32 %v9476_v30, %v11738_v43  ;;  %v19241_v8 = vmax.f32 %v9477_v56, %v11740_v18  ;;  %v10113_v10 = vsel %vm3420_vm10, %v9825_v53, %v10112_v51  ;;  %v9837_v22 = vrot.slane %v19154_v29, %v21721_v33 }
 0x4f4   :  { %v9342_v49 = vmax.f32 %v9308_v27, 0.0  ;;  %v9310_v21 = vadd.f32 %v9309_v3, %v9185_v45  ;;  %v9853_v41 = vrot.slane %v19156_v52, %v21721_v33  ;;  %v9861_v30 = vrot.slane %v19169_v39, %v21721_v33  ;;  %10174 = vrot.lane.b32.xlu0 %v10113_v10, %s12100_s4  ;;  %v9196_v0 = vpop.f32.mrf.mxu1  ;;  %v9319_v45 = vpop.f32.mrf.mxu0 }
 0x4f5   :  { %v9314_v56 = vadd.f32 %v9313_v23, %v9189_v7  ;;  %v9869_v15 = vrot.slane %v19173_v44, %v21721_v33  ;;  %v9833_v12 = vrot.slane %v19154_v29, %v21720_v17  ;;  %v10122_v53 = vsel %vm3414_vm7, %v9845_v55, %v9837_v22 }
 0x4f6   :  { %v9343_v62 = vmax.f32 %v9310_v21, 0.0  ;;  %v9849_v3 = vrot.slane %v19156_v52, %v21720_v17  ;;  %v9857_v2 = vrot.slane %v19169_v39, %v21720_v17  ;;  %v9865_v54 = vrot.slane %v19173_v44, %v21720_v17 }
 0x4f7   :  { %v9344_v18 = vmax.f32 %v9314_v56, 0.0  ;;  %v10123_v14 = vsel %vm3416_vm8, %v9853_v41, %v10122_v53  ;;  %v10118_v55 = vsel %vm3414_vm7, %v9841_v40, %v9833_v12  ;;  %v9191_v51 = vadd.f32 %v9190_v4, %v19117_v38 }
 0x4f8   :  { %v9478_v23 = vcombine.low %v9342_v49, %v9343_v62  ;;  %v9479_v43 = vcombine.high %v9342_v49, %v9343_v62  ;;  %v10124_v27 = vsel %vm3418_vm9, %v9861_v30, %v10123_v14  ;;  %v9195_v7 = vadd.f32 %v9194_v57, %v19121_v24 }
 0x4f9   :  { %v10125_v10 = vsel %vm3420_vm10, %v9869_v15, %v10124_v27  ;;  %v10119_v22 = vsel %vm3416_vm8, %v9849_v3, %v10118_v55  ;;  %v9316_v30 = vadd.f32 %v9315_v34, %v9191_v51  ;;  %v9197_v62 = vadd.f32 %v9196_v0, %v19124_v16  ;;  %v9321_v3 = vpop.f32.mrf.mxu0 }
 0x4fa   :  { %v9486_v21 = vrot.slane %v9478_v23, %v21718_v47  ;;  %v9493_v49 = vrot.slane %v9479_v43, %v21718_v47  ;;  %10180 = vrot.lane.b32.xlu1 %v10125_v10, %s12100_s4  ;;  %v10120_v41 = vsel %vm3418_vm9, %v9857_v2, %v10119_v22  ;;  %v19287_v40 = vadd.f32 %v9319_v45, %v9195_v7  ;;  %v9200_v45 = vpop.f32.mrf.mxu1 }
 0x4fb   :  { %v10121_v56 = vsel %vm3420_vm10, %v9865_v54, %v10120_v41  ;;  %v9345_v12 = vmax.f32 %v9316_v30, 0.0  ;;  %v9885_v53 = vrot.slane %v19175_v50, %v21721_v33  ;;  %v9893_v54 = vrot.slane %v19181_v25, %v21721_v33  ;;  %v9325_v22 = vpop.f32.mrf.mxu0 }
 0x4fc   :  { %v9494_v38 = vcombine.high %v9486_v21, %v9486_v21  ;;  %v9495_v4 = vcombine.high %v9493_v49, %v9493_v49  ;;  %v11741_v24 = vrot.slane %v9486_v21, 9  ;;  %v11743_v57 = vrot.slane %v9493_v49, 9  ;;  %10178 = vrot.lane.b32.xlu0 %v10121_v56, %s12100_s4 }
 0x4fd   :  { %v9346_v15 = vmax.f32 %v19287_v40, 0.0  ;;  %v9496_v43 = vcombine.low %v9344_v18, %v9345_v12  ;;  %v9497_v14 = vcombine.high %v9344_v18, %v9345_v12  ;;  %v9901_v0 = vrot.slane %v19186_v9, %v21721_v33  ;;  %v9202_v12 = vpop.f32.mrf.mxu1  ;;  %v9327_v51 = vpop.f32.mrf.mxu0 }
 0x4fe   :  { %v11742_v23 = vrot.slane %v9494_v38, 9  ;;  %v11744_v2 = vrot.slane %v9495_v4, 9  ;;  %v19293_v34 = vmax.f32 %v9486_v21, %v11741_v24  ;;  %v19295_v16 = vmax.f32 %v9493_v49, %v11743_v57 }
 0x4ff   :  { %v9504_v21 = vrot.slane %v9496_v43, %v21718_v47  ;;  %v9511_v18 = vrot.slane %v9497_v14, %v21718_v47  ;;  %v9909_v49 = vrot.slane %v19183_v61, %v21721_v33  ;;  %v10130_v10 = vsel %vm3414_vm7, %v9885_v53, %v9877_v59 }
 0x500   :  { %v19302_v27 = vmax.f32 %v9494_v38, %v11742_v23  ;;  %v19304_v55 = vmax.f32 %v9495_v4, %v11744_v2  ;;  %v10131_v41 = vsel %vm3416_vm8, %v9893_v54, %v10130_v10  ;;  %v9881_v30 = vrot.slane %v19175_v50, %v21720_v17 }
 0x501   :  { %v9889_v40 = vrot.slane %v19181_v25, %v21720_v17  ;;  %v9897_v38 = vrot.slane %v19186_v9, %v21720_v17  ;;  %v9512_v4 = vcombine.high %v9504_v21, %v9504_v21  ;;  %v9513_v24 = vcombine.high %v9511_v18, %v9511_v18 }
 0x502   :  { %v11745_v57 = vrot.slane %v9504_v21, 9  ;;  %v11747_v56 = vrot.slane %v9511_v18, 9  ;;  %v10132_v23 = vsel %vm3418_vm9, %v9901_v0, %v10131_v41  ;;  %v9905_v59 = vrot.slane %v19183_v61, %v21720_v17 }
 0x503   :  { %v10126_v53 = vsel %vm3414_vm7, %v9881_v30, %v9873_v60  ;;  %v9201_v2 = vadd.f32 %v9200_v45, %v19127_v5  ;;  %v11746_v43 = vrot.slane %v9512_v4, 9  ;;  %v11748_v14 = vrot.slane %v9513_v24, 9 }
 0x504   :  { %v19333_v54 = vmax.f32 %v9504_v21, %v11745_v57  ;;  %v19335_v10 = vmax.f32 %v9511_v18, %v11747_v56  ;;  %v10133_v7 = vsel %vm3420_vm10, %v9909_v49, %v10132_v23  ;;  %v10127_v0 = vsel %vm3416_vm8, %v9889_v40, %v10126_v53 }
 0x505   :  { %v9322_v41 = vadd.f32 %v9321_v3, %v9197_v62  ;;  %v9203_v28 = vadd.f32 %v9202_v12, %v19132_v13  ;;  %v19340_v58 = vmax.f32 %v9512_v4, %v11746_v43  ;;  %v19342_v25 = vmax.f32 %v9513_v24, %v11748_v14  ;;  %10184 = vrot.lane.b32.xlu1 %v10133_v7, %s12100_s4 }
 0x506   :  { %v10037_v60 = vrot.slane %v19335_v10, %v21721_v33  ;;  %v10128_v45 = vsel %vm3418_vm9, %v9897_v38, %v10127_v0  ;;  %v9326_v18 = vadd.f32 %v9325_v22, %v9201_v2  ;;  %v9917_v13 = vrot.slane %v19188_v63, %v21721_v33 }
 0x507   :  { %v9347_v21 = vmax.f32 %v9322_v41, 0.0  ;;  %v9328_v49 = vadd.f32 %v9327_v51, %v9203_v28  ;;  %v10129_v62 = vsel %vm3420_vm10, %v9905_v59, %v10128_v45  ;;  %v9933_v3 = vrot.slane %v19224_v48, %v21721_v33 }
 0x508   :  { %v9941_v30 = vrot.slane %v19222_v6, %v21721_v33  ;;  %10182 = vrot.lane.b32.xlu0 %v10129_v62, %s12100_s4  ;;  %v9348_v4 = vmax.f32 %v9326_v18, 0.0  ;;  %v9949_v28 = vrot.slane %v19226_v11, %v21721_v33  ;;  %v21723_v51 = vrot.slane %v19220_v37, %v21721_v33 }
 0x509   :  { %v9514_v40 = vcombine.low %v9346_v15, %v9347_v21  ;;  %v9515_v7 = vcombine.high %v9346_v15, %v9347_v21  ;;  %v9349_v38 = vmax.f32 %v9328_v49, 0.0  ;;  %v9913_v24 = vrot.slane %v19188_v63, %v21720_v17 }
 0x50a   :  { %v10138_v22 = vsel %vm3414_vm7, %v21723_v51, %v9917_v13  ;;  %v9929_v57 = vrot.slane %v19224_v48, %v21720_v17  ;;  %v9937_v53 = vrot.slane %v19222_v6, %v21720_v17  ;;  %v9945_v2 = vrot.slane %v19226_v11, %v21720_v17 }
 0x50b   :  { %v9522_v56 = vrot.slane %v9514_v40, %v21718_v47  ;;  %v9529_v15 = vrot.slane %v9515_v7, %v21718_v47  ;;  %v9532_v12 = vcombine.low %v9348_v4, %v9349_v38  ;;  %v9533_v23 = vcombine.high %v9348_v4, %v9349_v38 }
 0x50c   :  { %v10139_v59 = vsel %vm3416_vm8, %v9933_v3, %v10138_v22  ;;  %v21724_v43 = vrot.slane %v19220_v37, %v21720_v17 }
 0x50d   :  { %v9530_v0 = vcombine.high %v9522_v56, %v9522_v56  ;;  %v9531_v41 = vcombine.high %v9529_v15, %v9529_v15  ;;  %v11749_v45 = vrot.slane %v9522_v56, 9  ;;  %v11751_v21 = vrot.slane %v9529_v15, 9 }
 0x50e   :  { %v10134_v14 = vsel %vm3414_vm7, %v21724_v43, %v9913_v24  ;;  %v9540_v18 = vrot.slane %v9532_v12, %v21718_v47  ;;  %v9547_v49 = vrot.slane %v9533_v23, %v21718_v47  ;;  %v10140_v62 = vsel %vm3418_vm9, %v9941_v30, %v10139_v59 }
 0x50f   :  { %v10135_v13 = vsel %vm3416_vm8, %v9929_v57, %v10134_v14  ;;  %v11750_v3 = vrot.slane %v9530_v0, 9  ;;  %v11752_v40 = vrot.slane %v9531_v41, 9  ;;  %v19383_v7 = vmax.f32 %v9522_v56, %v11749_v45 }
 0x510   :  { %v19385_v4 = vmax.f32 %v9529_v15, %v11751_v21  ;;  %v9548_v38 = vcombine.high %v9540_v18, %v9540_v18  ;;  %v9549_v51 = vcombine.high %v9547_v49, %v9547_v49  ;;  %v11753_v22 = vrot.slane %v9540_v18, 9 }
 0x511   :  { %v11755_v24 = vrot.slane %v9547_v49, 9  ;;  %v19387_v43 = vmax.f32 %v9530_v0, %v11750_v3  ;;  %v19389_v5 = vmax.f32 %v9531_v41, %v11752_v40  ;;  %v10141_v12 = vsel %vm3420_vm10, %v9949_v28, %v10140_v62 }
 0x512   :  { %v10136_v30 = vsel %vm3418_vm9, %v9937_v53, %v10135_v13  ;;  %v11754_v23 = vrot.slane %v9548_v38, 9  ;;  %v11756_v57 = vrot.slane %v9549_v51, 9  ;;  %v19393_v59 = vmax.f32 %v9540_v18, %v11753_v22  ;;  %10188 = vrot.lane.b32.xlu1 %v10141_v12, %s12100_s4 }
 0x513   :  { %v19395_v56 = vmax.f32 %v9547_v49, %v11755_v24  ;;  %v10137_v15 = vsel %vm3420_vm10, %v9945_v2, %v10136_v30  ;;  %v9965_v14 = vrot.slane %v19239_v42, %v21721_v33  ;;  %v9973_v0 = vrot.slane %v19234_v35, %v21721_v33 }
 0x514   :  { %v9981_v28 = vrot.slane %v19241_v8, %v21721_v33  ;;  %v19405_v53 = vmax.f32 %v9548_v38, %v11754_v23  ;;  %v19407_v41 = vmax.f32 %v9549_v51, %v11756_v57  ;;  %v10081_v45 = vrot.slane %v19393_v59, %v21720_v17  ;;  %10186 = vrot.lane.b32.xlu0 %v10137_v15, %s12100_s4 }
 0x515   :  { %v10085_v21 = vrot.slane %v19393_v59, %v21721_v33  ;;  %v9989_v2 = vrot.slane %v19293_v34, %v21721_v33  ;;  %v21725_v18 = vrot.slane %v19232_v31, %v21721_v33  ;;  %v9961_v62 = vrot.slane %v19239_v42, %v21720_v17 }
 0x516   :  { %v9969_v13 = vrot.slane %v19234_v35, %v21720_v17  ;;  %v9977_v40 = vrot.slane %v19241_v8, %v21720_v17  ;;  %v9985_v38 = vrot.slane %v19293_v34, %v21720_v17  ;;  %v9997_v51 = vrot.slane %v19302_v27, %v21721_v33 }
 0x517   :  { %v10146_v49 = vsel %vm3414_vm7, %v9965_v14, %v21725_v18  ;;  %v21726_v24 = vrot.slane %v19232_v31, %v21720_v17  ;;  %v10013_v30 = vrot.slane %v19304_v55, %v21721_v33  ;;  %v10021_v23 = vrot.slane %v19333_v54, %v21721_v33 }
 0x518   :  { %v10147_v3 = vsel %vm3416_vm8, %v9973_v0, %v10146_v49  ;;  %v10029_v14 = vrot.slane %v19340_v58, %v21721_v33  ;;  %v21727_v0 = vrot.slane %v19295_v16, %v21721_v33 }
 0x519   :  { %v10148_v22 = vsel %vm3418_vm9, %v9981_v28, %v10147_v3  ;;  %v10142_v12 = vsel %vm3414_vm7, %v9961_v62, %v21726_v24  ;;  %v9993_v62 = vrot.slane %v19302_v27, %v21720_v17  ;;  %v21728_v24 = vrot.slane %v19295_v16, %v21720_v17 }
 0x51a   :  { %v10149_v57 = vsel %vm3420_vm10, %v9989_v2, %v10148_v22  ;;  %v10143_v15 = vsel %vm3416_vm8, %v9969_v13, %v10142_v12  ;;  %v10154_v28 = vsel %vm3414_vm7, %v21727_v0, %v9997_v51  ;;  %v10009_v2 = vrot.slane %v19304_v55, %v21720_v17 }
 0x51b   :  { %10192 = vrot.lane.b32.xlu1 %v10149_v57, %s12100_s4  ;;  %v10144_v18 = vsel %vm3418_vm9, %v9977_v40, %v10143_v15  ;;  %v10155_v49 = vsel %vm3416_vm8, %v10013_v30, %v10154_v28  ;;  %v10017_v22 = vrot.slane %v19333_v54, %v21720_v17  ;;  %v10025_v51 = vrot.slane %v19340_v58, %v21720_v17 }
 0x51c   :  { %v10145_v13 = vsel %vm3420_vm10, %v9985_v38, %v10144_v18  ;;  %v10156_v3 = vsel %vm3418_vm9, %v10021_v23, %v10155_v49  ;;  %v10150_v12 = vsel %vm3414_vm7, %v21728_v24, %v9993_v62  ;;  %v10045_v38 = vrot.slane %v19342_v25, %v21721_v33 }
 0x51d   :  { %10190 = vrot.lane.b32.xlu0 %v10145_v13, %s12100_s4  ;;  %v10157_v40 = vsel %vm3420_vm10, %v10029_v14, %v10156_v3  ;;  %v10053_v30 = vrot.slane %v19383_v7, %v21721_v33  ;;  %v10151_v23 = vsel %vm3416_vm8, %v10009_v2, %v10150_v12  ;;  %v10061_v57 = vrot.slane %v19387_v43, %v21721_v33 }
 0x51e   :  { %v10069_v15 = vrot.slane %v19385_v4, %v21721_v33  ;;  %v10041_v14 = vrot.slane %v19342_v25, %v21720_v17  ;;  %v10152_v0 = vsel %vm3418_vm9, %v10017_v22, %v10151_v23  ;;  %v10162_v28 = vsel %vm3414_vm7, %v10045_v38, %v10037_v60 }
 0x51f   :  { %10196 = vrot.lane.b32.xlu1 %v10157_v40, %s12100_s4  ;;  %v10049_v18 = vrot.slane %v19383_v7, %v21720_v17  ;;  %v10057_v49 = vrot.slane %v19387_v43, %v21720_v17  ;;  %v10153_v62 = vsel %vm3420_vm10, %v10025_v51, %v10152_v0  ;;  %v10163_v2 = vsel %vm3416_vm8, %v10053_v30, %v10162_v28 }
 0x520   :  { %v10065_v13 = vrot.slane %v19385_v4, %v21720_v17  ;;  %v21729_v3 = vrot.slane %v19335_v10, %v21720_v17  ;;  %v10164_v60 = vsel %vm3418_vm9, %v10061_v57, %v10163_v2  ;;  %v10077_v24 = vrot.slane %v19389_v5, %v21721_v33 }
 0x521   :  { %10194 = vrot.lane.b32.xlu0 %v10153_v62, %s12100_s4  ;;  %v10093_v51 = vrot.slane %v19405_v53, %v21721_v33  ;;  %v10165_v12 = vsel %vm3420_vm10, %v10069_v15, %v10164_v60  ;;  %v10101_v30 = vrot.slane %v19395_v56, %v21721_v33  ;;  %v10089_v0 = vrot.slane %v19405_v53, %v21720_v17  ;;  %v10919_v60 = vld [vmem:[%s20265_s5 + $0x70] sm:$0xff] }
 0x522   :  { %v10158_v22 = vsel %vm3414_vm7, %v10041_v14, %v21729_v3  ;;  %v10170_v57 = vsel %vm3414_vm7, %v10085_v21, %v10077_v24  ;;  %v10073_v14 = vrot.slane %v19389_v5, %v21720_v17  ;;  %v10109_v15 = vrot.slane %v19407_v41, %v21721_v33  ;;  %v10918_v24 = vld [vmem:[%s20265_s5 + $0x68] sm:$0xff] }
 0x523   :  { %v10159_v40 = vsel %vm3416_vm8, %v10049_v18, %v10158_v22  ;;  %10200 = vrot.lane.b32.xlu1 %v10165_v12, %s12100_s4  ;;  %v10171_v28 = vsel %vm3416_vm8, %v10093_v51, %v10170_v57  ;;  %v10105_v2 = vrot.slane %v19407_v41, %v21720_v17  ;;  %v10936_v22 = vld [vmem:[%s20265_s5 + $0xf8] sm:$0xff]  ;;  %v10933_v51 = vld [vmem:[%s20265_s5 + $0xe0] sm:$0xff] }
 0x524   :  { %v10160_v38 = vsel %vm3418_vm9, %v10057_v49, %v10159_v40  ;;  %v10172_v18 = vsel %vm3418_vm9, %v10101_v30, %v10171_v28  ;;  %v10097_v49 = vrot.slane %v19395_v56, %v21720_v17  ;;  %v10166_v21 = vsel %vm3414_vm7, %v10081_v45, %v10073_v14  ;;  %v10920_v45 = vld [vmem:[%s20265_s5 + $0x78] sm:$0xff]  ;;  %v10935_v17 = vld [vmem:[%s20265_s5 + $0xf0] sm:$0xff]  ;;  %11765 = vmatprep.subr.mxu0 %v10936_v22  ;;  %v10934_v40 = vld [vmem:[%s20265_s5 + $0xe8] sm:$0xff] }
 0x525   :  { %v10161_v23 = vsel %vm3420_vm10, %v10065_v13, %v10160_v38  ;;  %v10173_v62 = vsel %vm3420_vm10, %v10109_v15, %v10172_v18  ;;  %v10167_v33 = vsel %vm3416_vm8, %v10089_v0, %v10166_v21  ;;  %11766 = vmatpush3.msra.mxu0 %v10920_v45  ;;  %v10968_v12 = vld [vmem:[%s20265_s5 + $0x1f8] sm:$0xff]  ;;  %v10917_v38 = vld [vmem:[%s20265_s5 + $0x60] sm:$0xff]  ;;  %v10951_v14 = vld [vmem:[%s20265_s5 + $0x170] sm:$0xff] }
 0x526   :  { %10198 = vrot.lane.b32.xlu0 %v10161_v23, %s12100_s4  ;;  %v10168_v13 = vsel %vm3418_vm9, %v10097_v49, %v10167_v33  ;;  %11767 = vmatprep.subr.mxu0 %v10935_v17  ;;  %v10952_v30 = vld [vmem:[%s20265_s5 + $0x178] sm:$0xff]  ;;  %v10967_v23 = vld [vmem:[%s20265_s5 + $0x1f0] sm:$0xff]  ;;  %v10966_v15 = vld [vmem:[%s20265_s5 + $0x1e8] sm:$0xff] }
 0x527   :  { %10204 = vrot.lane.b32.xlu1 %v10173_v62, %s12100_s4  ;;  %v10169_v3 = vsel %vm3420_vm10, %v10105_v2, %v10168_v13  ;;  %11768 = vmatpush3.msra.mxu0 %v10919_v60  ;;  %v10932_v57 = vld [vmem:[%s20265_s5 + $0xd8] sm:$0xff]  ;;  %v10950_v28 = vld [vmem:[%s20265_s5 + $0x168] sm:$0xff]  ;;  %v10931_v18 = vld [vmem:[%s20265_s5 + $0xd0] sm:$0xff] }
 0x528   :  { %11769 = vmatprep.subr.mxu0 %v10934_v40  ;;  %11800 = vmatprep.subr.mxu1 %v10968_v12  ;;  %v10916_v0 = vld [vmem:[%s20265_s5 + $0x58] sm:$0xff]  ;;  %v10965_v49 = vld [vmem:[%s20265_s5 + $0x1e0] sm:$0xff]  ;;  %v10915_v21 = vld [vmem:[%s20265_s5 + $0x50] sm:$0xff] }
 0x529   :  { %11770 = vmatpush3.msra.mxu0 %v10918_v24  ;;  %11801 = vmatpush3.msra.mxu1 %v10952_v30  ;;  %v10949_v62 = vld [vmem:[%s20265_s5 + $0x160] sm:$0xff]  ;;  %v10930_v2 = vld [vmem:[%s20265_s5 + $0xc8] sm:$0xff]  ;;  %v10964_v33 = vld [vmem:[%s20265_s5 + $0x1d8] sm:$0xff] }
 0x52a   :  { %10202 = vrot.lane.b32.xlu0 %v10169_v3, %s12100_s4  ;;  %11771 = vmatprep.subr.mxu0 %v10933_v51  ;;  %v10914_v13 = vld [vmem:[%s20265_s5 + $0x48] sm:$0xff]  ;;  %v10948_v3 = vld [vmem:[%s20265_s5 + $0x158] sm:$0xff]  ;;  %v10929_v22 = vld [vmem:[%s20265_s5 + $0xc0] sm:$0xff] }
 0x52b   :  { %11802 = vmatprep.subr.mxu1 %v10967_v23  ;;  %11772 = vmatpush3.msra.mxu0 %v10917_v38  ;;  %v10963_v45 = vld [vmem:[%s20265_s5 + $0x1d0] sm:$0xff]  ;;  %v10913_v17 = vld [vmem:[%s20265_s5 + $0x40] sm:$0xff]  ;;  %v10928_v40 = vld [vmem:[%s20265_s5 + $0xb8] sm:$0xff] }
 0x52c   :  { %11803 = vmatpush3.msra.mxu1 %v10951_v14  ;;  %11773 = vmatprep.subr.mxu0 %v10932_v57  ;;  %v10947_v60 = vld [vmem:[%s20265_s5 + $0x150] sm:$0xff]  ;;  %v10962_v24 = vld [vmem:[%s20265_s5 + $0x1c8] sm:$0xff]  ;;  %v10912_v51 = vld [vmem:[%s20265_s5 + $0x38] sm:$0xff] }
 0x52d   :  { %11804 = vmatprep.subr.mxu1 %v10966_v15  ;;  %11774 = vmatpush3.msra.mxu0 %v10916_v0  ;;  %v10946_v12 = vld [vmem:[%s20265_s5 + $0x148] sm:$0xff]  ;;  %v10927_v38 = vld [vmem:[%s20265_s5 + $0xb0] sm:$0xff]  ;;  %v10961_v30 = vld [vmem:[%s20265_s5 + $0x1c0] sm:$0xff] }
 0x52e   :  { %11805 = vmatpush3.msra.mxu1 %v10950_v28  ;;  %11775 = vmatprep.subr.mxu0 %v10931_v18  ;;  %v10911_v23 = vld [vmem:[%s20265_s5 + $0x30] sm:$0xff]  ;;  %v10945_v57 = vld [vmem:[%s20265_s5 + $0x140] sm:$0xff]  ;;  %v10926_v14 = vld [vmem:[%s20265_s5 + $0xa8] sm:$0xff] }
 0x52f   :  { %11806 = vmatprep.subr.mxu1 %v10965_v49  ;;  %11776 = vmatpush3.msra.mxu0 %v10915_v21  ;;  %v10960_v0 = vld [vmem:[%s20265_s5 + $0x1b8] sm:$0xff]  ;;  %v10910_v15 = vld [vmem:[%s20265_s5 + $0x28] sm:$0xff]  ;;  %v10925_v18 = vld [vmem:[%s20265_s5 + $0xa0] sm:$0xff] }
 0x530   :  { %11807 = vmatpush3.msra.mxu1 %v10949_v62  ;;  %11777 = vmatprep.subr.mxu0 %v10930_v2  ;;  %v10944_v28 = vld [vmem:[%s20265_s5 + $0x138] sm:$0xff]  ;;  %v10959_v49 = vld [vmem:[%s20265_s5 + $0x1b0] sm:$0xff]  ;;  %v10909_v21 = vld [vmem:[%s20265_s5 + $0x20] sm:$0xff] }
 0x531   :  { %11808 = vmatprep.subr.mxu1 %v10964_v33  ;;  %11778 = vmatpush3.msra.mxu0 %v10914_v13  ;;  %v10943_v62 = vld [vmem:[%s20265_s5 + $0x130] sm:$0xff]  ;;  %v10924_v2 = vld [vmem:[%s20265_s5 + $0x98] sm:$0xff]  ;;  %v10958_v33 = vld [vmem:[%s20265_s5 + $0x1a8] sm:$0xff] }
 0x532   :  { %11809 = vmatpush3.msra.mxu1 %v10948_v3  ;;  %11779 = vmatprep.subr.mxu0 %v10929_v22  ;;  %v10908_v13 = vld [vmem:[%s20265_s5 + $0x18] sm:$0xff]  ;;  %v10942_v3 = vld [vmem:[%s20265_s5 + $0x128] sm:$0xff]  ;;  %v10923_v22 = vld [vmem:[%s20265_s5 + $0x90] sm:$0xff] }
 0x533   :  { %11810 = vmatprep.subr.mxu1 %v10963_v45  ;;  %11780 = vmatpush3.msra.mxu0 %v10913_v17  ;;  %v10957_v45 = vld [vmem:[%s20265_s5 + $0x1a0] sm:$0xff]  ;;  %v10907_v17 = vld [vmem:[%s20265_s5 + $0x10] sm:$0xff] }
 0x534   :  { %11811 = vmatpush3.msra.mxu1 %v10947_v60  ;;  %11781 = vmatprep.subr.mxu0 %v10928_v40  ;;  %v10922_v60 = vld [vmem:[%s20265_s5 + $0x88] sm:$0xff] }
 0x535   :  { %11812 = vmatprep.subr.mxu1 %v10962_v24  ;;  %11782 = vmatpush3.msra.mxu0 %v10912_v51  ;;  %v10906_v40 = vld [vmem:[%s20265_s5 + $0x8] sm:$0xff]  ;;  %v10921_v24 = vld [vmem:[%s20265_s5 + $0x80] sm:$0xff] }
 0x536   :  { %11813 = vmatpush3.msra.mxu1 %v10946_v12  ;;  %11783 = vmatprep.subr.mxu0 %v10927_v38 }
 0x537   :  { %11814 = vmatprep.subr.mxu1 %v10961_v30  ;;  %11784 = vmatpush3.msra.mxu0 %v10911_v23 }
 0x538   :  { %11815 = vmatpush3.msra.mxu1 %v10945_v57  ;;  %11785 = vmatprep.subr.mxu0 %v10926_v14 }
 0x539   :  { %11816 = vmatprep.subr.mxu1 %v10960_v0  ;;  %11786 = vmatpush3.msra.mxu0 %v10910_v15 }
 0x53a   :  { %11817 = vmatpush3.msra.mxu1 %v10944_v28  ;;  %11787 = vmatprep.subr.mxu0 %v10925_v18 }
 0x53b   :  { %11818 = vmatprep.subr.mxu1 %v10959_v49  ;;  %11788 = vmatpush3.msra.mxu0 %v10909_v21 }
 0x53c   :  { %11819 = vmatpush3.msra.mxu1 %v10943_v62  ;;  %11789 = vmatprep.subr.mxu0 %v10924_v2 }
 0x53d   :  { %11820 = vmatprep.subr.mxu1 %v10958_v33  ;;  %11790 = vmatpush3.msra.mxu0 %v10908_v13 }
 0x53e   :  { %11821 = vmatpush3.msra.mxu1 %v10942_v3  ;;  %11791 = vmatprep.subr.mxu0 %v10923_v22 }
 0x53f   :  { %11822 = vmatprep.subr.mxu1 %v10957_v45  ;;  %11792 = vmatpush3.msra.mxu0 %v10907_v17 }
 0x540   :  { %11793 = vmatprep.subr.mxu0 %v10922_v60 }
 0x541   :  { %11794 = vmatpush3.msra.mxu0 %v10906_v40 }
 0x542   :  { %11795 = vmatprep.subr.mxu0 %v10921_v24 }
 0x563   :  { %v10177_v51 = vpop.permute.xlu1 %10176 }
 0x564   :  { %v10224_v12 = vsel %vm10223_vm0, %v10177_v51, 0.0 }
 0x566   :  { %v10175_v38 = vpop.permute.xlu0 %10174 }
 0x567   :  { %v10207_v30 = vsel %vm10206_vm1, %v10175_v38, %v10177_v51 }
 0x568   :  { %v10241_v23 = vcombine.high %v10207_v30, %v10224_v12  ;;  %v10240_v14 = vcombine.low %v10207_v30, %v10224_v12 }
 0x56a   :  { %v10248_v21 = vrot.slane %v10240_v14, %v21718_v47  ;;  %v10255_v62 = vrot.slane %v10241_v23, %v21718_v47 }
 0x56c   :  { %v10181_v57 = vpop.permute.xlu1 %10180  ;;  %v10376_v13 = vrot.slane %v10248_v21, 1  ;;  %v10436_v3 = vmax.f32 %v19150_v19, %v10255_v62  ;;  %v10256_v60 = vcombine.high %v10248_v21, %v10248_v21 }
 0x56d   :  { %v10225_v0 = vsel %vm10223_vm0, %v10181_v57, 0.0 }
 0x56e   :  { %v10179_v15 = vpop.permute.xlu0 %10178  ;;  %v10433_v51 = vmax.f32 %v19141_v20, %v10376_v13 }
 0x56f   :  { %v10208_v28 = vsel %vm10206_vm1, %v10179_v15, %v10181_v57  ;;  %v10377_v57 = vrot.slane %v10256_v60, 1 }
 0x570   :  { %v10257_v18 = vcombine.low %v10208_v28, %v10225_v0  ;;  %v10258_v49 = vcombine.high %v10208_v28, %v10225_v0 }
 0x571   :  { %v10435_v20 = vmax.f32 %v19143_v32, %v10377_v57  ;;  %v12101_v32 = vmov 1934713408  }
 0x572   :  { %v10265_v2 = vrot.slane %v10257_v18, %v21718_v47  ;;  %v10272_v33 = vrot.slane %v10258_v49, %v21718_v47  ;;  %v10432_v49 = vmax.f32 %v19134_v36, %v10248_v21  ;;  %v10666_v21 = vunpack.c.l.s4 %v12101_v32 }
 0x574   :  { %v10441_v22 = vmax.f32 %v19173_v44, %v10272_v33  ;;  %v10273_v45 = vcombine.high %v10265_v2, %v10265_v2  ;;  %v10378_v17 = vrot.slane %v10265_v2, 1  ;;  %v10514_v44 = vrot.slane %v10433_v51, 7 }
 0x575   :  { %v10437_v62 = vmax.f32 %v19154_v29, %v10265_v2  ;;  %v10434_v29 = vmax.f32 %v19136_v1, %v10256_v60  ;;  %v10667_v60 = vunpack.c.0.s8 %v10666_v21 }
 0x576   :  { %v19705_v40 = vcombine.low %v10436_v3, %v10441_v22  ;;  %v10379_v38 = vrot.slane %v10273_v45, 1  ;;  %v10438_v30 = vmax.f32 %v19152_v46, %v10378_v17  ;;  %v10515_v13 = vsel %vm3414_vm7, %v10514_v44, %v10432_v49 }
 0x577   :  { %v10185_v24 = vpop.permute.xlu1 %10184  ;;  %v10516_v2 = vsel %vm3418_vm9, %v10514_v44, %v10515_v13 }
 0x578   :  { %v10226_v12 = vsel %vm10223_vm0, %v10185_v24, 0.0  ;;  %v10440_v15 = vmax.f32 %v19169_v39, %v10379_v38  ;;  %v10530_v28 = vrot.slane %v10438_v30, 7  ;;  %v19719_v39 = vrot.slane %v10435_v20, 7 }
 0x57a   :  { %v10183_v23 = vpop.permute.xlu0 %10182  ;;  %v10531_v3 = vsel %vm3414_vm7, %v10530_v28, %v10437_v62  ;;  %v10537_v22 = vrot.slane %v10440_v15, 7 }
 0x57b   :  { %v10209_v14 = vsel %vm10206_vm1, %v10183_v23, %v10185_v24  ;;  %v10532_v38 = vsel %vm3418_vm9, %v10530_v28, %v10531_v3 }
 0x57c   :  { %v10274_v19 = vcombine.low %v10209_v14, %v10226_v12  ;;  %v10275_v0 = vcombine.high %v10209_v14, %v10226_v12  ;;  %v10439_v12 = vmax.f32 %v19156_v52, %v10273_v45  ;;  %v10522_v52 = vsel %vm3414_vm7, %v19719_v39, %v10434_v29 }
 0x57d   :  { %v10533_v49 = vsel %vm3422_vm11, %v10530_v28, %v10532_v38  ;;  %v10523_v13 = vsel %vm3418_vm9, %v19719_v39, %v10522_v52  ;;  %v21731_v52 = vld [vmem:[#allocation2_spill] sm:$0xff] }
 0x57e   :  { %v10282_v18 = vrot.slane %v10274_v19, %v21718_v47  ;;  %v10538_v23 = vsel %vm3414_vm7, %v10537_v22, %v10439_v12  ;;  %v10289_v45 = vrot.slane %v10275_v0, %v21718_v47 }
 0x57f   :  { %v10539_v20 = vsel %vm3418_vm9, %v10537_v22, %v10538_v23 }
 0x580   :  { %v10290_v33 = vcombine.high %v10282_v18, %v10282_v18  ;;  %v10380_v46 = vrot.slane %v10282_v18, 1  ;;  %v10442_v1 = vmax.f32 %v19171_v26, %v10282_v18  ;;  %v10446_v26 = vmax.f32 %v19183_v61, %v10289_v45 }
 0x581   :  { %v10540_v12 = vsel %vm3422_vm11, %v10537_v22, %v10539_v20  ;;  %v19761_v45 = vsub.s32 %v10667_v60, %v21731_v52 }
 0x582   :  { %v10381_v17 = vrot.slane %v10290_v33, 1  ;;  %v10443_v24 = vmax.f32 %v19175_v50, %v10380_v46  ;;  %v10517_v46 = vsel %vm3422_vm11, %v10514_v44, %v10516_v2  ;;  %v10534_v2 = vsel %vm3426_vm13, %v10530_v28, %v10533_v49 }
 0x584   :  { %v10189_v51 = vpop.permute.xlu1 %10188  ;;  %v10445_v50 = vmax.f32 %v19186_v9, %v10381_v17  ;;  %v10546_v57 = vrot.slane %v10443_v24, 7 }
 0x585   :  { %v10227_v36 = vsel %vm10223_vm0, %v10189_v51, 0.0 }
 0x586   :  { %v10187_v30 = vpop.permute.xlu0 %10186  ;;  %v10547_v0 = vsel %vm3414_vm7, %v10546_v57, %v10442_v1  ;;  %v19741_v3 = vrot.slane %v10445_v50, 7 }
 0x587   :  { %v10210_v14 = vsel %vm10206_vm1, %v10187_v30, %v10189_v51  ;;  %v10548_v38 = vsel %vm3418_vm9, %v10546_v57, %v10547_v0  ;;  %v19770_v0 = vsel %vm3426_vm13, %v10537_v22, %v10540_v12 }
 0x588   :  { %v10291_v19 = vcombine.low %v10210_v14, %v10227_v36  ;;  %v10292_v15 = vcombine.high %v10210_v14, %v10227_v36  ;;  %v21730_v36 = vld [vmem:[#allocation50_spill] sm:$0xff]  ;;  %v10549_v49 = vsel %vm3422_vm11, %v10546_v57, %v10548_v38 }
 0x589   :  { %v10444_v32 = vmax.f32 %v21730_v36, %v10290_v33  ;;  %v10518_v33 = vsel %vm3426_vm13, %v10514_v44, %v10517_v46 }
 0x58a   :  { %v10299_v62 = vrot.slane %v10291_v19, %v21718_v47  ;;  %v10306_v9 = vrot.slane %v10292_v15, %v21718_v47  ;;  %v10664_v1 = vcombine.low %v10518_v33, %v10534_v2 }
 0x58c   :  { %v19744_v18 = vcombine.high %v10299_v62, %v10299_v62  ;;  %v10382_v24 = vrot.slane %v10299_v62, 1  ;;  %v10451_v51 = vmax.f32 %v19226_v11, %v10306_v9  ;;  %v10554_v11 = vsel %vm3414_vm7, %v19741_v3, %v10444_v32 }
 0x58d   :  { %v10193_v17 = vpop.permute.xlu1 %10192  ;;  %v10447_v20 = vmax.f32 %v19188_v63, %v10299_v62  ;;  %v10555_v44 = vsel %vm3418_vm9, %v19741_v3, %v10554_v11  ;;  %v19781_v22 = vrot.slane %v10664_v1, %v19761_v45  ;;  %v19790_v32 = vsel %vm3426_vm13, %v10546_v57, %v10549_v49 }
 0x58e   :  { %v10228_v21 = vsel %vm10223_vm0, %v10193_v17, 0.0  ;;  %v10383_v30 = vrot.slane %v19744_v18, 1  ;;  %v10448_v61 = vmax.f32 %v19220_v37, %v10382_v24  ;;  %v19754_v23 = vcombine.low %v10446_v26, %v10451_v51 }
 0x58f   :  { %v10191_v29 = vpop.permute.xlu0 %10190  ;;  %v10524_v37 = vsel %vm3422_vm11, %v19719_v39, %v10523_v13  ;;  %v10449_v57 = vmax.f32 %v19224_v48, %v19744_v18 }
 0x590   :  { %v10211_v50 = vsel %vm10206_vm1, %v10191_v29, %v10193_v17  ;;  %v19763_v28 = vrot.slane %v10448_v61, 7  ;;  %v10450_v60 = vmax.f32 %v19222_v6, %v10383_v30  ;;  %v19785_v51 = vsel %vm3426_vm13, %v19719_v39, %v10524_v37 }
 0x591   :  { %v10197_v14 = vpop.permute.xlu1 %10196  ;;  %v10308_v19 = vcombine.low %v10211_v50, %v10228_v21  ;;  %v10309_v15 = vcombine.high %v10211_v50, %v10228_v21  ;;  %v10556_v6 = vsel %vm3422_vm11, %v19741_v3, %v10555_v44  ;;  %v10700_v21 = vcombine.low %v19785_v51, %v19770_v0  ;;  %v11000_v0 = vld [vmem:[%s20265_s5 + $0x2f8] sm:$0xff] }
 0x592   :  { %v10229_v17 = vsel %vm10223_vm0, %v10197_v14, 0.0  ;;  %v10563_v13 = vsel %vm3414_vm7, %v19763_v28, %v10447_v20  ;;  %v19796_v2 = vrot.slane %v10450_v60, 7  ;;  %v19814_v48 = vsel %vm3426_vm13, %v19741_v3, %v10556_v6 }
 0x593   :  { %v10195_v9 = vpop.permute.xlu0 %10194  ;;  %v10316_v46 = vrot.slane %v10308_v19, %v21718_v47  ;;  %v10564_v29 = vsel %vm3418_vm9, %v19763_v28, %v10563_v13 }
 0x594   :  { %v10212_v26 = vsel %vm10206_vm1, %v10195_v9, %v10197_v14  ;;  %v10323_v14 = vrot.slane %v10309_v15, %v21718_v47  ;;  %v10565_v49 = vsel %vm3422_vm11, %v19763_v28, %v10564_v29  ;;  %v10570_v18 = vsel %vm3414_vm7, %v19796_v2, %v10449_v57 }
 0x595   :  { %v10324_v24 = vcombine.high %v10316_v46, %v10316_v46  ;;  %v10384_v63 = vrot.slane %v10316_v46, 1  ;;  %v10201_v62 = vpop.permute.xlu1 %10200  ;;  %v10325_v12 = vcombine.low %v10212_v26, %v10229_v17  ;;  %v10326_v30 = vcombine.high %v10212_v26, %v10229_v17 }
 0x596   :  { %v10230_v11 = vsel %vm10223_vm0, %v10201_v62, 0.0  ;;  %v10452_v15 = vmax.f32 %v19232_v31, %v10316_v46  ;;  %v10456_v17 = vmax.f32 %v19293_v34, %v10323_v14  ;;  %v10571_v31 = vsel %vm3418_vm9, %v19796_v2, %v10570_v18 }
 0x597   :  { %v10385_v38 = vrot.slane %v10324_v24, 1  ;;  %v10453_v39 = vmax.f32 %v19239_v42, %v10384_v63  ;;  %v10333_v61 = vrot.slane %v10325_v12, %v21718_v47  ;;  %v10340_v1 = vrot.slane %v10326_v30, %v21718_v47 }
 0x598   :  { %v10199_v36 = vpop.permute.xlu0 %10198 }
 0x599   :  { %v10213_v50 = vsel %vm10206_vm1, %v10199_v36, %v10201_v62  ;;  %v19805_v19 = vrot.slane %v10453_v39, 7  ;;  %v10341_v37 = vcombine.high %v10333_v61, %v10333_v61  ;;  %v10386_v42 = vrot.slane %v10333_v61, 1  ;;  %v10205_v12 = vpop.permute.xlu1 %10204 }
 0x59a   :  { %v10342_v33 = vcombine.low %v10213_v50, %v10230_v11  ;;  %v10343_v52 = vcombine.high %v10213_v50, %v10230_v11  ;;  %v10455_v20 = vmax.f32 %v19241_v8, %v10385_v38  ;;  %v10457_v13 = vmax.f32 %v19302_v27, %v10333_v61 }
 0x59b   :  { %v10387_v44 = vrot.slane %v10341_v37, 1  ;;  %v10458_v60 = vmax.f32 %v19295_v16, %v10386_v42  ;;  %v10461_v8 = vmax.f32 %v19340_v58, %v10340_v1  ;;  %v10579_v63 = vsel %vm3414_vm7, %v19805_v19, %v10452_v15 }
 0x59c   :  { %v10350_v9 = vrot.slane %v10342_v33, %v21718_v47  ;;  %v19828_v46 = vrot.slane %v10455_v20, 7  ;;  %v10203_v27 = vpop.permute.xlu0 %10202  ;;  %v10454_v58 = vmax.f32 %v19234_v35, %v10324_v24  ;;  %v10357_v39 = vrot.slane %v10343_v52, %v21718_v47 }
 0x59d   :  { %v10460_v3 = vmax.f32 %v19333_v54, %v10387_v44  ;;  %v10594_v62 = vrot.slane %v10458_v60, 7  ;;  %v19830_v16 = vcombine.low %v10456_v17, %v10461_v8  ;;  %v10580_v54 = vsel %vm3418_vm9, %v19805_v19, %v10579_v63 }
 0x59e   :  { %v10358_v26 = vcombine.high %v10350_v9, %v10350_v9  ;;  %v10388_v6 = vrot.slane %v10350_v9, 1  ;;  %v10231_v61 = vsel %vm10223_vm0, %v10205_v12, 0.0  ;;  %v10459_v11 = vmax.f32 %v19304_v55, %v10341_v37 }
 0x59f   :  { %v10595_v36 = vsel %vm3414_vm7, %v10594_v62, %v10457_v13  ;;  %v10601_v29 = vrot.slane %v10460_v3, 7  ;;  %v10214_v35 = vsel %vm10206_vm1, %v10203_v27, %v10205_v12  ;;  %v10586_v24 = vsel %vm3414_vm7, %v19828_v46, %v10454_v58 }
 0x5a0   :  { %v10389_v34 = vrot.slane %v10358_v26, 1  ;;  %v10463_v38 = vmax.f32 %v19342_v25, %v10388_v6  ;;  %v10596_v50 = vsel %vm3418_vm9, %v10594_v62, %v10595_v36  ;;  %v10462_v25 = vmax.f32 %v19335_v10, %v10350_v9 }
 0x5a1   :  { %v10359_v14 = vcombine.low %v10214_v35, %v10231_v61  ;;  %v10360_v33 = vcombine.high %v10214_v35, %v10231_v61  ;;  %v10572_v52 = vsel %vm3422_vm11, %v19796_v2, %v10571_v31  ;;  %v10566_v55 = vsel %vm3426_vm13, %v19763_v28, %v10565_v49 }
 0x5a2   :  { %v10465_v30 = vmax.f32 %v19387_v43, %v10389_v34  ;;  %v10610_v57 = vrot.slane %v10463_v38, 7  ;;  %v10602_v43 = vsel %vm3414_vm7, %v10601_v29, %v10459_v11  ;;  %v10597_v37 = vsel %vm3422_vm11, %v10594_v62, %v10596_v50 }
 0x5a3   :  { %v10367_v20 = vrot.slane %v10359_v14, %v21718_v47  ;;  %v10374_v10 = vrot.slane %v10360_v33, %v21718_v47  ;;  %v10581_v9 = vsel %vm3422_vm11, %v19805_v19, %v10580_v54  ;;  %v10587_v18 = vsel %vm3418_vm9, %v19828_v46, %v10586_v24  ;;  %v10956_v24 = vld [vmem:[%s20265_s5 + $0x198] sm:$0xff] }
 0x5a4   :  { %v19849_v1 = vrot.slane %v10465_v30, 7  ;;  %v10611_v42 = vsel %vm3414_vm7, %v10610_v57, %v10462_v25  ;;  %v10464_v15 = vmax.f32 %v19383_v7, %v10358_v26  ;;  %v10673_v44 = vcombine.low %v19790_v32, %v10566_v55  ;;  %v10905_v30 = vld [vmem:[%s20265_s5] sm:$0xff] }
 0x5a5   :  { %v10603_v28 = vsel %vm3418_vm9, %v10601_v29, %v10602_v43  ;;  %v10466_v49 = vmax.f32 %v19385_v4, %v10357_v39  ;;  %v10375_v60 = vcombine.high %v10367_v20, %v10367_v20  ;;  %v10390_v17 = vrot.slane %v10367_v20, 1  ;;  %11796 = vmatpush3.msra.mxu0 %v10905_v30  ;;  %v10955_v43 = vld [vmem:[%s20265_s5 + $0x190] sm:$0xff] }
 0x5a6   :  { %v10612_v13 = vsel %vm3418_vm9, %v10610_v57, %v10611_v42  ;;  %v10618_v8 = vsel %vm3414_vm7, %v19849_v1, %v10464_v15  ;;  %v10471_v63 = vmax.f32 %v19407_v41, %v10374_v10  ;;  %v10598_v3 = vsel %vm3426_vm13, %v10594_v62, %v10597_v37  ;;  %11835 = vmatprep.subr.mxu0 %v11000_v0  ;;  %v10939_v10 = vld [vmem:[%s20265_s5 + $0x110] sm:$0xff] }
 0x5a7   :  { %v10391_v6 = vrot.slane %v10375_v60, 1  ;;  %v10468_v7 = vmax.f32 %v19393_v59, %v10390_v17  ;;  %v19872_v32 = vrot.slane %v10673_v44, %v19761_v45  ;;  %v10573_v4 = vsel %vm3426_vm13, %v19796_v2, %v10572_v52 }
 0x5a8   :  { %v10588_v26 = vsel %vm3422_vm11, %v19828_v46, %v10587_v18  ;;  %v10604_v12 = vsel %vm3422_vm11, %v10601_v29, %v10603_v28  ;;  %v19879_v31 = vcombine.low %v10466_v49, %v10471_v63  ;;  %v10582_v41 = vsel %vm3426_vm13, %v19805_v19, %v10581_v9  ;;  %v10937_v63 = vld [vmem:[%s20265_s5 + $0x100] sm:$0xff] }
 0x5a9   :  { %v10619_v62 = vsel %vm3418_vm9, %v19849_v1, %v10618_v8  ;;  %v10467_v59 = vmax.f32 %v19389_v5, %v10367_v20  ;;  %v10470_v34 = vmax.f32 %v19395_v56, %v10391_v6  ;;  %v10626_v27 = vrot.slane %v10468_v7, 7  ;;  %v10941_v5 = vld [vmem:[%s20265_s5 + $0x120] sm:$0xff] }
 0x5aa   :  { %v10613_v2 = vsel %vm3422_vm11, %v10610_v57, %v10612_v13  ;;  %v10469_v58 = vmax.f32 %v19405_v53, %v10375_v60  ;;  %v10682_v36 = vcombine.low %v10582_v41, %v10598_v3  ;;  %v10709_v38 = vcombine.low %v19814_v48, %v10573_v4  ;;  %11823 = vmatpush3.msra.mxu1 %v10941_v5  ;;  %v10953_v13 = vld [vmem:[%s20265_s5 + $0x180] sm:$0xff] }
 0x5ab   :  { %v10627_v54 = vsel %vm3414_vm7, %v10626_v27, %v10467_v59  ;;  %v10633_v39 = vrot.slane %v10470_v34, 7  ;;  %v10605_v19 = vsel %vm3426_vm13, %v10601_v29, %v10604_v12  ;;  %v10772_v56 = vcombine.low %v19781_v22, %v19872_v32  ;;  %11824 = vmatprep.subr.mxu1 %v10956_v24  ;;  %v10998_v24 = vld [vmem:[%s20265_s5 + $0x2e8] sm:$0xff] }
 0x5ac   :  { %v10620_v53 = vsel %vm3422_vm11, %v19849_v1, %v10619_v62  ;;  %v10628_v48 = vsel %vm3418_vm9, %v10626_v27, %v10627_v54  ;;  %v19907_v29 = vrot.slane %v10700_v21, %v19761_v45  ;;  %v10614_v50 = vsel %vm3426_vm13, %v10610_v57, %v10613_v2 }
 0x5ad   :  { %v10629_v61 = vsel %vm3422_vm11, %v10626_v27, %v10628_v48  ;;  %v10634_v11 = vsel %vm3414_vm7, %v10633_v39, %v10469_v58  ;;  %v10589_v35 = vsel %vm3426_vm13, %v19828_v46, %v10588_v26  ;;  %v19923_v25 = vrot.slane %v10709_v38, %v19761_v45  ;;  %v10940_v46 = vld [vmem:[%s20265_s5 + $0x118] sm:$0xff] }
 0x5ae   :  { %v10635_v51 = vsel %vm3418_vm9, %v10633_v39, %v10634_v11  ;;  %v10630_v21 = vsel %vm3426_vm13, %v10626_v27, %v10629_v61  ;;  %v10718_v14 = vcombine.low %v10589_v35, %v10605_v19  ;;  %v10689_v33 = vrot.slane %v10682_v36, %v19761_v45  ;;  %11825 = vmatpush3.msra.mxu1 %v10940_v46  ;;  %v10999_v11 = vld [vmem:[%s20265_s5 + $0x2f0] sm:$0xff]  ;;  %v10981_v46 = vld [vmem:[%s20265_s5 + $0x260] sm:$0xff] }
 0x5af   :  { %v10636_v57 = vsel %vm3422_vm11, %v10633_v39, %v10635_v51  ;;  %v10691_v52 = vcombine.low %v10614_v50, %v10630_v21  ;;  %v11757_v55 = vcombine.high %v19781_v22, %v19872_v32  ;;  %v10621_v37 = vsel %vm3426_vm13, %v19849_v1, %v10620_v53  ;;  %11826 = vmatprep.subr.mxu1 %v10955_v43  ;;  %v10954_v1 = vld [vmem:[%s20265_s5 + $0x188] sm:$0xff] }
 0x5b0   :  { %v10637_v42 = vsel %vm3426_vm13, %v10633_v39, %v10636_v57  ;;  %v10743_v20 = vrot.slane %v19705_v40, %v19761_v45  ;;  %v10751_v15 = vrot.slane %v19754_v23, %v19761_v45  ;;  %v10759_v22 = vrot.slane %v19830_v16, %v19761_v45  ;;  %11827 = vmatpush3.msra.mxu1 %v10939_v10  ;;  %v10938_v23 = vld [vmem:[%s20265_s5 + $0x108] sm:$0xff]  ;;  %v10979_v10 = vld [vmem:[%s20265_s5 + $0x250] sm:$0xff] }
 0x5b1   :  { %v10698_v9 = vrot.slane %v10691_v52, %v19761_v45  ;;  %v10727_v18 = vcombine.low %v10621_v37, %v10637_v42  ;;  %v10725_v40 = vrot.slane %v10718_v14, %v19761_v45  ;;  %v10825_v44 = vcombine.low %v19907_v29, %v19923_v25  ;;  %11828 = vmatprep.subr.mxu1 %v10954_v1  ;;  %v10982_v21 = vld [vmem:[%s20265_s5 + $0x268] sm:$0xff]  ;;  %v10996_v52 = vld [vmem:[%s20265_s5 + $0x2d8] sm:$0xff]  ;;  %v10993_v1 = vld [vmem:[%s20265_s5 + $0x2c0] sm:$0xff] }
 0x5b2   :  { %v10767_v28 = vrot.slane %v19879_v31, %v19761_v45  ;;  %v10883_v17 = vcombine.low %v10743_v20, %v10751_v15  ;;  %11829 = vmatpush3.msra.mxu1 %v10938_v23  ;;  %v10804_v3 = vrot.slane %v11757_v55, %v21718_v47  ;;  %v10780_v32 = vrot.slane %v10772_v56, %v21718_v47  ;;  %v10980_v55 = vld [vmem:[%s20265_s5 + $0x258] sm:$0xff]  ;;  %v10995_v20 = vld [vmem:[%s20265_s5 + $0x2d0] sm:$0xff]  ;;  %v10978_v15 = vld [vmem:[%s20265_s5 + $0x248] sm:$0xff] }
 0x5b3   :  { %v11758_v49 = vcombine.high %v10689_v33, %v10698_v9  ;;  %v10734_v16 = vrot.slane %v10727_v18, %v19761_v45  ;;  %v10773_v60 = vcombine.low %v10689_v33, %v10698_v9  ;;  %11830 = vmatprep.subr.mxu1 %v10953_v13  ;;  %v21732_v12 = vmov 0.0   ;;  %v11004_v37 = vld [vmem:[%s20265_s5 + $0x318] sm:$0xff]  ;;  %v11003_v9 = vld [vmem:[%s20265_s5 + $0x310] sm:$0xff]  ;;  %v10994_v18 = vld [vmem:[%s20265_s5 + $0x2c8] sm:$0xff] }
 0x5b4   :  { %v10884_v8 = vcombine.low %v10759_v22, %v10767_v28  ;;  %11831 = vmatpush3.msra.mxu1 %v10937_v63  ;;  %v19971_v4 = vrot.slane %v10883_v17, %v21718_v47  ;;  %v10833_v41 = vrot.slane %v10825_v44, %v21718_v47  ;;  %v11759_v54 = vcombine.high %v19907_v29, %v19923_v25  ;;  %v10984_v29 = vld [vmem:[%s20265_s5 + $0x278] sm:$0xff]  ;;  %v10997_v25 = vld [vmem:[%s20265_s5 + $0x2e0] sm:$0xff]  ;;  %v11002_v22 = vld [vmem:[%s20265_s5 + $0x308] sm:$0xff] }
 0x5b5   :  { %v10811_v6 = vrot.slane %v11758_v49, %v21718_v47  ;;  %v10826_v7 = vcombine.low %v10725_v40, %v10734_v16  ;;  %v10787_v45 = vrot.slane %v10773_v60, %v21718_v47  ;;  %11909 = vmatprep.subr.mxu1 %v21732_v12  ;;  %v11760_v59 = vcombine.high %v10725_v40, %v10734_v16  ;;  %v10977_v40 = vld [vmem:[%s20265_s5 + $0x240] sm:$0xff]  ;;  %v10992_v28 = vld [vmem:[%s20265_s5 + $0x2b8] sm:$0xff]  ;;  %v10991_v49 = vld [vmem:[%s20265_s5 + $0x2b0] sm:$0xff] }
 0x5b6   :  { %v19974_v26 = vrot.slane %v10884_v8, %v21718_v47  ;;  %v10862_v5 = vrot.slane %v11759_v54, %v21718_v47  ;;  %v11001_v44 = vld [vmem:[%s20265_s5 + $0x300] sm:$0xff]  ;;  %v10976_v23 = vld [vmem:[%s20265_s5 + $0x238] sm:$0xff]  ;;  %v10975_v16 = vld [vmem:[%s20265_s5 + $0x230] sm:$0xff] }
 0x5b7   :  { %v10812_v31 = vcombine.low %v10804_v3, %v10811_v6  ;;  %v10840_v62 = vrot.slane %v10826_v7, %v21718_v47  ;;  %v10788_v34 = vcombine.low %v10780_v32, %v10787_v45  ;;  %v10789_v27 = vcombine.high %v10780_v32, %v10787_v45  ;;  %v10990_v60 = vld [vmem:[%s20265_s5 + $0x2a8] sm:$0xff]  ;;  %v10989_v13 = vld [vmem:[%s20265_s5 + $0x2a0] sm:$0xff]  ;;  %v10988_v63 = vld [vmem:[%s20265_s5 + $0x298] sm:$0xff] }
 0x5b8   :  { %v10899_v2 = vcombine.low %v19971_v4, %v19974_v26  ;;  %v10900_v58 = vcombine.high %v19971_v4, %v19974_v26  ;;  %v10813_v39 = vcombine.high %v10804_v3, %v10811_v6  ;;  %v10869_v30 = vrot.slane %v11760_v59, %v21718_v47  ;;  %v10983_v47 = vld [vmem:[%s20265_s5 + $0x270] sm:$0xff]  ;;  %v10974_v17 = vld [vmem:[%s20265_s5 + $0x228] sm:$0xff]  ;;  %v10973_v8 = vld [vmem:[%s20265_s5 + $0x220] sm:$0xff] }
 0x5b9   :  { %10814 = vrot.lane.b32.xlu0 %v10812_v31, %s12095_s30  ;;  %v10841_v36 = vcombine.low %v10833_v41, %v10840_v62  ;;  %v10842_v38 = vcombine.high %v10833_v41, %v10840_v62  ;;  %v10972_v3 = vld [vmem:[%s20265_s5 + $0x218] sm:$0xff]  ;;  %v10987_v6 = vld [vmem:[%s20265_s5 + $0x290] sm:$0xff]  ;;  %v10986_v45 = vld [vmem:[%s20265_s5 + $0x288] sm:$0xff] }
 0x5ba   :  { %v10871_v56 = vcombine.high %v10862_v5, %v10869_v30  ;;  %v10870_v53 = vcombine.low %v10862_v5, %v10869_v30  ;;  %v10971_v7 = vld [vmem:[%s20265_s5 + $0x210] sm:$0xff]  ;;  %v10970_v32 = vld [vmem:[%s20265_s5 + $0x208] sm:$0xff]  ;;  %v10985_v4 = vld [vmem:[%s20265_s5 + $0x280] sm:$0xff] }
 0x5bb   :  { %v12089_v19 = vpack.i.bf16 %v10842_v38, %v10841_v36  ;;  %v10969_v31 = vld [vmem:[%s20265_s5 + $0x200] sm:$0xff]  ;;  %v11310_v62 = vld [vmem:[%s20266_s7 + $0x78] sm:$0xff]  ;;  %v11309_v59 = vld [vmem:[%s20266_s7 + $0x70] sm:$0xff] }
 0x5bc   :  { %v11304_v36 = vld [vmem:[%s20266_s7 + $0x48] sm:$0xff]  ;;  %v11303_v38 = vld [vmem:[%s20266_s7 + $0x40] sm:$0xff]  ;;  %v11302_v54 = vld [vmem:[%s20266_s7 + $0x38] sm:$0xff] }
 0x5bd   :  { %10816 = vrot.lane.b32.xlu0 %v10813_v39, %s12095_s30  ;;  %12090 = vrot.lane.b32.xlu1 %v12089_v19, %s12096_s28  ;;  %v11301_v39 = vld [vmem:[%s20266_s7 + $0x30] sm:$0xff]  ;;  %v11300_v19 = vld [vmem:[%s20266_s7 + $0x28] sm:$0xff] }
 0x5be   :  { %v11299_v30 = vld [vmem:[%s20266_s7 + $0x20] sm:$0xff]  ;;  %v11298_v5 = vld [vmem:[%s20266_s7 + $0x18] sm:$0xff] }
 0x5c1   :  { %10874 = vrot.lane.b32.xlu0 %v10871_v56, %s12094_s29  ;;  %10872 = vrot.lane.b32.xlu1 %v10870_v53, %s12094_s29  ;;  %v11297_v56 = vld [vmem:[%s20266_s7 + $0x10] sm:$0xff]  ;;  %v11404_v53 = vld [vmem:[%s20267_s9 + $0x78] sm:$0xff] }
 0x62b   :  { %v10815_v48 = vpop.permute.xlu0 %10814 }
 0x62c   :  { %v10902_v61 = vsel %vm618_vm4, %v10789_v27, %v10815_v48  ;;  %v11307_v27 = vld [vmem:[%s20266_s7 + $0x60] sm:$0xff] }
 0x62d   :  { %11078 = vmatprep.mubr.f32.mxu0 %v10902_v61  ;;  %v11296_v61 = vld [vmem:[%s20266_s7 + $0x8] sm:$0xff] }
 0x62e   :  { %11079 = vmatmul.mubr.f32.vlgmr.msra.gmra.mxu0 %v10788_v34  ;;  %v11308_v34 = vld [vmem:[%s20266_s7 + $0x68] sm:$0xff] }
 0x62f   :  { %11836 = vmatpush3.msra.mxu0 %v10984_v29  ;;  %v10817_v50 = vpop.permute.xlu0 %10816  ;;  %11218 = vmatprep.mubr.f32.mxu0 %v10899_v2  ;;  %v12091_v35 = vpop.permute.xlu1 %12090  ;;  %v11306_v2 = vld [vmem:[%s20266_s7 + $0x58] sm:$0xff]  ;;  %v11402_v29 = vld [vmem:[%s20267_s9 + $0x68] sm:$0xff] }
 0x630   :  { %11837 = vmatprep.subr.mxu0 %v10999_v11  ;;  %v12093_v0 = vunpack.i.h.bf16 %v12091_v35  ;;  %v12092_v51 = vunpack.i.l.bf16 %v12091_v35  ;;  %v10818_v14 = vsel %vm618_vm4, %v10815_v48, %v10817_v50  ;;  %v11403_v48 = vld [vmem:[%s20267_s9 + $0x70] sm:$0xff]  ;;  %v11295_v11 = vld [vmem:[%s20266_s7] sm:$0xff]  ;;  %v11400_v50 = vld [vmem:[%s20267_s9 + $0x58] sm:$0xff] }
 0x631   :  { %11838 = vmatpush3.msra.mxu0 %v10983_v47  ;;  %v11401_v47 = vld [vmem:[%s20267_s9 + $0x60] sm:$0xff]  ;;  %v11399_v35 = vld [vmem:[%s20267_s9 + $0x50] sm:$0xff] }
 0x632   :  { %11839 = vmatprep.subr.mxu0 %v10998_v24  ;;  %v10847_v57 = vsel %vm651_vm5, %v12092_v51, %v12093_v0  ;;  %v10903_v42 = vsel %vm651_vm5, %v10818_v14, %v12092_v51  ;;  %v11398_v24 = vld [vmem:[%s20267_s9 + $0x48] sm:$0xff]  ;;  %v11397_v0 = vld [vmem:[%s20267_s9 + $0x40] sm:$0xff]  ;;  %v11396_v51 = vld [vmem:[%s20267_s9 + $0x38] sm:$0xff] }
 0x633   :  { %11840 = vmatpush3.msra.mxu0 %v10982_v21  ;;  %v20016_v33 = vpop.permute.xlu1 %10872  ;;  %v10875_v26 = vpop.permute.xlu0 %10874  ;;  %v11395_v21 = vld [vmem:[%s20267_s9 + $0x30] sm:$0xff]  ;;  %v11393_v14 = vld [vmem:[%s20267_s9 + $0x20] sm:$0xff] }
 0x634   :  { %11841 = vmatprep.subr.mxu0 %v10997_v25  ;;  %v10904_v43 = vsel %vm684_vm6, %v10847_v57, %v20016_v33  ;;  %v10876_v41 = vsel %vm684_vm6, %v20016_v33, %v10875_v26  ;;  %v11394_v25 = vld [vmem:[%s20267_s9 + $0x28] sm:$0xff] }
 0x635   :  { %11842 = vmatpush3.msra.mxu0 %v10981_v46  ;;  %11148 = vmatprep.mubr.f32.mxu1 %v10904_v43  ;;  %v11392_v46 = vld [vmem:[%s20267_s9 + $0x18] sm:$0xff] }
 0x636   :  { %11843 = vmatprep.subr.mxu0 %v10996_v52  ;;  %11149 = vmatmul.mubr.f32.vlgmr.msra.gmra.mxu1 %v10903_v42 }
 0x637   :  { %11844 = vmatpush3.msra.mxu0 %v10980_v55  ;;  %11910 = vmatpush3.msra.mxu1 %v11004_v37 }
 0x638   :  { %11845 = vmatprep.subr.mxu0 %v10995_v20  ;;  %11911 = vmatprep.subr.mxu1 %v21732_v12  ;;  %v11761_v20 = vld [vmem:[%s20268_s6] ss:$0 sm:$0xff] }
 0x639   :  { %11846 = vmatpush3.msra.mxu0 %v10979_v10  ;;  %11912 = vmatpush3.msra.mxu1 %v11003_v9 }
 0x63a   :  { %11847 = vmatprep.subr.mxu0 %v10994_v18  ;;  %11913 = vmatprep.subr.mxu1 %v21732_v12 }
 0x63b   :  { %11848 = vmatpush3.msra.mxu0 %v10978_v15  ;;  %11914 = vmatpush3.msra.mxu1 %v11002_v22 }
 0x63c   :  { %11849 = vmatprep.subr.mxu0 %v10993_v1  ;;  %11915 = vmatprep.subr.mxu1 %v21732_v12 }
 0x63d   :  { %11850 = vmatpush3.msra.mxu0 %v10977_v40  ;;  %11916 = vmatpush3.msra.mxu1 %v11001_v44 }
 0x63e   :  { %11917 = vmatprep.mubr.msk.f32.mxu1 %vm12102_vm2, %v21732_v12  ;;  %11851 = vmatprep.subr.mxu0 %v10992_v28 }
 0x63f   :  { %11918 = vmatmul.mubr.msk.f32.vlgmr.msra.gmra.mxu1 %vm618_vm4, %v10900_v58  ;;  %11852 = vmatpush3.msra.mxu0 %v10976_v23  ;;  %v11305_v58 = vld [vmem:[%s20266_s7 + $0x50] sm:$0xff] }
 0x640   :  { %11853 = vmatprep.subr.mxu0 %v10991_v49  ;;  %11920 = vmatprep.subr.mxu1 %v21732_v12  ;;  %v11391_v23 = vld [vmem:[%s20267_s9 + $0x10] sm:$0xff]  ;;  %v11390_v49 = vld [vmem:[%s20267_s9 + $0x8] sm:$0xff] }
 0x641   :  { %11854 = vmatpush3.msra.mxu0 %v10975_v16  ;;  %11952 = vmatprep.mubr.msk.f32.mxu1 %vm12102_vm2, %v21732_v12  ;;  %v11389_v16 = vld [vmem:[%s20267_s9] sm:$0xff] }
 0x642   :  { %11855 = vmatprep.subr.mxu0 %v10990_v60  ;;  %11921 = vmatpush3.msra.mxu1 %v11310_v62  ;;  %v11763_v60 = vld [vmem:[%s20269_s8] ss:$0 sm:$0xff] }
 0x643   :  { %11856 = vmatpush3.msra.mxu0 %v10974_v17  ;;  %11922 = vmatprep.subr.mxu1 %v21732_v12 }
 0x644   :  { %11857 = vmatprep.subr.mxu0 %v10989_v13  ;;  %11923 = vmatpush3.msra.mxu1 %v11309_v59 }
 0x645   :  { %11858 = vmatpush3.msra.mxu0 %v10973_v8  ;;  %11924 = vmatprep.subr.mxu1 %v21732_v12 }
 0x646   :  { %11859 = vmatprep.subr.mxu0 %v10988_v63  ;;  %11925 = vmatpush3.msra.mxu1 %v11308_v34 }
 0x647   :  { %11860 = vmatpush3.msra.mxu0 %v10972_v3  ;;  %11926 = vmatprep.subr.mxu1 %v21732_v12  ;;  %v11764_v3 = vld [vmem:[%s20270_s10] ss:$0 sm:$0xff] }
 0x648   :  { %11861 = vmatprep.subr.mxu0 %v10987_v6  ;;  %11927 = vmatpush3.msra.mxu1 %v11307_v27 }
 0x649   :  { %11862 = vmatpush3.msra.mxu0 %v10971_v7  ;;  %11928 = vmatprep.subr.mxu1 %v21732_v12 }
 0x64a   :  { %11863 = vmatprep.subr.mxu0 %v10986_v45  ;;  %11929 = vmatpush3.msra.mxu1 %v11306_v2 }
 0x64b   :  { %11864 = vmatpush3.msra.mxu0 %v10970_v32  ;;  %11930 = vmatprep.subr.mxu1 %v21732_v12 }
 0x64c   :  { %11865 = vmatprep.subr.mxu0 %v10985_v4  ;;  %11931 = vmatpush3.msra.mxu1 %v11305_v58 }
 0x64d   :  { %11866 = vmatpush3.msra.mxu0 %v10969_v31  ;;  %11932 = vmatprep.subr.mxu1 %v21732_v12 }
 0x64e   :  { %11219 = vmatmul.mubr.f32.vlgmr.msra.gmra.mxu0 %v10876_v41  ;;  %11955 = vmatprep.subr.mxu0 %v21732_v12 }
 0x64f   :  { %11987 = vmatprep.mubr.msk.f32.mxu0 %vm12102_vm2, %v21732_v12  ;;  %11933 = vmatpush3.msra.mxu1 %v11304_v36 }
 0x650   :  { %11934 = vmatprep.subr.mxu1 %v21732_v12  ;;  %11956 = vmatpush3.msra.mxu0 %v11404_v53 }
 0x651   :  { %11935 = vmatpush3.msra.mxu1 %v11303_v38  ;;  %11957 = vmatprep.subr.mxu0 %v21732_v12 }
 0x652   :  { %11936 = vmatprep.subr.mxu1 %v21732_v12  ;;  %11958 = vmatpush3.msra.mxu0 %v11403_v48 }
 0x653   :  { %11937 = vmatpush3.msra.mxu1 %v11302_v54  ;;  %11959 = vmatprep.subr.mxu0 %v21732_v12 }
 0x654   :  { %11938 = vmatprep.subr.mxu1 %v21732_v12  ;;  %11960 = vmatpush3.msra.mxu0 %v11402_v29 }
 0x655   :  { %11939 = vmatpush3.msra.mxu1 %v11301_v39  ;;  %11961 = vmatprep.subr.mxu0 %v21732_v12 }
 0x656   :  { %11940 = vmatprep.subr.mxu1 %v21732_v12  ;;  %11962 = vmatpush3.msra.mxu0 %v11401_v47 }
 0x657   :  { %11941 = vmatpush3.msra.mxu1 %v11300_v19  ;;  %11963 = vmatprep.subr.mxu0 %v21732_v12 }
 0x658   :  { %11942 = vmatprep.subr.mxu1 %v21732_v12  ;;  %11964 = vmatpush3.msra.mxu0 %v11400_v50 }
 0x659   :  { %11943 = vmatpush3.msra.mxu1 %v11299_v30  ;;  %11965 = vmatprep.subr.mxu0 %v21732_v12 }
 0x65a   :  { %11944 = vmatprep.subr.mxu1 %v21732_v12  ;;  %11966 = vmatpush3.msra.mxu0 %v11399_v35 }
 0x65b   :  { %11945 = vmatpush3.msra.mxu1 %v11298_v5  ;;  %11967 = vmatprep.subr.mxu0 %v21732_v12 }
 0x65c   :  { %11946 = vmatprep.subr.mxu1 %v21732_v12  ;;  %11968 = vmatpush3.msra.mxu0 %v11398_v24 }
 0x65d   :  { %11947 = vmatpush3.msra.mxu1 %v11297_v56  ;;  %11969 = vmatprep.subr.mxu0 %v21732_v12 }
 0x65e   :  { %11948 = vmatprep.subr.mxu1 %v21732_v12  ;;  %11970 = vmatpush3.msra.mxu0 %v11397_v0 }
 0x65f   :  { %11949 = vmatpush3.msra.mxu1 %v11296_v61  ;;  %11971 = vmatprep.subr.mxu0 %v21732_v12 }
 0x660   :  { %11950 = vmatprep.subr.mxu1 %v21732_v12  ;;  %11972 = vmatpush3.msra.mxu0 %v11396_v51 }
 0x661   :  { %11951 = vmatpush3.msra.mxu1 %v11295_v11  ;;  %11973 = vmatprep.subr.mxu0 %v21732_v12 }
 0x662   :  { %11974 = vmatpush3.msra.mxu0 %v11395_v21 }
 0x663   :  { %11975 = vmatprep.subr.mxu0 %v21732_v12 }
 0x664   :  { %11976 = vmatpush3.msra.mxu0 %v11394_v25 }
 0x665   :  { %11977 = vmatprep.subr.mxu0 %v21732_v12 }
 0x666   :  { %11978 = vmatpush3.msra.mxu0 %v11393_v14 }
 0x667   :  { %11979 = vmatprep.subr.mxu0 %v21732_v12 }
 0x668   :  { %11980 = vmatpush3.msra.mxu0 %v11392_v46 }
 0x669   :  { %11981 = vmatprep.subr.mxu0 %v21732_v12 }
 0x66a   :  { %11982 = vmatpush3.msra.mxu0 %v11391_v23 }
 0x66b   :  { %11983 = vmatprep.subr.mxu0 %v21732_v12 }
 0x66c   :  { %11984 = vmatpush3.msra.mxu0 %v11390_v49 }
 0x66d   :  { %11985 = vmatprep.subr.mxu0 %v21732_v12 }
 0x66e   :  { %11986 = vmatpush3.msra.mxu0 %v11389_v16 }
 0x6ee   :  { %v11797_v55 = vpop.f32.mrf.mxu0 }
 0x6f0   :  { %v11798_v37 = vpop.f32.mrf.mxu0 }
 0x6f1   :  { %v11799_v42 = vadd.f32 %v11798_v37, %v11797_v55 }
 0x6f3   :  { %v11081_v18 = vadd.f32 %v11799_v42, %v11761_v20 }
 0x6f6   :  { %v11832_v57 = vpop.f32.mrf.mxu1 }
 0x6f8   :  { %v11833_v33 = vpop.f32.mrf.mxu1 }
 0x6f9   :  { %v11834_v10 = vadd.f32 %v11833_v33, %v11832_v57 }
 0x6fb   :  { %v11151_v22 = vadd.f32 %v11834_v10, %v11081_v18 }
 0x6ff   :  { %v11290_v52 = vpop.f32.mrf.mxu1 }
 0x701   :  { %v11919_v43 = vpop.f32.mrf.mxu1 }
 0x70e   :  { %v11867_v9 = vpop.f32.mrf.mxu0 }
 0x710   :  { %v11868_v15 = vpop.f32.mrf.mxu0 }
 0x711   :  { %v11869_v1 = vadd.f32 %v11868_v15, %v11867_v9 }
 0x713   :  { %v11221_v40 = vadd.f32 %v11869_v1, %v11151_v22 }
 0x715   :  { %v11291_v44 = vadd.f32 %v11290_v52, %v11221_v40 }
 0x717   :  { %v11294_v28 = vmax.f32 %v11291_v44, 0.0 }
 0x719   :  { %11953 = vmatmul.mubr.f32.vlgmr.msra.gmra.mxu1 %v11294_v28 }
 0x7d9   :  { %v11384_v17 = vpop.f32.mrf.mxu1 }
 0x7da   :  { %v11385_v13 = vadd.f32 %v11763_v60, %v11384_v17 }
 0x7db   :  { %v11954_v8 = vpop.f32.mrf.mxu1 }
 0x7dc   :  { %v11388_v63 = vmax.f32 %v11385_v13, 0.0 }
 0x7de   :  { %11988 = vmatmul.mubr.f32.vlgmr.msra.gmra.mxu0 %v11388_v63 }
 0x89e   :  { %v11478_v6 = vpop.f32.mrf.mxu0 }
 0x89f   :  { %v11479_v7 = vadd.f32 %v11764_v3, %v11478_v6 }
 0x8a0   :  { %v11989_v45 = vpop.f32.mrf.mxu0 }
 0x8a1   :  { %11482 = vst [vmem:[%s20271_s11] sm:$0xff] %v11479_v7 }

</bundles_post_ra>
